<compile_context>
chip_gen: v7x
topology: tpu7x:2x2x1
jax: 0.10.0
libtpu: 0.0.40
codegen_flags: <defaults>
</compile_context>

<pallas_src>
import functools

import jax
import jax.numpy as jnp
from jax.experimental import pallas as pl
from jax.experimental.pallas import tpu as pltpu

CPAD = 128          # lane-dense padded channel width carried between layers
KSIZE = 4           # conv kernel size of every layer


def _round_up(x, m):
    return (x + m - 1) // m * m


# ------------------------------ Pallas kernel -------------------------------
# One fused layer (conv + bias [+ InstanceNorm] + LeakyReLU / sigmoid) for ONE
# image per grid step.
#
#   x_ref : (1, P, K)      flattened reflect-padded (and space-to-depth'd for
#                          stride-2 layers) activation rows, bf16.
#   w_ref : (T, K, CPAD)   per-tap weight matrices, bf16 (T = 16 or 4 taps).
#   b_ref : (1, CPAD)      bias, f32.
#   m_ref : (M, 1)         validity mask (1.0 = real output column), f32.
#   o_ref : (1, M, CPAD)   output rows (row pitch = padded width), bf16.
#
# The conv is computed as T shifted contiguous-row matmuls accumulated in f32:
#   out[m] = sum_t  x[m + offsets[t]] @ w[t],   m = i * Wrow + j
# Rows with j >= Wo are "wrap" garbage; they are zeroed out of the
# InstanceNorm statistics here and sliced off by the wrapper.

def _layer_kernel(x_ref, w_ref, b_ref, m_ref, o_ref, *,
                  offsets, rows, inv_count, mode):
    xv = x_ref.at[0]                                   # (P, K) view, this image

    def tap(t, off):
        return jnp.dot(xv[pl.ds(off, rows), :], w_ref[t],
                       preferred_element_type=jnp.float32)

    acc = tap(0, offsets[0])
    for t in range(1, len(offsets)):                   # static unroll (4 or 16)
        acc = acc + tap(t, offsets[t])

    mask = m_ref[...]                                  # (rows, 1) f32
    y = (acc + b_ref[...]) * mask                      # f32 from here on

    if mode == "in_lrelu":
        # InstanceNorm2d (affine=False, biased var, eps=1e-5), one-pass stats
        # over the valid spatial positions only.
        s1 = jnp.sum(y, axis=0, keepdims=True)
        s2 = jnp.sum(y * y, axis=0, keepdims=True)
        mean = s1 * inv_count
        var = jnp.maximum(s2 * inv_count - mean * mean, 0.0)
        y = (y - mean) * jax.lax.rsqrt(var + 1e-5)

    if mode == "sigmoid":
        y = jax.nn.sigmoid(y)
    else:                                              # "lrelu", "in_lrelu"
        y = jnp.where(y > 0, y, 0.2 * y)               # LeakyReLU(0.2)

    o_ref[0] = y.astype(o_ref.dtype)


# ------------------------------ layer wrapper --------------------------------

def _apply_layer(x, wt, bias, stride, mode):
    """x: (N, H, W, CPAD) bf16 -> (N, Ho, Wo, CPAD) bf16."""
    N, H, W, C = x.shape
    xp = jnp.pad(x, ((0, 0), (1, 1), (1, 1), (0, 0)), mode="reflect")
    if stride == 2:
        assert (H + 2) % 2 == 0 and (W + 2) % 2 == 0
        Hs, Ws = (H + 2) // 2, (W + 2) // 2
        # space-to-depth: 4x4/stride-2 conv == 2x2/stride-1 conv on packed chans
        xp = (xp.reshape(N, Hs, 2, Ws, 2, C)
                .transpose(0, 1, 3, 2, 4, 5)
                .reshape(N, Hs, Ws, 4 * C))
        K, taps = 4 * C, 2
    else:
        Hs, Ws, K, taps = H + 2, W + 2, C, 4
    Ho, Wo = Hs - (taps - 1), Ws - (taps - 1)
    M = Ho * Ws                                        # output rows, pitch Ws
    offsets = tuple(kh * Ws + kw for kh in range(taps) for kw in range(taps))
    P = _round_up(M + offsets[-1] + 1, 8)

    xf = xp.reshape(N, Hs * Ws, K)
    xf = jnp.pad(xf, ((0, 0), (0, P - Hs * Ws), (0, 0)))
    mask = ((jnp.arange(M) % Ws) < Wo).astype(jnp.float32).reshape(M, 1)

    kern = functools.partial(_layer_kernel, offsets=offsets, rows=M,
                             inv_count=1.0 / (Ho * Wo), mode=mode)
    y = pl.pallas_call(
        kern,
        out_shape=jax.ShapeDtypeStruct((N, M, CPAD), jnp.bfloat16),
        grid_spec=pltpu.PrefetchScalarGridSpec(
            num_scalar_prefetch=0,
            grid=(N,),
            in_specs=[
                pl.BlockSpec((1, P, K), lambda n: (n, 0, 0)),
                pl.BlockSpec((len(offsets), K, CPAD), lambda n: (0, 0, 0)),
                pl.BlockSpec((1, CPAD), lambda n: (0, 0)),
                pl.BlockSpec((M, 1), lambda n: (0, 0)),
            ],
            out_specs=pl.BlockSpec((1, M, CPAD), lambda n: (n, 0, 0)),
        ),
        compiler_params=pltpu.CompilerParams(
            dimension_semantics=("parallel",)),
    )(xf, wt, bias, mask)

    return y.reshape(N, Ho, Ws, CPAD)[:, :, :Wo, :]


def discriminator_forward(x_nchw, prepped):
    """x_nchw: (N, C, H, W) f32 -> (N, 1, Ho, Wo) f32 PatchGAN map."""
    x = jnp.transpose(x_nchw, (0, 2, 3, 1))                       # NHWC
    x = jnp.pad(x, ((0, 0), (0, 0), (0, 0), (0, CPAD - x.shape[-1])))
    x = x.astype(jnp.bfloat16)
    for (wt, bias, stride, mode) in prepped:
        x = _apply_layer(x, wt, bias, stride, mode)
    out = x[..., :1].astype(jnp.float32)                          # real channel
    return jnp.transpose(out, (0, 3, 1, 2))                       # NCHW


# --------------------------- parameter preparation ---------------------------

def _prep_layer(w, b, stride):
    """PyTorch (Cout, Cin, 4, 4) weight -> per-tap bf16 matmul operands,
    zero-padded to CPAD in and out channels (padded channels stay exactly 0
    through the whole net)."""
    cout, cin = w.shape[0], w.shape[1]
    wp = jnp.zeros((CPAD, CPAD, KSIZE, KSIZE), jnp.float32).at[:cout, :cin].set(w)
    bp = jnp.zeros((1, CPAD), jnp.float32).at[0, :cout].set(b)
    if stride == 2:
        # (o, c, kh, kw) -> (tI, tJ, di, dj, c, o) -> (4 taps, 4*CPAD, CPAD)
        wt = (wp.reshape(CPAD, CPAD, 2, 2, 2, 2)
                .transpose(2, 4, 3, 5, 1, 0)
                .reshape(4, 4 * CPAD, CPAD))
    else:
        wt = wp.transpose(2, 3, 1, 0).reshape(KSIZE * KSIZE, CPAD, CPAD)
    return wt.astype(jnp.bfloat16), bp


def make_discriminator_params(key, in_channels=3, features=(8, 16, 32, 64)):
    """Synthetic params mirroring Discriminator(in_channels, features)."""
    cfgs = [(in_channels, features[0], 2, "lrelu")]
    c_in = features[0]
    for f in features[1:]:
        cfgs.append((c_in, f, 1 if f == features[-1] else 2, "in_lrelu"))
        c_in = f
    cfgs.append((c_in, 1, 1, "sigmoid"))
    layers = []
    for (cin, cout, stride, mode) in cfgs:
        key, kw, kb = jax.random.split(key, 3)
        w = jax.random.normal(kw, (cout, cin, KSIZE, KSIZE), jnp.float32) * 0.05
        b = jax.random.normal(kb, (cout,), jnp.float32) * 0.05
        layers.append((w, b, stride, mode))
    return layers


# ------------------------ pure-JAX reference (lax.conv) -----------------------

def reference_forward(x_nchw, raw_layers):
    """Same math via lax.conv, with matching bf16 operand precision."""
    x = jnp.transpose(x_nchw, (0, 2, 3, 1)).astype(jnp.bfloat16)
    for (w, b, stride, mode) in raw_layers:
        xp = jnp.pad(x, ((0, 0), (1, 1), (1, 1), (0, 0)), mode="reflect")
        y = jax.lax.conv_general_dilated(
            xp, w.astype(jnp.bfloat16), (stride, stride), "VALID",
            dimension_numbers=("NHWC", "OIHW", "NHWC"),
            preferred_element_type=jnp.float32)
        y = y + b
        if mode == "in_lrelu":
            mean = jnp.mean(y, axis=(1, 2), keepdims=True)
            var = jnp.mean((y - mean) ** 2, axis=(1, 2), keepdims=True)
            y = (y - mean) * jax.lax.rsqrt(var + 1e-5)
        if mode == "sigmoid":
            y = jax.nn.sigmoid(y)
        else:
            y = jnp.where(y > 0, y, 0.2 * y)
        x = y.astype(jnp.bfloat16)
    return jnp.transpose(x.astype(jnp.float32), (0, 3, 1, 2))


if __name__ == "__main__":
    key = jax.random.PRNGKey(0)
    key, kx = jax.random.split(key)

    # Small shapes consistent with the module: batch=2, in_channels=3,
    # spatial=32, scaled-down feature widths (8, 16, 32, 64).
    N, C, H, W = 2, 3, 32, 32
    x = jax.random.normal(kx, (N, C, H, W), jnp.float32)

    raw = make_discriminator_params(key, in_channels=C, features=(8, 16, 32, 64))
    prepped = [(*_prep_layer(w, b, stride), stride, mode)
               for (w, b, stride, mode) in raw]

    fwd = jax.jit(functools.partial(discriminator_forward, prepped=prepped))
    out = jax.block_until_ready(fwd(x))

    assert out.shape == (N, 1, 2, 2), out.shape
    assert bool(jnp.all(jnp.isfinite(out)))
    assert bool(jnp.all((out >= 0.0) & (out <= 1.0)))

    ref = jax.block_until_ready(
        jax.jit(functools.partial(reference_forward, raw_layers=raw))(x))
    err = float(jnp.max(jnp.abs(out - ref)))
    assert err < 5e-2, f"max abs err vs reference = {err}"

    print("KERNEL_OK")
</pallas_src>

<mosaic_0001>
module attributes {stable_mosaic.version = 11 : i64} {
  func.func @_layer_kernel(%arg0: i32, %arg1: memref<1x296x512xbf16, #tpu.memory_space<vmem>>, %arg2: memref<4x512x128xbf16, #tpu.memory_space<vmem>>, %arg3: memref<1x128xf32, #tpu.memory_space<vmem>>, %arg4: memref<272x1xf32, #tpu.memory_space<vmem>>, %arg5: memref<1x272x128xbf16, #tpu.memory_space<vmem>>) attributes {dimension_semantics = [#tpu.dimension_semantics<parallel>], iteration_bounds = array<i64: 2>, scalar_prefetch = 0 : i64, scratch_operands = 0 : i64, tpu.core_type = #tpu.core_type<tc>, window_params = [{transform_indices = @transform_0, window_bounds = array<i64: 1, 296, 512>}, {pipeline_mode = #tpu.pipeline_mode<synchronous>, transform_indices = @transform_1, window_bounds = array<i64: 4, 512, 128>}, {pipeline_mode = #tpu.pipeline_mode<synchronous>, transform_indices = @transform_2, window_bounds = array<i64: 1, 128>}, {pipeline_mode = #tpu.pipeline_mode<synchronous>, transform_indices = @transform_3, window_bounds = array<i64: 272, 1>}, {transform_indices = @transform_4, window_bounds = array<i64: 1, 272, 128>}]} {
    %c0_i32 = arith.constant 0 : i32
    %c0_i32_0 = arith.constant 0 : i32
    %c0_i32_1 = arith.constant 0 : i32
    %0 = tpu.memref_slice %arg1[%c0_i32, %c0_i32_0, %c0_i32_1] : memref<1x296x512xbf16, #tpu.memory_space<vmem>> -> memref<1x296x512xbf16, #tpu.memory_space<vmem>>
    %1 = tpu.memref_squeeze %0 : memref<1x296x512xbf16, #tpu.memory_space<vmem>> -> memref<296x512xbf16, #tpu.memory_space<vmem>>
    %c0 = arith.constant 0 : index
    %c0_2 = arith.constant 0 : index
    %2 = vector.load %1[%c0, %c0_2] : memref<296x512xbf16, #tpu.memory_space<vmem>>, vector<272x512xbf16>
    %c0_3 = arith.constant 0 : index
    %c0_4 = arith.constant 0 : index
    %c0_5 = arith.constant 0 : index
    %3 = vector.load %arg2[%c0_3, %c0_4, %c0_5] : memref<4x512x128xbf16, #tpu.memory_space<vmem>>, vector<1x512x128xbf16>
    %4 = vector.shape_cast %3 : vector<1x512x128xbf16> to vector<512x128xbf16>
    %cst = arith.constant dense<0.000000e+00> : vector<272x128xf32>
    %5 = tpu.matmul %2, %4, %cst {dimension_numbers = #tpu.dot_dimension_numbers<[1], [0], [0], [1], [0, 0, 1, 1], [], []>} : vector<272x512xbf16>, vector<512x128xbf16>, vector<272x128xf32> -> vector<272x128xf32>
    %c0_i32_6 = arith.constant 0 : i32
    %c0_i32_7 = arith.constant 0 : i32
    %c0_i32_8 = arith.constant 0 : i32
    %6 = tpu.memref_slice %arg1[%c0_i32_6, %c0_i32_7, %c0_i32_8] : memref<1x296x512xbf16, #tpu.memory_space<vmem>> -> memref<1x296x512xbf16, #tpu.memory_space<vmem>>
    %7 = tpu.memref_squeeze %6 : memref<1x296x512xbf16, #tpu.memory_space<vmem>> -> memref<296x512xbf16, #tpu.memory_space<vmem>>
    %c1 = arith.constant 1 : index
    %c0_9 = arith.constant 0 : index
    %8 = vector.load %7[%c1, %c0_9] : memref<296x512xbf16, #tpu.memory_space<vmem>>, vector<272x512xbf16>
    %c1_10 = arith.constant 1 : index
    %c0_11 = arith.constant 0 : index
    %c0_12 = arith.constant 0 : index
    %9 = vector.load %arg2[%c1_10, %c0_11, %c0_12] : memref<4x512x128xbf16, #tpu.memory_space<vmem>>, vector<1x512x128xbf16>
    %10 = vector.shape_cast %9 : vector<1x512x128xbf16> to vector<512x128xbf16>
    %cst_13 = arith.constant dense<0.000000e+00> : vector<272x128xf32>
    %11 = tpu.matmul %8, %10, %cst_13 {dimension_numbers = #tpu.dot_dimension_numbers<[1], [0], [0], [1], [0, 0, 1, 1], [], []>} : vector<272x512xbf16>, vector<512x128xbf16>, vector<272x128xf32> -> vector<272x128xf32>
    %12 = arith.addf %5, %11 : vector<272x128xf32>
    %c0_i32_14 = arith.constant 0 : i32
    %c0_i32_15 = arith.constant 0 : i32
    %c0_i32_16 = arith.constant 0 : i32
    %13 = tpu.memref_slice %arg1[%c0_i32_14, %c0_i32_15, %c0_i32_16] : memref<1x296x512xbf16, #tpu.memory_space<vmem>> -> memref<1x296x512xbf16, #tpu.memory_space<vmem>>
    %14 = tpu.memref_squeeze %13 : memref<1x296x512xbf16, #tpu.memory_space<vmem>> -> memref<296x512xbf16, #tpu.memory_space<vmem>>
    %c17 = arith.constant 17 : index
    %c0_17 = arith.constant 0 : index
    %15 = vector.load %14[%c17, %c0_17] : memref<296x512xbf16, #tpu.memory_space<vmem>>, vector<272x512xbf16>
    %c2 = arith.constant 2 : index
    %c0_18 = arith.constant 0 : index
    %c0_19 = arith.constant 0 : index
    %16 = vector.load %arg2[%c2, %c0_18, %c0_19] : memref<4x512x128xbf16, #tpu.memory_space<vmem>>, vector<1x512x128xbf16>
    %17 = vector.shape_cast %16 : vector<1x512x128xbf16> to vector<512x128xbf16>
    %cst_20 = arith.constant dense<0.000000e+00> : vector<272x128xf32>
    %18 = tpu.matmul %15, %17, %cst_20 {dimension_numbers = #tpu.dot_dimension_numbers<[1], [0], [0], [1], [0, 0, 1, 1], [], []>} : vector<272x512xbf16>, vector<512x128xbf16>, vector<272x128xf32> -> vector<272x128xf32>
    %19 = arith.addf %12, %18 : vector<272x128xf32>
    %c0_i32_21 = arith.constant 0 : i32
    %c0_i32_22 = arith.constant 0 : i32
    %c0_i32_23 = arith.constant 0 : i32
    %20 = tpu.memref_slice %arg1[%c0_i32_21, %c0_i32_22, %c0_i32_23] : memref<1x296x512xbf16, #tpu.memory_space<vmem>> -> memref<1x296x512xbf16, #tpu.memory_space<vmem>>
    %21 = tpu.memref_squeeze %20 : memref<1x296x512xbf16, #tpu.memory_space<vmem>> -> memref<296x512xbf16, #tpu.memory_space<vmem>>
    %c18 = arith.constant 18 : index
    %c0_24 = arith.constant 0 : index
    %22 = vector.load %21[%c18, %c0_24] : memref<296x512xbf16, #tpu.memory_space<vmem>>, vector<272x512xbf16>
    %c3 = arith.constant 3 : index
    %c0_25 = arith.constant 0 : index
    %c0_26 = arith.constant 0 : index
    %23 = vector.load %arg2[%c3, %c0_25, %c0_26] : memref<4x512x128xbf16, #tpu.memory_space<vmem>>, vector<1x512x128xbf16>
    %24 = vector.shape_cast %23 : vector<1x512x128xbf16> to vector<512x128xbf16>
    %cst_27 = arith.constant dense<0.000000e+00> : vector<272x128xf32>
    %25 = tpu.matmul %22, %24, %cst_27 {dimension_numbers = #tpu.dot_dimension_numbers<[1], [0], [0], [1], [0, 0, 1, 1], [], []>} : vector<272x512xbf16>, vector<512x128xbf16>, vector<272x128xf32> -> vector<272x128xf32>
    %26 = arith.addf %19, %25 : vector<272x128xf32>
    %c0_28 = arith.constant 0 : index
    %c0_29 = arith.constant 0 : index
    %27 = vector.load %arg4[%c0_28, %c0_29] : memref<272x1xf32, #tpu.memory_space<vmem>>, vector<272x1xf32>
    %c0_30 = arith.constant 0 : index
    %c0_31 = arith.constant 0 : index
    %28 = vector.load %arg3[%c0_30, %c0_31] : memref<1x128xf32, #tpu.memory_space<vmem>>, vector<1x128xf32>
    %29 = vector.broadcast %28 : vector<1x128xf32> to vector<272x128xf32>
    %30 = arith.addf %26, %29 : vector<272x128xf32>
    %31 = vector.broadcast %27 : vector<272x1xf32> to vector<272x128xf32>
    %32 = arith.mulf %30, %31 : vector<272x128xf32>
    %cst_32 = arith.constant 0.000000e+00 : f32
    %33 = vector.broadcast %cst_32 : f32 to vector<272x128xf32>
    %34 = arith.cmpf ogt, %32, %33 : vector<272x128xf32>
    %cst_33 = arith.constant 2.000000e-01 : f32
    %35 = vector.broadcast %cst_33 : f32 to vector<272x128xf32>
    %36 = arith.mulf %35, %32 : vector<272x128xf32>
    %37 = arith.select %34, %32, %36 : vector<272x128xi1>, vector<272x128xf32>
    %38 = arith.truncf %37 : vector<272x128xf32> to vector<272x128xbf16>
    %c0_34 = arith.constant 0 : index
    %c0_35 = arith.constant 0 : index
    %c0_36 = arith.constant 0 : index
    %39 = vector.load %arg5[%c0_34, %c0_35, %c0_36] : memref<1x272x128xbf16, #tpu.memory_space<vmem>>, vector<1x272x128xbf16>
    %40 = vector.shape_cast %39 : vector<1x272x128xbf16> to vector<272x128xbf16>
    %41 = vector.shape_cast %38 : vector<272x128xbf16> to vector<1x272x128xbf16>
    tpu.vector_store %arg5[%c0_34, %c0_35, %c0_36], %41 {strides = array<i32>} : memref<1x272x128xbf16, #tpu.memory_space<vmem>>, vector<1x272x128xbf16>,
    return
  }
  func.func @transform_0(%arg0: i32) -> (i32, i32, i32) {
    %c0_i32 = arith.constant 0 : i32
    %c0_i32_0 = arith.constant 0 : i32
    %c0_i32_1 = arith.constant 0 : i32
    return %arg0, %c0_i32, %c0_i32_0 : i32, i32, i32
  }
  func.func @transform_1(%arg0: i32) -> (i32, i32, i32) {
    %c0_i32 = arith.constant 0 : i32
    %c0_i32_0 = arith.constant 0 : i32
    %c0_i32_1 = arith.constant 0 : i32
    %c0_i32_2 = arith.constant 0 : i32
    return %c0_i32, %c0_i32_0, %c0_i32_1 : i32, i32, i32
  }
  func.func @transform_2(%arg0: i32) -> (i32, i32) {
    %c0_i32 = arith.constant 0 : i32
    %c0_i32_0 = arith.constant 0 : i32
    %c0_i32_1 = arith.constant 0 : i32
    return %c0_i32, %c0_i32_0 : i32, i32
  }
  func.func @transform_3(%arg0: i32) -> (i32, i32) {
    %c0_i32 = arith.constant 0 : i32
    %c0_i32_0 = arith.constant 0 : i32
    %c0_i32_1 = arith.constant 0 : i32
    return %c0_i32, %c0_i32_0 : i32, i32
  }
  func.func @transform_4(%arg0: i32) -> (i32, i32, i32) {
    %c0_i32 = arith.constant 0 : i32
    %c0_i32_0 = arith.constant 0 : i32
    %c0_i32_1 = arith.constant 0 : i32
    return %arg0, %c0_i32, %c0_i32_0 : i32, i32, i32
  }
}

module attributes {stable_mosaic.version = 11 : i64} {
  func.func @_layer_kernel(%arg0: i32, %arg1: memref<1x88x512xbf16, #tpu.memory_space<vmem>>, %arg2: memref<4x512x128xbf16, #tpu.memory_space<vmem>>, %arg3: memref<1x128xf32, #tpu.memory_space<vmem>>, %arg4: memref<72x1xf32, #tpu.memory_space<vmem>>, %arg5: memref<1x72x128xbf16, #tpu.memory_space<vmem>>) attributes {dimension_semantics = [#tpu.dimension_semantics<parallel>], iteration_bounds = array<i64: 2>, scalar_prefetch = 0 : i64, scratch_operands = 0 : i64, tpu.core_type = #tpu.core_type<tc>, window_params = [{transform_indices = @transform_0, window_bounds = array<i64: 1, 88, 512>}, {pipeline_mode = #tpu.pipeline_mode<synchronous>, transform_indices = @transform_1, window_bounds = array<i64: 4, 512, 128>}, {pipeline_mode = #tpu.pipeline_mode<synchronous>, transform_indices = @transform_2, window_bounds = array<i64: 1, 128>}, {pipeline_mode = #tpu.pipeline_mode<synchronous>, transform_indices = @transform_3, window_bounds = array<i64: 72, 1>}, {transform_indices = @transform_4, window_bounds = array<i64: 1, 72, 128>}]} {
    %c0_i32 = arith.constant 0 : i32
    %c0_i32_0 = arith.constant 0 : i32
    %c0_i32_1 = arith.constant 0 : i32
    %0 = tpu.memref_slice %arg1[%c0_i32, %c0_i32_0, %c0_i32_1] : memref<1x88x512xbf16, #tpu.memory_space<vmem>> -> memref<1x88x512xbf16, #tpu.memory_space<vmem>>
    %1 = tpu.memref_squeeze %0 : memref<1x88x512xbf16, #tpu.memory_space<vmem>> -> memref<88x512xbf16, #tpu.memory_space<vmem>>
    %c0 = arith.constant 0 : index
    %c0_2 = arith.constant 0 : index
    %2 = vector.load %1[%c0, %c0_2] : memref<88x512xbf16, #tpu.memory_space<vmem>>, vector<72x512xbf16>
    %c0_3 = arith.constant 0 : index
    %c0_4 = arith.constant 0 : index
    %c0_5 = arith.constant 0 : index
    %3 = vector.load %arg2[%c0_3, %c0_4, %c0_5] : memref<4x512x128xbf16, #tpu.memory_space<vmem>>, vector<1x512x128xbf16>
    %4 = vector.shape_cast %3 : vector<1x512x128xbf16> to vector<512x128xbf16>
    %cst = arith.constant dense<0.000000e+00> : vector<72x128xf32>
    %5 = tpu.matmul %2, %4, %cst {dimension_numbers = #tpu.dot_dimension_numbers<[1], [0], [0], [1], [0, 0, 1, 1], [], []>} : vector<72x512xbf16>, vector<512x128xbf16>, vector<72x128xf32> -> vector<72x128xf32>
    %c0_i32_6 = arith.constant 0 : i32
    %c0_i32_7 = arith.constant 0 : i32
    %c0_i32_8 = arith.constant 0 : i32
    %6 = tpu.memref_slice %arg1[%c0_i32_6, %c0_i32_7, %c0_i32_8] : memref<1x88x512xbf16, #tpu.memory_space<vmem>> -> memref<1x88x512xbf16, #tpu.memory_space<vmem>>
    %7 = tpu.memref_squeeze %6 : memref<1x88x512xbf16, #tpu.memory_space<vmem>> -> memref<88x512xbf16, #tpu.memory_space<vmem>>
    %c1 = arith.constant 1 : index
    %c0_9 = arith.constant 0 : index
    %8 = vector.load %7[%c1, %c0_9] : memref<88x512xbf16, #tpu.memory_space<vmem>>, vector<72x512xbf16>
    %c1_10 = arith.constant 1 : index
    %c0_11 = arith.constant 0 : index
    %c0_12 = arith.constant 0 : index
    %9 = vector.load %arg2[%c1_10, %c0_11, %c0_12] : memref<4x512x128xbf16, #tpu.memory_space<vmem>>, vector<1x512x128xbf16>
    %10 = vector.shape_cast %9 : vector<1x512x128xbf16> to vector<512x128xbf16>
    %cst_13 = arith.constant dense<0.000000e+00> : vector<72x128xf32>
    %11 = tpu.matmul %8, %10, %cst_13 {dimension_numbers = #tpu.dot_dimension_numbers<[1], [0], [0], [1], [0, 0, 1, 1], [], []>} : vector<72x512xbf16>, vector<512x128xbf16>, vector<72x128xf32> -> vector<72x128xf32>
    %12 = arith.addf %5, %11 : vector<72x128xf32>
    %c0_i32_14 = arith.constant 0 : i32
    %c0_i32_15 = arith.constant 0 : i32
    %c0_i32_16 = arith.constant 0 : i32
    %13 = tpu.memref_slice %arg1[%c0_i32_14, %c0_i32_15, %c0_i32_16] : memref<1x88x512xbf16, #tpu.memory_space<vmem>> -> memref<1x88x512xbf16, #tpu.memory_space<vmem>>
    %14 = tpu.memref_squeeze %13 : memref<1x88x512xbf16, #tpu.memory_space<vmem>> -> memref<88x512xbf16, #tpu.memory_space<vmem>>
    %c9 = arith.constant 9 : index
    %c0_17 = arith.constant 0 : index
    %15 = vector.load %14[%c9, %c0_17] : memref<88x512xbf16, #tpu.memory_space<vmem>>, vector<72x512xbf16>
    %c2 = arith.constant 2 : index
    %c0_18 = arith.constant 0 : index
    %c0_19 = arith.constant 0 : index
    %16 = vector.load %arg2[%c2, %c0_18, %c0_19] : memref<4x512x128xbf16, #tpu.memory_space<vmem>>, vector<1x512x128xbf16>
    %17 = vector.shape_cast %16 : vector<1x512x128xbf16> to vector<512x128xbf16>
    %cst_20 = arith.constant dense<0.000000e+00> : vector<72x128xf32>
    %18 = tpu.matmul %15, %17, %cst_20 {dimension_numbers = #tpu.dot_dimension_numbers<[1], [0], [0], [1], [0, 0, 1, 1], [], []>} : vector<72x512xbf16>, vector<512x128xbf16>, vector<72x128xf32> -> vector<72x128xf32>
    %19 = arith.addf %12, %18 : vector<72x128xf32>
    %c0_i32_21 = arith.constant 0 : i32
    %c0_i32_22 = arith.constant 0 : i32
    %c0_i32_23 = arith.constant 0 : i32
    %20 = tpu.memref_slice %arg1[%c0_i32_21, %c0_i32_22, %c0_i32_23] : memref<1x88x512xbf16, #tpu.memory_space<vmem>> -> memref<1x88x512xbf16, #tpu.memory_space<vmem>>
    %21 = tpu.memref_squeeze %20 : memref<1x88x512xbf16, #tpu.memory_space<vmem>> -> memref<88x512xbf16, #tpu.memory_space<vmem>>
    %c10 = arith.constant 10 : index
    %c0_24 = arith.constant 0 : index
    %22 = vector.load %21[%c10, %c0_24] : memref<88x512xbf16, #tpu.memory_space<vmem>>, vector<72x512xbf16>
    %c3 = arith.constant 3 : index
    %c0_25 = arith.constant 0 : index
    %c0_26 = arith.constant 0 : index
    %23 = vector.load %arg2[%c3, %c0_25, %c0_26] : memref<4x512x128xbf16, #tpu.memory_space<vmem>>, vector<1x512x128xbf16>
    %24 = vector.shape_cast %23 : vector<1x512x128xbf16> to vector<512x128xbf16>
    %cst_27 = arith.constant dense<0.000000e+00> : vector<72x128xf32>
    %25 = tpu.matmul %22, %24, %cst_27 {dimension_numbers = #tpu.dot_dimension_numbers<[1], [0], [0], [1], [0, 0, 1, 1], [], []>} : vector<72x512xbf16>, vector<512x128xbf16>, vector<72x128xf32> -> vector<72x128xf32>
    %26 = arith.addf %19, %25 : vector<72x128xf32>
    %c0_28 = arith.constant 0 : index
    %c0_29 = arith.constant 0 : index
    %27 = vector.load %arg4[%c0_28, %c0_29] : memref<72x1xf32, #tpu.memory_space<vmem>>, vector<72x1xf32>
    %c0_30 = arith.constant 0 : index
    %c0_31 = arith.constant 0 : index
    %28 = vector.load %arg3[%c0_30, %c0_31] : memref<1x128xf32, #tpu.memory_space<vmem>>, vector<1x128xf32>
    %29 = vector.broadcast %28 : vector<1x128xf32> to vector<72x128xf32>
    %30 = arith.addf %26, %29 : vector<72x128xf32>
    %31 = vector.broadcast %27 : vector<72x1xf32> to vector<72x128xf32>
    %32 = arith.mulf %30, %31 : vector<72x128xf32>
    %cst_32 = arith.constant dense<0.000000e+00> : vector<128xf32>
    %33 = vector.multi_reduction <add>, %32, %cst_32 [0] : vector<72x128xf32> to vector<128xf32>
    %34 = vector.shape_cast %33 : vector<128xf32> to vector<1x128xf32>
    %35 = arith.mulf %32, %32 : vector<72x128xf32>
    %cst_33 = arith.constant dense<0.000000e+00> : vector<128xf32>
    %36 = vector.multi_reduction <add>, %35, %cst_33 [0] : vector<72x128xf32> to vector<128xf32>
    %37 = vector.shape_cast %36 : vector<128xf32> to vector<1x128xf32>
    %cst_34 = arith.constant 1.562500e-02 : f32
    %38 = vector.broadcast %cst_34 : f32 to vector<1x128xf32>
    %39 = arith.mulf %34, %38 : vector<1x128xf32>
    %cst_35 = arith.constant 1.562500e-02 : f32
    %40 = vector.broadcast %cst_35 : f32 to vector<1x128xf32>
    %41 = arith.mulf %37, %40 : vector<1x128xf32>
    %42 = arith.mulf %39, %39 : vector<1x128xf32>
    %43 = arith.subf %41, %42 : vector<1x128xf32>
    %cst_36 = arith.constant 0.000000e+00 : f32
    %44 = vector.broadcast %cst_36 : f32 to vector<1x128xf32>
    %45 = arith.maximumf %43, %44 : vector<1x128xf32>
    %46 = vector.broadcast %39 : vector<1x128xf32> to vector<72x128xf32>
    %47 = arith.subf %32, %46 : vector<72x128xf32>
    %cst_37 = arith.constant 9.99999974E-6 : f32
    %48 = vector.broadcast %cst_37 : f32 to vector<1x128xf32>
    %49 = arith.addf %45, %48 : vector<1x128xf32>
    %50 = math.rsqrt %49 : vector<1x128xf32>
    %51 = vector.broadcast %50 : vector<1x128xf32> to vector<72x128xf32>
    %52 = arith.mulf %47, %51 : vector<72x128xf32>
    %cst_38 = arith.constant 0.000000e+00 : f32
    %53 = vector.broadcast %cst_38 : f32 to vector<72x128xf32>
    %54 = arith.cmpf ogt, %52, %53 : vector<72x128xf32>
    %cst_39 = arith.constant 2.000000e-01 : f32
    %55 = vector.broadcast %cst_39 : f32 to vector<72x128xf32>
    %56 = arith.mulf %55, %52 : vector<72x128xf32>
    %57 = arith.select %54, %52, %56 : vector<72x128xi1>, vector<72x128xf32>
    %58 = arith.truncf %57 : vector<72x128xf32> to vector<72x128xbf16>
    %c0_40 = arith.constant 0 : index
    %c0_41 = arith.constant 0 : index
    %c0_42 = arith.constant 0 : index
    %59 = vector.load %arg5[%c0_40, %c0_41, %c0_42] : memref<1x72x128xbf16, #tpu.memory_space<vmem>>, vector<1x72x128xbf16>
    %60 = vector.shape_cast %59 : vector<1x72x128xbf16> to vector<72x128xbf16>
    %61 = vector.shape_cast %58 : vector<72x128xbf16> to vector<1x72x128xbf16>
    tpu.vector_store %arg5[%c0_40, %c0_41, %c0_42], %61 {strides = array<i32>} : memref<1x72x128xbf16, #tpu.memory_space<vmem>>, vector<1x72x128xbf16>,
    return
  }
  func.func @transform_0(%arg0: i32) -> (i32, i32, i32) {
    %c0_i32 = arith.constant 0 : i32
    %c0_i32_0 = arith.constant 0 : i32
    %c0_i32_1 = arith.constant 0 : i32
    return %arg0, %c0_i32, %c0_i32_0 : i32, i32, i32
  }
  func.func @transform_1(%arg0: i32) -> (i32, i32, i32) {
    %c0_i32 = arith.constant 0 : i32
    %c0_i32_0 = arith.constant 0 : i32
    %c0_i32_1 = arith.constant 0 : i32
    %c0_i32_2 = arith.constant 0 : i32
    return %c0_i32, %c0_i32_0, %c0_i32_1 : i32, i32, i32
  }
  func.func @transform_2(%arg0: i32) -> (i32, i32) {
    %c0_i32 = arith.constant 0 : i32
    %c0_i32_0 = arith.constant 0 : i32
    %c0_i32_1 = arith.constant 0 : i32
    return %c0_i32, %c0_i32_0 : i32, i32
  }
  func.func @transform_3(%arg0: i32) -> (i32, i32) {
    %c0_i32 = arith.constant 0 : i32
    %c0_i32_0 = arith.constant 0 : i32
    %c0_i32_1 = arith.constant 0 : i32
    return %c0_i32, %c0_i32_0 : i32, i32
  }
  func.func @transform_4(%arg0: i32) -> (i32, i32, i32) {
    %c0_i32 = arith.constant 0 : i32
    %c0_i32_0 = arith.constant 0 : i32
    %c0_i32_1 = arith.constant 0 : i32
    return %arg0, %c0_i32, %c0_i32_0 : i32, i32, i32
  }
}

module attributes {stable_mosaic.version = 11 : i64} {
  func.func @_layer_kernel(%arg0: i32, %arg1: memref<1x32x512xbf16, #tpu.memory_space<vmem>>, %arg2: memref<4x512x128xbf16, #tpu.memory_space<vmem>>, %arg3: memref<1x128xf32, #tpu.memory_space<vmem>>, %arg4: memref<20x1xf32, #tpu.memory_space<vmem>>, %arg5: memref<1x20x128xbf16, #tpu.memory_space<vmem>>) attributes {dimension_semantics = [#tpu.dimension_semantics<parallel>], iteration_bounds = array<i64: 2>, scalar_prefetch = 0 : i64, scratch_operands = 0 : i64, tpu.core_type = #tpu.core_type<tc>, window_params = [{transform_indices = @transform_0, window_bounds = array<i64: 1, 32, 512>}, {pipeline_mode = #tpu.pipeline_mode<synchronous>, transform_indices = @transform_1, window_bounds = array<i64: 4, 512, 128>}, {pipeline_mode = #tpu.pipeline_mode<synchronous>, transform_indices = @transform_2, window_bounds = array<i64: 1, 128>}, {pipeline_mode = #tpu.pipeline_mode<synchronous>, transform_indices = @transform_3, window_bounds = array<i64: 20, 1>}, {transform_indices = @transform_4, window_bounds = array<i64: 1, 20, 128>}]} {
    %c0_i32 = arith.constant 0 : i32
    %c0_i32_0 = arith.constant 0 : i32
    %c0_i32_1 = arith.constant 0 : i32
    %0 = tpu.memref_slice %arg1[%c0_i32, %c0_i32_0, %c0_i32_1] : memref<1x32x512xbf16, #tpu.memory_space<vmem>> -> memref<1x32x512xbf16, #tpu.memory_space<vmem>>
    %1 = tpu.memref_squeeze %0 : memref<1x32x512xbf16, #tpu.memory_space<vmem>> -> memref<32x512xbf16, #tpu.memory_space<vmem>>
    %c0 = arith.constant 0 : index
    %c0_2 = arith.constant 0 : index
    %2 = vector.load %1[%c0, %c0_2] : memref<32x512xbf16, #tpu.memory_space<vmem>>, vector<20x512xbf16>
    %c0_3 = arith.constant 0 : index
    %c0_4 = arith.constant 0 : index
    %c0_5 = arith.constant 0 : index
    %3 = vector.load %arg2[%c0_3, %c0_4, %c0_5] : memref<4x512x128xbf16, #tpu.memory_space<vmem>>, vector<1x512x128xbf16>
    %4 = vector.shape_cast %3 : vector<1x512x128xbf16> to vector<512x128xbf16>
    %cst = arith.constant dense<0.000000e+00> : vector<20x128xf32>
    %5 = tpu.matmul %2, %4, %cst {dimension_numbers = #tpu.dot_dimension_numbers<[1], [0], [0], [1], [0, 0, 1, 1], [], []>} : vector<20x512xbf16>, vector<512x128xbf16>, vector<20x128xf32> -> vector<20x128xf32>
    %c0_i32_6 = arith.constant 0 : i32
    %c0_i32_7 = arith.constant 0 : i32
    %c0_i32_8 = arith.constant 0 : i32
    %6 = tpu.memref_slice %arg1[%c0_i32_6, %c0_i32_7, %c0_i32_8] : memref<1x32x512xbf16, #tpu.memory_space<vmem>> -> memref<1x32x512xbf16, #tpu.memory_space<vmem>>
    %7 = tpu.memref_squeeze %6 : memref<1x32x512xbf16, #tpu.memory_space<vmem>> -> memref<32x512xbf16, #tpu.memory_space<vmem>>
    %c1 = arith.constant 1 : index
    %c0_9 = arith.constant 0 : index
    %8 = vector.load %7[%c1, %c0_9] : memref<32x512xbf16, #tpu.memory_space<vmem>>, vector<20x512xbf16>
    %c1_10 = arith.constant 1 : index
    %c0_11 = arith.constant 0 : index
    %c0_12 = arith.constant 0 : index
    %9 = vector.load %arg2[%c1_10, %c0_11, %c0_12] : memref<4x512x128xbf16, #tpu.memory_space<vmem>>, vector<1x512x128xbf16>
    %10 = vector.shape_cast %9 : vector<1x512x128xbf16> to vector<512x128xbf16>
    %cst_13 = arith.constant dense<0.000000e+00> : vector<20x128xf32>
    %11 = tpu.matmul %8, %10, %cst_13 {dimension_numbers = #tpu.dot_dimension_numbers<[1], [0], [0], [1], [0, 0, 1, 1], [], []>} : vector<20x512xbf16>, vector<512x128xbf16>, vector<20x128xf32> -> vector<20x128xf32>
    %12 = arith.addf %5, %11 : vector<20x128xf32>
    %c0_i32_14 = arith.constant 0 : i32
    %c0_i32_15 = arith.constant 0 : i32
    %c0_i32_16 = arith.constant 0 : i32
    %13 = tpu.memref_slice %arg1[%c0_i32_14, %c0_i32_15, %c0_i32_16] : memref<1x32x512xbf16, #tpu.memory_space<vmem>> -> memref<1x32x512xbf16, #tpu.memory_space<vmem>>
    %14 = tpu.memref_squeeze %13 : memref<1x32x512xbf16, #tpu.memory_space<vmem>> -> memref<32x512xbf16, #tpu.memory_space<vmem>>
    %c5 = arith.constant 5 : index
    %c0_17 = arith.constant 0 : index
    %15 = vector.load %14[%c5, %c0_17] : memref<32x512xbf16, #tpu.memory_space<vmem>>, vector<20x512xbf16>
    %c2 = arith.constant 2 : index
    %c0_18 = arith.constant 0 : index
    %c0_19 = arith.constant 0 : index
    %16 = vector.load %arg2[%c2, %c0_18, %c0_19] : memref<4x512x128xbf16, #tpu.memory_space<vmem>>, vector<1x512x128xbf16>
    %17 = vector.shape_cast %16 : vector<1x512x128xbf16> to vector<512x128xbf16>
    %cst_20 = arith.constant dense<0.000000e+00> : vector<20x128xf32>
    %18 = tpu.matmul %15, %17, %cst_20 {dimension_numbers = #tpu.dot_dimension_numbers<[1], [0], [0], [1], [0, 0, 1, 1], [], []>} : vector<20x512xbf16>, vector<512x128xbf16>, vector<20x128xf32> -> vector<20x128xf32>
    %19 = arith.addf %12, %18 : vector<20x128xf32>
    %c0_i32_21 = arith.constant 0 : i32
    %c0_i32_22 = arith.constant 0 : i32
    %c0_i32_23 = arith.constant 0 : i32
    %20 = tpu.memref_slice %arg1[%c0_i32_21, %c0_i32_22, %c0_i32_23] : memref<1x32x512xbf16, #tpu.memory_space<vmem>> -> memref<1x32x512xbf16, #tpu.memory_space<vmem>>
    %21 = tpu.memref_squeeze %20 : memref<1x32x512xbf16, #tpu.memory_space<vmem>> -> memref<32x512xbf16, #tpu.memory_space<vmem>>
    %c6 = arith.constant 6 : index
    %c0_24 = arith.constant 0 : index
    %22 = vector.load %21[%c6, %c0_24] : memref<32x512xbf16, #tpu.memory_space<vmem>>, vector<20x512xbf16>
    %c3 = arith.constant 3 : index
    %c0_25 = arith.constant 0 : index
    %c0_26 = arith.constant 0 : index
    %23 = vector.load %arg2[%c3, %c0_25, %c0_26] : memref<4x512x128xbf16, #tpu.memory_space<vmem>>, vector<1x512x128xbf16>
    %24 = vector.shape_cast %23 : vector<1x512x128xbf16> to vector<512x128xbf16>
    %cst_27 = arith.constant dense<0.000000e+00> : vector<20x128xf32>
    %25 = tpu.matmul %22, %24, %cst_27 {dimension_numbers = #tpu.dot_dimension_numbers<[1], [0], [0], [1], [0, 0, 1, 1], [], []>} : vector<20x512xbf16>, vector<512x128xbf16>, vector<20x128xf32> -> vector<20x128xf32>
    %26 = arith.addf %19, %25 : vector<20x128xf32>
    %c0_28 = arith.constant 0 : index
    %c0_29 = arith.constant 0 : index
    %27 = vector.load %arg4[%c0_28, %c0_29] : memref<20x1xf32, #tpu.memory_space<vmem>>, vector<20x1xf32>
    %c0_30 = arith.constant 0 : index
    %c0_31 = arith.constant 0 : index
    %28 = vector.load %arg3[%c0_30, %c0_31] : memref<1x128xf32, #tpu.memory_space<vmem>>, vector<1x128xf32>
    %29 = vector.broadcast %28 : vector<1x128xf32> to vector<20x128xf32>
    %30 = arith.addf %26, %29 : vector<20x128xf32>
    %31 = vector.broadcast %27 : vector<20x1xf32> to vector<20x128xf32>
    %32 = arith.mulf %30, %31 : vector<20x128xf32>
    %cst_32 = arith.constant dense<0.000000e+00> : vector<128xf32>
    %33 = vector.multi_reduction <add>, %32, %cst_32 [0] : vector<20x128xf32> to vector<128xf32>
    %34 = vector.shape_cast %33 : vector<128xf32> to vector<1x128xf32>
    %35 = arith.mulf %32, %32 : vector<20x128xf32>
    %cst_33 = arith.constant dense<0.000000e+00> : vector<128xf32>
    %36 = vector.multi_reduction <add>, %35, %cst_33 [0] : vector<20x128xf32> to vector<128xf32>
    %37 = vector.shape_cast %36 : vector<128xf32> to vector<1x128xf32>
    %cst_34 = arith.constant 6.250000e-02 : f32
    %38 = vector.broadcast %cst_34 : f32 to vector<1x128xf32>
    %39 = arith.mulf %34, %38 : vector<1x128xf32>
    %cst_35 = arith.constant 6.250000e-02 : f32
    %40 = vector.broadcast %cst_35 : f32 to vector<1x128xf32>
    %41 = arith.mulf %37, %40 : vector<1x128xf32>
    %42 = arith.mulf %39, %39 : vector<1x128xf32>
    %43 = arith.subf %41, %42 : vector<1x128xf32>
    %cst_36 = arith.constant 0.000000e+00 : f32
    %44 = vector.broadcast %cst_36 : f32 to vector<1x128xf32>
    %45 = arith.maximumf %43, %44 : vector<1x128xf32>
    %46 = vector.broadcast %39 : vector<1x128xf32> to vector<20x128xf32>
    %47 = arith.subf %32, %46 : vector<20x128xf32>
    %cst_37 = arith.constant 9.99999974E-6 : f32
    %48 = vector.broadcast %cst_37 : f32 to vector<1x128xf32>
    %49 = arith.addf %45, %48 : vector<1x128xf32>
    %50 = math.rsqrt %49 : vector<1x128xf32>
    %51 = vector.broadcast %50 : vector<1x128xf32> to vector<20x128xf32>
    %52 = arith.mulf %47, %51 : vector<20x128xf32>
    %cst_38 = arith.constant 0.000000e+00 : f32
    %53 = vector.broadcast %cst_38 : f32 to vector<20x128xf32>
    %54 = arith.cmpf ogt, %52, %53 : vector<20x128xf32>
    %cst_39 = arith.constant 2.000000e-01 : f32
    %55 = vector.broadcast %cst_39 : f32 to vector<20x128xf32>
    %56 = arith.mulf %55, %52 : vector<20x128xf32>
    %57 = arith.select %54, %52, %56 : vector<20x128xi1>, vector<20x128xf32>
    %58 = arith.truncf %57 : vector<20x128xf32> to vector<20x128xbf16>
    %c0_40 = arith.constant 0 : index
    %c0_41 = arith.constant 0 : index
    %c0_42 = arith.constant 0 : index
    %59 = vector.load %arg5[%c0_40, %c0_41, %c0_42] : memref<1x20x128xbf16, #tpu.memory_space<vmem>>, vector<1x20x128xbf16>
    %60 = vector.shape_cast %59 : vector<1x20x128xbf16> to vector<20x128xbf16>
    %61 = vector.shape_cast %58 : vector<20x128xbf16> to vector<1x20x128xbf16>
    tpu.vector_store %arg5[%c0_40, %c0_41, %c0_42], %61 {strides = array<i32>} : memref<1x20x128xbf16, #tpu.memory_space<vmem>>, vector<1x20x128xbf16>,
    return
  }
  func.func @transform_0(%arg0: i32) -> (i32, i32, i32) {
    %c0_i32 = arith.constant 0 : i32
    %c0_i32_0 = arith.constant 0 : i32
    %c0_i32_1 = arith.constant 0 : i32
    return %arg0, %c0_i32, %c0_i32_0 : i32, i32, i32
  }
  func.func @transform_1(%arg0: i32) -> (i32, i32, i32) {
    %c0_i32 = arith.constant 0 : i32
    %c0_i32_0 = arith.constant 0 : i32
    %c0_i32_1 = arith.constant 0 : i32
    %c0_i32_2 = arith.constant 0 : i32
    return %c0_i32, %c0_i32_0, %c0_i32_1 : i32, i32, i32
  }
  func.func @transform_2(%arg0: i32) -> (i32, i32) {
    %c0_i32 = arith.constant 0 : i32
    %c0_i32_0 = arith.constant 0 : i32
    %c0_i32_1 = arith.constant 0 : i32
    return %c0_i32, %c0_i32_0 : i32, i32
  }
  func.func @transform_3(%arg0: i32) -> (i32, i32) {
    %c0_i32 = arith.constant 0 : i32
    %c0_i32_0 = arith.constant 0 : i32
    %c0_i32_1 = arith.constant 0 : i32
    return %c0_i32, %c0_i32_0 : i32, i32
  }
  func.func @transform_4(%arg0: i32) -> (i32, i32, i32) {
    %c0_i32 = arith.constant 0 : i32
    %c0_i32_0 = arith.constant 0 : i32
    %c0_i32_1 = arith.constant 0 : i32
    return %arg0, %c0_i32, %c0_i32_0 : i32, i32, i32
  }
}

module attributes {stable_mosaic.version = 11 : i64} {
  func.func @_layer_kernel(%arg0: i32, %arg1: memref<1x40x128xbf16, #tpu.memory_space<vmem>>, %arg2: memref<16x128x128xbf16, #tpu.memory_space<vmem>>, %arg3: memref<1x128xf32, #tpu.memory_space<vmem>>, %arg4: memref<18x1xf32, #tpu.memory_space<vmem>>, %arg5: memref<1x18x128xbf16, #tpu.memory_space<vmem>>) attributes {dimension_semantics = [#tpu.dimension_semantics<parallel>], iteration_bounds = array<i64: 2>, scalar_prefetch = 0 : i64, scratch_operands = 0 : i64, tpu.core_type = #tpu.core_type<tc>, window_params = [{transform_indices = @transform_0, window_bounds = array<i64: 1, 40, 128>}, {pipeline_mode = #tpu.pipeline_mode<synchronous>, transform_indices = @transform_1, window_bounds = array<i64: 16, 128, 128>}, {pipeline_mode = #tpu.pipeline_mode<synchronous>, transform_indices = @transform_2, window_bounds = array<i64: 1, 128>}, {pipeline_mode = #tpu.pipeline_mode<synchronous>, transform_indices = @transform_3, window_bounds = array<i64: 18, 1>}, {transform_indices = @transform_4, window_bounds = array<i64: 1, 18, 128>}]} {
    %c0_i32 = arith.constant 0 : i32
    %c0_i32_0 = arith.constant 0 : i32
    %c0_i32_1 = arith.constant 0 : i32
    %0 = tpu.memref_slice %arg1[%c0_i32, %c0_i32_0, %c0_i32_1] : memref<1x40x128xbf16, #tpu.memory_space<vmem>> -> memref<1x40x128xbf16, #tpu.memory_space<vmem>>
    %1 = tpu.memref_squeeze %0 : memref<1x40x128xbf16, #tpu.memory_space<vmem>> -> memref<40x128xbf16, #tpu.memory_space<vmem>>
    %c0 = arith.constant 0 : index
    %c0_2 = arith.constant 0 : index
    %2 = vector.load %1[%c0, %c0_2] : memref<40x128xbf16, #tpu.memory_space<vmem>>, vector<18x128xbf16>
    %c0_3 = arith.constant 0 : index
    %c0_4 = arith.constant 0 : index
    %c0_5 = arith.constant 0 : index
    %3 = vector.load %arg2[%c0_3, %c0_4, %c0_5] : memref<16x128x128xbf16, #tpu.memory_space<vmem>>, vector<1x128x128xbf16>
    %4 = vector.shape_cast %3 : vector<1x128x128xbf16> to vector<128x128xbf16>
    %cst = arith.constant dense<0.000000e+00> : vector<18x128xf32>
    %5 = tpu.matmul %2, %4, %cst {dimension_numbers = #tpu.dot_dimension_numbers<[1], [0], [0], [1], [0, 0, 1, 1], [], []>} : vector<18x128xbf16>, vector<128x128xbf16>, vector<18x128xf32> -> vector<18x128xf32>
    %c0_i32_6 = arith.constant 0 : i32
    %c0_i32_7 = arith.constant 0 : i32
    %c0_i32_8 = arith.constant 0 : i32
    %6 = tpu.memref_slice %arg1[%c0_i32_6, %c0_i32_7, %c0_i32_8] : memref<1x40x128xbf16, #tpu.memory_space<vmem>> -> memref<1x40x128xbf16, #tpu.memory_space<vmem>>
    %7 = tpu.memref_squeeze %6 : memref<1x40x128xbf16, #tpu.memory_space<vmem>> -> memref<40x128xbf16, #tpu.memory_space<vmem>>
    %c1 = arith.constant 1 : index
    %c0_9 = arith.constant 0 : index
    %8 = vector.load %7[%c1, %c0_9] : memref<40x128xbf16, #tpu.memory_space<vmem>>, vector<18x128xbf16>
    %c1_10 = arith.constant 1 : index
    %c0_11 = arith.constant 0 : index
    %c0_12 = arith.constant 0 : index
    %9 = vector.load %arg2[%c1_10, %c0_11, %c0_12] : memref<16x128x128xbf16, #tpu.memory_space<vmem>>, vector<1x128x128xbf16>
    %10 = vector.shape_cast %9 : vector<1x128x128xbf16> to vector<128x128xbf16>
    %cst_13 = arith.constant dense<0.000000e+00> : vector<18x128xf32>
    %11 = tpu.matmul %8, %10, %cst_13 {dimension_numbers = #tpu.dot_dimension_numbers<[1], [0], [0], [1], [0, 0, 1, 1], [], []>} : vector<18x128xbf16>, vector<128x128xbf16>, vector<18x128xf32> -> vector<18x128xf32>
    %12 = arith.addf %5, %11 : vector<18x128xf32>
    %c0_i32_14 = arith.constant 0 : i32
    %c0_i32_15 = arith.constant 0 : i32
    %c0_i32_16 = arith.constant 0 : i32
    %13 = tpu.memref_slice %arg1[%c0_i32_14, %c0_i32_15, %c0_i32_16] : memref<1x40x128xbf16, #tpu.memory_space<vmem>> -> memref<1x40x128xbf16, #tpu.memory_space<vmem>>
    %14 = tpu.memref_squeeze %13 : memref<1x40x128xbf16, #tpu.memory_space<vmem>> -> memref<40x128xbf16, #tpu.memory_space<vmem>>
    %c2 = arith.constant 2 : index
    %c0_17 = arith.constant 0 : index
    %15 = vector.load %14[%c2, %c0_17] : memref<40x128xbf16, #tpu.memory_space<vmem>>, vector<18x128xbf16>
    %c2_18 = arith.constant 2 : index
    %c0_19 = arith.constant 0 : index
    %c0_20 = arith.constant 0 : index
    %16 = vector.load %arg2[%c2_18, %c0_19, %c0_20] : memref<16x128x128xbf16, #tpu.memory_space<vmem>>, vector<1x128x128xbf16>
    %17 = vector.shape_cast %16 : vector<1x128x128xbf16> to vector<128x128xbf16>
    %cst_21 = arith.constant dense<0.000000e+00> : vector<18x128xf32>
    %18 = tpu.matmul %15, %17, %cst_21 {dimension_numbers = #tpu.dot_dimension_numbers<[1], [0], [0], [1], [0, 0, 1, 1], [], []>} : vector<18x128xbf16>, vector<128x128xbf16>, vector<18x128xf32> -> vector<18x128xf32>
    %19 = arith.addf %12, %18 : vector<18x128xf32>
    %c0_i32_22 = arith.constant 0 : i32
    %c0_i32_23 = arith.constant 0 : i32
    %c0_i32_24 = arith.constant 0 : i32
    %20 = tpu.memref_slice %arg1[%c0_i32_22, %c0_i32_23, %c0_i32_24] : memref<1x40x128xbf16, #tpu.memory_space<vmem>> -> memref<1x40x128xbf16, #tpu.memory_space<vmem>>
    %21 = tpu.memref_squeeze %20 : memref<1x40x128xbf16, #tpu.memory_space<vmem>> -> memref<40x128xbf16, #tpu.memory_space<vmem>>
    %c3 = arith.constant 3 : index
    %c0_25 = arith.constant 0 : index
    %22 = vector.load %21[%c3, %c0_25] : memref<40x128xbf16, #tpu.memory_space<vmem>>, vector<18x128xbf16>
    %c3_26 = arith.constant 3 : index
    %c0_27 = arith.constant 0 : index
    %c0_28 = arith.constant 0 : index
    %23 = vector.load %arg2[%c3_26, %c0_27, %c0_28] : memref<16x128x128xbf16, #tpu.memory_space<vmem>>, vector<1x128x128xbf16>
    %24 = vector.shape_cast %23 : vector<1x128x128xbf16> to vector<128x128xbf16>
    %cst_29 = arith.constant dense<0.000000e+00> : vector<18x128xf32>
    %25 = tpu.matmul %22, %24, %cst_29 {dimension_numbers = #tpu.dot_dimension_numbers<[1], [0], [0], [1], [0, 0, 1, 1], [], []>} : vector<18x128xbf16>, vector<128x128xbf16>, vector<18x128xf32> -> vector<18x128xf32>
    %26 = arith.addf %19, %25 : vector<18x128xf32>
    %c0_i32_30 = arith.constant 0 : i32
    %c0_i32_31 = arith.constant 0 : i32
    %c0_i32_32 = arith.constant 0 : i32
    %27 = tpu.memref_slice %arg1[%c0_i32_30, %c0_i32_31, %c0_i32_32] : memref<1x40x128xbf16, #tpu.memory_space<vmem>> -> memref<1x40x128xbf16, #tpu.memory_space<vmem>>
    %28 = tpu.memref_squeeze %27 : memref<1x40x128xbf16, #tpu.memory_space<vmem>> -> memref<40x128xbf16, #tpu.memory_space<vmem>>
    %c6 = arith.constant 6 : index
    %c0_33 = arith.constant 0 : index
    %29 = vector.load %28[%c6, %c0_33] : memref<40x128xbf16, #tpu.memory_space<vmem>>, vector<18x128xbf16>
    %c4 = arith.constant 4 : index
    %c0_34 = arith.constant 0 : index
    %c0_35 = arith.constant 0 : index
    %30 = vector.load %arg2[%c4, %c0_34, %c0_35] : memref<16x128x128xbf16, #tpu.memory_space<vmem>>, vector<1x128x128xbf16>
    %31 = vector.shape_cast %30 : vector<1x128x128xbf16> to vector<128x128xbf16>
    %cst_36 = arith.constant dense<0.000000e+00> : vector<18x128xf32>
    %32 = tpu.matmul %29, %31, %cst_36 {dimension_numbers = #tpu.dot_dimension_numbers<[1], [0], [0], [1], [0, 0, 1, 1], [], []>} : vector<18x128xbf16>, vector<128x128xbf16>, vector<18x128xf32> -> vector<18x128xf32>
    %33 = arith.addf %26, %32 : vector<18x128xf32>
    %c0_i32_37 = arith.constant 0 : i32
    %c0_i32_38 = arith.constant 0 : i32
    %c0_i32_39 = arith.constant 0 : i32
    %34 = tpu.memref_slice %arg1[%c0_i32_37, %c0_i32_38, %c0_i32_39] : memref<1x40x128xbf16, #tpu.memory_space<vmem>> -> memref<1x40x128xbf16, #tpu.memory_space<vmem>>
    %35 = tpu.memref_squeeze %34 : memref<1x40x128xbf16, #tpu.memory_space<vmem>> -> memref<40x128xbf16, #tpu.memory_space<vmem>>
    %c7 = arith.constant 7 : index
    %c0_40 = arith.constant 0 : index
    %36 = vector.load %35[%c7, %c0_40] : memref<40x128xbf16, #tpu.memory_space<vmem>>, vector<18x128xbf16>
    %c5 = arith.constant 5 : index
    %c0_41 = arith.constant 0 : index
    %c0_42 = arith.constant 0 : index
    %37 = vector.load %arg2[%c5, %c0_41, %c0_42] : memref<16x128x128xbf16, #tpu.memory_space<vmem>>, vector<1x128x128xbf16>
    %38 = vector.shape_cast %37 : vector<1x128x128xbf16> to vector<128x128xbf16>
    %cst_43 = arith.constant dense<0.000000e+00> : vector<18x128xf32>
    %39 = tpu.matmul %36, %38, %cst_43 {dimension_numbers = #tpu.dot_dimension_numbers<[1], [0], [0], [1], [0, 0, 1, 1], [], []>} : vector<18x128xbf16>, vector<128x128xbf16>, vector<18x128xf32> -> vector<18x128xf32>
    %40 = arith.addf %33, %39 : vector<18x128xf32>
    %c0_i32_44 = arith.constant 0 : i32
    %c0_i32_45 = arith.constant 0 : i32
    %c0_i32_46 = arith.constant 0 : i32
    %41 = tpu.memref_slice %arg1[%c0_i32_44, %c0_i32_45, %c0_i32_46] : memref<1x40x128xbf16, #tpu.memory_space<vmem>> -> memref<1x40x128xbf16, #tpu.memory_space<vmem>>
    %42 = tpu.memref_squeeze %41 : memref<1x40x128xbf16, #tpu.memory_space<vmem>> -> memref<40x128xbf16, #tpu.memory_space<vmem>>
    %c8 = arith.constant 8 : index
    %c0_47 = arith.constant 0 : index
    %43 = vector.load %42[%c8, %c0_47] : memref<40x128xbf16, #tpu.memory_space<vmem>>, vector<18x128xbf16>
    %c6_48 = arith.constant 6 : index
    %c0_49 = arith.constant 0 : index
    %c0_50 = arith.constant 0 : index
    %44 = vector.load %arg2[%c6_48, %c0_49, %c0_50] : memref<16x128x128xbf16, #tpu.memory_space<vmem>>, vector<1x128x128xbf16>
    %45 = vector.shape_cast %44 : vector<1x128x128xbf16> to vector<128x128xbf16>
    %cst_51 = arith.constant dense<0.000000e+00> : vector<18x128xf32>
    %46 = tpu.matmul %43, %45, %cst_51 {dimension_numbers = #tpu.dot_dimension_numbers<[1], [0], [0], [1], [0, 0, 1, 1], [], []>} : vector<18x128xbf16>, vector<128x128xbf16>, vector<18x128xf32> -> vector<18x128xf32>
    %47 = arith.addf %40, %46 : vector<18x128xf32>
    %c0_i32_52 = arith.constant 0 : i32
    %c0_i32_53 = arith.constant 0 : i32
    %c0_i32_54 = arith.constant 0 : i32
    %48 = tpu.memref_slice %arg1[%c0_i32_52, %c0_i32_53, %c0_i32_54] : memref<1x40x128xbf16, #tpu.memory_space<vmem>> -> memref<1x40x128xbf16, #tpu.memory_space<vmem>>
    %49 = tpu.memref_squeeze %48 : memref<1x40x128xbf16, #tpu.memory_space<vmem>> -> memref<40x128xbf16, #tpu.memory_space<vmem>>
    %c9 = arith.constant 9 : index
    %c0_55 = arith.constant 0 : index
    %50 = vector.load %49[%c9, %c0_55] : memref<40x128xbf16, #tpu.memory_space<vmem>>, vector<18x128xbf16>
    %c7_56 = arith.constant 7 : index
    %c0_57 = arith.constant 0 : index
    %c0_58 = arith.constant 0 : index
    %51 = vector.load %arg2[%c7_56, %c0_57, %c0_58] : memref<16x128x128xbf16, #tpu.memory_space<vmem>>, vector<1x128x128xbf16>
    %52 = vector.shape_cast %51 : vector<1x128x128xbf16> to vector<128x128xbf16>
    %cst_59 = arith.constant dense<0.000000e+00> : vector<18x128xf32>
    %53 = tpu.matmul %50, %52, %cst_59 {dimension_numbers = #tpu.dot_dimension_numbers<[1], [0], [0], [1], [0, 0, 1, 1], [], []>} : vector<18x128xbf16>, vector<128x128xbf16>, vector<18x128xf32> -> vector<18x128xf32>
    %54 = arith.addf %47, %53 : vector<18x128xf32>
    %c0_i32_60 = arith.constant 0 : i32
    %c0_i32_61 = arith.constant 0 : i32
    %c0_i32_62 = arith.constant 0 : i32
    %55 = tpu.memref_slice %arg1[%c0_i32_60, %c0_i32_61, %c0_i32_62] : memref<1x40x128xbf16, #tpu.memory_space<vmem>> -> memref<1x40x128xbf16, #tpu.memory_space<vmem>>
    %56 = tpu.memref_squeeze %55 : memref<1x40x128xbf16, #tpu.memory_space<vmem>> -> memref<40x128xbf16, #tpu.memory_space<vmem>>
    %c12 = arith.constant 12 : index
    %c0_63 = arith.constant 0 : index
    %57 = vector.load %56[%c12, %c0_63] : memref<40x128xbf16, #tpu.memory_space<vmem>>, vector<18x128xbf16>
    %c8_64 = arith.constant 8 : index
    %c0_65 = arith.constant 0 : index
    %c0_66 = arith.constant 0 : index
    %58 = vector.load %arg2[%c8_64, %c0_65, %c0_66] : memref<16x128x128xbf16, #tpu.memory_space<vmem>>, vector<1x128x128xbf16>
    %59 = vector.shape_cast %58 : vector<1x128x128xbf16> to vector<128x128xbf16>
    %cst_67 = arith.constant dense<0.000000e+00> : vector<18x128xf32>
    %60 = tpu.matmul %57, %59, %cst_67 {dimension_numbers = #tpu.dot_dimension_numbers<[1], [0], [0], [1], [0, 0, 1, 1], [], []>} : vector<18x128xbf16>, vector<128x128xbf16>, vector<18x128xf32> -> vector<18x128xf32>
    %61 = arith.addf %54, %60 : vector<18x128xf32>
    %c0_i32_68 = arith.constant 0 : i32
    %c0_i32_69 = arith.constant 0 : i32
    %c0_i32_70 = arith.constant 0 : i32
    %62 = tpu.memref_slice %arg1[%c0_i32_68, %c0_i32_69, %c0_i32_70] : memref<1x40x128xbf16, #tpu.memory_space<vmem>> -> memref<1x40x128xbf16, #tpu.memory_space<vmem>>
    %63 = tpu.memref_squeeze %62 : memref<1x40x128xbf16, #tpu.memory_space<vmem>> -> memref<40x128xbf16, #tpu.memory_space<vmem>>
    %c13 = arith.constant 13 : index
    %c0_71 = arith.constant 0 : index
    %64 = vector.load %63[%c13, %c0_71] : memref<40x128xbf16, #tpu.memory_space<vmem>>, vector<18x128xbf16>
    %c9_72 = arith.constant 9 : index
    %c0_73 = arith.constant 0 : index
    %c0_74 = arith.constant 0 : index
    %65 = vector.load %arg2[%c9_72, %c0_73, %c0_74] : memref<16x128x128xbf16, #tpu.memory_space<vmem>>, vector<1x128x128xbf16>
    %66 = vector.shape_cast %65 : vector<1x128x128xbf16> to vector<128x128xbf16>
    %cst_75 = arith.constant dense<0.000000e+00> : vector<18x128xf32>
    %67 = tpu.matmul %64, %66, %cst_75 {dimension_numbers = #tpu.dot_dimension_numbers<[1], [0], [0], [1], [0, 0, 1, 1], [], []>} : vector<18x128xbf16>, vector<128x128xbf16>, vector<18x128xf32> -> vector<18x128xf32>
    %68 = arith.addf %61, %67 : vector<18x128xf32>
    %c0_i32_76 = arith.constant 0 : i32
    %c0_i32_77 = arith.constant 0 : i32
    %c0_i32_78 = arith.constant 0 : i32
    %69 = tpu.memref_slice %arg1[%c0_i32_76, %c0_i32_77, %c0_i32_78] : memref<1x40x128xbf16, #tpu.memory_space<vmem>> -> memref<1x40x128xbf16, #tpu.memory_space<vmem>>
    %70 = tpu.memref_squeeze %69 : memref<1x40x128xbf16, #tpu.memory_space<vmem>> -> memref<40x128xbf16, #tpu.memory_space<vmem>>
    %c14 = arith.constant 14 : index
    %c0_79 = arith.constant 0 : index
    %71 = vector.load %70[%c14, %c0_79] : memref<40x128xbf16, #tpu.memory_space<vmem>>, vector<18x128xbf16>
    %c10 = arith.constant 10 : index
    %c0_80 = arith.constant 0 : index
    %c0_81 = arith.constant 0 : index
    %72 = vector.load %arg2[%c10, %c0_80, %c0_81] : memref<16x128x128xbf16, #tpu.memory_space<vmem>>, vector<1x128x128xbf16>
    %73 = vector.shape_cast %72 : vector<1x128x128xbf16> to vector<128x128xbf16>
    %cst_82 = arith.constant dense<0.000000e+00> : vector<18x128xf32>
    %74 = tpu.matmul %71, %73, %cst_82 {dimension_numbers = #tpu.dot_dimension_numbers<[1], [0], [0], [1], [0, 0, 1, 1], [], []>} : vector<18x128xbf16>, vector<128x128xbf16>, vector<18x128xf32> -> vector<18x128xf32>
    %75 = arith.addf %68, %74 : vector<18x128xf32>
    %c0_i32_83 = arith.constant 0 : i32
    %c0_i32_84 = arith.constant 0 : i32
    %c0_i32_85 = arith.constant 0 : i32
    %76 = tpu.memref_slice %arg1[%c0_i32_83, %c0_i32_84, %c0_i32_85] : memref<1x40x128xbf16, #tpu.memory_space<vmem>> -> memref<1x40x128xbf16, #tpu.memory_space<vmem>>
    %77 = tpu.memref_squeeze %76 : memref<1x40x128xbf16, #tpu.memory_space<vmem>> -> memref<40x128xbf16, #tpu.memory_space<vmem>>
    %c15 = arith.constant 15 : index
    %c0_86 = arith.constant 0 : index
    %78 = vector.load %77[%c15, %c0_86] : memref<40x128xbf16, #tpu.memory_space<vmem>>, vector<18x128xbf16>
    %c11 = arith.constant 11 : index
    %c0_87 = arith.constant 0 : index
    %c0_88 = arith.constant 0 : index
    %79 = vector.load %arg2[%c11, %c0_87, %c0_88] : memref<16x128x128xbf16, #tpu.memory_space<vmem>>, vector<1x128x128xbf16>
    %80 = vector.shape_cast %79 : vector<1x128x128xbf16> to vector<128x128xbf16>
    %cst_89 = arith.constant dense<0.000000e+00> : vector<18x128xf32>
    %81 = tpu.matmul %78, %80, %cst_89 {dimension_numbers = #tpu.dot_dimension_numbers<[1], [0], [0], [1], [0, 0, 1, 1], [], []>} : vector<18x128xbf16>, vector<128x128xbf16>, vector<18x128xf32> -> vector<18x128xf32>
    %82 = arith.addf %75, %81 : vector<18x128xf32>
    %c0_i32_90 = arith.constant 0 : i32
    %c0_i32_91 = arith.constant 0 : i32
    %c0_i32_92 = arith.constant 0 : i32
    %83 = tpu.memref_slice %arg1[%c0_i32_90, %c0_i32_91, %c0_i32_92] : memref<1x40x128xbf16, #tpu.memory_space<vmem>> -> memref<1x40x128xbf16, #tpu.memory_space<vmem>>
    %84 = tpu.memref_squeeze %83 : memref<1x40x128xbf16, #tpu.memory_space<vmem>> -> memref<40x128xbf16, #tpu.memory_space<vmem>>
    %c18 = arith.constant 18 : index
    %c0_93 = arith.constant 0 : index
    %85 = vector.load %84[%c18, %c0_93] : memref<40x128xbf16, #tpu.memory_space<vmem>>, vector<18x128xbf16>
    %c12_94 = arith.constant 12 : index
    %c0_95 = arith.constant 0 : index
    %c0_96 = arith.constant 0 : index
    %86 = vector.load %arg2[%c12_94, %c0_95, %c0_96] : memref<16x128x128xbf16, #tpu.memory_space<vmem>>, vector<1x128x128xbf16>
    %87 = vector.shape_cast %86 : vector<1x128x128xbf16> to vector<128x128xbf16>
    %cst_97 = arith.constant dense<0.000000e+00> : vector<18x128xf32>
    %88 = tpu.matmul %85, %87, %cst_97 {dimension_numbers = #tpu.dot_dimension_numbers<[1], [0], [0], [1], [0, 0, 1, 1], [], []>} : vector<18x128xbf16>, vector<128x128xbf16>, vector<18x128xf32> -> vector<18x128xf32>
    %89 = arith.addf %82, %88 : vector<18x128xf32>
    %c0_i32_98 = arith.constant 0 : i32
    %c0_i32_99 = arith.constant 0 : i32
    %c0_i32_100 = arith.constant 0 : i32
    %90 = tpu.memref_slice %arg1[%c0_i32_98, %c0_i32_99, %c0_i32_100] : memref<1x40x128xbf16, #tpu.memory_space<vmem>> -> memref<1x40x128xbf16, #tpu.memory_space<vmem>>
    %91 = tpu.memref_squeeze %90 : memref<1x40x128xbf16, #tpu.memory_space<vmem>> -> memref<40x128xbf16, #tpu.memory_space<vmem>>
    %c19 = arith.constant 19 : index
    %c0_101 = arith.constant 0 : index
    %92 = vector.load %91[%c19, %c0_101] : memref<40x128xbf16, #tpu.memory_space<vmem>>, vector<18x128xbf16>
    %c13_102 = arith.constant 13 : index
    %c0_103 = arith.constant 0 : index
    %c0_104 = arith.constant 0 : index
    %93 = vector.load %arg2[%c13_102, %c0_103, %c0_104] : memref<16x128x128xbf16, #tpu.memory_space<vmem>>, vector<1x128x128xbf16>
    %94 = vector.shape_cast %93 : vector<1x128x128xbf16> to vector<128x128xbf16>
    %cst_105 = arith.constant dense<0.000000e+00> : vector<18x128xf32>
    %95 = tpu.matmul %92, %94, %cst_105 {dimension_numbers = #tpu.dot_dimension_numbers<[1], [0], [0], [1], [0, 0, 1, 1], [], []>} : vector<18x128xbf16>, vector<128x128xbf16>, vector<18x128xf32> -> vector<18x128xf32>
    %96 = arith.addf %89, %95 : vector<18x128xf32>
    %c0_i32_106 = arith.constant 0 : i32
    %c0_i32_107 = arith.constant 0 : i32
    %c0_i32_108 = arith.constant 0 : i32
    %97 = tpu.memref_slice %arg1[%c0_i32_106, %c0_i32_107, %c0_i32_108] : memref<1x40x128xbf16, #tpu.memory_space<vmem>> -> memref<1x40x128xbf16, #tpu.memory_space<vmem>>
    %98 = tpu.memref_squeeze %97 : memref<1x40x128xbf16, #tpu.memory_space<vmem>> -> memref<40x128xbf16, #tpu.memory_space<vmem>>
    %c20 = arith.constant 20 : index
    %c0_109 = arith.constant 0 : index
    %99 = vector.load %98[%c20, %c0_109] : memref<40x128xbf16, #tpu.memory_space<vmem>>, vector<18x128xbf16>
    %c14_110 = arith.constant 14 : index
    %c0_111 = arith.constant 0 : index
    %c0_112 = arith.constant 0 : index
    %100 = vector.load %arg2[%c14_110, %c0_111, %c0_112] : memref<16x128x128xbf16, #tpu.memory_space<vmem>>, vector<1x128x128xbf16>
    %101 = vector.shape_cast %100 : vector<1x128x128xbf16> to vector<128x128xbf16>
    %cst_113 = arith.constant dense<0.000000e+00> : vector<18x128xf32>
    %102 = tpu.matmul %99, %101, %cst_113 {dimension_numbers = #tpu.dot_dimension_numbers<[1], [0], [0], [1], [0, 0, 1, 1], [], []>} : vector<18x128xbf16>, vector<128x128xbf16>, vector<18x128xf32> -> vector<18x128xf32>
    %103 = arith.addf %96, %102 : vector<18x128xf32>
    %c0_i32_114 = arith.constant 0 : i32
    %c0_i32_115 = arith.constant 0 : i32
    %c0_i32_116 = arith.constant 0 : i32
    %104 = tpu.memref_slice %arg1[%c0_i32_114, %c0_i32_115, %c0_i32_116] : memref<1x40x128xbf16, #tpu.memory_space<vmem>> -> memref<1x40x128xbf16, #tpu.memory_space<vmem>>
    %105 = tpu.memref_squeeze %104 : memref<1x40x128xbf16, #tpu.memory_space<vmem>> -> memref<40x128xbf16, #tpu.memory_space<vmem>>
    %c21 = arith.constant 21 : index
    %c0_117 = arith.constant 0 : index
    %106 = vector.load %105[%c21, %c0_117] : memref<40x128xbf16, #tpu.memory_space<vmem>>, vector<18x128xbf16>
    %c15_118 = arith.constant 15 : index
    %c0_119 = arith.constant 0 : index
    %c0_120 = arith.constant 0 : index
    %107 = vector.load %arg2[%c15_118, %c0_119, %c0_120] : memref<16x128x128xbf16, #tpu.memory_space<vmem>>, vector<1x128x128xbf16>
    %108 = vector.shape_cast %107 : vector<1x128x128xbf16> to vector<128x128xbf16>
    %cst_121 = arith.constant dense<0.000000e+00> : vector<18x128xf32>
    %109 = tpu.matmul %106, %108, %cst_121 {dimension_numbers = #tpu.dot_dimension_numbers<[1], [0], [0], [1], [0, 0, 1, 1], [], []>} : vector<18x128xbf16>, vector<128x128xbf16>, vector<18x128xf32> -> vector<18x128xf32>
    %110 = arith.addf %103, %109 : vector<18x128xf32>
    %c0_122 = arith.constant 0 : index
    %c0_123 = arith.constant 0 : index
    %111 = vector.load %arg4[%c0_122, %c0_123] : memref<18x1xf32, #tpu.memory_space<vmem>>, vector<18x1xf32>
    %c0_124 = arith.constant 0 : index
    %c0_125 = arith.constant 0 : index
    %112 = vector.load %arg3[%c0_124, %c0_125] : memref<1x128xf32, #tpu.memory_space<vmem>>, vector<1x128xf32>
    %113 = vector.broadcast %112 : vector<1x128xf32> to vector<18x128xf32>
    %114 = arith.addf %110, %113 : vector<18x128xf32>
    %115 = vector.broadcast %111 : vector<18x1xf32> to vector<18x128xf32>
    %116 = arith.mulf %114, %115 : vector<18x128xf32>
    %cst_126 = arith.constant dense<0.000000e+00> : vector<128xf32>
    %117 = vector.multi_reduction <add>, %116, %cst_126 [0] : vector<18x128xf32> to vector<128xf32>
    %118 = vector.shape_cast %117 : vector<128xf32> to vector<1x128xf32>
    %119 = arith.mulf %116, %116 : vector<18x128xf32>
    %cst_127 = arith.constant dense<0.000000e+00> : vector<128xf32>
    %120 = vector.multi_reduction <add>, %119, %cst_127 [0] : vector<18x128xf32> to vector<128xf32>
    %121 = vector.shape_cast %120 : vector<128xf32> to vector<1x128xf32>
    %cst_128 = arith.constant 0.111111112 : f32
    %122 = vector.broadcast %cst_128 : f32 to vector<1x128xf32>
    %123 = arith.mulf %118, %122 : vector<1x128xf32>
    %cst_129 = arith.constant 0.111111112 : f32
    %124 = vector.broadcast %cst_129 : f32 to vector<1x128xf32>
    %125 = arith.mulf %121, %124 : vector<1x128xf32>
    %126 = arith.mulf %123, %123 : vector<1x128xf32>
    %127 = arith.subf %125, %126 : vector<1x128xf32>
    %cst_130 = arith.constant 0.000000e+00 : f32
    %128 = vector.broadcast %cst_130 : f32 to vector<1x128xf32>
    %129 = arith.maximumf %127, %128 : vector<1x128xf32>
    %130 = vector.broadcast %123 : vector<1x128xf32> to vector<18x128xf32>
    %131 = arith.subf %116, %130 : vector<18x128xf32>
    %cst_131 = arith.constant 9.99999974E-6 : f32
    %132 = vector.broadcast %cst_131 : f32 to vector<1x128xf32>
    %133 = arith.addf %129, %132 : vector<1x128xf32>
    %134 = math.rsqrt %133 : vector<1x128xf32>
    %135 = vector.broadcast %134 : vector<1x128xf32> to vector<18x128xf32>
    %136 = arith.mulf %131, %135 : vector<18x128xf32>
    %cst_132 = arith.constant 0.000000e+00 : f32
    %137 = vector.broadcast %cst_132 : f32 to vector<18x128xf32>
    %138 = arith.cmpf ogt, %136, %137 : vector<18x128xf32>
    %cst_133 = arith.constant 2.000000e-01 : f32
    %139 = vector.broadcast %cst_133 : f32 to vector<18x128xf32>
    %140 = arith.mulf %139, %136 : vector<18x128xf32>
    %141 = arith.select %138, %136, %140 : vector<18x128xi1>, vector<18x128xf32>
    %142 = arith.truncf %141 : vector<18x128xf32> to vector<18x128xbf16>
    %c0_134 = arith.constant 0 : index
    %c0_135 = arith.constant 0 : index
    %c0_136 = arith.constant 0 : index
    %143 = vector.load %arg5[%c0_134, %c0_135, %c0_136] : memref<1x18x128xbf16, #tpu.memory_space<vmem>>, vector<1x18x128xbf16>
    %144 = vector.shape_cast %143 : vector<1x18x128xbf16> to vector<18x128xbf16>
    %145 = vector.shape_cast %142 : vector<18x128xbf16> to vector<1x18x128xbf16>
    tpu.vector_store %arg5[%c0_134, %c0_135, %c0_136], %145 {strides = array<i32>} : memref<1x18x128xbf16, #tpu.memory_space<vmem>>, vector<1x18x128xbf16>,
    return
  }
  func.func @transform_0(%arg0: i32) -> (i32, i32, i32) {
    %c0_i32 = arith.constant 0 : i32
    %c0_i32_0 = arith.constant 0 : i32
    %c0_i32_1 = arith.constant 0 : i32
    return %arg0, %c0_i32, %c0_i32_0 : i32, i32, i32
  }
  func.func @transform_1(%arg0: i32) -> (i32, i32, i32) {
    %c0_i32 = arith.constant 0 : i32
    %c0_i32_0 = arith.constant 0 : i32
    %c0_i32_1 = arith.constant 0 : i32
    %c0_i32_2 = arith.constant 0 : i32
    return %c0_i32, %c0_i32_0, %c0_i32_1 : i32, i32, i32
  }
  func.func @transform_2(%arg0: i32) -> (i32, i32) {
    %c0_i32 = arith.constant 0 : i32
    %c0_i32_0 = arith.constant 0 : i32
    %c0_i32_1 = arith.constant 0 : i32
    return %c0_i32, %c0_i32_0 : i32, i32
  }
  func.func @transform_3(%arg0: i32) -> (i32, i32) {
    %c0_i32 = arith.constant 0 : i32
    %c0_i32_0 = arith.constant 0 : i32
    %c0_i32_1 = arith.constant 0 : i32
    return %c0_i32, %c0_i32_0 : i32, i32
  }
  func.func @transform_4(%arg0: i32) -> (i32, i32, i32) {
    %c0_i32 = arith.constant 0 : i32
    %c0_i32_0 = arith.constant 0 : i32
    %c0_i32_1 = arith.constant 0 : i32
    return %arg0, %c0_i32, %c0_i32_0 : i32, i32, i32
  }
}

module attributes {stable_mosaic.version = 11 : i64} {
  func.func @_layer_kernel(%arg0: i32, %arg1: memref<1x32x128xbf16, #tpu.memory_space<vmem>>, %arg2: memref<16x128x128xbf16, #tpu.memory_space<vmem>>, %arg3: memref<1x128xf32, #tpu.memory_space<vmem>>, %arg4: memref<10x1xf32, #tpu.memory_space<vmem>>, %arg5: memref<1x10x128xbf16, #tpu.memory_space<vmem>>) attributes {dimension_semantics = [#tpu.dimension_semantics<parallel>], iteration_bounds = array<i64: 2>, scalar_prefetch = 0 : i64, scratch_operands = 0 : i64, tpu.core_type = #tpu.core_type<tc>, window_params = [{transform_indices = @transform_0, window_bounds = array<i64: 1, 32, 128>}, {pipeline_mode = #tpu.pipeline_mode<synchronous>, transform_indices = @transform_1, window_bounds = array<i64: 16, 128, 128>}, {pipeline_mode = #tpu.pipeline_mode<synchronous>, transform_indices = @transform_2, window_bounds = array<i64: 1, 128>}, {pipeline_mode = #tpu.pipeline_mode<synchronous>, transform_indices = @transform_3, window_bounds = array<i64: 10, 1>}, {transform_indices = @transform_4, window_bounds = array<i64: 1, 10, 128>}]} {
    %c0_i32 = arith.constant 0 : i32
    %c0_i32_0 = arith.constant 0 : i32
    %c0_i32_1 = arith.constant 0 : i32
    %0 = tpu.memref_slice %arg1[%c0_i32, %c0_i32_0, %c0_i32_1] : memref<1x32x128xbf16, #tpu.memory_space<vmem>> -> memref<1x32x128xbf16, #tpu.memory_space<vmem>>
    %1 = tpu.memref_squeeze %0 : memref<1x32x128xbf16, #tpu.memory_space<vmem>> -> memref<32x128xbf16, #tpu.memory_space<vmem>>
    %c0 = arith.constant 0 : index
    %c0_2 = arith.constant 0 : index
    %2 = vector.load %1[%c0, %c0_2] : memref<32x128xbf16, #tpu.memory_space<vmem>>, vector<10x128xbf16>
    %c0_3 = arith.constant 0 : index
    %c0_4 = arith.constant 0 : index
    %c0_5 = arith.constant 0 : index
    %3 = vector.load %arg2[%c0_3, %c0_4, %c0_5] : memref<16x128x128xbf16, #tpu.memory_space<vmem>>, vector<1x128x128xbf16>
    %4 = vector.shape_cast %3 : vector<1x128x128xbf16> to vector<128x128xbf16>
    %cst = arith.constant dense<0.000000e+00> : vector<10x128xf32>
    %5 = tpu.matmul %2, %4, %cst {dimension_numbers = #tpu.dot_dimension_numbers<[1], [0], [0], [1], [0, 0, 1, 1], [], []>} : vector<10x128xbf16>, vector<128x128xbf16>, vector<10x128xf32> -> vector<10x128xf32>
    %c0_i32_6 = arith.constant 0 : i32
    %c0_i32_7 = arith.constant 0 : i32
    %c0_i32_8 = arith.constant 0 : i32
    %6 = tpu.memref_slice %arg1[%c0_i32_6, %c0_i32_7, %c0_i32_8] : memref<1x32x128xbf16, #tpu.memory_space<vmem>> -> memref<1x32x128xbf16, #tpu.memory_space<vmem>>
    %7 = tpu.memref_squeeze %6 : memref<1x32x128xbf16, #tpu.memory_space<vmem>> -> memref<32x128xbf16, #tpu.memory_space<vmem>>
    %c1 = arith.constant 1 : index
    %c0_9 = arith.constant 0 : index
    %8 = vector.load %7[%c1, %c0_9] : memref<32x128xbf16, #tpu.memory_space<vmem>>, vector<10x128xbf16>
    %c1_10 = arith.constant 1 : index
    %c0_11 = arith.constant 0 : index
    %c0_12 = arith.constant 0 : index
    %9 = vector.load %arg2[%c1_10, %c0_11, %c0_12] : memref<16x128x128xbf16, #tpu.memory_space<vmem>>, vector<1x128x128xbf16>
    %10 = vector.shape_cast %9 : vector<1x128x128xbf16> to vector<128x128xbf16>
    %cst_13 = arith.constant dense<0.000000e+00> : vector<10x128xf32>
    %11 = tpu.matmul %8, %10, %cst_13 {dimension_numbers = #tpu.dot_dimension_numbers<[1], [0], [0], [1], [0, 0, 1, 1], [], []>} : vector<10x128xbf16>, vector<128x128xbf16>, vector<10x128xf32> -> vector<10x128xf32>
    %12 = arith.addf %5, %11 : vector<10x128xf32>
    %c0_i32_14 = arith.constant 0 : i32
    %c0_i32_15 = arith.constant 0 : i32
    %c0_i32_16 = arith.constant 0 : i32
    %13 = tpu.memref_slice %arg1[%c0_i32_14, %c0_i32_15, %c0_i32_16] : memref<1x32x128xbf16, #tpu.memory_space<vmem>> -> memref<1x32x128xbf16, #tpu.memory_space<vmem>>
    %14 = tpu.memref_squeeze %13 : memref<1x32x128xbf16, #tpu.memory_space<vmem>> -> memref<32x128xbf16, #tpu.memory_space<vmem>>
    %c2 = arith.constant 2 : index
    %c0_17 = arith.constant 0 : index
    %15 = vector.load %14[%c2, %c0_17] : memref<32x128xbf16, #tpu.memory_space<vmem>>, vector<10x128xbf16>
    %c2_18 = arith.constant 2 : index
    %c0_19 = arith.constant 0 : index
    %c0_20 = arith.constant 0 : index
    %16 = vector.load %arg2[%c2_18, %c0_19, %c0_20] : memref<16x128x128xbf16, #tpu.memory_space<vmem>>, vector<1x128x128xbf16>
    %17 = vector.shape_cast %16 : vector<1x128x128xbf16> to vector<128x128xbf16>
    %cst_21 = arith.constant dense<0.000000e+00> : vector<10x128xf32>
    %18 = tpu.matmul %15, %17, %cst_21 {dimension_numbers = #tpu.dot_dimension_numbers<[1], [0], [0], [1], [0, 0, 1, 1], [], []>} : vector<10x128xbf16>, vector<128x128xbf16>, vector<10x128xf32> -> vector<10x128xf32>
    %19 = arith.addf %12, %18 : vector<10x128xf32>
    %c0_i32_22 = arith.constant 0 : i32
    %c0_i32_23 = arith.constant 0 : i32
    %c0_i32_24 = arith.constant 0 : i32
    %20 = tpu.memref_slice %arg1[%c0_i32_22, %c0_i32_23, %c0_i32_24] : memref<1x32x128xbf16, #tpu.memory_space<vmem>> -> memref<1x32x128xbf16, #tpu.memory_space<vmem>>
    %21 = tpu.memref_squeeze %20 : memref<1x32x128xbf16, #tpu.memory_space<vmem>> -> memref<32x128xbf16, #tpu.memory_space<vmem>>
    %c3 = arith.constant 3 : index
    %c0_25 = arith.constant 0 : index
    %22 = vector.load %21[%c3, %c0_25] : memref<32x128xbf16, #tpu.memory_space<vmem>>, vector<10x128xbf16>
    %c3_26 = arith.constant 3 : index
    %c0_27 = arith.constant 0 : index
    %c0_28 = arith.constant 0 : index
    %23 = vector.load %arg2[%c3_26, %c0_27, %c0_28] : memref<16x128x128xbf16, #tpu.memory_space<vmem>>, vector<1x128x128xbf16>
    %24 = vector.shape_cast %23 : vector<1x128x128xbf16> to vector<128x128xbf16>
    %cst_29 = arith.constant dense<0.000000e+00> : vector<10x128xf32>
    %25 = tpu.matmul %22, %24, %cst_29 {dimension_numbers = #tpu.dot_dimension_numbers<[1], [0], [0], [1], [0, 0, 1, 1], [], []>} : vector<10x128xbf16>, vector<128x128xbf16>, vector<10x128xf32> -> vector<10x128xf32>
    %26 = arith.addf %19, %25 : vector<10x128xf32>
    %c0_i32_30 = arith.constant 0 : i32
    %c0_i32_31 = arith.constant 0 : i32
    %c0_i32_32 = arith.constant 0 : i32
    %27 = tpu.memref_slice %arg1[%c0_i32_30, %c0_i32_31, %c0_i32_32] : memref<1x32x128xbf16, #tpu.memory_space<vmem>> -> memref<1x32x128xbf16, #tpu.memory_space<vmem>>
    %28 = tpu.memref_squeeze %27 : memref<1x32x128xbf16, #tpu.memory_space<vmem>> -> memref<32x128xbf16, #tpu.memory_space<vmem>>
    %c5 = arith.constant 5 : index
    %c0_33 = arith.constant 0 : index
    %29 = vector.load %28[%c5, %c0_33] : memref<32x128xbf16, #tpu.memory_space<vmem>>, vector<10x128xbf16>
    %c4 = arith.constant 4 : index
    %c0_34 = arith.constant 0 : index
    %c0_35 = arith.constant 0 : index
    %30 = vector.load %arg2[%c4, %c0_34, %c0_35] : memref<16x128x128xbf16, #tpu.memory_space<vmem>>, vector<1x128x128xbf16>
    %31 = vector.shape_cast %30 : vector<1x128x128xbf16> to vector<128x128xbf16>
    %cst_36 = arith.constant dense<0.000000e+00> : vector<10x128xf32>
    %32 = tpu.matmul %29, %31, %cst_36 {dimension_numbers = #tpu.dot_dimension_numbers<[1], [0], [0], [1], [0, 0, 1, 1], [], []>} : vector<10x128xbf16>, vector<128x128xbf16>, vector<10x128xf32> -> vector<10x128xf32>
    %33 = arith.addf %26, %32 : vector<10x128xf32>
    %c0_i32_37 = arith.constant 0 : i32
    %c0_i32_38 = arith.constant 0 : i32
    %c0_i32_39 = arith.constant 0 : i32
    %34 = tpu.memref_slice %arg1[%c0_i32_37, %c0_i32_38, %c0_i32_39] : memref<1x32x128xbf16, #tpu.memory_space<vmem>> -> memref<1x32x128xbf16, #tpu.memory_space<vmem>>
    %35 = tpu.memref_squeeze %34 : memref<1x32x128xbf16, #tpu.memory_space<vmem>> -> memref<32x128xbf16, #tpu.memory_space<vmem>>
    %c6 = arith.constant 6 : index
    %c0_40 = arith.constant 0 : index
    %36 = vector.load %35[%c6, %c0_40] : memref<32x128xbf16, #tpu.memory_space<vmem>>, vector<10x128xbf16>
    %c5_41 = arith.constant 5 : index
    %c0_42 = arith.constant 0 : index
    %c0_43 = arith.constant 0 : index
    %37 = vector.load %arg2[%c5_41, %c0_42, %c0_43] : memref<16x128x128xbf16, #tpu.memory_space<vmem>>, vector<1x128x128xbf16>
    %38 = vector.shape_cast %37 : vector<1x128x128xbf16> to vector<128x128xbf16>
    %cst_44 = arith.constant dense<0.000000e+00> : vector<10x128xf32>
    %39 = tpu.matmul %36, %38, %cst_44 {dimension_numbers = #tpu.dot_dimension_numbers<[1], [0], [0], [1], [0, 0, 1, 1], [], []>} : vector<10x128xbf16>, vector<128x128xbf16>, vector<10x128xf32> -> vector<10x128xf32>
    %40 = arith.addf %33, %39 : vector<10x128xf32>
    %c0_i32_45 = arith.constant 0 : i32
    %c0_i32_46 = arith.constant 0 : i32
    %c0_i32_47 = arith.constant 0 : i32
    %41 = tpu.memref_slice %arg1[%c0_i32_45, %c0_i32_46, %c0_i32_47] : memref<1x32x128xbf16, #tpu.memory_space<vmem>> -> memref<1x32x128xbf16, #tpu.memory_space<vmem>>
    %42 = tpu.memref_squeeze %41 : memref<1x32x128xbf16, #tpu.memory_space<vmem>> -> memref<32x128xbf16, #tpu.memory_space<vmem>>
    %c7 = arith.constant 7 : index
    %c0_48 = arith.constant 0 : index
    %43 = vector.load %42[%c7, %c0_48] : memref<32x128xbf16, #tpu.memory_space<vmem>>, vector<10x128xbf16>
    %c6_49 = arith.constant 6 : index
    %c0_50 = arith.constant 0 : index
    %c0_51 = arith.constant 0 : index
    %44 = vector.load %arg2[%c6_49, %c0_50, %c0_51] : memref<16x128x128xbf16, #tpu.memory_space<vmem>>, vector<1x128x128xbf16>
    %45 = vector.shape_cast %44 : vector<1x128x128xbf16> to vector<128x128xbf16>
    %cst_52 = arith.constant dense<0.000000e+00> : vector<10x128xf32>
    %46 = tpu.matmul %43, %45, %cst_52 {dimension_numbers = #tpu.dot_dimension_numbers<[1], [0], [0], [1], [0, 0, 1, 1], [], []>} : vector<10x128xbf16>, vector<128x128xbf16>, vector<10x128xf32> -> vector<10x128xf32>
    %47 = arith.addf %40, %46 : vector<10x128xf32>
    %c0_i32_53 = arith.constant 0 : i32
    %c0_i32_54 = arith.constant 0 : i32
    %c0_i32_55 = arith.constant 0 : i32
    %48 = tpu.memref_slice %arg1[%c0_i32_53, %c0_i32_54, %c0_i32_55] : memref<1x32x128xbf16, #tpu.memory_space<vmem>> -> memref<1x32x128xbf16, #tpu.memory_space<vmem>>
    %49 = tpu.memref_squeeze %48 : memref<1x32x128xbf16, #tpu.memory_space<vmem>> -> memref<32x128xbf16, #tpu.memory_space<vmem>>
    %c8 = arith.constant 8 : index
    %c0_56 = arith.constant 0 : index
    %50 = vector.load %49[%c8, %c0_56] : memref<32x128xbf16, #tpu.memory_space<vmem>>, vector<10x128xbf16>
    %c7_57 = arith.constant 7 : index
    %c0_58 = arith.constant 0 : index
    %c0_59 = arith.constant 0 : index
    %51 = vector.load %arg2[%c7_57, %c0_58, %c0_59] : memref<16x128x128xbf16, #tpu.memory_space<vmem>>, vector<1x128x128xbf16>
    %52 = vector.shape_cast %51 : vector<1x128x128xbf16> to vector<128x128xbf16>
    %cst_60 = arith.constant dense<0.000000e+00> : vector<10x128xf32>
    %53 = tpu.matmul %50, %52, %cst_60 {dimension_numbers = #tpu.dot_dimension_numbers<[1], [0], [0], [1], [0, 0, 1, 1], [], []>} : vector<10x128xbf16>, vector<128x128xbf16>, vector<10x128xf32> -> vector<10x128xf32>
    %54 = arith.addf %47, %53 : vector<10x128xf32>
    %c0_i32_61 = arith.constant 0 : i32
    %c0_i32_62 = arith.constant 0 : i32
    %c0_i32_63 = arith.constant 0 : i32
    %55 = tpu.memref_slice %arg1[%c0_i32_61, %c0_i32_62, %c0_i32_63] : memref<1x32x128xbf16, #tpu.memory_space<vmem>> -> memref<1x32x128xbf16, #tpu.memory_space<vmem>>
    %56 = tpu.memref_squeeze %55 : memref<1x32x128xbf16, #tpu.memory_space<vmem>> -> memref<32x128xbf16, #tpu.memory_space<vmem>>
    %c10 = arith.constant 10 : index
    %c0_64 = arith.constant 0 : index
    %57 = vector.load %56[%c10, %c0_64] : memref<32x128xbf16, #tpu.memory_space<vmem>>, vector<10x128xbf16>
    %c8_65 = arith.constant 8 : index
    %c0_66 = arith.constant 0 : index
    %c0_67 = arith.constant 0 : index
    %58 = vector.load %arg2[%c8_65, %c0_66, %c0_67] : memref<16x128x128xbf16, #tpu.memory_space<vmem>>, vector<1x128x128xbf16>
    %59 = vector.shape_cast %58 : vector<1x128x128xbf16> to vector<128x128xbf16>
    %cst_68 = arith.constant dense<0.000000e+00> : vector<10x128xf32>
    %60 = tpu.matmul %57, %59, %cst_68 {dimension_numbers = #tpu.dot_dimension_numbers<[1], [0], [0], [1], [0, 0, 1, 1], [], []>} : vector<10x128xbf16>, vector<128x128xbf16>, vector<10x128xf32> -> vector<10x128xf32>
    %61 = arith.addf %54, %60 : vector<10x128xf32>
    %c0_i32_69 = arith.constant 0 : i32
    %c0_i32_70 = arith.constant 0 : i32
    %c0_i32_71 = arith.constant 0 : i32
    %62 = tpu.memref_slice %arg1[%c0_i32_69, %c0_i32_70, %c0_i32_71] : memref<1x32x128xbf16, #tpu.memory_space<vmem>> -> memref<1x32x128xbf16, #tpu.memory_space<vmem>>
    %63 = tpu.memref_squeeze %62 : memref<1x32x128xbf16, #tpu.memory_space<vmem>> -> memref<32x128xbf16, #tpu.memory_space<vmem>>
    %c11 = arith.constant 11 : index
    %c0_72 = arith.constant 0 : index
    %64 = vector.load %63[%c11, %c0_72] : memref<32x128xbf16, #tpu.memory_space<vmem>>, vector<10x128xbf16>
    %c9 = arith.constant 9 : index
    %c0_73 = arith.constant 0 : index
    %c0_74 = arith.constant 0 : index
    %65 = vector.load %arg2[%c9, %c0_73, %c0_74] : memref<16x128x128xbf16, #tpu.memory_space<vmem>>, vector<1x128x128xbf16>
    %66 = vector.shape_cast %65 : vector<1x128x128xbf16> to vector<128x128xbf16>
    %cst_75 = arith.constant dense<0.000000e+00> : vector<10x128xf32>
    %67 = tpu.matmul %64, %66, %cst_75 {dimension_numbers = #tpu.dot_dimension_numbers<[1], [0], [0], [1], [0, 0, 1, 1], [], []>} : vector<10x128xbf16>, vector<128x128xbf16>, vector<10x128xf32> -> vector<10x128xf32>
    %68 = arith.addf %61, %67 : vector<10x128xf32>
    %c0_i32_76 = arith.constant 0 : i32
    %c0_i32_77 = arith.constant 0 : i32
    %c0_i32_78 = arith.constant 0 : i32
    %69 = tpu.memref_slice %arg1[%c0_i32_76, %c0_i32_77, %c0_i32_78] : memref<1x32x128xbf16, #tpu.memory_space<vmem>> -> memref<1x32x128xbf16, #tpu.memory_space<vmem>>
    %70 = tpu.memref_squeeze %69 : memref<1x32x128xbf16, #tpu.memory_space<vmem>> -> memref<32x128xbf16, #tpu.memory_space<vmem>>
    %c12 = arith.constant 12 : index
    %c0_79 = arith.constant 0 : index
    %71 = vector.load %70[%c12, %c0_79] : memref<32x128xbf16, #tpu.memory_space<vmem>>, vector<10x128xbf16>
    %c10_80 = arith.constant 10 : index
    %c0_81 = arith.constant 0 : index
    %c0_82 = arith.constant 0 : index
    %72 = vector.load %arg2[%c10_80, %c0_81, %c0_82] : memref<16x128x128xbf16, #tpu.memory_space<vmem>>, vector<1x128x128xbf16>
    %73 = vector.shape_cast %72 : vector<1x128x128xbf16> to vector<128x128xbf16>
    %cst_83 = arith.constant dense<0.000000e+00> : vector<10x128xf32>
    %74 = tpu.matmul %71, %73, %cst_83 {dimension_numbers = #tpu.dot_dimension_numbers<[1], [0], [0], [1], [0, 0, 1, 1], [], []>} : vector<10x128xbf16>, vector<128x128xbf16>, vector<10x128xf32> -> vector<10x128xf32>
    %75 = arith.addf %68, %74 : vector<10x128xf32>
    %c0_i32_84 = arith.constant 0 : i32
    %c0_i32_85 = arith.constant 0 : i32
    %c0_i32_86 = arith.constant 0 : i32
    %76 = tpu.memref_slice %arg1[%c0_i32_84, %c0_i32_85, %c0_i32_86] : memref<1x32x128xbf16, #tpu.memory_space<vmem>> -> memref<1x32x128xbf16, #tpu.memory_space<vmem>>
    %77 = tpu.memref_squeeze %76 : memref<1x32x128xbf16, #tpu.memory_space<vmem>> -> memref<32x128xbf16, #tpu.memory_space<vmem>>
    %c13 = arith.constant 13 : index
    %c0_87 = arith.constant 0 : index
    %78 = vector.load %77[%c13, %c0_87] : memref<32x128xbf16, #tpu.memory_space<vmem>>, vector<10x128xbf16>
    %c11_88 = arith.constant 11 : index
    %c0_89 = arith.constant 0 : index
    %c0_90 = arith.constant 0 : index
    %79 = vector.load %arg2[%c11_88, %c0_89, %c0_90] : memref<16x128x128xbf16, #tpu.memory_space<vmem>>, vector<1x128x128xbf16>
    %80 = vector.shape_cast %79 : vector<1x128x128xbf16> to vector<128x128xbf16>
    %cst_91 = arith.constant dense<0.000000e+00> : vector<10x128xf32>
    %81 = tpu.matmul %78, %80, %cst_91 {dimension_numbers = #tpu.dot_dimension_numbers<[1], [0], [0], [1], [0, 0, 1, 1], [], []>} : vector<10x128xbf16>, vector<128x128xbf16>, vector<10x128xf32> -> vector<10x128xf32>
    %82 = arith.addf %75, %81 : vector<10x128xf32>
    %c0_i32_92 = arith.constant 0 : i32
    %c0_i32_93 = arith.constant 0 : i32
    %c0_i32_94 = arith.constant 0 : i32
    %83 = tpu.memref_slice %arg1[%c0_i32_92, %c0_i32_93, %c0_i32_94] : memref<1x32x128xbf16, #tpu.memory_space<vmem>> -> memref<1x32x128xbf16, #tpu.memory_space<vmem>>
    %84 = tpu.memref_squeeze %83 : memref<1x32x128xbf16, #tpu.memory_space<vmem>> -> memref<32x128xbf16, #tpu.memory_space<vmem>>
    %c15 = arith.constant 15 : index
    %c0_95 = arith.constant 0 : index
    %85 = vector.load %84[%c15, %c0_95] : memref<32x128xbf16, #tpu.memory_space<vmem>>, vector<10x128xbf16>
    %c12_96 = arith.constant 12 : index
    %c0_97 = arith.constant 0 : index
    %c0_98 = arith.constant 0 : index
    %86 = vector.load %arg2[%c12_96, %c0_97, %c0_98] : memref<16x128x128xbf16, #tpu.memory_space<vmem>>, vector<1x128x128xbf16>
    %87 = vector.shape_cast %86 : vector<1x128x128xbf16> to vector<128x128xbf16>
    %cst_99 = arith.constant dense<0.000000e+00> : vector<10x128xf32>
    %88 = tpu.matmul %85, %87, %cst_99 {dimension_numbers = #tpu.dot_dimension_numbers<[1], [0], [0], [1], [0, 0, 1, 1], [], []>} : vector<10x128xbf16>, vector<128x128xbf16>, vector<10x128xf32> -> vector<10x128xf32>
    %89 = arith.addf %82, %88 : vector<10x128xf32>
    %c0_i32_100 = arith.constant 0 : i32
    %c0_i32_101 = arith.constant 0 : i32
    %c0_i32_102 = arith.constant 0 : i32
    %90 = tpu.memref_slice %arg1[%c0_i32_100, %c0_i32_101, %c0_i32_102] : memref<1x32x128xbf16, #tpu.memory_space<vmem>> -> memref<1x32x128xbf16, #tpu.memory_space<vmem>>
    %91 = tpu.memref_squeeze %90 : memref<1x32x128xbf16, #tpu.memory_space<vmem>> -> memref<32x128xbf16, #tpu.memory_space<vmem>>
    %c16 = arith.constant 16 : index
    %c0_103 = arith.constant 0 : index
    %92 = vector.load %91[%c16, %c0_103] : memref<32x128xbf16, #tpu.memory_space<vmem>>, vector<10x128xbf16>
    %c13_104 = arith.constant 13 : index
    %c0_105 = arith.constant 0 : index
    %c0_106 = arith.constant 0 : index
    %93 = vector.load %arg2[%c13_104, %c0_105, %c0_106] : memref<16x128x128xbf16, #tpu.memory_space<vmem>>, vector<1x128x128xbf16>
    %94 = vector.shape_cast %93 : vector<1x128x128xbf16> to vector<128x128xbf16>
    %cst_107 = arith.constant dense<0.000000e+00> : vector<10x128xf32>
    %95 = tpu.matmul %92, %94, %cst_107 {dimension_numbers = #tpu.dot_dimension_numbers<[1], [0], [0], [1], [0, 0, 1, 1], [], []>} : vector<10x128xbf16>, vector<128x128xbf16>, vector<10x128xf32> -> vector<10x128xf32>
    %96 = arith.addf %89, %95 : vector<10x128xf32>
    %c0_i32_108 = arith.constant 0 : i32
    %c0_i32_109 = arith.constant 0 : i32
    %c0_i32_110 = arith.constant 0 : i32
    %97 = tpu.memref_slice %arg1[%c0_i32_108, %c0_i32_109, %c0_i32_110] : memref<1x32x128xbf16, #tpu.memory_space<vmem>> -> memref<1x32x128xbf16, #tpu.memory_space<vmem>>
    %98 = tpu.memref_squeeze %97 : memref<1x32x128xbf16, #tpu.memory_space<vmem>> -> memref<32x128xbf16, #tpu.memory_space<vmem>>
    %c17 = arith.constant 17 : index
    %c0_111 = arith.constant 0 : index
    %99 = vector.load %98[%c17, %c0_111] : memref<32x128xbf16, #tpu.memory_space<vmem>>, vector<10x128xbf16>
    %c14 = arith.constant 14 : index
    %c0_112 = arith.constant 0 : index
    %c0_113 = arith.constant 0 : index
    %100 = vector.load %arg2[%c14, %c0_112, %c0_113] : memref<16x128x128xbf16, #tpu.memory_space<vmem>>, vector<1x128x128xbf16>
    %101 = vector.shape_cast %100 : vector<1x128x128xbf16> to vector<128x128xbf16>
    %cst_114 = arith.constant dense<0.000000e+00> : vector<10x128xf32>
    %102 = tpu.matmul %99, %101, %cst_114 {dimension_numbers = #tpu.dot_dimension_numbers<[1], [0], [0], [1], [0, 0, 1, 1], [], []>} : vector<10x128xbf16>, vector<128x128xbf16>, vector<10x128xf32> -> vector<10x128xf32>
    %103 = arith.addf %96, %102 : vector<10x128xf32>
    %c0_i32_115 = arith.constant 0 : i32
    %c0_i32_116 = arith.constant 0 : i32
    %c0_i32_117 = arith.constant 0 : i32
    %104 = tpu.memref_slice %arg1[%c0_i32_115, %c0_i32_116, %c0_i32_117] : memref<1x32x128xbf16, #tpu.memory_space<vmem>> -> memref<1x32x128xbf16, #tpu.memory_space<vmem>>
    %105 = tpu.memref_squeeze %104 : memref<1x32x128xbf16, #tpu.memory_space<vmem>> -> memref<32x128xbf16, #tpu.memory_space<vmem>>
    %c18 = arith.constant 18 : index
    %c0_118 = arith.constant 0 : index
    %106 = vector.load %105[%c18, %c0_118] : memref<32x128xbf16, #tpu.memory_space<vmem>>, vector<10x128xbf16>
    %c15_119 = arith.constant 15 : index
    %c0_120 = arith.constant 0 : index
    %c0_121 = arith.constant 0 : index
    %107 = vector.load %arg2[%c15_119, %c0_120, %c0_121] : memref<16x128x128xbf16, #tpu.memory_space<vmem>>, vector<1x128x128xbf16>
    %108 = vector.shape_cast %107 : vector<1x128x128xbf16> to vector<128x128xbf16>
    %cst_122 = arith.constant dense<0.000000e+00> : vector<10x128xf32>
    %109 = tpu.matmul %106, %108, %cst_122 {dimension_numbers = #tpu.dot_dimension_numbers<[1], [0], [0], [1], [0, 0, 1, 1], [], []>} : vector<10x128xbf16>, vector<128x128xbf16>, vector<10x128xf32> -> vector<10x128xf32>
    %110 = arith.addf %103, %109 : vector<10x128xf32>
    %c0_123 = arith.constant 0 : index
    %c0_124 = arith.constant 0 : index
    %111 = vector.load %arg4[%c0_123, %c0_124] : memref<10x1xf32, #tpu.memory_space<vmem>>, vector<10x1xf32>
    %c0_125 = arith.constant 0 : index
    %c0_126 = arith.constant 0 : index
    %112 = vector.load %arg3[%c0_125, %c0_126] : memref<1x128xf32, #tpu.memory_space<vmem>>, vector<1x128xf32>
    %113 = vector.broadcast %112 : vector<1x128xf32> to vector<10x128xf32>
    %114 = arith.addf %110, %113 : vector<10x128xf32>
    %115 = vector.broadcast %111 : vector<10x1xf32> to vector<10x128xf32>
    %116 = arith.mulf %114, %115 : vector<10x128xf32>
    %117 = arith.negf %116 : vector<10x128xf32>
    %118 = math.exp %117 : vector<10x128xf32>
    %cst_127 = arith.constant 1.000000e+00 : f32
    %119 = vector.broadcast %cst_127 : f32 to vector<10x128xf32>
    %120 = arith.addf %119, %118 : vector<10x128xf32>
    %121 = arith.divf %119, %120 : vector<10x128xf32>
    %122 = arith.truncf %121 : vector<10x128xf32> to vector<10x128xbf16>
    %c0_128 = arith.constant 0 : index
    %c0_129 = arith.constant 0 : index
    %c0_130 = arith.constant 0 : index
    %123 = vector.load %arg5[%c0_128, %c0_129, %c0_130] : memref<1x10x128xbf16, #tpu.memory_space<vmem>>, vector<1x10x128xbf16>
    %124 = vector.shape_cast %123 : vector<1x10x128xbf16> to vector<10x128xbf16>
    %125 = vector.shape_cast %122 : vector<10x128xbf16> to vector<1x10x128xbf16>
    tpu.vector_store %arg5[%c0_128, %c0_129, %c0_130], %125 {strides = array<i32>} : memref<1x10x128xbf16, #tpu.memory_space<vmem>>, vector<1x10x128xbf16>,
    return
  }
  func.func @transform_0(%arg0: i32) -> (i32, i32, i32) {
    %c0_i32 = arith.constant 0 : i32
    %c0_i32_0 = arith.constant 0 : i32
    %c0_i32_1 = arith.constant 0 : i32
    return %arg0, %c0_i32, %c0_i32_0 : i32, i32, i32
  }
  func.func @transform_1(%arg0: i32) -> (i32, i32, i32) {
    %c0_i32 = arith.constant 0 : i32
    %c0_i32_0 = arith.constant 0 : i32
    %c0_i32_1 = arith.constant 0 : i32
    %c0_i32_2 = arith.constant 0 : i32
    return %c0_i32, %c0_i32_0, %c0_i32_1 : i32, i32, i32
  }
  func.func @transform_2(%arg0: i32) -> (i32, i32) {
    %c0_i32 = arith.constant 0 : i32
    %c0_i32_0 = arith.constant 0 : i32
    %c0_i32_1 = arith.constant 0 : i32
    return %c0_i32, %c0_i32_0 : i32, i32
  }
  func.func @transform_3(%arg0: i32) -> (i32, i32) {
    %c0_i32 = arith.constant 0 : i32
    %c0_i32_0 = arith.constant 0 : i32
    %c0_i32_1 = arith.constant 0 : i32
    return %c0_i32, %c0_i32_0 : i32, i32
  }
  func.func @transform_4(%arg0: i32) -> (i32, i32, i32) {
    %c0_i32 = arith.constant 0 : i32
    %c0_i32_0 = arith.constant 0 : i32
    %c0_i32_1 = arith.constant 0 : i32
    return %arg0, %c0_i32, %c0_i32_0 : i32, i32, i32
  }
}

</mosaic_0001>

<bundles_post_ra>
// kernel: discriminator_forward.5
= control target key start
LH: loop header
LB: loop body
LE: loop exit
PB: predicated region body
PF: predicated region fallthrough
CT: control target
= control target key end

     0   :  { %s6657_s15 = smov 0   ;;  %s8771_s0 = inlined_call_operand.vmem [shape: bf16[2,296,512], index: 0, kind: input, shape index: {}]   ;;  %s8772_s1 = inlined_call_operand.vmem [shape: bf16[4,512,128], index: 1, kind: input, shape index: {}]   ;;  %s8773_s2 = inlined_call_operand.vmem [shape: f32[1,128], index: 2, kind: input, shape index: {}]   ;;  %s8774_s3 = inlined_call_operand.vmem [shape: f32[272,1], index: 3, kind: input, shape index: {}]   ;;  %s8775_s4 = inlined_call_operand.vmem [shape: bf16[2,272,128], index: 4, kind: output, shape index: {}]  }
   0x1 LB: > { %s5502_s16 = sadd.s32 4294967295, %s6629_s15   ;;  %p5506_p0 = scmp.ge.s32.totalorder %s6629_s15, 1  ;;  %s6629_s15 = sphi %s6657_s15, %s14_s15  }
   0x2   : > { %p162_p1 = scmp.lt.s32.totalorder %s6629_s15, 3 }
   0x4   : > { %p163_p2 = pnand %p5506_p0, %p162_p1 }
   0x6   : > { %166 = sbr.rel (%p163_p2) target bundleno = 843 (0x34b), region = 36 }
   0xd   : > { %v6162_v0 = vld [vmem:[%s8772_s1 + $0x100] sm:$0xff]   ;;  %v6631_v1 = vmov 0   ;;  %v6164_v3 = vld [vmem:[%s8772_s1 + $0x108] sm:$0xff]   ;;  %v6166_v5 = vld [vmem:[%s8772_s1 + $0x110] sm:$0xff]   ;;  %p188_p3 = scmp.lt.s32.totalorder %s5502_s16, 1  ;;  %vm4123_vm1 = vcmask 1046528  }
   0xe   : > { %1501 = vmatprep.subr.bf16.mxu0 %v6631_v1  ;;  %1670 = vmatprep.subr.bf16.mxu1 %v6631_v1  ;;  %v6163_v2 = vld [vmem:[%s8772_s1 + $0x180] sm:$0xff]   ;;  %v6165_v4 = vld [vmem:[%s8772_s1 + $0x188] sm:$0xff]   ;;  %v6167_v6 = vld [vmem:[%s8772_s1 + $0x190] sm:$0xff]   ;;  %vm680_vm0 = vsmask.f32 7424 }
   0xf   : > { %1502 = vmatpush1.bf16.msra.mxu0 %v6162_v0  ;;  %6160 = vset.pattern.permute.xlu0 %v6631_v1  ;;  %v6168_v7 = vld [vmem:[%s8772_s1 + $0x118] sm:$0xff]   ;;  %v6170_v9 = vld [vmem:[%s8772_s1 + $0x120] sm:$0xff]   ;;  %v6172_v11 = vld [vmem:[%s8772_s1 + $0x128] sm:$0xff]   ;;  %s8801_s16 = smov (!%p188_p3, %s5502_s16), 1 }
  0x10   : > { %1671 = vmatpush1.bf16.msra.mxu1 %v6163_v2  ;;  %1503 = vmatprep.subr.bf16.mxu0 %v6631_v1  ;;  %v6169_v8 = vld [vmem:[%s8772_s1 + $0x198] sm:$0xff]   ;;  %v6171_v10 = vld [vmem:[%s8772_s1 + $0x1a0] sm:$0xff]   ;;  %v6173_v12 = vld [vmem:[%s8772_s1 + $0x1a8] sm:$0xff]   ;;  %s6149_s23 = smul.u32 592, %s8801_s16 }
  0x11   : > { %1672 = vmatprep.subr.bf16.mxu1 %v6631_v1  ;;  %6161 = vset.pattern.permute.xlu1 %v6631_v1  ;;  %v6174_v13 = vld [vmem:[%s8772_s1 + $0x130] sm:$0xff]   ;;  %v6176_v15 = vld [vmem:[%s8772_s1 + $0x138] sm:$0xff]   ;;  %v6178_v17 = vld [vmem:[%s8772_s1 + $0x140] sm:$0xff]   ;;  %s6150_s22 = smul.u32 136, %s8801_s16 }
  0x12   : > { %v6175_v14 = vld [vmem:[%s8772_s1 + $0x1b0] sm:$0xff]   ;;  %v6177_v16 = vld [vmem:[%s8772_s1 + $0x1b8] sm:$0xff]   ;;  %s6744_s30 = scalar_lea.vmem %s8771_s0, %s6149_s23  ;;  %v6179_v18 = vld [vmem:[%s8772_s1 + $0x1c0] sm:$0xff]  }
  0x13   : > { %1504 = vmatpush1.bf16.msra.mxu0 %v6164_v3  ;;  %v6180_v19 = vld [vmem:[%s8772_s1 + $0x148] sm:$0xff]   ;;  %v6194_v21 = vld [vmem:[%s6744_s30 + $0x4] ss:$16 sps:$4 sm:$0xff]   ;;  %v6184_v40 = vld [vmem:[%s8772_s1 + $0x158] sm:$0xff]   ;;  %s8686_s25 = scalar_lea.vmem %s8775_s4, %s6150_s22 }
  0x14   : > { %1673 = vmatpush1.bf16.msra.mxu1 %v6165_v4  ;;  %1505 = vmatprep.subr.bf16.mxu0 %v6631_v1  ;;  %v6181_v20 = vld [vmem:[%s8772_s1 + $0x1c8] sm:$0xff]   ;;  %v6759_v22 = vld [vmem:[%s6744_s30 + $0x24] ss:$16 sps:$4 sm:$0xff]   ;;  %v694_v23 = vshrl.u32 %v6194_v21, 16  ;;  %v696_v24 = vshll.u32 %v6194_v21, 16  ;;  %v6185_v41 = vld [vmem:[%s8772_s1 + $0x1d8] sm:$0xff]  }
  0x15   : > { %1674 = vmatprep.subr.bf16.mxu1 %v6631_v1  ;;  %v701_v25 = vshll.u32 %v6759_v22, 16  ;;  %v6198_v26 = vld [vmem:[%s6744_s30 + $0xc] ss:$16 sps:$4 sm:$0xff]   ;;  %v6182_v32 = vld [vmem:[%s8772_s1 + $0x150] sm:$0xff]   ;;  %v6186_v43 = vld [vmem:[%s8772_s1 + $0x160] sm:$0xff]   ;;  %v737_v0 = vshrl.u32 %v6759_v22, 16 }
  0x16   : > { %v6766_v27 = vld [vmem:[%s6744_s30 + $0x2c] ss:$16 sps:$4 sm:$0xff]   ;;  %v698_v28 = vrot.slane %v696_v24, 1  ;;  %v718_v30 = vshrl.u32 %v6198_v26, 16  ;;  %v720_v31 = vshll.u32 %v6198_v26, 16  ;;  %v6183_v34 = vld [vmem:[%s8772_s1 + $0x1d0] sm:$0xff]  }
  0x17   : > { %1506 = vmatpush1.bf16.msra.mxu0 %v6166_v5  ;;  %v6768_v29 = vrot.slane %v701_v25, 1  ;;  %v725_v33 = vshll.u32 %v6766_v27, 16  ;;  %v6187_v44 = vld [vmem:[%s8772_s1 + $0x1e0] sm:$0xff]   ;;  %v6204_v46 = vld [vmem:[%s6744_s30 + $0x8] ss:$16 sps:$4 sm:$0xff]   ;;  %v6190_v55 = vld [vmem:[%s8772_s1 + $0x170] sm:$0xff]  }
  0x18   : > { %1675 = vmatpush1.bf16.msra.mxu1 %v6167_v6  ;;  %1507 = vmatprep.subr.bf16.mxu0 %v6631_v1  ;;  %v699_v35 = vor.u32 %v698_v28, %v694_v23  ;;  %v722_v36 = vrot.slane %v720_v31, 1  ;;  %v6202_v45 = vld [vmem:[%s6744_s30] ss:$16 sps:$4 sm:$0xff]   ;;  %v6188_v47 = vld [vmem:[%s8772_s1 + $0x168] sm:$0xff]   ;;  %v708_v52 = vshll.u32 %v6204_v46, 16  ;;  %v706_v60 = vshrl.u32 %v6204_v46, 16 }
  0x19   : > { %1676 = vmatprep.subr.bf16.mxu1 %v6631_v1  ;;  %v6779_v37 = vrot.slane %v725_v33, 1  ;;  %v6807_v48 = vld [vmem:[%s6744_s30 + $0x20] ss:$16 sps:$4 sm:$0xff]   ;;  %v684_v49 = vshll.u32 %v6202_v45, 16  ;;  %v6189_v50 = vld [vmem:[%s8772_s1 + $0x1e8] sm:$0xff]   ;;  %v682_v56 = vshrl.u32 %v6202_v45, 16 }
  0x1a   : > { %v704_v38 = vsel %vm680_vm0, %v699_v35, %v6768_v29  ;;  %v723_v39 = vor.u32 %v722_v36, %v718_v30  ;;  %v6814_v51 = vld [vmem:[%s6744_s30 + $0x28] ss:$16 sps:$4 sm:$0xff]   ;;  %v6818_v53 = vld [vmem:[%s6744_s30 + $0x44] ss:$16 sps:$4 sm:$0xff]   ;;  %v6821_v54 = vld [vmem:[%s6744_s30 + $0x4c] ss:$16 sps:$4 sm:$0xff]  }
  0x1b   : > { %1508 = vmatpush1.bf16.msra.mxu0 %v6168_v7  ;;  %1533 = vmatprep.mubr.bf16.mxu0 %v704_v38  ;;  %v686_v57 = vrot.slane %v684_v49, 1  ;;  %v689_v58 = vshll.u32 %v6807_v48, 16  ;;  %v6191_v59 = vld [vmem:[%s8772_s1 + $0x1f0] sm:$0xff]   ;;  %v710_v61 = vrot.slane %v708_v52, 1  ;;  %v713_v62 = vshll.u32 %v6814_v51, 16  ;;  %v6192_v63 = vld [vmem:[%s8772_s1 + $0x178] sm:$0xff]  }
  0x1c   : > { %1677 = vmatpush1.bf16.msra.mxu1 %v6169_v8  ;;  %1509 = vmatprep.subr.bf16.mxu0 %v6631_v1  ;;  %v728_v42 = vsel %vm680_vm0, %v723_v39, %v6779_v37  ;;  %v741_v2 = vshll.u32 %v6818_v53, 16  ;;  %v6193_v3 = vld [vmem:[%s8772_s1 + $0x1f8] sm:$0xff]   ;;  %v753_v4 = vshrl.u32 %v6766_v27, 16  ;;  %v757_v5 = vshll.u32 %v6821_v54, 16  ;;  %v6844_v6 = vld [vmem:[%s6744_s30 + $0x40] ss:$16 sps:$4 sm:$0xff]  }
  0x1d   : > { %1678 = vmatprep.subr.bf16.mxu1 %v6631_v1  ;;  %1702 = vmatprep.mubr.bf16.mxu1 %v728_v42  ;;  %v687_v7 = vor.u32 %v686_v57, %v682_v56  ;;  %v691_v8 = vrot.slane %v689_v58, 1  ;;  %v745_v21 = vshrl.u32 %v6814_v51, 16  ;;  %v733_v23 = vshll.u32 %v6844_v6, 16  ;;  %v6875_v28 = vld [vmem:[%s6744_s30 + $0x60] ss:$16 sps:$4 sm:$0xff]   ;;  %v6215_v39 = vld [vmem:[%s8772_s1 + $0x88] sm:$0xff]  }
  0x1e   : > { %v769_v26 = vshrl.u32 %v6818_v53, 16  ;;  %v785_v30 = vshrl.u32 %v6821_v54, 16  ;;  %v6886_v38 = vld [vmem:[%s6744_s30 + $0x68] ss:$16 sps:$4 sm:$0xff]   ;;  %v6892_v42 = vld [vmem:[%s6744_s30 + $0x84] ss:$16 sps:$4 sm:$0xff]  }
  0x1f   : > { %1510 = vmatpush1.bf16.msra.mxu0 %v6170_v9  ;;  %v6847_v9 = vld [vmem:[%s6744_s30 + $0x48] ss:$16 sps:$4 sm:$0xff]   ;;  %v692_v22 = vsel %vm680_vm0, %v687_v7, %v691_v8  ;;  %v765_v45 = vshll.u32 %v6875_v28, 16  ;;  %v6897_v46 = vld [vmem:[%s6744_s30 + $0x8c] ss:$16 sps:$4 sm:$0xff]   ;;  %v6222_v53 = vld [vmem:[%s8772_s1 + $0x10] sm:$0xff]  }
  0x20   : > { %1679 = vmatpush1.bf16.msra.mxu1 %v6171_v10  ;;  %1511 = vmatprep.subr.bf16.mxu0 %v6631_v1  ;;  %v711_v10 = vor.u32 %v710_v61, %v706_v60  ;;  %v749_v24 = vshll.u32 %v6847_v9, 16  ;;  %v777_v52 = vshrl.u32 %v6847_v9, 16  ;;  %v6223_v58 = vld [vmem:[%s8772_s1 + $0x90] sm:$0xff]   ;;  %v821_v60 = vshll.u32 %v6897_v46, 16 }
  0x21   : > { %1680 = vmatprep.subr.bf16.mxu1 %v6631_v1  ;;  %v767_v57 = vrot.slane %v765_v45, 1  ;;  %v6920_v61 = vld [vmem:[%s6744_s30 + $0x80] ss:$16 sps:$4 sm:$0xff]   ;;  %v6932_v7 = vld [vmem:[%s6744_s30 + $0xa4] ss:$16 sps:$4 sm:$0xff]  }
  0x22   : > { %v751_v36 = vrot.slane %v749_v24, 1  ;;  %v823_v9 = vrot.slane %v821_v60, 1 }
  0x23   : > { %1512 = vmatpush1.bf16.msra.mxu0 %v6172_v11  ;;  %v715_v11 = vrot.slane %v713_v62, 1 }
  0x24   : > { %1681 = vmatpush1.bf16.msra.mxu1 %v6173_v12  ;;  %1513 = vmatprep.subr.bf16.mxu0 %v6631_v1  ;;  %v6851_v12 = vld [vmem:[%s6744_s30 + $0x64] ss:$16 sps:$4 sm:$0xff]  }
  0x25   : > { %1682 = vmatprep.subr.bf16.mxu1 %v6631_v1  ;;  %v716_v25 = vsel %vm680_vm0, %v711_v10, %v715_v11  ;;  %v773_v27 = vshll.u32 %v6851_v12, 16  ;;  %v747_v35 = vor.u32 %v745_v21, %v715_v11  ;;  %v801_v54 = vshrl.u32 %v6851_v12, 16  ;;  %v6936_v10 = vld [vmem:[%s6744_s30 + $0xac] ss:$16 sps:$4 sm:$0xff]   ;;  %v6950_v21 = vld [vmem:[%s6744_s30 + $0xa0] ss:$16 sps:$4 sm:$0xff]  }
  0x26   : > { %v793_v12 = vshrl.u32 %v6875_v28, 16  ;;  %v853_v24 = vshll.u32 %v6936_v10, 16 }
  0x27   : > { %1514 = vmatpush1.bf16.msra.mxu0 %v6174_v13  ;;  %v739_v13 = vor.u32 %v737_v0, %v6768_v29  ;;  %v752_v49 = vsel %vm680_vm0, %v747_v35, %v751_v36 }
  0x28   : > { %1683 = vmatpush1.bf16.msra.mxu1 %v6175_v14  ;;  %1515 = vmatprep.subr.bf16.mxu0 %v6631_v1  ;;  %v743_v14 = vrot.slane %v741_v2, 1  ;;  %v6230_v2 = vld [vmem:[%s8772_s1 + $0x18] sm:$0xff]  }
  0x29   : > { %1684 = vmatprep.subr.bf16.mxu1 %v6631_v1 }
  0x2a   : > { %v744_v29 = vsel %vm680_vm0, %v739_v13, %v743_v14  ;;  %v797_v13 = vshll.u32 %v6920_v61, 16 }
  0x2b   : > { %1516 = vmatpush1.bf16.msra.mxu0 %v6176_v15  ;;  %v6856_v15 = vld [vmem:[%s6744_s30 + $0x6c] ss:$16 sps:$4 sm:$0xff]  }
  0x2c   : > { %1685 = vmatpush1.bf16.msra.mxu1 %v6177_v16  ;;  %1517 = vmatprep.subr.bf16.mxu0 %v6631_v1  ;;  %v6206_v16 = vld [vmem:[%s8772_s1] sm:$0xff]   ;;  %v789_v31 = vshll.u32 %v6856_v15, 16  ;;  %v799_v28 = vrot.slane %v797_v13, 1 }
  0x2d   : > { %1686 = vmatprep.subr.bf16.mxu1 %v6631_v1 }
  0x2f   : > { %1518 = vmatpush1.bf16.msra.mxu0 %v6178_v17  ;;  %v6207_v17 = vld [vmem:[%s8772_s1 + $0x80] sm:$0xff]  }
  0x30   : > { %1687 = vmatpush1.bf16.msra.mxu1 %v6179_v18  ;;  %1519 = vmatprep.subr.bf16.mxu0 %v6631_v1  ;;  %v755_v18 = vor.u32 %v753_v4, %v6779_v37  ;;  %v6214_v37 = vld [vmem:[%s8772_s1 + $0x8] sm:$0xff]   ;;  %v779_v4 = vor.u32 %v777_v52, %v751_v36  ;;  %v855_v36 = vrot.slane %v853_v24, 1  ;;  %v6255_v52 = vld [vmem:[%s8772_s1 + $0xb0] sm:$0xff]  }
  0x31   : > { %1688 = vmatprep.subr.bf16.mxu1 %v6631_v1  ;;  %v7045_v24 = vld [vmem:[%s6744_s30 + $0x104] ss:$16 sps:$4 sm:$0xff]  }
  0x33   : > { %1520 = vmatpush1.bf16.msra.mxu0 %v6180_v19  ;;  %v759_v19 = vrot.slane %v757_v5, 1 }
  0x34   : > { %1689 = vmatpush1.bf16.msra.mxu1 %v6181_v20  ;;  %1521 = vmatprep.subr.bf16.mxu0 %v6631_v1  ;;  %v729_v20 = vshrl.u32 %v6807_v48, 16 }
  0x35   : > { %1690 = vmatprep.subr.bf16.mxu1 %v6631_v1 }
  0x36   : > { %v731_v33 = vor.u32 %v729_v20, %v691_v8  ;;  %v837_v20 = vshll.u32 %v6932_v7, 16 }
  0x37   : > { %1522 = vmatpush1.bf16.msra.mxu0 %v6182_v32  ;;  %v760_v32 = vsel %vm680_vm0, %v755_v18, %v759_v19 }
  0x38   : > { %1691 = vmatpush1.bf16.msra.mxu1 %v6183_v34  ;;  %1523 = vmatprep.subr.bf16.mxu0 %v6631_v1  ;;  %v735_v34 = vrot.slane %v733_v23, 1 }
  0x39   : > { %1692 = vmatprep.subr.bf16.mxu1 %v6631_v1 }
  0x3a   : > { %v736_v48 = vsel %vm680_vm0, %v731_v33, %v735_v34  ;;  %v6966_v33 = vld [vmem:[%s6744_s30 + $0xc4] ss:$16 sps:$4 sm:$0xff]  }
  0x3b   : > { %1524 = vmatpush1.bf16.msra.mxu0 %v6184_v40  ;;  %v771_v40 = vor.u32 %v769_v26, %v743_v14  ;;  %v809_v14 = vshrl.u32 %v6886_v38, 16  ;;  %v6239_v26 = vld [vmem:[%s8772_s1 + $0xa0] sm:$0xff]  }
  0x3c   : > { %1693 = vmatpush1.bf16.msra.mxu1 %v6185_v41  ;;  %1525 = vmatprep.subr.bf16.mxu0 %v6631_v1  ;;  %v775_v41 = vrot.slane %v773_v27, 1  ;;  %v795_v27 = vor.u32 %v793_v12, %v767_v57  ;;  %v897_v12 = vshrl.u32 %v6966_v33, 16 }
  0x3d   : > { %1694 = vmatprep.subr.bf16.mxu1 %v6631_v1 }
  0x3e   : > { %v776_v51 = vsel %vm680_vm0, %v771_v40, %v775_v41  ;;  %v803_v5 = vor.u32 %v801_v54, %v775_v41  ;;  %v800_v41 = vsel %vm680_vm0, %v795_v27, %v799_v28 }
  0x3f   : > { %1526 = vmatpush1.bf16.msra.mxu0 %v6186_v43  ;;  %v787_v43 = vor.u32 %v785_v30, %v759_v19 }
  0x40   : > { %1695 = vmatpush1.bf16.msra.mxu1 %v6187_v44  ;;  %1527 = vmatprep.subr.bf16.mxu0 %v6631_v1  ;;  %v791_v44 = vrot.slane %v789_v31, 1 }
  0x41   : > { %1696 = vmatprep.subr.bf16.mxu1 %v6631_v1 }
  0x42   : > { %v792_v56 = vsel %vm680_vm0, %v787_v43, %v791_v44 }
  0x43   : > { %1528 = vmatpush1.bf16.msra.mxu0 %v6188_v47  ;;  %v761_v47 = vshrl.u32 %v6844_v6, 16 }
  0x44   : > { %1697 = vmatpush1.bf16.msra.mxu1 %v6189_v50  ;;  %1529 = vmatprep.subr.bf16.mxu0 %v6631_v1  ;;  %v781_v50 = vshll.u32 %v6886_v38, 16  ;;  %v6247_v38 = vld [vmem:[%s8772_s1 + $0xa8] sm:$0xff]  }
  0x45   : > { %1698 = vmatprep.subr.bf16.mxu1 %v6631_v1  ;;  %v763_v62 = vor.u32 %v761_v47, %v735_v34  ;;  %v6246_v34 = vld [vmem:[%s8772_s1 + $0x28] sm:$0xff]   ;;  %v869_v47 = vshll.u32 %v6966_v33, 16 }
  0x46   : > { %v783_v0 = vrot.slane %v781_v50, 1  ;;  %v881_v50 = vshrl.u32 %v6936_v10, 16  ;;  %v7026_v10 = vld [vmem:[%s6744_s30 + $0xe0] ss:$16 sps:$4 sm:$0xff]   ;;  %v6279_v33 = vld [vmem:[%s8772_s1 + $0xc8] sm:$0xff]  }
  0x47   : > { %1530 = vmatpush1.bf16.msra.mxu0 %v6190_v55  ;;  %v805_v55 = vshll.u32 %v6892_v42, 16  ;;  %v768_v11 = vsel %vm680_vm0, %v763_v62, %v767_v57  ;;  %v7009_v62 = vld [vmem:[%s6744_s30 + $0xec] ss:$16 sps:$4 sm:$0xff]  }
  0x48   : > { %1699 = vmatpush1.bf16.msra.mxu1 %v6191_v59  ;;  %1531 = vmatprep.subr.bf16.mxu0 %v6631_v1  ;;  %v817_v59 = vshrl.u32 %v6856_v15, 16  ;;  %v784_v18 = vsel %vm680_vm0, %v779_v4, %v783_v0  ;;  %v857_v4 = vshrl.u32 %v6950_v21, 16 }
  0x49   : > { %1700 = vmatprep.subr.bf16.mxu1 %v6631_v1  ;;  %v807_v6 = vrot.slane %v805_v55, 1  ;;  %v6999_v55 = vld [vmem:[%s6744_s30 + $0xc0] ss:$16 sps:$4 sm:$0xff]  }
  0x4a   : > { %v819_v8 = vor.u32 %v817_v59, %v791_v44  ;;  %v7006_v59 = vld [vmem:[%s6744_s30 + $0xe4] ss:$16 sps:$4 sm:$0xff]  }
  0x4b   : > { %1532 = vmatpush1.bf16.msra.mxu0 %v6192_v63  ;;  %v6923_v63 = vld [vmem:[%s6744_s30 + $0x88] ss:$16 sps:$4 sm:$0xff]   ;;  %v808_v19 = vsel %vm680_vm0, %v803_v5, %v807_v6  ;;  %v861_v5 = vshll.u32 %v6999_v55, 16  ;;  %v901_v13 = vshll.u32 %v7006_v59, 16 }
  0x4c   : > { %1701 = vmatpush1.bf16.msra.mxu1 %v6193_v3  ;;  %2099 = vmatprep.subr.bf16.mxu0 %v6631_v1  ;;  %v6231_v3 = vld [vmem:[%s8772_s1 + $0x98] sm:$0xff]   ;;  %v813_v15 = vshll.u32 %v6923_v63, 16  ;;  %v824_v23 = vsel %vm680_vm0, %v819_v8, %v823_v9  ;;  %v841_v43 = vshrl.u32 %v6923_v63, 16 }
  0x4d   : > { %2268 = vmatprep.subr.bf16.mxu1 %v6631_v1  ;;  %v6262_v63 = vld [vmem:[%s8772_s1 + $0x38] sm:$0xff]   ;;  %v903_v27 = vrot.slane %v901_v13, 1 }
  0x4e   : > { %1534 = vmatmul.mubr.bf16.vlgmr.msra.gmra.mrb[0].mxu0 %v692_v22  ;;  %v6238_v22 = vld [vmem:[%s8772_s1 + $0x20] sm:$0xff]   ;;  %v815_v30 = vrot.slane %v813_v15, 1  ;;  %v7033_v15 = vld [vmem:[%s6744_s30 + $0xe8] ss:$16 sps:$4 sm:$0xff]  }
  0x4f   : > { %1703 = vmatmul.mubr.bf16.vlgmr.msra.gmra.mrb[0].mxu1 %v716_v25  ;;  %2100 = vmatpush1.bf16.msra.mxu0 %v6206_v16  ;;  %v833_v16 = vshrl.u32 %v6892_v42, 16  ;;  %v6958_v25 = vld [vmem:[%s6744_s30 + $0xa8] ss:$16 sps:$4 sm:$0xff]   ;;  %v825_v42 = vshrl.u32 %v6920_v61, 16  ;;  %v871_v61 = vrot.slane %v869_v47, 1 }
  0x50   : > { %2269 = vmatpush1.bf16.msra.mxu1 %v6207_v17  ;;  %1541 = vmatprep.mubr.bf16.mxu0 %v744_v29  ;;  %v849_v17 = vshrl.u32 %v6897_v46, 16  ;;  %v811_v29 = vor.u32 %v809_v14, %v783_v0  ;;  %v845_v40 = vshll.u32 %v6958_v25, 16  ;;  %v865_v46 = vshrl.u32 %v6932_v7, 16 }
  0x51   : > { %1710 = vmatprep.mubr.bf16.mxu1 %v760_v32  ;;  %2101 = vmatprep.subr.bf16.mxu0 %v6631_v1  ;;  %v835_v31 = vor.u32 %v833_v16, %v807_v6  ;;  %v839_v32 = vrot.slane %v837_v20, 1  ;;  %v827_v57 = vor.u32 %v825_v42, %v799_v28  ;;  %v883_v0 = vor.u32 %v881_v50, %v855_v36  ;;  %v6270_v16 = vld [vmem:[%s8772_s1 + $0x40] sm:$0xff]  }
  0x52   : > { %2270 = vmatprep.subr.bf16.mxu1 %v6631_v1  ;;  %v851_v35 = vor.u32 %v849_v17, %v823_v9  ;;  %v816_v44 = vsel %vm680_vm0, %v811_v29, %v815_v30  ;;  %v847_v54 = vrot.slane %v845_v40, 1  ;;  %v873_v6 = vshrl.u32 %v6958_v25, 16  ;;  %v6278_v29 = vld [vmem:[%s8772_s1 + $0x48] sm:$0xff]   ;;  %v7085_v50 = vld [vmem:[%s6744_s30 + $0x124] ss:$16 sps:$4 sm:$0xff]  }
  0x53   : > { %2102 = vmatpush1.bf16.msra.mxu0 %v6214_v37  ;;  %v6972_v37 = vld [vmem:[%s6744_s30 + $0xcc] ss:$16 sps:$4 sm:$0xff]   ;;  %v840_v45 = vsel %vm680_vm0, %v835_v31, %v839_v32  ;;  %v867_v60 = vor.u32 %v865_v46, %v839_v32  ;;  %v893_v25 = vshll.u32 %v7026_v10, 16  ;;  %v909_v28 = vshll.u32 %v7033_v15, 16 }
  0x54   : > { %2271 = vmatpush1.bf16.msra.mxu1 %v6215_v39  ;;  %2103 = vmatprep.subr.bf16.mxu0 %v6631_v1  ;;  %v829_v39 = vshll.u32 %v6950_v21, 16  ;;  %v913_v14 = vshrl.u32 %v6972_v37, 16  ;;  %v863_v21 = vrot.slane %v861_v5, 1  ;;  %v7054_v32 = vld [vmem:[%s6744_s30 + $0x10c] ss:$16 sps:$4 sm:$0xff]   ;;  %v933_v42 = vshll.u32 %v7045_v24, 16 }
  0x55   : > { %2272 = vmatprep.subr.bf16.mxu1 %v6631_v1  ;;  %v949_v47 = vshll.u32 %v7054_v32, 16 }
  0x56   : > { %1542 = vmatmul.mubr.bf16.gmra.mrb[4].mxu0 %v736_v48  ;;  %v6254_v48 = vld [vmem:[%s8772_s1 + $0x30] sm:$0xff]  }
  0x57   : > { %1711 = vmatmul.mubr.bf16.gmra.mrb[4].mxu1 %v752_v49  ;;  %1549 = vmatprep.mubr.bf16.mxu0 %v776_v51  ;;  %v856_v49 = vsel %vm680_vm0, %v851_v35, %v855_v36  ;;  %v885_v51 = vshll.u32 %v6972_v37, 16  ;;  %v889_v36 = vshrl.u32 %v6999_v55, 16  ;;  %v895_v37 = vrot.slane %v893_v25, 1 }
  0x58   : > { %1718 = vmatprep.mubr.bf16.mxu1 %v792_v56  ;;  %2104 = vmatpush1.bf16.msra.mxu0 %v6222_v53  ;;  %v831_v53 = vrot.slane %v829_v39, 1  ;;  %v7002_v56 = vld [vmem:[%s6744_s30 + $0xc8] ss:$16 sps:$4 sm:$0xff]   ;;  %v929_v39 = vshrl.u32 %v7006_v59, 16 }
  0x59   : > { %2273 = vmatpush1.bf16.msra.mxu1 %v6223_v58  ;;  %2105 = vmatprep.subr.bf16.mxu0 %v6631_v1  ;;  %v843_v58 = vor.u32 %v841_v43, %v815_v30  ;;  %v877_v7 = vshll.u32 %v7002_v56, 16  ;;  %v945_v43 = vshrl.u32 %v7009_v62, 16  ;;  %v6298_v59 = vld [vmem:[%s8772_s1 + $0x58] sm:$0xff]  }
  0x5a   : > { %2274 = vmatprep.subr.bf16.mxu1 %v6631_v1  ;;  %v832_v8 = vsel %vm680_vm0, %v827_v57, %v831_v53  ;;  %v859_v20 = vor.u32 %v857_v4, %v831_v53  ;;  %v7092_v53 = vld [vmem:[%s6744_s30 + $0x120] ss:$16 sps:$4 sm:$0xff]   ;;  %v931_v55 = vor.u32 %v929_v39, %v903_v27  ;;  %v921_v57 = vshrl.u32 %v7026_v10, 16 }
  0x5b   : > { %v848_v9 = vsel %vm680_vm0, %v843_v58, %v847_v54  ;;  %v7096_v58 = vld [vmem:[%s6744_s30 + $0x128] ss:$16 sps:$4 sm:$0xff]   ;;  %v965_v4 = vshll.u32 %v7085_v50, 16 }
  0x5c   : > { %2106 = vmatpush1.bf16.msra.mxu0 %v6230_v2  ;;  %v887_v2 = vrot.slane %v885_v51, 1  ;;  %v891_v51 = vor.u32 %v889_v36, %v863_v21 }
  0x5d   : > { %2275 = vmatpush1.bf16.msra.mxu1 %v6231_v3  ;;  %2107 = vmatprep.subr.bf16.mxu0 %v6631_v1  ;;  %v6263_v3 = vld [vmem:[%s8772_s1 + $0xb8] sm:$0xff]  }
  0x5e   : > { %1550 = vmatmul.mubr.bf16.gmra.mrb[8].mxu0 %v768_v11  ;;  %2276 = vmatprep.subr.bf16.mxu1 %v6631_v1  ;;  %v872_v11 = vsel %vm680_vm0, %v867_v60, %v871_v61  ;;  %v888_v17 = vsel %vm680_vm0, %v883_v0, %v887_v2  ;;  %v915_v30 = vor.u32 %v913_v14, %v887_v2  ;;  %v6299_v0 = vld [vmem:[%s8772_s1 + $0xd8] sm:$0xff]  }
  0x5f   : > { %1719 = vmatmul.mubr.bf16.gmra.mrb[8].mxu1 %v784_v18  ;;  %1557 = vmatprep.mubr.bf16.mxu0 %v808_v19  ;;  %v917_v18 = vshll.u32 %v7009_v62, 16  ;;  %v6271_v19 = vld [vmem:[%s8772_s1 + $0xc0] sm:$0xff]   ;;  %v896_v5 = vsel %vm680_vm0, %v891_v51, %v895_v37 }
  0x60   : > { %1726 = vmatprep.mubr.bf16.mxu1 %v824_v23  ;;  %2108 = vmatpush1.bf16.msra.mxu0 %v6238_v22  ;;  %v875_v22 = vor.u32 %v873_v6, %v847_v54  ;;  %v879_v23 = vrot.slane %v877_v7, 1  ;;  %v957_v7 = vshll.u32 %v7092_v53, 16 }
  0x61   : > { %2277 = vmatpush1.bf16.msra.mxu1 %v6239_v26  ;;  %2109 = vmatprep.subr.bf16.mxu0 %v6631_v1  ;;  %v899_v26 = vor.u32 %v897_v12, %v871_v61  ;;  %v919_v31 = vrot.slane %v917_v18, 1  ;;  %v951_v61 = vrot.slane %v949_v47, 1  ;;  %v6306_v12 = vld [vmem:[%s8772_s1 + $0x60] sm:$0xff]   ;;  %v923_v18 = vor.u32 %v921_v57, %v895_v37  ;;  %v7156_v37 = vld [vmem:[%s6744_s30 + $0x16c] ss:$16 sps:$4 sm:$0xff]  }
  0x62   : > { %2278 = vmatprep.subr.bf16.mxu1 %v6631_v1  ;;  %v880_v35 = vsel %vm680_vm0, %v875_v22, %v879_v23  ;;  %v7136_v22 = vld [vmem:[%s6744_s30 + $0x148] ss:$16 sps:$4 sm:$0xff]   ;;  %v1001_v47 = vshrl.u32 %v7096_v58, 16  ;;  %v1045_v51 = vshll.u32 %v7156_v37, 16 }
  0x63   : > { %v904_v40 = vsel %vm680_vm0, %v899_v26, %v903_v27  ;;  %v920_v46 = vsel %vm680_vm0, %v915_v30, %v919_v31  ;;  %v947_v60 = vor.u32 %v945_v43, %v919_v31  ;;  %v7147_v31 = vld [vmem:[%s6744_s30 + $0x164] ss:$16 sps:$4 sm:$0xff]  }
  0x64   : > { %2110 = vmatpush1.bf16.msra.mxu0 %v6246_v34  ;;  %v864_v34 = vsel %vm680_vm0, %v859_v20, %v863_v21  ;;  %v7133_v21 = vld [vmem:[%s6744_s30 + $0x140] ss:$16 sps:$4 sm:$0xff]  }
  0x65   : > { %2279 = vmatpush1.bf16.msra.mxu1 %v6247_v38  ;;  %2111 = vmatprep.subr.bf16.mxu0 %v6631_v1  ;;  %v905_v38 = vshrl.u32 %v7002_v56, 16  ;;  %v935_v56 = vrot.slane %v933_v42, 1  ;;  %v952_v13 = vsel %vm680_vm0, %v947_v60, %v951_v61  ;;  %v989_v39 = vshll.u32 %v7133_v21, 16  ;;  %v7190_v60 = vld [vmem:[%s6744_s30 + $0x184] ss:$16 sps:$4 sm:$0xff]  }
  0x66   : > { %1558 = vmatmul.mubr.bf16.gmra.mrb[12].mxu0 %v800_v41  ;;  %2280 = vmatprep.subr.bf16.mxu1 %v6631_v1  ;;  %v911_v41 = vrot.slane %v909_v28, 1 }
  0x67   : > { %1727 = vmatmul.mubr.bf16.gmra.mrb[12].mxu1 %v816_v44  ;;  %1565 = vmatprep.mubr.bf16.mxu0 %v840_v45  ;;  %v7070_v44 = vld [vmem:[%s6744_s30 + $0x100] ss:$16 sps:$4 sm:$0xff]   ;;  %v907_v54 = vor.u32 %v905_v38, %v879_v23  ;;  %v936_v10 = vsel %vm680_vm0, %v931_v55, %v935_v56  ;;  %v967_v23 = vrot.slane %v965_v4, 1  ;;  %v6317_v38 = vld [vmem:[%s8772_s1 + $0xe8] sm:$0xff]  }
  0x68   : > { %1734 = vmatprep.mubr.bf16.mxu1 %v856_v49  ;;  %2112 = vmatpush1.bf16.msra.mxu0 %v6254_v48  ;;  %v6286_v45 = vld [vmem:[%s8772_s1 + $0x50] sm:$0xff]   ;;  %v7078_v48 = vld [vmem:[%s6744_s30 + $0x108] ss:$16 sps:$4 sm:$0xff]   ;;  %v925_v62 = vshll.u32 %v7070_v44, 16 }
  0x69   : > { %2281 = vmatpush1.bf16.msra.mxu1 %v6255_v52  ;;  %2113 = vmatprep.subr.bf16.mxu0 %v6631_v1  ;;  %v6287_v49 = vld [vmem:[%s8772_s1 + $0xd0] sm:$0xff]   ;;  %v7089_v52 = vld [vmem:[%s6744_s30 + $0x12c] ss:$16 sps:$4 sm:$0xff]   ;;  %v941_v2 = vshll.u32 %v7078_v48, 16  ;;  %v969_v25 = vshrl.u32 %v7078_v48, 16  ;;  %v1029_v48 = vshll.u32 %v7147_v31, 16 }
  0x6a   : > { %2282 = vmatprep.subr.bf16.mxu1 %v6631_v1  ;;  %v981_v6 = vshll.u32 %v7089_v52, 16  ;;  %v927_v14 = vrot.slane %v925_v62, 1 }
  0x6b   : > { %v943_v20 = vrot.slane %v941_v2, 1  ;;  %v6324_v2 = vld [vmem:[%s8772_s1 + $0x70] sm:$0xff]  }
  0x6c   : > { %2114 = vmatpush1.bf16.msra.mxu0 %v6262_v63  ;;  %v937_v63 = vshrl.u32 %v7033_v15, 16  ;;  %v977_v15 = vshrl.u32 %v7054_v32, 16  ;;  %v983_v28 = vrot.slane %v981_v6, 1  ;;  %v6316_v32 = vld [vmem:[%s8772_s1 + $0x68] sm:$0xff]   ;;  %v928_v42 = vsel %vm680_vm0, %v923_v18, %v927_v14 }
  0x6d   : > { %2283 = vmatpush1.bf16.msra.mxu1 %v6263_v3  ;;  %2115 = vmatprep.subr.bf16.mxu0 %v6631_v1  ;;  %v961_v3 = vshrl.u32 %v7045_v24, 16  ;;  %v953_v24 = vshrl.u32 %v7070_v44, 16  ;;  %v985_v44 = vshrl.u32 %v7092_v53, 16  ;;  %v7180_v53 = vrot.slane %v989_v39, 1 }
  0x6e   : > { %1566 = vmatmul.mubr.bf16.gmra.mrb[16].mxu0 %v832_v8  ;;  %2284 = vmatprep.subr.bf16.mxu1 %v6631_v1  ;;  %v7115_v8 = vld [vmem:[%s6744_s30 + $0x144] ss:$16 sps:$4 sm:$0xff]  }
  0x6f   : > { %1735 = vmatmul.mubr.bf16.gmra.mrb[16].mxu1 %v848_v9  ;;  %1573 = vmatprep.mubr.bf16.mxu0 %v872_v11  ;;  %v912_v9 = vsel %vm680_vm0, %v907_v54, %v911_v41  ;;  %v973_v11 = vshll.u32 %v7096_v58, 16  ;;  %v997_v26 = vshll.u32 %v7115_v8, 16  ;;  %v963_v27 = vor.u32 %v961_v3, %v935_v56  ;;  %v6325_v3 = vld [vmem:[%s8772_s1 + $0xf0] sm:$0xff]  }
  0x70   : > { %1742 = vmatprep.mubr.bf16.mxu1 %v888_v17  ;;  %2116 = vmatpush1.bf16.msra.mxu0 %v6270_v16  ;;  %v7126_v16 = vld [vmem:[%s6744_s30 + $0x14c] ss:$16 sps:$4 sm:$0xff]   ;;  %v6307_v17 = vld [vmem:[%s8772_s1 + $0xe0] sm:$0xff]   ;;  %v1025_v55 = vshrl.u32 %v7115_v8, 16  ;;  %v955_v57 = vor.u32 %v953_v24, %v927_v14  ;;  %v1057_v8 = vshrl.u32 %v7147_v31, 16 }
  0x71   : > { %2285 = vmatpush1.bf16.msra.mxu1 %v6271_v19  ;;  %2117 = vmatprep.subr.bf16.mxu0 %v6631_v1  ;;  %v939_v19 = vor.u32 %v937_v63, %v911_v41  ;;  %v7144_v30 = vrot.slane %v973_v11, 1  ;;  %v1013_v36 = vshll.u32 %v7126_v16, 16  ;;  %v7165_v41 = vld [vmem:[%s6744_s30 + $0x160] ss:$16 sps:$4 sm:$0xff]   ;;  %v999_v43 = vrot.slane %v997_v26, 1  ;;  %v6330_v14 = vld [vmem:[%s8772_s1 + $0x78] sm:$0xff]  }
  0x72   : > { %2286 = vmatprep.subr.bf16.mxu1 %v6631_v1  ;;  %v1021_v56 = vshll.u32 %v7165_v41, 16  ;;  %v1041_v58 = vshrl.u32 %v7126_v16, 16  ;;  %v7192_v63 = vrot.slane %v1029_v48, 1  ;;  %v7238_v26 = vld [vmem:[%s6744_s30 + $0x1a4] ss:$16 sps:$4 sm:$0xff]  }
  0x73   : > { %v1027_v31 = vor.u32 %v1025_v55, %v999_v43  ;;  %v1093_v39 = vshll.u32 %v7238_v26, 16 }
  0x74   : > { %2118 = vmatpush1.bf16.msra.mxu0 %v6278_v29  ;;  %v7142_v29 = vrot.slane %v957_v7, 1  ;;  %v7204_v7 = vrot.slane %v1021_v56, 1 }
  0x75   : > { %2287 = vmatpush1.bf16.msra.mxu1 %v6279_v33  ;;  %2119 = vmatprep.subr.bf16.mxu0 %v6631_v1  ;;  %v979_v33 = vor.u32 %v977_v15, %v951_v61  ;;  %v971_v61 = vor.u32 %v969_v25, %v943_v20  ;;  %v1095_v55 = vrot.slane %v1093_v39, 1  ;;  %v7334_v39 = vld [vmem:[%s6744_s30 + $0x204] ss:$16 sps:$4 sm:$0xff]  }
  0x76   : > { %1574 = vmatmul.mubr.bf16.gmra.mrb[20].mxu0 %v864_v34  ;;  %2288 = vmatprep.subr.bf16.mxu1 %v6631_v1  ;;  %v993_v34 = vshrl.u32 %v7085_v50, 16  ;;  %v1015_v50 = vrot.slane %v1013_v36, 1  ;;  %v960_v11 = vsel %vm680_vm0, %v955_v57, %v7142_v29  ;;  %v1089_v36 = vshrl.u32 %v7190_v60, 16 }
  0x77   : > { %1743 = vmatmul.mubr.bf16.gmra.mrb[20].mxu1 %v880_v35  ;;  %1581 = vmatprep.mubr.bf16.mxu0 %v904_v40  ;;  %v1009_v35 = vshrl.u32 %v7089_v52, 16  ;;  %v1005_v40 = vshll.u32 %v7136_v22, 16  ;;  %v7177_v52 = vld [vmem:[%s6744_s30 + $0x168] ss:$16 sps:$4 sm:$0xff]   ;;  %v976_v15 = vsel %vm680_vm0, %v971_v61, %v7144_v30  ;;  %v7281_v61 = vld [vmem:[%s6744_s30 + $0x1cc] ss:$16 sps:$4 sm:$0xff]  }
  0x78   : > { %1750 = vmatprep.mubr.bf16.mxu1 %v920_v46  ;;  %2120 = vmatpush1.bf16.msra.mxu0 %v6286_v45  ;;  %v944_v45 = vsel %vm680_vm0, %v939_v19, %v943_v20  ;;  %v968_v46 = vsel %vm680_vm0, %v963_v27, %v967_v23  ;;  %v995_v62 = vor.u32 %v993_v34, %v967_v23  ;;  %v1037_v6 = vshll.u32 %v7177_v52, 16  ;;  %v6331_v23 = vld [vmem:[%s8772_s1 + $0xf8] sm:$0xff]  }
  0x79   : > { %2289 = vmatpush1.bf16.msra.mxu1 %v6287_v49  ;;  %2121 = vmatprep.subr.bf16.mxu0 %v6631_v1  ;;  %v984_v49 = vsel %vm680_vm0, %v979_v33, %v983_v28  ;;  %v7182_v54 = vrot.slane %v1005_v40, 1  ;;  %v1011_v4 = vor.u32 %v1009_v35, %v983_v28  ;;  %v1073_v19 = vshrl.u32 %v7156_v37, 16 }
  0x7a   : > { %2290 = vmatprep.subr.bf16.mxu1 %v6631_v1  ;;  %v1000_v16 = vsel %vm680_vm0, %v995_v62, %v999_v43  ;;  %v7228_v18 = vrot.slane %v1037_v6, 1  ;;  %v1049_v20 = vshrl.u32 %v7165_v41, 16  ;;  %v987_v27 = vor.u32 %v985_v44, %v7142_v29  ;;  %v7259_v44 = vld [vmem:[%s6744_s30 + $0x1a0] ss:$16 sps:$4 sm:$0xff]  }
  0x7b   : > { %v1003_v28 = vor.u32 %v1001_v47, %v7144_v30  ;;  %v1065_v34 = vshrl.u32 %v7177_v52, 16  ;;  %v1043_v37 = vor.u32 %v1041_v58, %v1015_v50  ;;  %v1032_v43 = vsel %vm680_vm0, %v1027_v31, %v7192_v63 }
  0x7c   : > { %2122 = vmatpush1.bf16.msra.mxu0 %v6298_v59  ;;  %v1017_v59 = vshrl.u32 %v7133_v21, 16  ;;  %v1059_v52 = vor.u32 %v1057_v8, %v7192_v63  ;;  %v1085_v58 = vshll.u32 %v7259_v44, 16  ;;  %v1121_v63 = vshrl.u32 %v7238_v26, 16 }
  0x7d   : > { %2291 = vmatpush1.bf16.msra.mxu1 %v6299_v0  ;;  %2123 = vmatprep.subr.bf16.mxu0 %v6631_v1  ;;  %v1033_v0 = vshrl.u32 %v7136_v22, 16  ;;  %v1051_v6 = vor.u32 %v1049_v20, %v7204_v7  ;;  %v1169_v31 = vshrl.u32 %v7281_v61, 16 }
  0x7e   : > { %1582 = vmatmul.mubr.bf16.gmra.mrb[24].mxu0 %v896_v5  ;;  %2292 = vmatprep.subr.bf16.mxu1 %v6631_v1  ;;  %v7201_v5 = vrot.slane %v1045_v51, 1 }
  0x7f   : > { %1751 = vmatmul.mubr.bf16.gmra.mrb[24].mxu1 %v912_v9  ;;  %1589 = vmatprep.mubr.bf16.mxu0 %v936_v10  ;;  %v7208_v9 = vld [vmem:[%s6744_s30 + $0x18c] ss:$16 sps:$4 sm:$0xff]   ;;  %v7211_v10 = vld [vmem:[%s6744_s30 + $0x180] ss:$16 sps:$4 sm:$0xff]   ;;  %v1035_v51 = vor.u32 %v1033_v0, %v7182_v54 }
  0x80   : > { %1758 = vmatprep.mubr.bf16.mxu1 %v952_v13  ;;  %2124 = vmatpush1.bf16.msra.mxu0 %v6306_v12  ;;  %v1061_v12 = vshll.u32 %v7190_v60, 16  ;;  %v7217_v13 = vld [vmem:[%s6744_s30 + $0x188] ss:$16 sps:$4 sm:$0xff]   ;;  %v1077_v24 = vshll.u32 %v7208_v9, 16  ;;  %v1053_v25 = vshll.u32 %v7211_v10, 16  ;;  %v1105_v48 = vshrl.u32 %v7208_v9, 16 }
  0x81   : > { %2293 = vmatpush1.bf16.msra.mxu1 %v6307_v17  ;;  %2125 = vmatprep.subr.bf16.mxu0 %v6631_v1  ;;  %v1016_v17 = vsel %vm680_vm0, %v1011_v4, %v1015_v50  ;;  %v1069_v35 = vshll.u32 %v7217_v13, 16  ;;  %v7271_v50 = vld [vmem:[%s6744_s30 + $0x1c4] ss:$16 sps:$4 sm:$0xff]   ;;  %v1075_v57 = vor.u32 %v1073_v19, %v7201_v5  ;;  %v1097_v62 = vshrl.u32 %v7217_v13, 16 }
  0x82   : > { %2294 = vmatprep.subr.bf16.mxu1 %v6631_v1  ;;  %v1063_v33 = vrot.slane %v1061_v12, 1  ;;  %v1079_v29 = vrot.slane %v1077_v24, 1  ;;  %v1055_v30 = vrot.slane %v1053_v25, 1  ;;  %v1125_v22 = vshll.u32 %v7271_v50, 16 }
  0x83   : > { %v1071_v47 = vrot.slane %v1069_v35, 1  ;;  %v1113_v9 = vshrl.u32 %v7259_v44, 16  ;;  %v1123_v25 = vor.u32 %v1121_v63, %v1095_v55  ;;  %v7356_v63 = vld [vmem:[%s6744_s30 + $0x208] ss:$16 sps:$4 sm:$0xff]  }
  0x84   : > { %2126 = vmatpush1.bf16.msra.mxu0 %v6316_v32  ;;  %v7243_v32 = vld [vmem:[%s6744_s30 + $0x1ac] ss:$16 sps:$4 sm:$0xff]   ;;  %v1080_v0 = vsel %vm680_vm0, %v1075_v57, %v1079_v29  ;;  %v1127_v8 = vrot.slane %v1125_v22, 1  ;;  %v1107_v12 = vor.u32 %v1105_v48, %v1079_v29  ;;  %v1056_v13 = vsel %vm680_vm0, %v1051_v6, %v1055_v30 }
  0x85   : > { %2295 = vmatpush1.bf16.msra.mxu1 %v6317_v38  ;;  %2127 = vmatprep.subr.bf16.mxu0 %v6631_v1  ;;  %v992_v38 = vsel %vm680_vm0, %v987_v27, %v7180_v53  ;;  %v1109_v40 = vshll.u32 %v7243_v32, 16  ;;  %v1099_v24 = vor.u32 %v1097_v62, %v1071_v47 }
  0x86   : > { %1590 = vmatmul.mubr.bf16.gmra.mrb[28].mxu0 %v928_v42  ;;  %2296 = vmatprep.subr.bf16.mxu1 %v6631_v1  ;;  %v1008_v42 = vsel %vm680_vm0, %v1003_v28, %v7182_v54  ;;  %v1040_v54 = vsel %vm680_vm0, %v1035_v51, %v7228_v18  ;;  %v1153_v28 = vshrl.u32 %v7271_v50, 16 }
  0x87   : > { %1759 = vmatmul.mubr.bf16.gmra.mrb[28].mxu1 %v944_v45  ;;  %1597 = vmatprep.mubr.bf16.mxu0 %v968_v46  ;;  %v1048_v45 = vsel %vm680_vm0, %v1043_v37, %v7201_v5  ;;  %v7264_v46 = vld [vmem:[%s6744_s30 + $0x1a8] ss:$16 sps:$4 sm:$0xff]   ;;  %v1111_v56 = vrot.slane %v1109_v40, 1  ;;  %v1141_v5 = vshll.u32 %v7281_v61, 16 }
  0x88   : > { %1766 = vmatprep.mubr.bf16.mxu1 %v984_v49  ;;  %2128 = vmatpush1.bf16.msra.mxu0 %v6324_v2  ;;  %v1019_v49 = vor.u32 %v1017_v59, %v7180_v53  ;;  %v1101_v60 = vshll.u32 %v7264_v46, 16  ;;  %v1081_v53 = vshrl.u32 %v7211_v10, 16  ;;  %v1064_v59 = vsel %vm680_vm0, %v1059_v52, %v1063_v33 }
  0x89   : > { %2297 = vmatpush1.bf16.msra.mxu1 %v6325_v3  ;;  %2129 = vmatprep.subr.bf16.mxu0 %v6631_v1  ;;  %v1087_v2 = vrot.slane %v1085_v58, 1  ;;  %v1137_v3 = vshrl.u32 %v7243_v32, 16  ;;  %v1067_v10 = vor.u32 %v1065_v34, %v7228_v18  ;;  %v1112_v41 = vsel %vm680_vm0, %v1107_v12, %v1111_v56  ;;  %v7312_v18 = vld [vmem:[%s6744_s30 + $0x1e4] ss:$16 sps:$4 sm:$0xff]   ;;  %v7321_v32 = vld [vmem:[%s6744_s30 + $0x1e0] ss:$16 sps:$4 sm:$0xff]  }
  0x8a   : > { %2298 = vmatprep.subr.bf16.mxu1 %v6631_v1  ;;  %v1024_v21 = vsel %vm680_vm0, %v1019_v49, %v7204_v7  ;;  %v1103_v4 = vrot.slane %v1101_v60, 1  ;;  %v1143_v7 = vrot.slane %v1141_v5, 1  ;;  %v1129_v19 = vshrl.u32 %v7264_v46, 16 }
  0x8b   : > { %v1083_v20 = vor.u32 %v1081_v53, %v1055_v30  ;;  %v1139_v26 = vor.u32 %v1137_v3, %v1111_v56  ;;  %v1157_v37 = vshll.u32 %v7312_v18, 16  ;;  %v1149_v49 = vshll.u32 %v7321_v32, 16 }
  0x8c   : > { %2130 = vmatpush1.bf16.msra.mxu0 %v6330_v14  ;;  %v1072_v14 = vsel %vm680_vm0, %v1067_v10, %v1071_v47  ;;  %v1104_v35 = vsel %vm680_vm0, %v1099_v24, %v1103_v4  ;;  %v1131_v44 = vor.u32 %v1129_v19, %v1103_v4  ;;  %v1155_v47 = vor.u32 %v1153_v28, %v1127_v8 }
  0x8d   : > { %2299 = vmatpush1.bf16.msra.mxu1 %v6331_v23  ;;  %3674 = vmatprep.subr.bf16.mxu0 %v6631_v1  ;;  %v7315_v23 = vld [vmem:[%s6744_s30 + $0x1ec] ss:$16 sps:$4 sm:$0xff]   ;;  %v1144_v29 = vsel %vm680_vm0, %v1139_v26, %v1143_v7  ;;  %v1159_v48 = vrot.slane %v1157_v37, 1  ;;  %v1171_v50 = vor.u32 %v1169_v31, %v1143_v7  ;;  %v1185_v58 = vshrl.u32 %v7312_v18, 16 }
  0x8e   : > { %1598 = vmatmul.mubr.bf16.gmra.mrb[32].mxu0 %v960_v11  ;;  %3843 = vmatprep.subr.bf16.mxu1 %v6631_v1  ;;  %v1091_v11 = vor.u32 %v1089_v36, %v1063_v33  ;;  %v1088_v33 = vsel %vm680_vm0, %v1083_v20, %v1087_v2  ;;  %v1128_v36 = vsel %vm680_vm0, %v1123_v25, %v1127_v8  ;;  %v1173_v30 = vshll.u32 %v7315_v23, 16 }
  0x8f   : > { %1767 = vmatmul.mubr.bf16.gmra.mrb[32].mxu1 %v976_v15  ;;  %1605 = vmatprep.mubr.bf16.mxu0 %v1000_v16  ;;  %v7304_v16 = vld [vmem:[%s6744_s30 + $0x1c0] ss:$16 sps:$4 sm:$0xff]   ;;  %v1189_v60 = vshll.u32 %v7334_v39, 16  ;;  %v1160_v22 = vsel %vm680_vm0, %v1155_v47, %v1159_v48  ;;  %v1177_v5 = vshrl.u32 %v7321_v32, 16  ;;  %v1217_v25 = vshrl.u32 %v7334_v39, 16 }
  0x90   : > { %1774 = vmatprep.mubr.bf16.mxu1 %v1016_v17  ;;  %v1096_v15 = vsel %vm680_vm0, %v1091_v11, %v1095_v55  ;;  %v7308_v17 = vld [vmem:[%s6744_s30 + $0x1c8] ss:$16 sps:$4 sm:$0xff]   ;;  %v1117_v27 = vshll.u32 %v7304_v16, 16  ;;  %v1175_v51 = vrot.slane %v1173_v30, 1  ;;  %v331_v55 = vld [vmem:[%s6744_s30 + $0x220] sm:$0x11] }
  0x91   : > { %v1133_v34 = vshll.u32 %v7308_v17, 16  ;;  %v1161_v57 = vshrl.u32 %v7308_v17, 16  ;;  %v5642_v6 = vcombine.high %v331_v55, %v331_v55  ;;  %v1191_v10 = vrot.slane %v1189_v60, 1 }
  0x92   : > { %v1119_v40 = vrot.slane %v1117_v27, 1  ;;  %v5641_v31 = vcombine.low %v331_v55, %v331_v55 }
  0x93   : > { %v1135_v46 = vrot.slane %v1133_v34, 1  ;;  %v1221_v7 = vshll.u32 %v5642_v6, 16  ;;  %v6336_v6 = vld [vmem:[%s8772_s1 + $0x210] sm:$0xff]  }
  0x95   : > { %v1136_v53 = vsel %vm680_vm0, %v1131_v44, %v1135_v46  ;;  %v1163_v8 = vor.u32 %v1161_v57, %v1135_v46  ;;  %v1213_v44 = vshll.u32 %v5641_v31, 16  ;;  %v6518_v31 = vld [vmem:[%s6744_s30 + $0x60] ss:$16 sps:$4 sm:$0xff]  }
  0x96   : > { %1606 = vmatmul.mubr.bf16.gmra.mrb[36].mxu0 %v992_v38  ;;  %v7331_v38 = vld [vmem:[%s6744_s30 + $0x1e8] ss:$16 sps:$4 sm:$0xff]  }
  0x97   : > { %1775 = vmatmul.mubr.bf16.gmra.mrb[36].mxu1 %v1008_v42  ;;  %1613 = vmatprep.mubr.bf16.mxu0 %v1032_v43  ;;  %v1145_v42 = vshrl.u32 %v7304_v16, 16  ;;  %v1115_v43 = vor.u32 %v1113_v9, %v1087_v2  ;;  %v1165_v52 = vshll.u32 %v7331_v38, 16  ;;  %v1151_v2 = vrot.slane %v1149_v49, 1 }
  0x98   : > { %1782 = vmatprep.mubr.bf16.mxu1 %v1048_v45  ;;  %v7338_v45 = vld [vmem:[%s6744_s30 + $0x20c] ss:$16 sps:$4 sm:$0xff]   ;;  %v1187_v9 = vor.u32 %v1185_v58, %v1159_v48  ;;  %v1193_v24 = vshrl.u32 %v7331_v38, 16  ;;  %v1225_v49 = vshrl.u32 %v7356_v63, 16  ;;  %v1215_v55 = vrot.slane %v1213_v44, 1 }
  0x99   : > { %v1120_v56 = vsel %vm680_vm0, %v1115_v43, %v1119_v40  ;;  %v1205_v62 = vshll.u32 %v7338_v45, 16  ;;  %v1167_v3 = vrot.slane %v1165_v52, 1  ;;  %v1147_v4 = vor.u32 %v1145_v42, %v1119_v40  ;;  %v6525_v44 = vld [vmem:[%s6744_s30 + $0xac] ss:$16 sps:$4 sm:$0xff]  }
  0x9a   : > { %v1192_v20 = vsel %vm680_vm0, %v1187_v9, %v1191_v10  ;;  %v1233_v27 = vshrl.u32 %v7338_v45, 16  ;;  %v6510_v9 = vld [vmem:[%s6744_s30 + $0x20] ss:$16 sps:$4 sm:$0xff]  }
  0x9b   : > { %v1207_v12 = vrot.slane %v1205_v62, 1  ;;  %v1168_v19 = vsel %vm680_vm0, %v1163_v8, %v1167_v3  ;;  %v1195_v37 = vor.u32 %v1193_v24, %v1167_v3  ;;  %v6506_v62 = vld [vmem:[%s6744_s30] ss:$16 sps:$4 sm:$0xff]   ;;  %v6508_v3 = vld [vmem:[%s6744_s30 + $0x24] ss:$16 sps:$4 sm:$0xff]  }
  0x9c   : > { %v6337_v8 = vld [vmem:[%s8772_s1 + $0x290] sm:$0xff]   ;;  %v6517_v24 = vld [vmem:[%s6744_s30 + $0x6c] ss:$16 sps:$4 sm:$0xff]  }
  0x9d   : > { %v1235_v40 = vor.u32 %v1233_v27, %v1207_v12  ;;  %v6344_v27 = vld [vmem:[%s8772_s1 + $0x230] sm:$0xff]  }
  0x9e   : > { %1614 = vmatmul.mubr.bf16.gmra.mrb[40].mxu0 %v1024_v21  ;;  %v7348_v21 = vld [vmem:[%s6744_s30 + $0x200] ss:$16 sps:$4 sm:$0xff]  }
  0x9f   : > { %1783 = vmatmul.mubr.bf16.gmra.mrb[40].mxu1 %v1040_v54  ;;  %1621 = vmatprep.mubr.bf16.mxu0 %v1064_v59  ;;  %v1176_v54 = vsel %vm680_vm0, %v1171_v50, %v1175_v51  ;;  %v1201_v59 = vshrl.u32 %v7315_v23, 16  ;;  %v1209_v43 = vshrl.u32 %v7348_v21, 16 }
  0xa0   : > { %1790 = vmatprep.mubr.bf16.mxu1 %v1080_v0  ;;  %v332_v0 = vld [vmem:[%s6744_s30 + $0x228] sm:$0x11] }
  0xa1   : > { %v1203_v11 = vor.u32 %v1201_v59, %v1175_v51  ;;  %v5643_v30 = vcombine.low %v332_v0, %v332_v0  ;;  %v6333_v59 = vld [vmem:[%s8772_s1 + $0x280] sm:$0xff]  }
  0xa3   : > { %v1208_v26 = vsel %vm680_vm0, %v1203_v11, %v1207_v12  ;;  %v1229_v50 = vshll.u32 %v5643_v30, 16  ;;  %v6512_v11 = vld [vmem:[%s6744_s30 + $0x44] ss:$16 sps:$4 sm:$0xff]   ;;  %v6513_v12 = vld [vmem:[%s6744_s30 + $0x4c] ss:$16 sps:$4 sm:$0xff]  }
  0xa4   : > { %v6349_v30 = vld [vmem:[%s8772_s1 + $0x2c0] sm:$0xff]  }
  0xa5   : > { %v1231_v57 = vrot.slane %v1229_v50, 1  ;;  %v6526_v50 = vld [vmem:[%s6744_s30 + $0xa0] ss:$16 sps:$4 sm:$0xff]  }
  0xa6   : > { %1622 = vmatmul.mubr.bf16.gmra.mrb[44].mxu0 %v1056_v13  ;;  %v1181_v13 = vshll.u32 %v7348_v21, 16 }
  0xa7   : > { %1791 = vmatmul.mubr.bf16.gmra.mrb[44].mxu1 %v1072_v14  ;;  %1629 = vmatprep.mubr.bf16.mxu0 %v1096_v15  ;;  %v5644_v14 = vcombine.high %v332_v0, %v332_v0  ;;  %v1152_v15 = vsel %vm680_vm0, %v1147_v4, %v1151_v2  ;;  %v6507_v0 = vld [vmem:[%s6744_s30 + $0x8] ss:$16 sps:$4 sm:$0xff]  }
  0xa8   : > { %1798 = vmatprep.mubr.bf16.mxu1 %v1112_v41  ;;  %v1197_v41 = vshll.u32 %v7356_v63, 16  ;;  %v1183_v34 = vrot.slane %v1181_v13, 1  ;;  %v6335_v4 = vld [vmem:[%s8772_s1 + $0x288] sm:$0xff]   ;;  %v6338_v13 = vld [vmem:[%s8772_s1 + $0x218] sm:$0xff]  }
  0xa9   : > { %v1237_v28 = vshll.u32 %v5644_v14, 16  ;;  %v6339_v14 = vld [vmem:[%s8772_s1 + $0x298] sm:$0xff]  }
  0xaa   : > { %v1211_v52 = vor.u32 %v1209_v43, %v1183_v34  ;;  %v6524_v43 = vld [vmem:[%s6744_s30 + $0xa4] ss:$16 sps:$4 sm:$0xff]  }
  0xab   : > { %v1239_v42 = vrot.slane %v1237_v28, 1  ;;  %v6345_v28 = vld [vmem:[%s8772_s1 + $0x2b0] sm:$0xff]  }
  0xac   : > { %v1216_v58 = vsel %vm680_vm0, %v1211_v52, %v1215_v55  ;;  %v6528_v52 = vld [vmem:[%s6744_s30 + $0xc4] ss:$16 sps:$4 sm:$0xff]   ;;  %v6529_v55 = vld [vmem:[%s6744_s30 + $0xcc] ss:$16 sps:$4 sm:$0xff]  }
  0xad   : > { %v1240_v51 = vsel %vm680_vm0, %v1235_v40, %v1239_v42  ;;  %v6522_v40 = vld [vmem:[%s6744_s30 + $0x80] ss:$16 sps:$4 sm:$0xff]   ;;  %v6523_v42 = vld [vmem:[%s6744_s30 + $0x88] ss:$16 sps:$4 sm:$0xff]  }
  0xae   : > { %1630 = vmatmul.mubr.bf16.gmra.mrb[48].mxu0 %v1088_v33  ;;  %v1179_v33 = vor.u32 %v1177_v5, %v1151_v2  ;;  %v6334_v2 = vld [vmem:[%s8772_s1 + $0x208] sm:$0xff]  }
  0xaf   : > { %1799 = vmatmul.mubr.bf16.gmra.mrb[48].mxu1 %v1104_v35  ;;  %1637 = vmatprep.mubr.bf16.mxu0 %v1128_v36  ;;  %v1199_v35 = vrot.slane %v1197_v41, 1  ;;  %v1223_v36 = vrot.slane %v1221_v7, 1  ;;  %v6509_v5 = vld [vmem:[%s6744_s30 + $0x2c] ss:$16 sps:$4 sm:$0xff]   ;;  %v6341_v41 = vld [vmem:[%s8772_s1 + $0x2a0] sm:$0xff]  }
  0xb0   : > { %1806 = vmatprep.mubr.bf16.mxu1 %v1144_v29  ;;  %v1219_v29 = vor.u32 %v1217_v25, %v1191_v10  ;;  %v1184_v46 = vsel %vm680_vm0, %v1179_v33, %v1183_v34  ;;  %v6511_v10 = vld [vmem:[%s6744_s30 + $0x28] ss:$16 sps:$4 sm:$0xff]   ;;  %v6514_v7 = vld [vmem:[%s6744_s30 + $0x40] ss:$16 sps:$4 sm:$0xff]   ;;  %v6520_v34 = vld [vmem:[%s6744_s30 + $0x84] ss:$16 sps:$4 sm:$0xff]  }
  0xb1   : > { %v1200_v47 = vsel %vm680_vm0, %v1195_v37, %v1199_v35  ;;  %v6342_v25 = vld [vmem:[%s8772_s1 + $0x228] sm:$0xff]   ;;  %v6347_v37 = vld [vmem:[%s8772_s1 + $0x2b8] sm:$0xff]  }
  0xb2   : > { %v1224_v48 = vsel %vm680_vm0, %v1219_v29, %v1223_v36  ;;  %v6519_v33 = vld [vmem:[%s6744_s30 + $0x68] ss:$16 sps:$4 sm:$0xff]   ;;  %v6348_v29 = vld [vmem:[%s8772_s1 + $0x240] sm:$0xff]  }
  0xb3   : > { %v6346_v36 = vld [vmem:[%s8772_s1 + $0x238] sm:$0xff]  }
  0xb6   : > { %1638 = vmatmul.mubr.bf16.gmra.mrb[52].mxu0 %v1120_v56  ;;  %v1227_v56 = vor.u32 %v1225_v49, %v1199_v35  ;;  %v6521_v35 = vld [vmem:[%s6744_s30 + $0x8c] ss:$16 sps:$4 sm:$0xff]   ;;  %v6353_v49 = vld [vmem:[%s8772_s1 + $0x2d0] sm:$0xff]  }
  0xb7   : > { %1807 = vmatmul.mubr.bf16.gmra.mrb[52].mxu1 %v1136_v53  ;;  %1645 = vmatprep.mubr.bf16.mxu0 %v1160_v22  ;;  %v6504_v53 = vld [vmem:[%s6744_s30 + $0x4] ss:$16 sps:$4 sm:$0xff]   ;;  %v6505_v22 = vld [vmem:[%s6744_s30 + $0xc] ss:$16 sps:$4 sm:$0xff]  }
  0xb8   : > { %1814 = vmatprep.mubr.bf16.mxu1 %v1176_v54  ;;  %v1232_v60 = vsel %vm680_vm0, %v1227_v56, %v1231_v57  ;;  %v6332_v54 = vld [vmem:[%s8772_s1 + $0x200] sm:$0xff]   ;;  %v6354_v56 = vld [vmem:[%s8772_s1 + $0x258] sm:$0xff]  }
  0xb9   : > { %v6355_v57 = vld [vmem:[%s8772_s1 + $0x2d8] sm:$0xff]  }
  0xbe   : > { %1646 = vmatmul.mubr.bf16.gmra.mrb[56].mxu0 %v1152_v15  ;;  %v6340_v15 = vld [vmem:[%s8772_s1 + $0x220] sm:$0xff]  }
  0xbf   : > { %1815 = vmatmul.mubr.bf16.gmra.mrb[56].mxu1 %v1168_v19  ;;  %1653 = vmatprep.mubr.bf16.mxu0 %v1192_v20  ;;  %v6515_v19 = vld [vmem:[%s6744_s30 + $0x48] ss:$16 sps:$4 sm:$0xff]   ;;  %v6516_v20 = vld [vmem:[%s6744_s30 + $0x64] ss:$16 sps:$4 sm:$0xff]  }
  0xc0   : > { %1822 = vmatprep.mubr.bf16.mxu1 %v1208_v26  ;;  %v6343_v26 = vld [vmem:[%s8772_s1 + $0x2a8] sm:$0xff]  }
  0xc6   : > { %1654 = vmatmul.mubr.bf16.gmra.mrb[60].mxu0 %v1184_v46  ;;  %v6350_v46 = vld [vmem:[%s8772_s1 + $0x248] sm:$0xff]  }
  0xc7   : > { %1823 = vmatmul.mubr.bf16.gmra.mrb[60].mxu1 %v1200_v47  ;;  %1661 = vmatprep.mubr.bf16.mxu0 %v1224_v48  ;;  %v6351_v47 = vld [vmem:[%s8772_s1 + $0x2c8] sm:$0xff]   ;;  %v6352_v48 = vld [vmem:[%s8772_s1 + $0x250] sm:$0xff]  }
  0xc8   : > { %1830 = vmatprep.mubr.bf16.mxu1 %v1240_v51  ;;  %v6527_v51 = vld [vmem:[%s6744_s30 + $0xa8] ss:$16 sps:$4 sm:$0xff]  }
  0xce   : > { %1662 = vmatmul.mubr.bf16.gmra.mrb[64].mxu0 %v1216_v58  ;;  %v6356_v58 = vld [vmem:[%s8772_s1 + $0x260] sm:$0xff]  }
  0xcf   : > { %1831 = vmatmul.mubr.bf16.gmra.mrb[64].mxu1 %v1232_v60  ;;  %2131 = vmatprep.mubr.bf16.mxu0 %v6504_v53  ;;  %v6357_v60 = vld [vmem:[%s8772_s1 + $0x2e0] sm:$0xff]  }
  0xd0   : > { %2300 = vmatprep.mubr.bf16.mxu1 %v6505_v22  ;;  %v6530_v53 = vld [vmem:[%s6744_s30 + $0xc0] ss:$16 sps:$4 sm:$0xff]   ;;  %v6531_v22 = vld [vmem:[%s6744_s30 + $0xc8] ss:$16 sps:$4 sm:$0xff]  }
  0xd6   : > { %2132 = vmatmul.mubr.bf16.vlgmr.msra.gmra.mrb[68].mxu0 %v6506_v62  ;;  %v6358_v62 = vld [vmem:[%s8772_s1 + $0x268] sm:$0xff]  }
  0xd7   : > { %2301 = vmatmul.mubr.bf16.vlgmr.msra.gmra.mrb[68].mxu1 %v6507_v0  ;;  %3675 = vmatpush1.bf16.msra.mxu0 %v6332_v54  ;;  %v6532_v54 = vld [vmem:[%s6744_s30 + $0xe4] ss:$16 sps:$4 sm:$0xff]   ;;  %v6359_v0 = vld [vmem:[%s8772_s1 + $0x2e8] sm:$0xff]  }
  0xd8   : > { %3844 = vmatpush1.bf16.msra.mxu1 %v6333_v59  ;;  %2139 = vmatprep.mubr.bf16.mxu0 %v6508_v3  ;;  %v6533_v59 = vld [vmem:[%s6744_s30 + $0xec] ss:$16 sps:$4 sm:$0xff]   ;;  %v6361_v3 = vld [vmem:[%s8772_s1 + $0x2f0] sm:$0xff]  }
  0xd9   : > { %2308 = vmatprep.mubr.bf16.mxu1 %v6509_v5  ;;  %3676 = vmatprep.subr.bf16.mxu0 %v6631_v1  ;;  %v6535_v5 = vld [vmem:[%s6744_s30 + $0xe8] ss:$16 sps:$4 sm:$0xff]  }
  0xda   : > { %3845 = vmatprep.subr.bf16.mxu1 %v6631_v1 }
  0xdb   : > { %3677 = vmatpush1.bf16.msra.mxu0 %v6334_v2  ;;  %v6360_v2 = vld [vmem:[%s8772_s1 + $0x270] sm:$0xff]  }
  0xdc   : > { %3846 = vmatpush1.bf16.msra.mxu1 %v6335_v4  ;;  %3678 = vmatprep.subr.bf16.mxu0 %v6631_v1  ;;  %v6534_v4 = vld [vmem:[%s6744_s30 + $0xe0] ss:$16 sps:$4 sm:$0xff]  }
  0xdd   : > { %3847 = vmatprep.subr.bf16.mxu1 %v6631_v1 }
  0xde   : > { %2140 = vmatmul.mubr.bf16.gmra.mrb[72].mxu0 %v6510_v9  ;;  %v6362_v9 = vld [vmem:[%s8772_s1 + $0x278] sm:$0xff]  }
  0xdf   : > { %2309 = vmatmul.mubr.bf16.gmra.mrb[72].mxu1 %v6511_v10  ;;  %2147 = vmatprep.mubr.bf16.mxu0 %v6512_v11  ;;  %v6363_v10 = vld [vmem:[%s8772_s1 + $0x2f8] sm:$0xff]   ;;  %v6538_v11 = vld [vmem:[%s6744_s30 + $0x100] ss:$16 sps:$4 sm:$0xff]  }
  0xe0   : > { %2316 = vmatprep.mubr.bf16.mxu1 %v6513_v12  ;;  %3679 = vmatpush1.bf16.msra.mxu0 %v6336_v6  ;;  %v6536_v6 = vld [vmem:[%s6744_s30 + $0x104] ss:$16 sps:$4 sm:$0xff]   ;;  %v6539_v12 = vld [vmem:[%s6744_s30 + $0x108] ss:$16 sps:$4 sm:$0xff]  }
  0xe1   : > { %3848 = vmatpush1.bf16.msra.mxu1 %v6337_v8  ;;  %3680 = vmatprep.subr.bf16.mxu0 %v6631_v1  ;;  %v6537_v8 = vld [vmem:[%s6744_s30 + $0x10c] ss:$16 sps:$4 sm:$0xff]  }
  0xe2   : > { %3849 = vmatprep.subr.bf16.mxu1 %v6631_v1 }
  0xe4   : > { %3681 = vmatpush1.bf16.msra.mxu0 %v6338_v13  ;;  %v6540_v13 = vld [vmem:[%s6744_s30 + $0x124] ss:$16 sps:$4 sm:$0xff]  }
  0xe5   : > { %3850 = vmatpush1.bf16.msra.mxu1 %v6339_v14  ;;  %3682 = vmatprep.subr.bf16.mxu0 %v6631_v1  ;;  %v6541_v14 = vld [vmem:[%s6744_s30 + $0x12c] ss:$16 sps:$4 sm:$0xff]  }
  0xe6   : > { %2148 = vmatmul.mubr.bf16.gmra.mrb[76].mxu0 %v6514_v7  ;;  %3851 = vmatprep.subr.bf16.mxu1 %v6631_v1  ;;  %v6544_v7 = vld [vmem:[%s6744_s30 + $0x144] ss:$16 sps:$4 sm:$0xff]  }
  0xe7   : > { %2317 = vmatmul.mubr.bf16.gmra.mrb[76].mxu1 %v6515_v19  ;;  %2155 = vmatprep.mubr.bf16.mxu0 %v6516_v20  ;;  %v6545_v19 = vld [vmem:[%s6744_s30 + $0x14c] ss:$16 sps:$4 sm:$0xff]  }
  0xe8   : > { %2324 = vmatprep.mubr.bf16.mxu1 %v6517_v24  ;;  %3683 = vmatpush1.bf16.msra.mxu0 %v6340_v15  ;;  %v6542_v15 = vld [vmem:[%s6744_s30 + $0x120] ss:$16 sps:$4 sm:$0xff]  }
  0xe9   : > { %3852 = vmatpush1.bf16.msra.mxu1 %v6341_v41  ;;  %3684 = vmatprep.subr.bf16.mxu0 %v6631_v1  ;;  %v6543_v41 = vld [vmem:[%s6744_s30 + $0x128] ss:$16 sps:$4 sm:$0xff]  }
  0xea   : > { %3853 = vmatprep.subr.bf16.mxu1 %v6631_v1 }
  0xec   : > { %3685 = vmatpush1.bf16.msra.mxu0 %v6342_v25 }
  0xed   : > { %3854 = vmatpush1.bf16.msra.mxu1 %v6343_v26  ;;  %3686 = vmatprep.subr.bf16.mxu0 %v6631_v1 }
  0xee   : > { %2156 = vmatmul.mubr.bf16.gmra.mrb[80].mxu0 %v6518_v31  ;;  %3855 = vmatprep.subr.bf16.mxu1 %v6631_v1 }
  0xef   : > { %2325 = vmatmul.mubr.bf16.gmra.mrb[80].mxu1 %v6519_v33  ;;  %2163 = vmatprep.mubr.bf16.mxu0 %v6520_v34 }
  0xf0   : > { %2332 = vmatprep.mubr.bf16.mxu1 %v6521_v35  ;;  %3687 = vmatpush1.bf16.msra.mxu0 %v6344_v27 }
  0xf1   : > { %3856 = vmatpush1.bf16.msra.mxu1 %v6345_v28  ;;  %3688 = vmatprep.subr.bf16.mxu0 %v6631_v1 }
  0xf2   : > { %3857 = vmatprep.subr.bf16.mxu1 %v6631_v1 }
  0xf4   : > { %3689 = vmatpush1.bf16.msra.mxu0 %v6346_v36  ;;  %v6546_v36 = vld [vmem:[%s6744_s30 + $0x140] ss:$16 sps:$4 sm:$0xff]  }
  0xf5   : > { %3858 = vmatpush1.bf16.msra.mxu1 %v6347_v37  ;;  %3690 = vmatprep.subr.bf16.mxu0 %v6631_v1  ;;  %v6547_v37 = vld [vmem:[%s6744_s30 + $0x148] ss:$16 sps:$4 sm:$0xff]  }
  0xf6   : > { %2164 = vmatmul.mubr.bf16.gmra.mrb[84].mxu0 %v6522_v40  ;;  %3859 = vmatprep.subr.bf16.mxu1 %v6631_v1 }
  0xf7   : > { %2333 = vmatmul.mubr.bf16.gmra.mrb[84].mxu1 %v6523_v42  ;;  %2171 = vmatprep.mubr.bf16.mxu0 %v6524_v43 }
  0xf8   : > { %2340 = vmatprep.mubr.bf16.mxu1 %v6525_v44  ;;  %3691 = vmatpush1.bf16.msra.mxu0 %v6348_v29  ;;  %v6548_v29 = vld [vmem:[%s6744_s30 + $0x164] ss:$16 sps:$4 sm:$0xff]  }
  0xf9   : > { %3860 = vmatpush1.bf16.msra.mxu1 %v6349_v30  ;;  %3692 = vmatprep.subr.bf16.mxu0 %v6631_v1  ;;  %v6549_v30 = vld [vmem:[%s6744_s30 + $0x16c] ss:$16 sps:$4 sm:$0xff]  }
  0xfa   : > { %3861 = vmatprep.subr.bf16.mxu1 %v6631_v1 }
  0xfc   : > { %3693 = vmatpush1.bf16.msra.mxu0 %v6350_v46 }
  0xfd   : > { %3862 = vmatpush1.bf16.msra.mxu1 %v6351_v47  ;;  %3694 = vmatprep.subr.bf16.mxu0 %v6631_v1 }
  0xfe   : > { %2172 = vmatmul.mubr.bf16.gmra.mrb[88].mxu0 %v6526_v50  ;;  %3863 = vmatprep.subr.bf16.mxu1 %v6631_v1  ;;  %v6550_v50 = vld [vmem:[%s6744_s30 + $0x160] ss:$16 sps:$4 sm:$0xff]  }
  0xff   : > { %2341 = vmatmul.mubr.bf16.gmra.mrb[88].mxu1 %v6527_v51  ;;  %2179 = vmatprep.mubr.bf16.mxu0 %v6528_v52  ;;  %v6551_v51 = vld [vmem:[%s6744_s30 + $0x168] ss:$16 sps:$4 sm:$0xff]   ;;  %v6552_v52 = vld [vmem:[%s6744_s30 + $0x184] ss:$16 sps:$4 sm:$0xff]  }
 0x100   : > { %2348 = vmatprep.mubr.bf16.mxu1 %v6529_v55  ;;  %3695 = vmatpush1.bf16.msra.mxu0 %v6352_v48 }
 0x101   : > { %3864 = vmatpush1.bf16.msra.mxu1 %v6353_v49  ;;  %3696 = vmatprep.subr.bf16.mxu0 %v6631_v1 }
 0x102   : > { %3865 = vmatprep.subr.bf16.mxu1 %v6631_v1 }
 0x104   : > { %3697 = vmatpush1.bf16.msra.mxu0 %v6354_v56  ;;  %v6553_v56 = vld [vmem:[%s6744_s30 + $0x18c] ss:$16 sps:$4 sm:$0xff]  }
 0x105   : > { %3866 = vmatpush1.bf16.msra.mxu1 %v6355_v57  ;;  %3698 = vmatprep.subr.bf16.mxu0 %v6631_v1 }
 0x106   : > { %2180 = vmatmul.mubr.bf16.gmra.mrb[92].mxu0 %v6530_v53  ;;  %3867 = vmatprep.subr.bf16.mxu1 %v6631_v1 }
 0x107   : > { %2349 = vmatmul.mubr.bf16.gmra.mrb[92].mxu1 %v6531_v22  ;;  %2187 = vmatprep.mubr.bf16.mxu0 %v6532_v54 }
 0x108   : > { %2356 = vmatprep.mubr.bf16.mxu1 %v6533_v59  ;;  %3699 = vmatpush1.bf16.msra.mxu0 %v6356_v58 }
 0x109   : > { %3868 = vmatpush1.bf16.msra.mxu1 %v6357_v60  ;;  %3700 = vmatprep.subr.bf16.mxu0 %v6631_v1 }
 0x10a   : > { %3869 = vmatprep.subr.bf16.mxu1 %v6631_v1 }
 0x10c   : > { %3701 = vmatpush1.bf16.msra.mxu0 %v6358_v62 }
 0x10d   : > { %3870 = vmatpush1.bf16.msra.mxu1 %v6359_v0  ;;  %3702 = vmatprep.subr.bf16.mxu0 %v6631_v1 }
 0x10e   : > { %2188 = vmatmul.mubr.bf16.gmra.mrb[96].mxu0 %v6534_v4  ;;  %3871 = vmatprep.subr.bf16.mxu1 %v6631_v1  ;;  %v6555_v4 = vld [vmem:[%s6744_s30 + $0x188] ss:$16 sps:$4 sm:$0xff]  }
 0x10f   : > { %2357 = vmatmul.mubr.bf16.gmra.mrb[96].mxu1 %v6535_v5  ;;  %2195 = vmatprep.mubr.bf16.mxu0 %v6536_v6  ;;  %v6556_v5 = vld [vmem:[%s6744_s30 + $0x1a4] ss:$16 sps:$4 sm:$0xff]   ;;  %v6557_v6 = vld [vmem:[%s6744_s30 + $0x1ac] ss:$16 sps:$4 sm:$0xff]  }
 0x110   : > { %2364 = vmatprep.mubr.bf16.mxu1 %v6537_v8  ;;  %3703 = vmatpush1.bf16.msra.mxu0 %v6360_v2 }
 0x111   : > { %3872 = vmatpush1.bf16.msra.mxu1 %v6361_v3  ;;  %3704 = vmatprep.subr.bf16.mxu0 %v6631_v1  ;;  %v6554_v3 = vld [vmem:[%s6744_s30 + $0x180] ss:$16 sps:$4 sm:$0xff]  }
 0x112   : > { %3873 = vmatprep.subr.bf16.mxu1 %v6631_v1 }
 0x114   : > { %3705 = vmatpush1.bf16.msra.mxu0 %v6362_v9 }
 0x115   : > { %3874 = vmatpush1.bf16.msra.mxu1 %v6363_v10  ;;  %4524 = vmatprep.subr.bf16.mxu0 %v6631_v1 }
 0x116   : > { %2196 = vmatmul.mubr.bf16.gmra.mrb[100].mxu0 %v6538_v11  ;;  %4693 = vmatprep.subr.bf16.mxu1 %v6631_v1 }
 0x117   : > { %2365 = vmatmul.mubr.bf16.gmra.mrb[100].mxu1 %v6539_v12  ;;  %2203 = vmatprep.mubr.bf16.mxu0 %v6540_v13 }
 0x118   : > { %2372 = vmatprep.mubr.bf16.mxu1 %v6541_v14 }
 0x11e   : > { %2204 = vmatmul.mubr.bf16.gmra.mrb[104].mxu0 %v6542_v15 }
 0x11f   : > { %2373 = vmatmul.mubr.bf16.gmra.mrb[104].mxu1 %v6543_v41  ;;  %2211 = vmatprep.mubr.bf16.mxu0 %v6544_v7 }
 0x120   : > { %2380 = vmatprep.mubr.bf16.mxu1 %v6545_v19  ;;  %v6558_v19 = vld [vmem:[%s6744_s30 + $0x1a0] ss:$16 sps:$4 sm:$0xff]  }
 0x121   : > { %v1535_v20 = vpop.f32.mrb[0].mxu0 }
 0x122   : > { %v1704_v24 = vpop.f32.mrb[0].mxu1  ;;  %v1537_v25 = vpop.f32.mrb[1].mxu0 }
 0x123   : > { %v1706_v26 = vpop.f32.mrb[1].mxu1  ;;  %v1538_v27 = vpop.f32.mrb[2].mxu0  ;;  %v7547_v34 = vadd.f32 %v1704_v24, %v1535_v20  ;;  %v6559_v20 = vld [vmem:[%s6744_s30 + $0x1a8] ss:$16 sps:$4 sm:$0xff]   ;;  %v6560_v24 = vld [vmem:[%s6744_s30 + $0x1c4] ss:$16 sps:$4 sm:$0xff]  }
 0x124   : > { %v1707_v28 = vpop.f32.mrb[2].mxu1  ;;  %v1540_v31 = vpop.f32.mrb[3].mxu0  ;;  %v2437_v26 = vld [vmem:[%s6744_s30 + $0x20] sm:$0xff] }
 0x125   : > { %v1709_v33 = vpop.f32.mrb[3].mxu1  ;;  %v7549_v35 = vadd.f32 %v1707_v28, %v1538_v27  ;;  %v2439_v27 = vld [vmem:[%s6744_s30 + $0x30] sm:$0xff] }
 0x126   : > { %2212 = vmatmul.mubr.bf16.gmra.mrb[108].mxu0 %v6546_v36  ;;  %v2438_v36 = vld [vmem:[%s6744_s30 + $0x28] sm:$0xff] }
 0x127   : > { %2381 = vmatmul.mubr.bf16.gmra.mrb[108].mxu1 %v6547_v37  ;;  %2219 = vmatprep.mubr.bf16.mxu0 %v6548_v29  ;;  %v2440_v37 = vld [vmem:[%s6744_s30 + $0x38] sm:$0xff] }
 0x128   : > { %2388 = vmatprep.mubr.bf16.mxu1 %v6549_v30 }
 0x129   : > { %v1543_v40 = vpop.f32.mrb[4].mxu0 }
 0x12a   : > { %v1712_v42 = vpop.f32.mrb[4].mxu1  ;;  %v1545_v43 = vpop.f32.mrb[5].mxu0 }
 0x12b   : > { %v1714_v44 = vpop.f32.mrb[5].mxu1  ;;  %v1546_v46 = vpop.f32.mrb[6].mxu0  ;;  %v7558_v55 = vadd.f32 %v1712_v42, %v1543_v40 }
 0x12c   : > { %v1715_v47 = vpop.f32.mrb[6].mxu1  ;;  %v1548_v48 = vpop.f32.mrb[7].mxu0  ;;  %v5774_v44 = vcombine.high %v2437_v26, %v2439_v27 }
 0x12d   : > { %v1717_v49 = vpop.f32.mrb[7].mxu1  ;;  %v7561_v57 = vadd.f32 %v1715_v47, %v1546_v46  ;;  %v5776_v47 = vcombine.high %v2438_v36, %v2440_v37  ;;  %v7592_v48 = vld [vmem:[%s6744_s30 + $0x44] ss:$16 sps:$4 sm:$0xff]  }
 0x12e   : > { %2220 = vmatmul.mubr.bf16.gmra.mrb[112].mxu0 %v6550_v50  ;;  %v2869_v49 = vshll.u32 %v5774_v44, 16 }
 0x12f   : > { %2389 = vmatmul.mubr.bf16.gmra.mrb[112].mxu1 %v6551_v51  ;;  %2227 = vmatprep.mubr.bf16.mxu0 %v6552_v52  ;;  %v7595_v51 = vld [vmem:[%s6744_s30 + $0x4c] ss:$16 sps:$4 sm:$0xff]   ;;  %v2893_v52 = vshll.u32 %v5776_v47, 16 }
 0x130   : > { %2396 = vmatprep.mubr.bf16.mxu1 %v6553_v56 }
 0x131   : > { %v1551_v58 = vpop.f32.mrb[8].mxu0 }
 0x132   : > { %v1720_v60 = vpop.f32.mrb[8].mxu1  ;;  %v1553_v53 = vpop.f32.mrb[9].mxu0 }
 0x133   : > { %v1722_v22 = vpop.f32.mrb[9].mxu1  ;;  %v1554_v54 = vpop.f32.mrb[10].mxu0  ;;  %v7563_v59 = vadd.f32 %v1720_v60, %v1551_v58  ;;  %v5773_v60 = vcombine.low %v2437_v26, %v2439_v27  ;;  %v7618_v27 = vld [vmem:[%s6744_s30 + $0x6c] ss:$16 sps:$4 sm:$0xff]  }
 0x134   : > { %v1723_v62 = vpop.f32.mrb[10].mxu1  ;;  %v1556_v0 = vpop.f32.mrb[11].mxu0 }
 0x135   : > { %v1725_v2 = vpop.f32.mrb[11].mxu1  ;;  %v7569_v9 = vadd.f32 %v1723_v62, %v1554_v54  ;;  %v2871_v62 = vrot.slane %v2869_v49, 1  ;;  %v2874_v0 = vshll.u32 %v7592_v48, 16 }
 0x136   : > { %2228 = vmatmul.mubr.bf16.gmra.mrb[116].mxu0 %v6554_v3 }
 0x137   : > { %2397 = vmatmul.mubr.bf16.gmra.mrb[116].mxu1 %v6555_v4  ;;  %2235 = vmatprep.mubr.bf16.mxu0 %v6556_v5  ;;  %v2891_v4 = vshrl.u32 %v5776_v47, 16  ;;  %v2895_v5 = vrot.slane %v2893_v52, 1  ;;  %v2910_v47 = vshrl.u32 %v7592_v48, 16  ;;  %v7637_v48 = vld [vmem:[%s6744_s30 + $0x68] ss:$16 sps:$4 sm:$0xff]  }
 0x138   : > { %2404 = vmatprep.mubr.bf16.mxu1 %v6557_v6  ;;  %v2898_v6 = vshll.u32 %v7595_v51, 16 }
 0x139   : > { %v1559_v8 = vpop.f32.mrb[12].mxu0 }
 0x13a   : > { %v1728_v10 = vpop.f32.mrb[12].mxu1  ;;  %v1561_v11 = vpop.f32.mrb[13].mxu0 }
 0x13b   : > { %v1730_v12 = vpop.f32.mrb[13].mxu1  ;;  %v1562_v13 = vpop.f32.mrb[14].mxu0  ;;  %v7571_v14 = vadd.f32 %v1728_v10, %v1559_v8  ;;  %v7605_v8 = vld [vmem:[%s6744_s30 + $0x40] ss:$16 sps:$4 sm:$0xff]   ;;  %v2857_v10 = vshll.u32 %v5773_v60, 16 }
 0x13c   : > { %v1731_v15 = vpop.f32.mrb[14].mxu1  ;;  %v1564_v41 = vpop.f32.mrb[15].mxu0  ;;  %v7610_v11 = vld [vmem:[%s6744_s30 + $0x48] ss:$16 sps:$4 sm:$0xff]  }
 0x13d   : > { %v1733_v7 = vpop.f32.mrb[15].mxu1  ;;  %v7579_v28 = vadd.f32 %v1731_v15, %v1562_v13  ;;  %v2876_v15 = vrot.slane %v2874_v0, 1  ;;  %v2859_v26 = vrot.slane %v2857_v10, 1 }
 0x13e   : > { %2236 = vmatmul.mubr.bf16.gmra.mrb[120].mxu0 %v6558_v19  ;;  %v2896_v7 = vor.u32 %v2895_v5, %v2891_v4  ;;  %v2900_v19 = vrot.slane %v2898_v6, 1 }
 0x13f   : > { %2405 = vmatmul.mubr.bf16.gmra.mrb[120].mxu1 %v6559_v20  ;;  %2243 = vmatprep.mubr.bf16.mxu0 %v6560_v24  ;;  %v2855_v20 = vshrl.u32 %v5773_v60, 16 }
 0x140   : > { %2412 = vmatprep.mubr.bf16.mxu1 %v7281_v61 }
 0x141   : > { %v1567_v25 = vpop.f32.mrb[16].mxu0 }
 0x142   : > { %v1736_v31 = vpop.f32.mrb[16].mxu1  ;;  %v1569_v33 = vpop.f32.mrb[17].mxu0 }
 0x143   : > { %v7583_v29 = vadd.f32 %v1736_v31, %v1567_v25  ;;  %v1738_v30 = vpop.f32.mrb[17].mxu1  ;;  %v1570_v40 = vpop.f32.mrb[18].mxu0 }
 0x144   : > { %v1739_v42 = vpop.f32.mrb[18].mxu1  ;;  %v1572_v43 = vpop.f32.mrb[19].mxu0 }
 0x145   : > { %v7585_v46 = vadd.f32 %v1739_v42, %v1570_v40  ;;  %v1741_v61 = vpop.f32.mrb[19].mxu1 }
 0x146   : > { %2244 = vmatmul.mubr.bf16.gmra.mrb[124].mxu0 %v7304_v16  ;;  %v2901_v61 = vsel %vm680_vm0, %v2896_v7, %v2900_v19 }
 0x147   : > { %2413 = vmatmul.mubr.bf16.gmra.mrb[124].mxu1 %v7308_v17  ;;  %2251 = vmatprep.mubr.bf16.mxu0 %v7312_v18  ;;  %v5775_v17 = vcombine.low %v2438_v36, %v2440_v37  ;;  %v2886_v37 = vshll.u32 %v7610_v11, 16 }
 0x148   : > { %2420 = vmatprep.mubr.bf16.mxu1 %v7315_v23  ;;  %v2867_v23 = vshrl.u32 %v5774_v44, 16 }
 0x149   : > { %v1575_v50 = vpop.f32.mrb[20].mxu0  ;;  %v2881_v12 = vshll.u32 %v5775_v17, 16 }
 0x14a   : > { %v1744_v56 = vpop.f32.mrb[20].mxu1  ;;  %v1577_v58 = vpop.f32.mrb[21].mxu0  ;;  %v2872_v13 = vor.u32 %v2871_v62, %v2867_v23  ;;  %v7643_v23 = vld [vmem:[%s6744_s30 + $0x8c] ss:$16 sps:$4 sm:$0xff]  }
 0x14b   : > { %v7597_v53 = vadd.f32 %v1744_v56, %v1575_v50  ;;  %v1746_v16 = vpop.f32.mrb[21].mxu1  ;;  %v1578_v22 = vpop.f32.mrb[22].mxu0  ;;  %v2883_v36 = vrot.slane %v2881_v12, 1  ;;  %v2860_v50 = vor.u32 %v2859_v26, %v2855_v20  ;;  %v2926_v56 = vshrl.u32 %v7595_v51, 16  ;;  %v6374_v12 = vld [vmem:[%s8772_s1 + $0x300] sm:$0xff]  }
 0x14c   : > { %v1747_v18 = vpop.f32.mrb[22].mxu1  ;;  %v1580_v54 = vpop.f32.mrb[23].mxu0  ;;  %v2877_v42 = vsel %vm680_vm0, %v2872_v13, %v2876_v15  ;;  %v2930_v58 = vshll.u32 %v7618_v27, 16  ;;  %v2888_v16 = vrot.slane %v2886_v37, 1  ;;  %v6375_v13 = vld [vmem:[%s8772_s1 + $0x380] sm:$0xff]   ;;  %v2918_v20 = vshrl.u32 %v7610_v11, 16 }
 0x14d   : > { %v7600_v2 = vadd.f32 %v1747_v18, %v1578_v22  ;;  %v1749_v3 = vpop.f32.mrb[23].mxu1  ;;  %v7634_v22 = vld [vmem:[%s6744_s30 + $0x60] ss:$16 sps:$4 sm:$0xff]   ;;  %v2912_v18 = vor.u32 %v2910_v47, %v2876_v15  ;;  %v2902_v15 = vshrl.u32 %v7605_v8, 16  ;;  %v7671_v37 = vld [vmem:[%s6744_s30 + $0x88] ss:$16 sps:$4 sm:$0xff]  }
 0x14e   : > { %2252 = vmatmul.mubr.bf16.gmra.mrb[128].mxu0 %v7321_v32  ;;  %v7614_v32 = vld [vmem:[%s6744_s30 + $0x64] ss:$16 sps:$4 sm:$0xff]   ;;  %v2932_v3 = vrot.slane %v2930_v58, 1  ;;  %v7668_v11 = vld [vmem:[%s6744_s30 + $0x80] ss:$16 sps:$4 sm:$0xff]  }
 0x14f   : > { %2421 = vmatmul.mubr.bf16.gmra.mrb[128].mxu1 %v7331_v38  ;;  %2259 = vmatprep.mubr.bf16.mxu0 %v7334_v39  ;;  %v2862_v38 = vshll.u32 %v7605_v8, 16  ;;  %v2914_v49 = vshll.u32 %v7614_v32, 16  ;;  %v2958_v8 = vshrl.u32 %v7618_v27, 16  ;;  %v2920_v27 = vor.u32 %v2918_v20, %v2888_v16  ;;  %v7684_v58 = vld [vmem:[%s6744_s30 + $0xac] ss:$16 sps:$4 sm:$0xff]  }
 0x150   : > { %2428 = vmatprep.mubr.bf16.mxu1 %v7338_v45  ;;  %v2879_v45 = vshrl.u32 %v5775_v17, 16  ;;  %v7640_v17 = vld [vmem:[%s6744_s30 + $0x84] ss:$16 sps:$4 sm:$0xff]   ;;  %v2990_v20 = vshrl.u32 %v7643_v23, 16 }
 0x151   : > { %v1583_v41 = vpop.f32.mrb[24].mxu0  ;;  %v2864_v52 = vrot.slane %v2862_v38, 1  ;;  %v2916_v54 = vrot.slane %v2914_v49, 1  ;;  %v2946_v26 = vshll.u32 %v7640_v17, 16  ;;  %v7680_v49 = vld [vmem:[%s6744_s30 + $0xa4] ss:$16 sps:$4 sm:$0xff]  }
 0x152   : > { %v1752_v24 = vpop.f32.mrb[24].mxu1  ;;  %v1585_v25 = vpop.f32.mrb[25].mxu0  ;;  %v2884_v60 = vor.u32 %v2883_v36, %v2879_v45  ;;  %v2962_v45 = vshll.u32 %v7643_v23, 16  ;;  %v6398_v23 = vld [vmem:[%s8772_s1 + $0x318] sm:$0xff]  }
 0x153   : > { %v7620_v39 = vadd.f32 %v1752_v24, %v1583_v41  ;;  %v1754_v31 = vpop.f32.mrb[25].mxu1  ;;  %v1586_v33 = vpop.f32.mrb[26].mxu0  ;;  %v2865_v0 = vsel %vm680_vm0, %v2860_v50, %v2864_v52  ;;  %v2906_v41 = vshll.u32 %v7634_v22, 16  ;;  %v2922_v24 = vshll.u32 %v7637_v48, 16 }
 0x154   : > { %v1755_v30 = vpop.f32.mrb[26].mxu1  ;;  %v1588_v40 = vpop.f32.mrb[27].mxu0  ;;  %v2889_v10 = vsel %vm680_vm0, %v2884_v60, %v2888_v16  ;;  %v2942_v25 = vshrl.u32 %v7614_v32, 16  ;;  %v2904_v32 = vor.u32 %v2902_v15, %v2864_v52  ;;  %v2948_v47 = vrot.slane %v2946_v26, 1 }
 0x155   : > { %v7624_v43 = vadd.f32 %v1755_v30, %v1586_v33  ;;  %v1757_v44 = vpop.f32.mrb[27].mxu1  ;;  %v2917_v33 = vsel %vm680_vm0, %v2912_v18, %v2916_v54  ;;  %v2908_v30 = vrot.slane %v2906_v41, 1  ;;  %v6382_v40 = vld [vmem:[%s8772_s1 + $0x308] sm:$0xff]   ;;  %v2960_v52 = vor.u32 %v2958_v8, %v2932_v3 }
 0x156   : > { %2260 = vmatmul.mubr.bf16.gmra.mrb[132].mxu0 %v7348_v21  ;;  %v6383_v44 = vld [vmem:[%s8772_s1 + $0x388] sm:$0xff]   ;;  %v2934_v16 = vshrl.u32 %v7634_v22, 16  ;;  %v2938_v18 = vshll.u32 %v7668_v11, 16 }
 0x157   : > { %2429 = vmatmul.mubr.bf16.gmra.mrb[132].mxu1 %v7356_v63  ;;  %3706 = vmatprep.mubr.bf16.mxu0 %v2877_v42  ;;  %v2928_v63 = vor.u32 %v2926_v56, %v2900_v19  ;;  %v2924_v42 = vrot.slane %v2922_v24, 1  ;;  %v2964_v56 = vrot.slane %v2962_v45, 1 }
 0x158   : > { %3875 = vmatprep.mubr.bf16.mxu1 %v2901_v61  ;;  %v2944_v61 = vor.u32 %v2942_v25, %v2916_v54  ;;  %v2950_v54 = vshrl.u32 %v7637_v48, 16  ;;  %v6390_v48 = vld [vmem:[%s8772_s1 + $0x310] sm:$0xff]   ;;  %v2936_v24 = vor.u32 %v2934_v16, %v2908_v30  ;;  %v2940_v25 = vrot.slane %v2938_v18, 1 }
 0x159   : > { %v1591_v21 = vpop.f32.mrb[28].mxu0  ;;  %v2933_v36 = vsel %vm680_vm0, %v2928_v63, %v2932_v3  ;;  %v2909_v3 = vsel %vm680_vm0, %v2904_v32, %v2908_v30  ;;  %v7721_v32 = vld [vmem:[%s6744_s30 + $0xc4] ss:$16 sps:$4 sm:$0xff]   ;;  %v2966_v16 = vshrl.u32 %v7668_v11, 16 }
 0x15a   : > { %v1760_v51 = vpop.f32.mrb[28].mxu1  ;;  %v1593_v62 = vpop.f32.mrb[29].mxu0  ;;  %v2949_v22 = vsel %vm680_vm0, %v2944_v61, %v2948_v47  ;;  %v2952_v26 = vor.u32 %v2950_v54, %v2924_v42  ;;  %v2982_v54 = vshrl.u32 %v7671_v37, 16  ;;  %v6406_v11 = vld [vmem:[%s8772_s1 + $0x320] sm:$0xff]  }
 0x15b   : > { %v7646_v4 = vadd.f32 %v1760_v51, %v1591_v21  ;;  %v1762_v5 = vpop.f32.mrb[29].mxu1  ;;  %v1594_v6 = vpop.f32.mrb[30].mxu0  ;;  %v2954_v51 = vshll.u32 %v7671_v37, 16 }
 0x15c   : > { %v1763_v7 = vpop.f32.mrb[30].mxu1  ;;  %v1596_v19 = vpop.f32.mrb[31].mxu0 }
 0x15d   : > { %v7661_v38 = vadd.f32 %v1763_v7, %v1594_v6  ;;  %v1765_v31 = vpop.f32.mrb[31].mxu1  ;;  %v2965_v7 = vsel %vm680_vm0, %v2960_v52, %v2964_v56  ;;  %v6391_v19 = vld [vmem:[%s8772_s1 + $0x390] sm:$0xff]  }
 0x15e   : > { %3707 = vmatmul.mubr.bf16.vlgmr.msra.gmra.mrb[136].mxu0 %v2865_v0  ;;  %v2956_v31 = vrot.slane %v2954_v51, 1 }
 0x15f   : > { %3876 = vmatmul.mubr.bf16.vlgmr.msra.gmra.mrb[136].mxu1 %v2889_v10  ;;  %4525 = vmatpush1.bf16.msra.mxu0 %v6374_v12  ;;  %v2925_v10 = vsel %vm680_vm0, %v2920_v27, %v2924_v42  ;;  %v2974_v12 = vshrl.u32 %v7640_v17, 16  ;;  %v2994_v17 = vshll.u32 %v7684_v58, 16  ;;  %v6399_v42 = vld [vmem:[%s8772_s1 + $0x398] sm:$0xff]  }
 0x160   : > { %4694 = vmatpush1.bf16.msra.mxu1 %v6375_v13  ;;  %3714 = vmatprep.mubr.bf16.mxu0 %v2917_v33  ;;  %v2978_v13 = vshll.u32 %v7680_v49, 16  ;;  %v7712_v33 = vld [vmem:[%s6744_s30 + $0xa0] ss:$16 sps:$4 sm:$0xff]   ;;  %v2957_v52 = vsel %vm680_vm0, %v2952_v26, %v2956_v31  ;;  %v7762_v26 = vld [vmem:[%s6744_s30 + $0xe4] ss:$16 sps:$4 sm:$0xff]  }
 0x161   : > { %v1599_v50 = vpop.f32.mrb[32].mxu0  ;;  %3883 = vmatprep.mubr.bf16.mxu1 %v2933_v36  ;;  %4526 = vmatprep.subr.bf16.mxu0 %v6631_v1  ;;  %v2976_v8 = vor.u32 %v2974_v12, %v2948_v47  ;;  %v7715_v36 = vld [vmem:[%s6744_s30 + $0xa8] ss:$16 sps:$4 sm:$0xff]   ;;  %v2996_v27 = vrot.slane %v2994_v17, 1  ;;  %v2970_v18 = vshll.u32 %v7712_v33, 16 }
 0x162   : > { %v1768_v60 = vpop.f32.mrb[32].mxu1  ;;  %v1601_v21 = vpop.f32.mrb[33].mxu0  ;;  %4695 = vmatprep.subr.bf16.mxu1 %v6631_v1  ;;  %v2980_v45 = vrot.slane %v2978_v13, 1  ;;  %v7755_v13 = vld [vmem:[%s6744_s30 + $0xc0] ss:$16 sps:$4 sm:$0xff]  }
 0x163   : > { %v7691_v62 = vadd.f32 %v1768_v60, %v1599_v50  ;;  %v1770_v0 = vpop.f32.mrb[33].mxu1  ;;  %v1602_v63 = vpop.f32.mrb[34].mxu0  ;;  %4527 = vmatpush1.bf16.msra.mxu0 %v6382_v40  ;;  %v2992_v40 = vor.u32 %v2990_v20, %v2964_v56  ;;  %v2941_v50 = vsel %vm680_vm0, %v2936_v24, %v2940_v25 }
 0x164   : > { %v1771_v5 = vpop.f32.mrb[34].mxu1  ;;  %v1604_v6 = vpop.f32.mrb[35].mxu0  ;;  %4696 = vmatpush1.bf16.msra.mxu1 %v6383_v44  ;;  %4528 = vmatprep.subr.bf16.mxu0 %v6631_v1  ;;  %v7728_v44 = vld [vmem:[%s6744_s30 + $0xcc] ss:$16 sps:$4 sm:$0xff]  }
 0x165   : > { %v7702_v15 = vadd.f32 %v1771_v5, %v1602_v63  ;;  %v1773_v41 = vpop.f32.mrb[35].mxu1  ;;  %4697 = vmatprep.subr.bf16.mxu1 %v6631_v1  ;;  %v2981_v63 = vsel %vm680_vm0, %v2976_v8, %v2980_v45  ;;  %v3006_v5 = vshrl.u32 %v7680_v49, 16  ;;  %v3010_v6 = vshll.u32 %v7721_v32, 16  ;;  %v6407_v49 = vld [vmem:[%s8772_s1 + $0x3a0] sm:$0xff]   ;;  %v6414_v8 = vld [vmem:[%s8772_s1 + $0x328] sm:$0xff]  }
 0x166   : > { %3715 = vmatmul.mubr.bf16.gmra.mrb[140].mxu0 %v2909_v3  ;;  %v2986_v3 = vshll.u32 %v7715_v36, 16  ;;  %v3026_v12 = vshll.u32 %v7728_v44, 16  ;;  %v7758_v41 = vld [vmem:[%s6744_s30 + $0xc8] ss:$16 sps:$4 sm:$0xff]  }
 0x167   : > { %3884 = vmatmul.mubr.bf16.gmra.mrb[140].mxu1 %v2925_v10  ;;  %3722 = vmatprep.mubr.bf16.mxu0 %v2949_v22  ;;  %v2997_v22 = vsel %vm680_vm0, %v2992_v40, %v2996_v27  ;;  %v3008_v17 = vor.u32 %v3006_v5, %v2980_v45  ;;  %v3012_v24 = vrot.slane %v3010_v6, 1 }
 0x168   : > { %3891 = vmatprep.mubr.bf16.mxu1 %v2965_v7  ;;  %4529 = vmatpush1.bf16.msra.mxu0 %v6390_v48  ;;  %v3022_v48 = vshrl.u32 %v7684_v58, 16  ;;  %v2968_v58 = vor.u32 %v2966_v16, %v2940_v25  ;;  %v2972_v7 = vrot.slane %v2970_v18, 1  ;;  %v2988_v20 = vrot.slane %v2986_v3, 1  ;;  %v6415_v25 = vld [vmem:[%s8772_s1 + $0x3a8] sm:$0xff]  }
 0x169   : > { %v1607_v30 = vpop.f32.mrb[36].mxu0  ;;  %4698 = vmatpush1.bf16.msra.mxu1 %v6391_v19  ;;  %4530 = vmatprep.subr.bf16.mxu0 %v6631_v1  ;;  %v2984_v19 = vor.u32 %v2982_v54, %v2956_v31  ;;  %v3028_v40 = vrot.slane %v3026_v12, 1 }
 0x16a   : > { %v1776_v61 = vpop.f32.mrb[36].mxu1  ;;  %v1609_v47 = vpop.f32.mrb[37].mxu0  ;;  %4699 = vmatprep.subr.bf16.mxu1 %v6631_v1  ;;  %v2973_v16 = vsel %vm680_vm0, %v2968_v58, %v2972_v7 }
 0x16b   : > { %v7733_v60 = vadd.f32 %v1776_v61, %v1607_v30  ;;  %v1778_v56 = vpop.f32.mrb[37].mxu1  ;;  %v1610_v21 = vpop.f32.mrb[38].mxu0  ;;  %v3024_v30 = vor.u32 %v3022_v48, %v2996_v27  ;;  %v2998_v61 = vshrl.u32 %v7712_v33, 16  ;;  %v3002_v47 = vshll.u32 %v7755_v13, 16 }
 0x16c   : > { %v1779_v51 = vpop.f32.mrb[38].mxu1  ;;  %v1612_v0 = vpop.f32.mrb[39].mxu0  ;;  %4531 = vmatpush1.bf16.msra.mxu0 %v6398_v23  ;;  %v3018_v27 = vshll.u32 %v7758_v41, 16  ;;  %v3013_v33 = vsel %vm680_vm0, %v3008_v17, %v3012_v24  ;;  %v7803_v17 = vld [vmem:[%s6744_s30 + $0xe8] ss:$16 sps:$4 sm:$0xff]  }
 0x16d   : > { %v7745_v10 = vadd.f32 %v1779_v51, %v1610_v21  ;;  %v1781_v37 = vpop.f32.mrb[39].mxu1  ;;  %4700 = vmatpush1.bf16.msra.mxu1 %v6399_v42  ;;  %4532 = vmatprep.subr.bf16.mxu0 %v6631_v1  ;;  %v7768_v42 = vld [vmem:[%s6744_s30 + $0xec] ss:$16 sps:$4 sm:$0xff]   ;;  %v2989_v51 = vsel %vm680_vm0, %v2984_v19, %v2988_v20  ;;  %v3038_v0 = vshrl.u32 %v7721_v32, 16  ;;  %v3029_v6 = vsel %vm680_vm0, %v3024_v30, %v3028_v40  ;;  %v6423_v32 = vld [vmem:[%s8772_s1 + $0x3b0] sm:$0xff]  }
 0x16e   : > { %3723 = vmatmul.mubr.bf16.gmra.mrb[144].mxu0 %v2941_v50  ;;  %4701 = vmatprep.subr.bf16.mxu1 %v6631_v1  ;;  %v3014_v50 = vshrl.u32 %v7715_v36, 16  ;;  %v3042_v36 = vshll.u32 %v7762_v26, 16  ;;  %v3058_v37 = vshll.u32 %v7768_v42, 16  ;;  %v3004_v48 = vrot.slane %v3002_v47, 1 }
 0x16f   : > { %3892 = vmatmul.mubr.bf16.gmra.mrb[144].mxu1 %v2957_v52  ;;  %3730 = vmatprep.mubr.bf16.mxu0 %v2981_v63  ;;  %v6422_v63 = vld [vmem:[%s8772_s1 + $0x330] sm:$0xff]   ;;  %v3040_v58 = vor.u32 %v3038_v0, %v3012_v24  ;;  %v6431_v24 = vld [vmem:[%s8772_s1 + $0x3b8] sm:$0xff]   ;;  %v3070_v0 = vshrl.u32 %v7762_v26, 16  ;;  %v6439_v26 = vld [vmem:[%s8772_s1 + $0x3c0] sm:$0xff]  }
 0x170   : > { %3899 = vmatprep.mubr.bf16.mxu1 %v2997_v22  ;;  %4533 = vmatpush1.bf16.msra.mxu0 %v6406_v11  ;;  %v3054_v11 = vshrl.u32 %v7728_v44, 16  ;;  %v3000_v22 = vor.u32 %v2998_v61, %v2972_v7  ;;  %v3016_v12 = vor.u32 %v3014_v50, %v2988_v20  ;;  %v7800_v44 = vld [vmem:[%s6744_s30 + $0xe0] ss:$16 sps:$4 sm:$0xff]   ;;  %v3044_v19 = vrot.slane %v3042_v36, 1  ;;  %v6430_v7 = vld [vmem:[%s8772_s1 + $0x338] sm:$0xff]  }
 0x171   : > { %v1615_v23 = vpop.f32.mrb[40].mxu0  ;;  %4702 = vmatpush1.bf16.msra.mxu1 %v6407_v49  ;;  %4534 = vmatprep.subr.bf16.mxu0 %v6631_v1  ;;  %v3020_v49 = vrot.slane %v3018_v27, 1  ;;  %v3060_v30 = vrot.slane %v3058_v37, 1  ;;  %v7843_v37 = vld [vmem:[%s6744_s30 + $0x100] ss:$16 sps:$4 sm:$0xff]  }
 0x172   : > { %v1784_v31 = vpop.f32.mrb[40].mxu1  ;;  %v1617_v45 = vpop.f32.mrb[41].mxu0  ;;  %4703 = vmatprep.subr.bf16.mxu1 %v6631_v1  ;;  %v3005_v61 = vsel %vm680_vm0, %v3000_v22, %v3004_v48 }
 0x173   : > { %v7779_v52 = vadd.f32 %v1784_v31, %v1615_v23  ;;  %v1786_v56 = vpop.f32.mrb[41].mxu1  ;;  %v1618_v21 = vpop.f32.mrb[42].mxu0  ;;  %v3056_v23 = vor.u32 %v3054_v11, %v3028_v40  ;;  %v3021_v47 = vsel %vm680_vm0, %v3016_v12, %v3020_v49 }
 0x174   : > { %v1787_v18 = vpop.f32.mrb[42].mxu1  ;;  %v1620_v54 = vpop.f32.mrb[43].mxu0  ;;  %4535 = vmatpush1.bf16.msra.mxu0 %v6414_v8  ;;  %v7806_v8 = vld [vmem:[%s6744_s30 + $0x104] ss:$16 sps:$4 sm:$0xff]   ;;  %v3030_v56 = vshrl.u32 %v7755_v13, 16 }
 0x175   : > { %v7789_v3 = vadd.f32 %v1787_v18, %v1618_v21  ;;  %v1789_v5 = vpop.f32.mrb[43].mxu1  ;;  %4704 = vmatpush1.bf16.msra.mxu1 %v6415_v25  ;;  %4536 = vmatprep.subr.bf16.mxu0 %v6631_v1  ;;  %v7812_v25 = vld [vmem:[%s6744_s30 + $0x10c] ss:$16 sps:$4 sm:$0xff]   ;;  %v3034_v21 = vshll.u32 %v7800_v44, 16  ;;  %v3074_v36 = vshll.u32 %v7806_v8, 16  ;;  %v6438_v13 = vld [vmem:[%s8772_s1 + $0x340] sm:$0xff]  }
 0x176   : > { %3731 = vmatmul.mubr.bf16.gmra.mrb[148].mxu0 %v2973_v16  ;;  %4705 = vmatprep.subr.bf16.mxu1 %v6631_v1  ;;  %v3046_v16 = vshrl.u32 %v7758_v41, 16  ;;  %v3061_v5 = vsel %vm680_vm0, %v3056_v23, %v3060_v30  ;;  %v3090_v11 = vshll.u32 %v7812_v25, 16  ;;  %v7850_v23 = vld [vmem:[%s6744_s30 + $0x124] ss:$16 sps:$4 sm:$0xff]  }
 0x177   : > { %3900 = vmatmul.mubr.bf16.gmra.mrb[148].mxu1 %v2989_v51  ;;  %3738 = vmatprep.mubr.bf16.mxu0 %v3013_v33  ;;  %v3045_v51 = vsel %vm680_vm0, %v3040_v58, %v3044_v19  ;;  %v3050_v33 = vshll.u32 %v7803_v17, 16  ;;  %v3036_v22 = vrot.slane %v3034_v21, 1 }
 0x178   : > { %3907 = vmatprep.mubr.bf16.mxu1 %v3029_v6  ;;  %4537 = vmatpush1.bf16.msra.mxu0 %v6422_v63  ;;  %v3086_v6 = vshrl.u32 %v7768_v42, 16  ;;  %v3032_v42 = vor.u32 %v3030_v56, %v3004_v48  ;;  %v3048_v12 = vor.u32 %v3046_v16, %v3020_v49  ;;  %v6447_v48 = vld [vmem:[%s8772_s1 + $0x3c8] sm:$0xff]   ;;  %v3078_v56 = vshrl.u32 %v7803_v17, 16 }
 0x179   : > { %v1623_v20 = vpop.f32.mrb[44].mxu0  ;;  %4706 = vmatpush1.bf16.msra.mxu1 %v6423_v32  ;;  %4538 = vmatprep.subr.bf16.mxu0 %v6631_v1  ;;  %v7846_v32 = vld [vmem:[%s6744_s30 + $0x108] ss:$16 sps:$4 sm:$0xff]   ;;  %v3052_v58 = vrot.slane %v3050_v33, 1  ;;  %v3106_v17 = vshll.u32 %v7850_v23, 16 }
 0x17a   : > { %v1792_v31 = vpop.f32.mrb[44].mxu1  ;;  %v1625_v45 = vpop.f32.mrb[45].mxu0  ;;  %4707 = vmatprep.subr.bf16.mxu1 %v6631_v1 }
 0x17b   : > { %v7821_v50 = vadd.f32 %v1792_v31, %v1623_v20  ;;  %v1794_v40 = vpop.f32.mrb[45].mxu1  ;;  %v1626_v27 = vpop.f32.mrb[46].mxu0  ;;  %v3076_v20 = vrot.slane %v3074_v36, 1  ;;  %v3088_v45 = vor.u32 %v3086_v6, %v3060_v30  ;;  %v3082_v30 = vshll.u32 %v7846_v32, 16 }
 0x17c   : > { %v1795_v18 = vpop.f32.mrb[46].mxu1  ;;  %v1628_v54 = vpop.f32.mrb[47].mxu0  ;;  %4539 = vmatpush1.bf16.msra.mxu0 %v6430_v7  ;;  %v3072_v7 = vor.u32 %v3070_v0, %v3044_v19  ;;  %v7856_v40 = vld [vmem:[%s6744_s30 + $0x12c] ss:$16 sps:$4 sm:$0xff]   ;;  %v3053_v0 = vsel %vm680_vm0, %v3048_v12, %v3052_v58  ;;  %v3102_v36 = vshrl.u32 %v7806_v8, 16  ;;  %v6455_v8 = vld [vmem:[%s8772_s1 + $0x3d0] sm:$0xff]  }
 0x17d   : > { %v7833_v63 = vadd.f32 %v1795_v18, %v1626_v27  ;;  %v1797_v41 = vpop.f32.mrb[47].mxu1  ;;  %4708 = vmatpush1.bf16.msra.mxu1 %v6431_v24  ;;  %4540 = vmatprep.subr.bf16.mxu0 %v6631_v1  ;;  %v6446_v24 = vld [vmem:[%s8772_s1 + $0x348] sm:$0xff]   ;;  %v3066_v27 = vshll.u32 %v7843_v37, 16  ;;  %v3037_v54 = vsel %vm680_vm0, %v3032_v42, %v3036_v22 }
 0x17e   : > { %3739 = vmatmul.mubr.bf16.gmra.mrb[152].mxu0 %v3005_v61  ;;  %4709 = vmatprep.subr.bf16.mxu1 %v6631_v1  ;;  %v3092_v61 = vrot.slane %v3090_v11, 1  ;;  %v3118_v11 = vshrl.u32 %v7812_v25, 16  ;;  %v7888_v25 = vld [vmem:[%s6744_s30 + $0x120] ss:$16 sps:$4 sm:$0xff]  }
 0x17f   : > { %3908 = vmatmul.mubr.bf16.gmra.mrb[152].mxu1 %v3021_v47  ;;  %3746 = vmatprep.mubr.bf16.mxu0 %v3045_v51  ;;  %v3062_v47 = vshrl.u32 %v7800_v44, 16  ;;  %v3077_v44 = vsel %vm680_vm0, %v3072_v7, %v3076_v20  ;;  %v3068_v12 = vrot.slane %v3066_v27, 1  ;;  %v3080_v7 = vor.u32 %v3078_v56, %v3052_v58  ;;  %v7900_v27 = vld [vmem:[%s6744_s30 + $0x14c] ss:$16 sps:$4 sm:$0xff]  }
 0x180   : > { %3915 = vmatprep.mubr.bf16.mxu1 %v3061_v5  ;;  %4541 = vmatpush1.bf16.msra.mxu0 %v6438_v13  ;;  %v6454_v13 = vld [vmem:[%s8772_s1 + $0x350] sm:$0xff]   ;;  %v3093_v6 = vsel %vm680_vm0, %v3088_v45, %v3092_v61  ;;  %v3108_v45 = vrot.slane %v3106_v17, 1 }
 0x181   : > { %v1631_v31 = vpop.f32.mrb[48].mxu0  ;;  %4710 = vmatpush1.bf16.msra.mxu1 %v6439_v26  ;;  %4542 = vmatprep.subr.bf16.mxu0 %v6631_v1  ;;  %v3122_v26 = vshll.u32 %v7856_v40, 16  ;;  %v3064_v42 = vor.u32 %v3062_v47, %v3036_v22  ;;  %v6466_v22 = vld [vmem:[%s8772_s1 + $0x358] sm:$0xff]  }
 0x182   : > { %v1800_v49 = vpop.f32.mrb[48].mxu1  ;;  %v1633_v19 = vpop.f32.mrb[49].mxu0  ;;  %4711 = vmatprep.subr.bf16.mxu1 %v6631_v1 }
 0x183   : > { %v7867_v21 = vadd.f32 %v1800_v49, %v1631_v31  ;;  %v1802_v16 = vpop.f32.mrb[49].mxu1  ;;  %v1634_v18 = vpop.f32.mrb[50].mxu0  ;;  %v3104_v31 = vor.u32 %v3102_v36, %v3076_v20  ;;  %v7894_v49 = vld [vmem:[%s6744_s30 + $0x144] ss:$16 sps:$4 sm:$0xff]   ;;  %v3120_v19 = vor.u32 %v3118_v11, %v3092_v61  ;;  %v3124_v47 = vrot.slane %v3122_v26, 1  ;;  %v6467_v20 = vld [vmem:[%s8772_s1 + $0x3d8] sm:$0xff]  }
 0x184   : > { %v1803_v51 = vpop.f32.mrb[50].mxu1  ;;  %v1636_v33 = vpop.f32.mrb[51].mxu0  ;;  %4543 = vmatpush1.bf16.msra.mxu0 %v6446_v24  ;;  %v3084_v24 = vrot.slane %v3082_v30, 1  ;;  %v3069_v16 = vsel %vm680_vm0, %v3064_v42, %v3068_v12  ;;  %v3138_v11 = vshll.u32 %v7894_v49, 16  ;;  %v3150_v42 = vshrl.u32 %v7856_v40, 16 }
 0x185   : > { %v7877_v41 = vadd.f32 %v1803_v51, %v1634_v18  ;;  %v1805_v5 = vpop.f32.mrb[51].mxu1  ;;  %4712 = vmatpush1.bf16.msra.mxu1 %v6447_v48  ;;  %4544 = vmatprep.subr.bf16.mxu0 %v6631_v1  ;;  %v7891_v48 = vld [vmem:[%s6744_s30 + $0x128] ss:$16 sps:$4 sm:$0xff]   ;;  %v3094_v33 = vshrl.u32 %v7843_v37, 16  ;;  %v6474_v37 = vld [vmem:[%s8772_s1 + $0x360] sm:$0xff]  }
 0x186   : > { %3747 = vmatmul.mubr.bf16.gmra.mrb[156].mxu0 %v3037_v54  ;;  %4713 = vmatprep.subr.bf16.mxu1 %v6631_v1  ;;  %v3085_v18 = vsel %vm680_vm0, %v3080_v7, %v3084_v24  ;;  %v3114_v5 = vshll.u32 %v7891_v48, 16  ;;  %v3154_v7 = vshll.u32 %v7900_v27, 16 }
 0x187   : > { %3916 = vmatmul.mubr.bf16.gmra.mrb[156].mxu1 %v3053_v0  ;;  %3754 = vmatprep.mubr.bf16.mxu0 %v3077_v44  ;;  %v3098_v0 = vshll.u32 %v7888_v25, 16  ;;  %v3110_v44 = vshrl.u32 %v7846_v32, 16  ;;  %v3096_v40 = vor.u32 %v3094_v33, %v3068_v12  ;;  %v6485_v12 = vld [vmem:[%s8772_s1 + $0x3e8] sm:$0xff]  }
 0x188   : > { %3923 = vmatprep.mubr.bf16.mxu1 %v3093_v6  ;;  %4545 = vmatpush1.bf16.msra.mxu0 %v6454_v13  ;;  %v3109_v13 = vsel %vm680_vm0, %v3104_v31, %v3108_v45  ;;  %v3134_v6 = vshrl.u32 %v7850_v23, 16  ;;  %v6475_v23 = vld [vmem:[%s8772_s1 + $0x3e0] sm:$0xff]  }
 0x189   : > { %v1639_v58 = vpop.f32.mrb[52].mxu0  ;;  %4714 = vmatpush1.bf16.msra.mxu1 %v6455_v8  ;;  %4546 = vmatprep.subr.bf16.mxu0 %v6631_v1  ;;  %v3125_v8 = vsel %vm680_vm0, %v3120_v19, %v3124_v47  ;;  %v7931_v31 = vld [vmem:[%s6744_s30 + $0x140] ss:$16 sps:$4 sm:$0xff]   ;;  %v3112_v19 = vor.u32 %v3110_v44, %v3084_v24 }
 0x18a   : > { %v1808_v56 = vpop.f32.mrb[52].mxu1  ;;  %v1641_v30 = vpop.f32.mrb[53].mxu0  ;;  %4715 = vmatprep.subr.bf16.mxu1 %v6631_v1  ;;  %v3130_v33 = vshll.u32 %v7931_v31, 16 }
 0x18b   : > { %v7909_v54 = vadd.f32 %v1808_v56, %v1639_v58  ;;  %v1810_v61 = vpop.f32.mrb[53].mxu1  ;;  %v1642_v51 = vpop.f32.mrb[54].mxu0  ;;  %v3100_v58 = vrot.slane %v3098_v0, 1  ;;  %v3136_v56 = vor.u32 %v3134_v6, %v3108_v45  ;;  %v3140_v30 = vrot.slane %v3138_v11, 1 }
 0x18c   : > { %v1811_v36 = vpop.f32.mrb[54].mxu1  ;;  %v1644_v17 = vpop.f32.mrb[55].mxu0  ;;  %4547 = vmatpush1.bf16.msra.mxu0 %v6466_v22  ;;  %v7934_v22 = vld [vmem:[%s6744_s30 + $0x148] ss:$16 sps:$4 sm:$0xff]   ;;  %v7938_v61 = vld [vmem:[%s6744_s30 + $0x164] ss:$16 sps:$4 sm:$0xff]  }
 0x18d   : > { %v7921_v26 = vadd.f32 %v1811_v36, %v1642_v51  ;;  %v1813_v32 = vpop.f32.mrb[55].mxu1  ;;  %4716 = vmatpush1.bf16.msra.mxu1 %v6467_v20  ;;  %4548 = vmatprep.subr.bf16.mxu0 %v6631_v1  ;;  %v3116_v20 = vrot.slane %v3114_v5, 1  ;;  %v3152_v36 = vor.u32 %v3150_v42, %v3124_v47  ;;  %v3156_v17 = vrot.slane %v3154_v7, 1  ;;  %v6492_v7 = vld [vmem:[%s8772_s1 + $0x370] sm:$0xff]  }
 0x18e   : > { %3755 = vmatmul.mubr.bf16.gmra.mrb[160].mxu0 %v3069_v16  ;;  %4717 = vmatprep.subr.bf16.mxu1 %v6631_v1  ;;  %v6484_v16 = vld [vmem:[%s8772_s1 + $0x368] sm:$0xff]   ;;  %v3142_v0 = vshrl.u32 %v7891_v48, 16  ;;  %v3146_v47 = vshll.u32 %v7934_v22, 16  ;;  %v3101_v6 = vsel %vm680_vm0, %v3096_v40, %v3100_v58  ;;  %v3166_v42 = vshrl.u32 %v7894_v49, 16  ;;  %v6493_v49 = vld [vmem:[%s8772_s1 + $0x3f0] sm:$0xff]  }
 0x18f   : > { %3924 = vmatmul.mubr.bf16.gmra.mrb[160].mxu1 %v3085_v18  ;;  %3762 = vmatprep.mubr.bf16.mxu0 %v3109_v13  ;;  %v7944_v32 = vld [vmem:[%s6744_s30 + $0x16c] ss:$16 sps:$4 sm:$0xff]   ;;  %v3126_v18 = vshrl.u32 %v7888_v25, 16  ;;  %v3141_v25 = vsel %vm680_vm0, %v3136_v56, %v3140_v30  ;;  %v3170_v48 = vshll.u32 %v7938_v61, 16  ;;  %v3157_v40 = vsel %vm680_vm0, %v3152_v36, %v3156_v17 }
 0x190   : > { %3931 = vmatprep.mubr.bf16.mxu1 %v3125_v8  ;;  %4549 = vmatpush1.bf16.msra.mxu0 %v6474_v37  ;;  %v3117_v8 = vsel %vm680_vm0, %v3112_v19, %v3116_v20  ;;  %v3186_v19 = vshll.u32 %v7944_v32, 16  ;;  %v3168_v36 = vor.u32 %v3166_v42, %v3140_v30  ;;  %v6499_v30 = vld [vmem:[%s8772_s1 + $0x3f8] sm:$0xff]  }
 0x191   : > { %v1647_v51 = vpop.f32.mrb[56].mxu0  ;;  %4718 = vmatpush1.bf16.msra.mxu1 %v6475_v23  ;;  %4550 = vmatprep.subr.bf16.mxu0 %v6631_v1  ;;  %v3128_v56 = vor.u32 %v3126_v18, %v3100_v58  ;;  %v6498_v58 = vld [vmem:[%s8772_s1 + $0x378] sm:$0xff]  }
 0x192   : > { %v1816_v24 = vpop.f32.mrb[56].mxu1  ;;  %v1649_v45 = vpop.f32.mrb[57].mxu0  ;;  %4719 = vmatprep.subr.bf16.mxu1 %v6631_v1 }
 0x193   : > { %v7955_v44 = vadd.f32 %v1816_v24, %v1647_v51  ;;  %v1818_v13 = vpop.f32.mrb[57].mxu1  ;;  %v1650_v5 = vpop.f32.mrb[58].mxu0  ;;  %v3182_v24 = vshrl.u32 %v7900_v27, 16  ;;  %v3144_v45 = vor.u32 %v3142_v0, %v3116_v20  ;;  %v7976_v27 = vld [vmem:[%s6744_s30 + $0x160] ss:$16 sps:$4 sm:$0xff]  }
 0x194   : > { %v1819_v11 = vpop.f32.mrb[58].mxu1  ;;  %v1652_v37 = vpop.f32.mrb[59].mxu0  ;;  %4551 = vmatpush1.bf16.msra.mxu0 %v6484_v16  ;;  %v3132_v16 = vrot.slane %v3130_v33, 1  ;;  %v3148_v13 = vrot.slane %v3146_v47, 1  ;;  %v3188_v33 = vrot.slane %v3186_v19, 1 }
 0x195   : > { %v7965_v23 = vadd.f32 %v1819_v11, %v1650_v5  ;;  %v1821_v51 = vpop.f32.mrb[59].mxu1  ;;  %4720 = vmatpush1.bf16.msra.mxu1 %v6485_v12  ;;  %4552 = vmatprep.subr.bf16.mxu0 %v6631_v1  ;;  %v3172_v12 = vrot.slane %v3170_v48, 1  ;;  %v7979_v5 = vld [vmem:[%s6744_s30 + $0x168] ss:$16 sps:$4 sm:$0xff]   ;;  %v7982_v11 = vld [vmem:[%s6744_s30 + $0x184] ss:$16 sps:$4 sm:$0xff]   ;;  %v3184_v18 = vor.u32 %v3182_v24, %v3156_v17 }
 0x196   : > { %3763 = vmatmul.mubr.bf16.gmra.mrb[164].mxu0 %v3101_v6  ;;  %4721 = vmatprep.subr.bf16.mxu1 %v6631_v1  ;;  %v7988_v0 = vld [vmem:[%s6744_s30 + $0x18c] ss:$16 sps:$4 sm:$0xff]   ;;  %v3133_v37 = vsel %vm680_vm0, %v3128_v56, %v3132_v16  ;;  %v3158_v48 = vshrl.u32 %v7931_v31, 16  ;;  %v3174_v51 = vshrl.u32 %v7934_v22, 16  ;;  %v3202_v56 = vshll.u32 %v7982_v11, 16 }
 0x197   : > { %8778 = vst [vmem:[#allocation2_spill] sm:$0xff] %v7965_v23  ;;  %3932 = vmatmul.mubr.bf16.gmra.mrb[164].mxu1 %v3117_v8  ;;  %3770 = vmatprep.mubr.bf16.mxu0 %v3141_v25  ;;  %v3149_v8 = vsel %vm680_vm0, %v3144_v45, %v3148_v13  ;;  %v3173_v19 = vsel %vm680_vm0, %v3168_v36, %v3172_v12  ;;  %v3214_v22 = vshrl.u32 %v7944_v32, 16  ;;  %v8012_v36 = vld [vmem:[%s6744_s30 + $0x180] ss:$16 sps:$4 sm:$0xff]   ;;  %v3190_v23 = vshrl.u32 %v7976_v27, 16 }
 0x198   : > { %3939 = vmatprep.mubr.bf16.mxu1 %v3157_v40  ;;  %4553 = vmatpush1.bf16.msra.mxu0 %v6492_v7  ;;  %v3162_v7 = vshll.u32 %v7976_v27, 16  ;;  %v3204_v32 = vrot.slane %v3202_v56, 1 }
 0x199   : > { %v1655_v20 = vpop.f32.mrb[60].mxu0  ;;  %4722 = vmatpush1.bf16.msra.mxu1 %v6493_v49  ;;  %4554 = vmatprep.subr.bf16.mxu0 %v6631_v1  ;;  %v3178_v49 = vshll.u32 %v7979_v5, 16 }
 0x19a   : > { %v1824_v47 = vpop.f32.mrb[60].mxu1  ;;  %v1657_v6 = vpop.f32.mrb[61].mxu0  ;;  %4723 = vmatprep.subr.bf16.mxu1 %v6631_v1  ;;  %v3198_v1 = vshrl.u32 %v7938_v61, 16  ;;  %v3160_v61 = vor.u32 %v3158_v48, %v3132_v16  ;;  %v3206_v16 = vshrl.u32 %v7979_v5, 16 }
 0x19b   : > { %v7997_v25 = vadd.f32 %v1824_v47, %v1655_v20  ;;  %v1826_v17 = vpop.f32.mrb[61].mxu1  ;;  %v1658_v42 = vpop.f32.mrb[62].mxu0  ;;  %v3189_v20 = vsel %vm680_vm0, %v3184_v18, %v3188_v33  ;;  %v3218_v47 = vshll.u32 %v7988_v0, 16  ;;  %v8015_v6 = vld [vmem:[%s6744_s30 + $0x188] ss:$16 sps:$4 sm:$0xff]   ;;  %v3180_v18 = vrot.slane %v3178_v49, 1 }
 0x19c   : > { %v1827_v40 = vpop.f32.mrb[62].mxu1  ;;  %v1660_v24 = vpop.f32.mrb[63].mxu0  ;;  %4555 = vmatpush1.bf16.msra.mxu0 %v6498_v58  ;;  %v3164_v58 = vrot.slane %v3162_v7, 1  ;;  %v8018_v17 = vld [vmem:[%s6744_s30 + $0x1a4] ss:$16 sps:$4 sm:$0xff]   ;;  %v3210_v48 = vshll.u32 %v8015_v6, 16 }
 0x19d   : > { %8779 = vst [vmem:[#allocation3_spill] sm:$0xff] %v7997_v25  ;;  %v8006_v45 = vadd.f32 %v1827_v40, %v1658_v42  ;;  %v1829_v31 = vpop.f32.mrb[63].mxu1  ;;  %4724 = vmatpush1.bf16.msra.mxu1 %v6499_v30  ;;  %v3176_v42 = vor.u32 %v3174_v51, %v3148_v13  ;;  %v3200_v40 = vor.u32 %v3198_v1, %v3172_v12  ;;  %v3220_v30 = vrot.slane %v3218_v47, 1 }
 0x19e   : > { %3771 = vmatmul.mubr.bf16.gmra.mrb[168].mxu0 %v3133_v37  ;;  %v3216_v31 = vor.u32 %v3214_v22, %v3188_v33  ;;  %v8021_v37 = vld [vmem:[%s6744_s30 + $0x1ac] ss:$16 sps:$4 sm:$0xff]   ;;  %v3165_v51 = vsel %vm680_vm0, %v3160_v61, %v3164_v58  ;;  %v3230_v33 = vshrl.u32 %v7982_v11, 16  ;;  %v3192_v22 = vor.u32 %v3190_v23, %v3164_v58 }
 0x19f   : > { %8780 = vst [vmem:[#allocation4_spill] sm:$0xff] %v8006_v45  ;;  %3940 = vmatmul.mubr.bf16.gmra.mrb[168].mxu1 %v3149_v8  ;;  %3778 = vmatprep.mubr.bf16.mxu0 %v3173_v19  ;;  %v3194_v8 = vshll.u32 %v8012_v36, 16  ;;  %v3234_v19 = vshll.u32 %v8018_v17, 16  ;;  %v3181_v27 = vsel %vm680_vm0, %v3176_v42, %v3180_v18  ;;  %v3205_v1 = vsel %vm680_vm0, %v3200_v40, %v3204_v32 }
 0x1a0   : > { %3947 = vmatprep.mubr.bf16.mxu1 %v3189_v20  ;;  %v3246_v20 = vshrl.u32 %v7988_v0, 16  ;;  %v3250_v11 = vshll.u32 %v8021_v37, 16  ;;  %v3208_v61 = vor.u32 %v3206_v16, %v3180_v18  ;;  %v3212_v42 = vrot.slane %v3210_v48, 1 }
 0x1a1   : > { %v1663_v24 = vpop.f32.mrb[64].mxu0  ;;  %v3196_v47 = vrot.slane %v3194_v8, 1  ;;  %v3232_v40 = vor.u32 %v3230_v33, %v3204_v32  ;;  %v3222_v16 = vshrl.u32 %v8012_v36, 16  ;;  %v3262_v36 = vshrl.u32 %v8018_v17, 16  ;;  %v8073_v17 = vld [vmem:[%s6744_s30 + $0x1c8] ss:$16 sps:$4 sm:$0xff]  }
 0x1a2   : > { %v1832_v45 = vpop.f32.mrb[64].mxu1  ;;  %v1665_v25 = vpop.f32.mrb[65].mxu0  ;;  %v3213_v32 = vsel %vm680_vm0, %v3208_v61, %v3212_v42 }
 0x1a3   : > { %v8027_v7 = vadd.f32 %v1832_v45, %v1663_v24  ;;  %v1834_v13 = vpop.f32.mrb[65].mxu1  ;;  %v1666_v12 = vpop.f32.mrb[66].mxu0  ;;  %v3221_v45 = vsel %vm680_vm0, %v3216_v31, %v3220_v30  ;;  %v3236_v24 = vrot.slane %v3234_v19, 1  ;;  %v8046_v31 = vld [vmem:[%s6744_s30 + $0x1c4] ss:$16 sps:$4 sm:$0xff]   ;;  %v3197_v8 = vsel %vm680_vm0, %v3192_v22, %v3196_v47 }
 0x1a4   : > { %v1835_v49 = vpop.f32.mrb[66].mxu1  ;;  %v1668_v25 = vpop.f32.mrb[67].mxu0  ;;  %v8040_v13 = vld [vmem:[%s6744_s30 + $0x1a0] ss:$16 sps:$4 sm:$0xff]  }
 0x1a5   : > { %v8034_v5 = vadd.f32 %v1835_v49, %v1666_v12  ;;  %v1837_v56 = vpop.f32.mrb[67].mxu1  ;;  %v8043_v12 = vld [vmem:[%s6744_s30 + $0x1a8] ss:$16 sps:$4 sm:$0xff]   ;;  %v3248_v49 = vor.u32 %v3246_v20, %v3220_v30  ;;  %v3252_v25 = vrot.slane %v3250_v11, 1  ;;  %v3237_v19 = vsel %vm680_vm0, %v3232_v40, %v3236_v24 }
 0x1a6   : > { %3779 = vmatmul.mubr.bf16.gmra.mrb[172].mxu0 %v3165_v51  ;;  %v8049_v51 = vld [vmem:[%s6744_s30 + $0x1cc] ss:$16 sps:$4 sm:$0xff]   ;;  %v3226_v30 = vshll.u32 %v8040_v13, 16  ;;  %v3266_v11 = vshll.u32 %v8046_v31, 16  ;;  %v3278_v40 = vshrl.u32 %v8021_v37, 16  ;;  %v3264_v37 = vor.u32 %v3262_v36, %v3236_v24 }
 0x1a7   : > { %3948 = vmatmul.mubr.bf16.gmra.mrb[172].mxu1 %v3181_v27  ;;  %3786 = vmatprep.mubr.bf16.mxu0 %v3205_v1  ;;  %v3238_v27 = vshrl.u32 %v8015_v6, 16  ;;  %v3242_v1 = vshll.u32 %v8043_v12, 16  ;;  %v3253_v61 = vsel %vm680_vm0, %v3248_v49, %v3252_v25  ;;  %v3282_v6 = vshll.u32 %v8049_v51, 16 }
 0x1a8   : > { %3955 = vmatprep.mubr.bf16.mxu1 %v3221_v45 }
 0x1a9   : > { %v2133_v0 = vpop.f32.mrb[68].mxu0  ;;  %v3240_v49 = vor.u32 %v3238_v27, %v3212_v42  ;;  %v3294_v27 = vshrl.u32 %v8046_v31, 16 }
 0x1aa   : > { %v2134_v23 = vadd.f32 %v2133_v0, %v7547_v34  ;;  %v2302_v58 = vpop.f32.mrb[68].mxu1  ;;  %v2135_v18 = vpop.f32.mrb[69].mxu0 }
 0x1ab   : > { %v2304_v48 = vpop.f32.mrb[69].mxu1  ;;  %v2136_v33 = vpop.f32.mrb[70].mxu0  ;;  %v8076_v18 = vld [vmem:[%s6744_s30 + $0x1e4] ss:$16 sps:$4 sm:$0xff]  }
 0x1ac   : > { %v8059_v34 = vadd.f32 %v2302_v58, %v2134_v23  ;;  %v2137_v56 = vadd.f32 %v2136_v33, %v7549_v35  ;;  %v2305_v45 = vpop.f32.mrb[70].mxu1  ;;  %v2138_v20 = vpop.f32.mrb[71].mxu0  ;;  %v8070_v35 = vld [vmem:[%s6744_s30 + $0x1c0] ss:$16 sps:$4 sm:$0xff]   ;;  %v3224_v23 = vor.u32 %v3222_v16, %v3196_v47  ;;  %v3228_v58 = vrot.slane %v3226_v30, 1 }
 0x1ad   : > { %v2307_v22 = vpop.f32.mrb[71].mxu1  ;;  %v3244_v48 = vrot.slane %v3242_v1, 1  ;;  %v3268_v33 = vrot.slane %v3266_v11, 1  ;;  %v3254_v47 = vshrl.u32 %v8040_v13, 16  ;;  %v3258_v16 = vshll.u32 %v8070_v35, 16 }
 0x1ae   : > { %v8067_v0 = vadd.f32 %v2305_v45, %v2137_v56  ;;  %3787 = vmatmul.mubr.bf16.gmra.mrb[176].mxu0 %v3197_v8  ;;  %v3280_v56 = vor.u32 %v3278_v40, %v3252_v25  ;;  %v3284_v45 = vrot.slane %v3282_v6, 1  ;;  %v8079_v8 = vld [vmem:[%s6744_s30 + $0x1ec] ss:$16 sps:$4 sm:$0xff]   ;;  %v3270_v30 = vshrl.u32 %v8043_v12, 16 }
 0x1af   : > { %3956 = vmatmul.mubr.bf16.gmra.mrb[176].mxu1 %v3213_v32  ;;  %3794 = vmatprep.mubr.bf16.mxu0 %v3237_v19  ;;  %v3229_v24 = vsel %vm680_vm0, %v3224_v23, %v3228_v58  ;;  %v3274_v25 = vshll.u32 %v8073_v17, 16  ;;  %v3298_v1 = vshll.u32 %v8076_v18, 16  ;;  %v3245_v12 = vsel %vm680_vm0, %v3240_v49, %v3244_v48  ;;  %v8103_v49 = vld [vmem:[%s6744_s30 + $0x1e8] ss:$16 sps:$4 sm:$0xff]  }
 0x1b0   : > { %3963 = vmatprep.mubr.bf16.mxu1 %v3253_v61  ;;  %v3269_v40 = vsel %vm680_vm0, %v3264_v37, %v3268_v33  ;;  %v3285_v23 = vsel %vm680_vm0, %v3280_v56, %v3284_v45  ;;  %v3314_v31 = vshll.u32 %v8079_v8, 16  ;;  %v3296_v56 = vor.u32 %v3294_v27, %v3268_v33 }
 0x1b1   : > { %v2141_v20 = vpop.f32.mrb[72].mxu0  ;;  %v3276_v37 = vrot.slane %v3274_v25, 1  ;;  %v3302_v33 = vshrl.u32 %v8073_v17, 16  ;;  %v3306_v25 = vshll.u32 %v8103_v49, 16 }
 0x1b2   : > { %v2142_v22 = vadd.f32 %v2141_v20, %v7558_v55  ;;  %v2310_v32 = vpop.f32.mrb[72].mxu1  ;;  %v2143_v19 = vpop.f32.mrb[73].mxu0  ;;  %v3310_v20 = vshrl.u32 %v8049_v51, 16  ;;  %v3286_v51 = vshrl.u32 %v8070_v35, 16 }
 0x1b3   : > { %v2312_v61 = vpop.f32.mrb[73].mxu1  ;;  %v2144_v42 = vpop.f32.mrb[74].mxu0  ;;  %v8098_v19 = vld [vmem:[%s6744_s30 + $0x1e0] ss:$16 sps:$4 sm:$0xff]  }
 0x1b4   : > { %v8089_v55 = vadd.f32 %v2310_v32, %v2142_v22  ;;  %v2145_v13 = vadd.f32 %v2144_v42, %v7561_v57  ;;  %v2313_v36 = vpop.f32.mrb[74].mxu1  ;;  %v2146_v11 = vpop.f32.mrb[75].mxu0  ;;  %v3256_v57 = vor.u32 %v3254_v47, %v3228_v58  ;;  %v3260_v32 = vrot.slane %v3258_v16, 1  ;;  %v8111_v47 = vld [vmem:[%s6744_s30 + $0x20c] ss:$16 sps:$4 sm:$0xff]  }
 0x1b5   : > { %v2315_v6 = vpop.f32.mrb[75].mxu1  ;;  %v3272_v61 = vor.u32 %v3270_v30, %v3244_v48  ;;  %v3300_v42 = vrot.slane %v3298_v1, 1  ;;  %v8107_v11 = vld [vmem:[%s6744_s30 + $0x204] ss:$16 sps:$4 sm:$0xff]   ;;  %v3290_v58 = vshll.u32 %v8098_v19, 16 }
 0x1b6   : > { %v8100_v22 = vadd.f32 %v2313_v36, %v2145_v13  ;;  %3795 = vmatmul.mubr.bf16.gmra.mrb[180].mxu0 %v3229_v24  ;;  %v3312_v13 = vor.u32 %v3310_v20, %v3284_v45  ;;  %v3316_v24 = vrot.slane %v3314_v31, 1  ;;  %v3261_v1 = vsel %vm680_vm0, %v3256_v57, %v3260_v32 }
 0x1b7   : > { %3964 = vmatmul.mubr.bf16.gmra.mrb[180].mxu1 %v3245_v12  ;;  %3802 = vmatprep.mubr.bf16.mxu0 %v3269_v40  ;;  %v3277_v36 = vsel %vm680_vm0, %v3272_v61, %v3276_v37  ;;  %v3301_v45 = vsel %vm680_vm0, %v3296_v56, %v3300_v42  ;;  %v3288_v12 = vor.u32 %v3286_v51, %v3260_v32  ;;  %v8120_v40 = vld [vmem:[%s6744_s30 + $0x200] ss:$16 sps:$4 sm:$0xff]   ;;  %v3326_v31 = vshrl.u32 %v8076_v18, 16 }
 0x1b8   : > { %3971 = vmatprep.mubr.bf16.mxu1 %v3285_v23  ;;  %v3317_v61 = vsel %vm680_vm0, %v3312_v13, %v3316_v24  ;;  %v3342_v32 = vshrl.u32 %v8079_v8, 16  ;;  %v3346_v56 = vshll.u32 %v8111_v47, 16  ;;  %v3322_v18 = vshll.u32 %v8120_v40, 16  ;;  %v4896_v8 = vld [vmem:[%s8774_s3] sm:$0xff] }
 0x1b9   : > { %v2149_v6 = vpop.f32.mrb[76].mxu0  ;;  %v3328_v13 = vor.u32 %v3326_v31, %v3300_v42  ;;  %4973 = vperm.xlu0 %6160, %v4896_v8  }
 0x1ba   : > { %v2150_v48 = vadd.f32 %v2149_v6, %v7563_v59  ;;  %v2318_v16 = vpop.f32.mrb[76].mxu1  ;;  %v2151_v30 = vpop.f32.mrb[77].mxu0  ;;  %v3330_v6 = vshll.u32 %v8107_v11, 16 }
 0x1bb   : > { %v2320_v35 = vpop.f32.mrb[77].mxu1  ;;  %v2152_v27 = vpop.f32.mrb[78].mxu0  ;;  %v3292_v30 = vrot.slane %v3290_v58, 1 }
 0x1bc   : > { %v8122_v23 = vadd.f32 %v2318_v16, %v2150_v48  ;;  %v2153_v59 = vadd.f32 %v2152_v27, %v7569_v9  ;;  %v2321_v20 = vpop.f32.mrb[78].mxu1  ;;  %v2154_v17 = vpop.f32.mrb[79].mxu0  ;;  %v3304_v9 = vor.u32 %v3302_v33, %v3276_v37  ;;  %v3308_v48 = vrot.slane %v3306_v25, 1  ;;  %v8134_v16 = vld [vmem:[%s6744_s30 + $0x208] ss:$16 sps:$4 sm:$0xff]  }
 0x1bd   : > { %v2323_v57 = vpop.f32.mrb[79].mxu1  ;;  %v8137_v35 = vld [vmem:[%s6744_s30 + $0x224] ss:$16 sps:$4 sm:$0xff]   ;;  %v3332_v58 = vrot.slane %v3330_v6, 1  ;;  %v3293_v37 = vsel %vm680_vm0, %v3288_v12, %v3292_v30  ;;  %v3344_v33 = vor.u32 %v3342_v32, %v3316_v24  ;;  %v3348_v25 = vrot.slane %v3346_v56, 1 }
 0x1be   : > { %8781 = vst [vmem:[#allocation5_spill] sm:$0xff] %v8122_v23  ;;  %v8130_v51 = vadd.f32 %v2321_v20, %v2153_v59  ;;  %3803 = vmatmul.mubr.bf16.gmra.mrb[184].mxu0 %v3261_v1  ;;  %v8144_v1 = vld [vmem:[%s6744_s30 + $0x22c] ss:$16 sps:$4 sm:$0xff]   ;;  %v3309_v20 = vsel %vm680_vm0, %v3304_v9, %v3308_v48  ;;  %v3318_v17 = vshrl.u32 %v8098_v19, 16  ;;  %v3334_v57 = vshrl.u32 %v8103_v49, 16 }
 0x1bf   : > { %3972 = vmatmul.mubr.bf16.gmra.mrb[184].mxu1 %v3277_v36  ;;  %3810 = vmatprep.mubr.bf16.mxu0 %v3301_v45  ;;  %v3324_v6 = vrot.slane %v3322_v18, 1  ;;  %v3338_v12 = vshll.u32 %v8134_v16, 16  ;;  %v3358_v24 = vshrl.u32 %v8107_v11, 16  ;;  %v3333_v49 = vsel %vm680_vm0, %v3328_v13, %v3332_v58 }
 0x1c0   : > { %8782 = vst [vmem:[#allocation6_spill] sm:$0xff] %v8130_v51  ;;  %3979 = vmatprep.mubr.bf16.mxu1 %v3317_v61  ;;  %v3362_v61 = vshll.u32 %v8137_v35, 16  ;;  %v3374_v9 = vshrl.u32 %v8111_v47, 16  ;;  %v3349_v8 = vsel %vm680_vm0, %v3344_v33, %v3348_v25  ;;  %v3378_v11 = vshll.u32 %v8144_v1, 16  ;;  %v8173_v47 = vld [vmem:[%s6744_s30 + $0x228] ss:$16 sps:$4 sm:$0xff]  }
 0x1c1   : > { %v2157_v27 = vpop.f32.mrb[80].mxu0  ;;  %v3320_v13 = vor.u32 %v3318_v17, %v3292_v30  ;;  %v2506_v33 = vld [vmem:[%s6744_s30 + $0x248] sm:$0x11]  ;;  %v3350_v30 = vshrl.u32 %v8120_v40, 16 }
 0x1c2   : > { %v2158_v36 = vadd.f32 %v2157_v27, %v7571_v14  ;;  %v2326_v45 = vpop.f32.mrb[80].mxu1  ;;  %v2159_v59 = vpop.f32.mrb[81].mxu0  ;;  %v2505_v27 = vld [vmem:[%s6744_s30 + $0x240] sm:$0x11]  ;;  %v8179_v17 = vcombine.high %v2506_v33, %v2506_v33 }
 0x1c3   : > { %v2328_v42 = vpop.f32.mrb[81].mxu1  ;;  %v2160_v31 = vpop.f32.mrb[82].mxu0  ;;  %v8170_v59 = vld [vmem:[%s6744_s30 + $0x220] ss:$16 sps:$4 sm:$0xff]   ;;  %v3352_v23 = vor.u32 %v3350_v30, %v3324_v6 }
 0x1c4   : > { %v8153_v14 = vadd.f32 %v2326_v45, %v2158_v36  ;;  %v2161_v32 = vadd.f32 %v2160_v31, %v7579_v28  ;;  %v2329_v19 = vpop.f32.mrb[82].mxu1  ;;  %v2162_v56 = vpop.f32.mrb[83].mxu0  ;;  %v4897_v36 = vld [vmem:[%s8774_s3 + $0x8] sm:$0xff]  ;;  %v4898_v28 = vld [vmem:[%s8774_s3 + $0x10] sm:$0xff]  ;;  %v3336_v42 = vor.u32 %v3334_v57, %v3308_v48  ;;  %v3340_v31 = vrot.slane %v3338_v12, 1 }
 0x1c5   : > { %v2331_v18 = vpop.f32.mrb[83].mxu1  ;;  %4978 = vperm.xlu0 %6160, %v4897_v36   ;;  %v3360_v56 = vor.u32 %v3358_v24, %v3332_v58  ;;  %4983 = vperm.xlu1 %6161, %v4898_v28   ;;  %v3354_v12 = vshll.u32 %v8170_v59, 16  ;;  %v3366_v24 = vshrl.u32 %v8134_v16, 16  ;;  %v4902_v30 = vld [vmem:[%s8774_s3 + $0x30] sm:$0xff] }
 0x1c6   : > { %8783 = vst [vmem:[#allocation7_spill] sm:$0xff] %v8153_v14  ;;  %v8167_v45 = vadd.f32 %v2329_v19, %v2161_v32  ;;  %3811 = vmatmul.mubr.bf16.gmra.mrb[188].mxu0 %v3293_v37  ;;  %v3364_v18 = vrot.slane %v3362_v61, 1  ;;  %v8176_v14 = vcombine.high %v2505_v27, %v2505_v27  ;;  %v3376_v19 = vor.u32 %v3374_v9, %v3348_v25 }
 0x1c7   : > { %3980 = vmatmul.mubr.bf16.gmra.mrb[188].mxu1 %v3309_v20  ;;  %3818 = vmatprep.mubr.bf16.mxu0 %v3333_v49  ;;  %v3380_v37 = vrot.slane %v3378_v11, 1  ;;  %v4899_v20 = vld [vmem:[%s8774_s3 + $0x18] sm:$0xff]  ;;  %v3370_v61 = vshll.u32 %v8173_v47, 16  ;;  %v3325_v9 = vsel %vm680_vm0, %v3320_v13, %v3324_v6  ;;  %v3406_v13 = vshrl.u32 %v8144_v1, 16 }
 0x1c8   : > { %8784 = vst [vmem:[#allocation8_spill] sm:$0xff] %v8167_v45  ;;  %3987 = vmatprep.mubr.bf16.mxu1 %v3349_v8  ;;  %v3341_v8 = vsel %vm680_vm0, %v3336_v42, %v3340_v31  ;;  %v3365_v11 = vsel %vm680_vm0, %v3360_v56, %v3364_v18  ;;  %v3394_v45 = vshll.u32 %v8176_v14, 16  ;;  %v3410_v42 = vshll.u32 %v8179_v17, 16  ;;  %v4901_v56 = vld [vmem:[%s8774_s3 + $0x28] sm:$0xff] }
 0x1c9   : > { %v2165_v32 = vpop.f32.mrb[84].mxu0  ;;  %4988 = vperm.xlu1 %6161, %v4899_v20   ;;  %v3356_v20 = vrot.slane %v3354_v12, 1  ;;  %v8207_v1 = vcombine.low %v2505_v27, %v2505_v27  ;;  %v8209_v6 = vcombine.low %v2506_v33, %v2506_v33  ;;  %v4903_v27 = vld [vmem:[%s8774_s3 + $0x38] sm:$0xff] }
 0x1ca   : > { %v2166_v48 = vadd.f32 %v2165_v32, %v7583_v29  ;;  %v2334_v57 = vpop.f32.mrb[84].mxu1  ;;  %v2167_v58 = vpop.f32.mrb[85].mxu0 }
 0x1cb   : > { %v2336_v25 = vpop.f32.mrb[85].mxu1  ;;  %v2168_v49 = vpop.f32.mrb[86].mxu0  ;;  %v3390_v58 = vshrl.u32 %v8137_v35, 16 }
 0x1cc   : > { %v8191_v36 = vadd.f32 %v2334_v57, %v2166_v48  ;;  %v2169_v29 = vadd.f32 %v2168_v49, %v7585_v46  ;;  %v2337_v28 = vpop.f32.mrb[86].mxu1  ;;  %v2170_v32 = vpop.f32.mrb[87].mxu0  ;;  %v3381_v25 = vsel %vm680_vm0, %v3376_v19, %v3380_v37  ;;  %v4900_v46 = vld [vmem:[%s8774_s3 + $0x20] sm:$0xff]  ;;  %v3372_v19 = vrot.slane %v3370_v61, 1 }
 0x1cd   : > { %v2339_v51 = vpop.f32.mrb[87].mxu1  ;;  %4993 = vperm.xlu0 %6160, %v4900_v46   ;;  %v3392_v48 = vor.u32 %v3390_v58, %v3364_v18  ;;  %v3396_v57 = vrot.slane %v3394_v45, 1  ;;  %4998 = vperm.xlu1 %6161, %v4901_v56   ;;  %v3408_v49 = vor.u32 %v3406_v13, %v3380_v37  ;;  %v8224_v45 = vld [vmem:[%s6744_s30 + $0x28] sm:$0xee]  ;;  %v3398_v32 = vshrl.u32 %v8173_v47, 16  ;;  %v6561_v56 = vld [vmem:[%s6744_s30 + $0x30] sm:$0xff] }
 0x1ce   : > { %v8205_v35 = vadd.f32 %v2337_v28, %v2169_v29  ;;  %3819 = vmatmul.mubr.bf16.gmra.mrb[192].mxu0 %v3325_v9  ;;  %v3368_v51 = vor.u32 %v3366_v24, %v3340_v31  ;;  %v3412_v31 = vrot.slane %v3410_v42, 1  ;;  %v8215_v24 = vld [vmem:[%s6744_s30 + $0x20] sm:$0xee]  ;;  %v3382_v29 = vshrl.u32 %v8170_v59, 16 }
 0x1cf   : > { %3988 = vmatmul.mubr.bf16.gmra.mrb[192].mxu1 %v3341_v8  ;;  %3826 = vmatprep.mubr.bf16.mxu0 %v3365_v11  ;;  %v3357_v8 = vsel %vm680_vm0, %v3352_v23, %v3356_v20  ;;  %v3386_v28 = vshll.u32 %v8207_v1, 16  ;;  %v3397_v42 = vsel %vm680_vm0, %v3392_v48, %v3396_v57  ;;  %v5942_v46 = vcombine.high %v8215_v24, %v6561_v56 }
 0x1d0   : > { %3995 = vmatprep.mubr.bf16.mxu1 %v3381_v25  ;;  %v3373_v18 = vsel %vm680_vm0, %v3368_v51, %v3372_v19  ;;  %v3384_v57 = vor.u32 %v3382_v29, %v3356_v20 }
 0x1d1   : > { %v2173_v12 = vpop.f32.mrb[88].mxu0  ;;  %5003 = vperm.xlu0 %6160, %v4902_v30   ;;  %5008 = vperm.xlu1 %6161, %v4903_v27   ;;  %v3413_v30 = vsel %vm680_vm0, %v3408_v49, %v3412_v31  ;;  %v3388_v49 = vrot.slane %v3386_v28, 1  ;;  %v3400_v31 = vor.u32 %v3398_v32, %v3372_v19  ;;  %v4907_v19 = vld [vmem:[%s8774_s3 + $0x58] sm:$0xff] }
 0x1d2   : > { %v2174_v33 = vadd.f32 %v2173_v12, %v7597_v53  ;;  %v2342_v61 = vpop.f32.mrb[88].mxu1  ;;  %v2175_v9 = vpop.f32.mrb[89].mxu0  ;;  %v3402_v53 = vshll.u32 %v8209_v6, 16  ;;  %v6562_v12 = vld [vmem:[%s6744_s30 + $0x38] sm:$0xff] }
 0x1d3   : > { %v2344_v37 = vpop.f32.mrb[89].mxu1  ;;  %v2176_v11 = vpop.f32.mrb[90].mxu0  ;;  %v5944_v9 = vcombine.high %v8224_v45, %v6562_v12 }
 0x1d4   : > { %v8230_v58 = vadd.f32 %v2342_v61, %v2174_v33  ;;  %v2177_v23 = vadd.f32 %v2176_v11, %v7600_v2  ;;  %v2345_v25 = vpop.f32.mrb[90].mxu1  ;;  %v2178_v13 = vpop.f32.mrb[91].mxu0  ;;  %v4905_v33 = vld [vmem:[%s8774_s3 + $0x48] sm:$0xff]  ;;  %v4904_v2 = vld [vmem:[%s8774_s3 + $0x40] sm:$0xff]  ;;  %v3404_v27 = vrot.slane %v3402_v53, 1  ;;  %v4906_v61 = vld [vmem:[%s8774_s3 + $0x50] sm:$0xff] }
 0x1d5   : > { %v2347_v51 = vpop.f32.mrb[91].mxu1  ;;  %5013 = vperm.xlu0 %6160, %v4904_v2   ;;  %v4127_v37 = vrot.slane %v5942_v46, 1  ;;  %v8251_v11 = vld [vmem:[%s6744_s30 + $0x44] ss:$16 sps:$4 sm:$0xff]   ;;  %5018 = vperm.xlu1 %6161, %v4905_v33   ;;  %v4252_v13 = vrot.slane %v8173_v47, 1  ;;  %v4915_v47 = vld [vmem:[%s8774_s3 + $0x98] sm:$0xff] }
 0x1d6   : > { %v8245_v48 = vadd.f32 %v2345_v25, %v2177_v23  ;;  %3827 = vmatmul.mubr.bf16.gmra.mrb[196].mxu0 %v3357_v8  ;;  %v4128_v23 = vrot.slane %v8251_v11, 1  ;;  %v4133_v25 = vrot.slane %v5944_v9, 1  ;;  %v3389_v51 = vsel %vm680_vm0, %v3384_v57, %v3388_v49  ;;  %v6569_v11 = vld [vmem:[%s6744_s30 + $0x60] ss:$16 sps:$4 sm:$0xff]  }
 0x1d7   : > { %3996 = vmatmul.mubr.bf16.gmra.mrb[196].mxu1 %v3373_v18  ;;  %3834 = vmatprep.mubr.bf16.mxu0 %v3397_v42  ;;  %v8255_v18 = vld [vmem:[%s6744_s30 + $0x4c] ss:$16 sps:$4 sm:$0xff]   ;;  %v5941_v9 = vcombine.low %v8215_v24, %v6561_v56  ;;  %v8777_v57 = vrot.slane %v8120_v40, 1  ;;  %v8776_v49 = vrot.slane %v8134_v16, 1 }
 0x1d8   : > { %4003 = vmatprep.mubr.bf16.mxu1 %v3413_v30  ;;  %v3405_v30 = vsel %vm680_vm0, %v3400_v31, %v3404_v27  ;;  %v8785_v24 = vrot.slane %v8255_v18, 1  ;;  %v4908_v27 = vld [vmem:[%s8774_s3 + $0x60] sm:$0xff] }
 0x1d9   : > { %v2181_v8 = vpop.f32.mrb[92].mxu0  ;;  %5023 = vperm.xlu0 %6160, %v4906_v61   ;;  %v5943_v61 = vcombine.low %v8224_v45, %v6562_v12  ;;  %5028 = vperm.xlu1 %6161, %v4907_v19   ;;  %v4124_v12 = vrot.slane %v5941_v9, 1  ;;  %v8303_v19 = vsel %vm4123_vm1, %v8776_v49, %v4252_v13 }
 0x1da   : > { %v2182_v28 = vadd.f32 %v2181_v8, %v7620_v39  ;;  %v2350_v32 = vpop.f32.mrb[92].mxu1  ;;  %v2183_v53 = vpop.f32.mrb[93].mxu0  ;;  %v4129_v39 = vsel %vm4123_vm1, %v4127_v37, %v4128_v23  ;;  %v4135_v56 = vsel %vm4123_vm1, %v4133_v25, %v8785_v24  ;;  %v8288_v37 = vld [vmem:[%s6744_s30 + $0x40] ss:$16 sps:$4 sm:$0xff]   ;;  %v8786_v25 = vrot.slane %v8170_v59, 1 }
 0x1db   : > { %v2352_v42 = vpop.f32.mrb[93].mxu1  ;;  %v2184_v46 = vpop.f32.mrb[94].mxu0  ;;  %v4125_v8 = vrot.slane %v8288_v37, 1 }
 0x1dc   : > { %v8267_v33 = vadd.f32 %v2350_v32, %v2182_v28  ;;  %v2185_v2 = vadd.f32 %v2184_v46, %v7624_v43  ;;  %v2353_v29 = vpop.f32.mrb[94].mxu1  ;;  %v2186_v20 = vpop.f32.mrb[95].mxu0  ;;  %v4909_v43 = vld [vmem:[%s8774_s3 + $0x68] sm:$0xff]  ;;  %v4130_v28 = vrot.slane %v5943_v61, 1  ;;  %v6567_v42 = vld [vmem:[%s6744_s30 + $0x64] ss:$16 sps:$4 sm:$0xff]  }
 0x1dd   : > { %v2355_v31 = vpop.f32.mrb[95].mxu1  ;;  %5033 = vperm.xlu0 %6160, %v4908_v27   ;;  %v8296_v20 = vsel %vm4123_vm1, %v8777_v57, %v8786_v25  ;;  %v6566_v32 = vld [vmem:[%s6744_s30 + $0x48] ss:$16 sps:$4 sm:$0xff]   ;;  %v4138_v46 = vrot.slane %v6567_v42, 1  ;;  %5038 = vperm.xlu1 %6161, %v4909_v43   ;;  %v4256_v61 = vrot.slane %v8207_v1, 1  ;;  %v4126_v43 = vsel %vm4123_vm1, %v4124_v12, %v4125_v8 }
 0x1de   : > { %v8285_v45 = vadd.f32 %v2353_v29, %v2185_v2  ;;  %3835 = vmatmul.mubr.bf16.gmra.mrb[200].mxu0 %v3389_v51  ;;  %v4910_v29 = vld [vmem:[%s8774_s3 + $0x70] sm:$0xff]  ;;  %v4131_v53 = vrot.slane %v6566_v32, 1  ;;  %v4911_v2 = vld [vmem:[%s8774_s3 + $0x78] sm:$0xff] }
 0x1df   : > { %4004 = vmatmul.mubr.bf16.gmra.mrb[200].mxu1 %v3405_v30  ;;  %4556 = vmatprep.mubr.bf16.mxu0 %v4129_v39  ;;  %v6568_v30 = vld [vmem:[%s6744_s30 + $0x6c] ss:$16 sps:$4 sm:$0xff]  }
 0x1e0   : > { %4725 = vmatprep.mubr.bf16.mxu1 %v4135_v56  ;;  %v4142_v9 = vrot.slane %v6568_v30, 1  ;;  %v4260_v56 = vrot.slane %v8209_v6, 1  ;;  %v8787_v6 = vrot.slane %v8255_v18, 1  ;;  %v8788_v18 = vrot.slane %v8170_v59, 1  ;;  %v6572_v59 = vld [vmem:[%s6744_s30 + $0x8c] ss:$16 sps:$4 sm:$0xff]  }
 0x1e1   : > { %v2189_v51 = vpop.f32.mrb[96].mxu0  ;;  %5043 = vperm.xlu0 %6160, %v4910_v29   ;;  %v4139_v29 = vsel %vm4123_vm1, %v4128_v23, %v4138_v46  ;;  %5048 = vperm.xlu1 %6161, %v4911_v2   ;;  %v4136_v23 = vrot.slane %v6569_v11, 1 }
 0x1e2   : > { %v2190_v39 = vadd.f32 %v2189_v51, %v7646_v4  ;;  %v2358_v31 = vpop.f32.mrb[96].mxu1  ;;  %v2191_v24 = vpop.f32.mrb[97].mxu0  ;;  %v4132_v4 = vsel %vm4123_vm1, %v4130_v28, %v4131_v53  ;;  %v4143_v12 = vsel %vm4123_vm1, %v8787_v6, %v4142_v9  ;;  %v4912_v28 = vld [vmem:[%s8774_s3 + $0x80] sm:$0xff]  ;;  %v8340_v2 = vsel %vm4123_vm1, %v8788_v18, %v4256_v61 }
 0x1e3   : > { %v2360_v27 = vpop.f32.mrb[97].mxu1  ;;  %v2192_v37 = vpop.f32.mrb[98].mxu0  ;;  %v6570_v24 = vld [vmem:[%s6744_s30 + $0x68] ss:$16 sps:$4 sm:$0xff]  }
 0x1e4   : > { %v8318_v25 = vadd.f32 %v2358_v31, %v2190_v39  ;;  %v2193_v32 = vadd.f32 %v2192_v37, %v7661_v38  ;;  %v2361_v42 = vpop.f32.mrb[98].mxu1  ;;  %v2194_v30 = vpop.f32.mrb[99].mxu0  ;;  %v4913_v38 = vld [vmem:[%s8774_s3 + $0x88] sm:$0xff]  ;;  %v8345_v39 = vsel %vm4123_vm1, %v4252_v13, %v4260_v56  ;;  %v4914_v31 = vld [vmem:[%s8774_s3 + $0x90] sm:$0xff]  ;;  %v4140_v27 = vrot.slane %v6570_v24, 1 }
 0x1e5   : > { %v2363_v1 = vpop.f32.mrb[99].mxu1  ;;  %5053 = vperm.xlu0 %6160, %v4912_v28   ;;  %v6571_v37 = vld [vmem:[%s6744_s30 + $0x84] ss:$16 sps:$4 sm:$0xff]   ;;  %5058 = vperm.xlu1 %6161, %v4913_v38   ;;  %v6574_v24 = vld [vmem:[%s6744_s30 + $0x88] ss:$16 sps:$4 sm:$0xff]  }
 0x1e6   : > { %v8334_v51 = vadd.f32 %v2361_v42, %v2193_v32  ;;  %4557 = vmatmul.mubr.bf16.vlgmr.msra.gmra.mrb[204].mxu0 %v4126_v43  ;;  %v4146_v43 = vrot.slane %v6571_v37, 1  ;;  %v4150_v42 = vrot.slane %v6572_v59, 1  ;;  %v4141_v28 = vsel %vm4123_vm1, %v4131_v53, %v4140_v27  ;;  %v6573_v53 = vld [vmem:[%s6744_s30 + $0x80] ss:$16 sps:$4 sm:$0xff]  }
 0x1e7   : > { %4726 = vmatmul.mubr.bf16.vlgmr.msra.gmra.mrb[204].mxu1 %v4132_v4  ;;  %4564 = vmatprep.mubr.bf16.mxu0 %v4139_v29  ;;  %v4137_v29 = vsel %vm4123_vm1, %v4125_v8, %v4136_v23  ;;  %v4917_v8 = vld [vmem:[%s8774_s3 + $0xa8] sm:$0xff]  ;;  %v4148_v37 = vrot.slane %v6574_v24, 1 }
 0x1e8   : > { %4733 = vmatprep.mubr.bf16.mxu1 %v4143_v12  ;;  %v4147_v11 = vsel %vm4123_vm1, %v4138_v46, %v4146_v43  ;;  %v4151_v18 = vsel %vm4123_vm1, %v4142_v9, %v4150_v42  ;;  %v4144_v46 = vrot.slane %v6573_v53, 1  ;;  %v4918_v9 = vld [vmem:[%s8774_s3 + $0xb0] sm:$0xff]  ;;  %v6578_v24 = vld [vmem:[%s6744_s30 + $0xa8] ss:$16 sps:$4 sm:$0xff]  }
 0x1e9   : > { %v2197_v32 = vpop.f32.mrb[100].mxu0  ;;  %5063 = vperm.xlu0 %6160, %v4914_v31   ;;  %5068 = vperm.xlu1 %6161, %v4915_v47  }
 0x1ea   : > { %v2198_v13 = vadd.f32 %v2197_v32, %v7691_v62  ;;  %v2366_v61 = vpop.f32.mrb[100].mxu1  ;;  %v2199_v56 = vpop.f32.mrb[101].mxu0  ;;  %v6575_v32 = vld [vmem:[%s6744_s30 + $0xa4] ss:$16 sps:$4 sm:$0xff]  }
 0x1eb   : > { %v2368_v30 = vpop.f32.mrb[101].mxu1  ;;  %v2200_v4 = vpop.f32.mrb[102].mxu0  ;;  %v4154_v59 = vrot.slane %v6575_v32, 1  ;;  %v4919_v56 = vld [vmem:[%s8774_s3 + $0xb8] sm:$0xff]  ;;  %v4156_v32 = vrot.slane %v6578_v24, 1 }
 0x1ec   : > { %v8358_v1 = vadd.f32 %v2366_v61, %v2198_v13  ;;  %v2201_v6 = vadd.f32 %v2200_v4, %v7702_v15  ;;  %v2369_v12 = vpop.f32.mrb[102].mxu1  ;;  %v2202_v38 = vpop.f32.mrb[103].mxu0  ;;  %v4916_v15 = vld [vmem:[%s8774_s3 + $0xa0] sm:$0xff]  ;;  %v6576_v13 = vld [vmem:[%s6744_s30 + $0xac] ss:$16 sps:$4 sm:$0xff]  }
 0x1ed   : > { %v2371_v62 = vpop.f32.mrb[103].mxu1  ;;  %5073 = vperm.xlu0 %6160, %v4916_v15   ;;  %5078 = vperm.xlu1 %6161, %v4917_v8   ;;  %v4158_v61 = vrot.slane %v6576_v13, 1  ;;  %v4145_v38 = vsel %vm4123_vm1, %v4136_v23, %v4144_v46  ;;  %v4149_v8 = vsel %vm4123_vm1, %v4140_v27, %v4148_v37  ;;  %v4155_v15 = vsel %vm4123_vm1, %v4146_v43, %v4154_v59  ;;  %v4921_v23 = vld [vmem:[%s8774_s3 + $0xc8] sm:$0xff]  ;;  %v6577_v27 = vld [vmem:[%s6744_s30 + $0xa0] ss:$16 sps:$4 sm:$0xff]  }
 0x1ee   : > { %v8370_v31 = vadd.f32 %v2369_v12, %v2201_v6  ;;  %4565 = vmatmul.mubr.bf16.gmra.mrb[208].mxu0 %v4137_v29  ;;  %v4152_v43 = vrot.slane %v6577_v27, 1  ;;  %v6582_v24 = vld [vmem:[%s6744_s30 + $0xc8] ss:$16 sps:$4 sm:$0xff]  }
 0x1ef   : > { %4734 = vmatmul.mubr.bf16.gmra.mrb[208].mxu1 %v4141_v28  ;;  %4572 = vmatprep.mubr.bf16.mxu0 %v4147_v11  ;;  %v4159_v53 = vsel %vm4123_vm1, %v4150_v42, %v4158_v61  ;;  %v4922_v42 = vld [vmem:[%s8774_s3 + $0xd0] sm:$0xff] }
 0x1f0   : > { %4741 = vmatprep.mubr.bf16.mxu1 %v4151_v18 }
 0x1f1   : > { %v2205_v47 = vpop.f32.mrb[104].mxu0  ;;  %5083 = vperm.xlu0 %6160, %v4918_v9   ;;  %5088 = vperm.xlu1 %6161, %v4919_v56  }
 0x1f2   : > { %v2206_v30 = vadd.f32 %v2205_v47, %v7733_v60  ;;  %v2374_v4 = vpop.f32.mrb[104].mxu1  ;;  %v2207_v29 = vpop.f32.mrb[105].mxu0  ;;  %v6579_v47 = vld [vmem:[%s6744_s30 + $0xc4] ss:$16 sps:$4 sm:$0xff]  }
 0x1f3   : > { %v2376_v6 = vpop.f32.mrb[105].mxu1  ;;  %v2208_v12 = vpop.f32.mrb[106].mxu0  ;;  %v4162_v13 = vrot.slane %v6579_v47, 1  ;;  %v4923_v29 = vld [vmem:[%s8774_s3 + $0xd8] sm:$0xff]  ;;  %v4164_v47 = vrot.slane %v6582_v24, 1 }
 0x1f4   : > { %v8384_v28 = vadd.f32 %v2374_v4, %v2206_v30  ;;  %v2209_v11 = vadd.f32 %v2208_v12, %v7745_v10  ;;  %v2377_v62 = vpop.f32.mrb[106].mxu1  ;;  %v2210_v18 = vpop.f32.mrb[107].mxu0  ;;  %v4920_v10 = vld [vmem:[%s8774_s3 + $0xc0] sm:$0xff]  ;;  %v6580_v30 = vld [vmem:[%s6744_s30 + $0xcc] ss:$16 sps:$4 sm:$0xff]  }
 0x1f5   : > { %v2379_v60 = vpop.f32.mrb[107].mxu1  ;;  %5093 = vperm.xlu0 %6160, %v4920_v10   ;;  %5098 = vperm.xlu1 %6161, %v4921_v23   ;;  %v4166_v4 = vrot.slane %v6580_v30, 1  ;;  %v4153_v18 = vsel %vm4123_vm1, %v4144_v46, %v4152_v43  ;;  %v4157_v23 = vsel %vm4123_vm1, %v4148_v37, %v4156_v32  ;;  %v4163_v10 = vsel %vm4123_vm1, %v4154_v59, %v4162_v13  ;;  %v4925_v46 = vld [vmem:[%s8774_s3 + $0xe8] sm:$0xff]  ;;  %v6581_v37 = vld [vmem:[%s6744_s30 + $0xc0] ss:$16 sps:$4 sm:$0xff]  }
 0x1f6   : > { %v8396_v9 = vadd.f32 %v2377_v62, %v2209_v11  ;;  %4573 = vmatmul.mubr.bf16.gmra.mrb[212].mxu0 %v4145_v38  ;;  %v4160_v59 = vrot.slane %v6581_v37, 1  ;;  %v6586_v24 = vld [vmem:[%s6744_s30 + $0xe8] ss:$16 sps:$4 sm:$0xff]  }
 0x1f7   : > { %4742 = vmatmul.mubr.bf16.gmra.mrb[212].mxu1 %v4149_v8  ;;  %4580 = vmatprep.mubr.bf16.mxu0 %v4155_v15  ;;  %v4167_v27 = vsel %vm4123_vm1, %v4158_v61, %v4166_v4  ;;  %v4926_v61 = vld [vmem:[%s8774_s3 + $0xf0] sm:$0xff] }
 0x1f8   : > { %4749 = vmatprep.mubr.bf16.mxu1 %v4159_v53 }
 0x1f9   : > { %v2213_v56 = vpop.f32.mrb[108].mxu0  ;;  %5103 = vperm.xlu0 %6160, %v4922_v42   ;;  %5108 = vperm.xlu1 %6161, %v4923_v29  }
 0x1fa   : > { %v2214_v6 = vadd.f32 %v2213_v56, %v7779_v52  ;;  %v2382_v12 = vpop.f32.mrb[108].mxu1  ;;  %v2215_v38 = vpop.f32.mrb[109].mxu0  ;;  %v6583_v56 = vld [vmem:[%s6744_s30 + $0xe4] ss:$16 sps:$4 sm:$0xff]  }
 0x1fb   : > { %v2384_v11 = vpop.f32.mrb[109].mxu1  ;;  %v2216_v62 = vpop.f32.mrb[110].mxu0  ;;  %v4170_v30 = vrot.slane %v6583_v56, 1  ;;  %v4927_v38 = vld [vmem:[%s8774_s3 + $0xf8] sm:$0xff]  ;;  %v6587_v56 = vld [vmem:[%s6744_s30 + $0x104] ss:$16 sps:$4 sm:$0xff]  }
 0x1fc   : > { %v8410_v8 = vadd.f32 %v2382_v12, %v2214_v6  ;;  %v2217_v15 = vadd.f32 %v2216_v62, %v7789_v3  ;;  %v2385_v60 = vpop.f32.mrb[110].mxu1  ;;  %v2218_v53 = vpop.f32.mrb[111].mxu0  ;;  %v4924_v3 = vld [vmem:[%s8774_s3 + $0xe0] sm:$0xff]  ;;  %v6584_v6 = vld [vmem:[%s6744_s30 + $0xec] ss:$16 sps:$4 sm:$0xff]  }
 0x1fd   : > { %v2387_v52 = vpop.f32.mrb[111].mxu1  ;;  %5113 = vperm.xlu0 %6160, %v4924_v3   ;;  %5118 = vperm.xlu1 %6161, %v4925_v46   ;;  %v4174_v12 = vrot.slane %v6584_v6, 1  ;;  %v4161_v53 = vsel %vm4123_vm1, %v4152_v43, %v4160_v59  ;;  %v4165_v46 = vsel %vm4123_vm1, %v4156_v32, %v4164_v47  ;;  %v4171_v3 = vsel %vm4123_vm1, %v4162_v13, %v4170_v30  ;;  %v4929_v43 = vld [vmem:[%s8774_s3 + $0x108] sm:$0xff]  ;;  %v6585_v32 = vld [vmem:[%s6744_s30 + $0xe0] ss:$16 sps:$4 sm:$0xff]  }
 0x1fe   : > { %v8422_v42 = vadd.f32 %v2385_v60, %v2217_v15  ;;  %4581 = vmatmul.mubr.bf16.gmra.mrb[216].mxu0 %v4153_v18  ;;  %v4168_v13 = vrot.slane %v6585_v32, 1 }
 0x1ff   : > { %4750 = vmatmul.mubr.bf16.gmra.mrb[216].mxu1 %v4157_v23  ;;  %4588 = vmatprep.mubr.bf16.mxu0 %v4163_v10  ;;  %v4175_v37 = vsel %vm4123_vm1, %v4166_v4, %v4174_v12  ;;  %v4172_v4 = vrot.slane %v6586_v24, 1 }
 0x200   : > { %4757 = vmatprep.mubr.bf16.mxu1 %v4167_v27 }
 0x201   : > { %v2221_v29 = vpop.f32.mrb[112].mxu0  ;;  %5123 = vperm.xlu0 %6160, %v4926_v61   ;;  %5128 = vperm.xlu1 %6161, %v4927_v38   ;;  %v6588_v38 = vld [vmem:[%s6744_s30 + $0x10c] ss:$16 sps:$4 sm:$0xff]  }
 0x202   : > { %v2222_v11 = vadd.f32 %v2221_v29, %v7821_v50  ;;  %v2390_v62 = vpop.f32.mrb[112].mxu1  ;;  %v2223_v18 = vpop.f32.mrb[113].mxu0  ;;  %v4178_v29 = vrot.slane %v6587_v56, 1  ;;  %v6591_v56 = vld [vmem:[%s6744_s30 + $0x124] ss:$16 sps:$4 sm:$0xff]  }
 0x203   : > { %v2392_v15 = vpop.f32.mrb[113].mxu1  ;;  %v2224_v60 = vpop.f32.mrb[114].mxu0 }
 0x204   : > { %v8436_v23 = vadd.f32 %v2390_v62, %v2222_v11  ;;  %v2225_v10 = vadd.f32 %v2224_v60, %v7833_v63  ;;  %v2393_v52 = vpop.f32.mrb[114].mxu1  ;;  %v2226_v27 = vpop.f32.mrb[115].mxu0  ;;  %v4928_v63 = vld [vmem:[%s8774_s3 + $0x100] sm:$0xff]  ;;  %v4182_v11 = vrot.slane %v6588_v38, 1 }
 0x205   : > { %v2395_v50 = vpop.f32.mrb[115].mxu1  ;;  %5133 = vperm.xlu0 %6160, %v4928_v63   ;;  %5138 = vperm.xlu1 %6161, %v4929_v43  }
 0x206   : > { %v8448_v61 = vadd.f32 %v2393_v52, %v2225_v10  ;;  %4589 = vmatmul.mubr.bf16.gmra.mrb[220].mxu0 %v4161_v53  ;;  %v4169_v10 = vsel %vm4123_vm1, %v4160_v59, %v4168_v13  ;;  %v4173_v50 = vsel %vm4123_vm1, %v4164_v47, %v4172_v4  ;;  %v4183_v43 = vsel %vm4123_vm1, %v4174_v12, %v4182_v11  ;;  %v6589_v59 = vld [vmem:[%s6744_s30 + $0x100] ss:$16 sps:$4 sm:$0xff]   ;;  %v6592_v47 = vld [vmem:[%s6744_s30 + $0x12c] ss:$16 sps:$4 sm:$0xff]  }
 0x207   : > { %4758 = vmatmul.mubr.bf16.gmra.mrb[220].mxu1 %v4165_v46  ;;  %4596 = vmatprep.mubr.bf16.mxu0 %v4171_v3  ;;  %v4176_v32 = vrot.slane %v6589_v59, 1 }
 0x208   : > { %4765 = vmatprep.mubr.bf16.mxu1 %v4175_v37 }
 0x209   : > { %v2229_v6 = vpop.f32.mrb[116].mxu0 }
 0x20a   : > { %v2230_v62 = vadd.f32 %v2229_v6, %v7867_v21  ;;  %v2398_v18 = vpop.f32.mrb[116].mxu1  ;;  %v2231_v15 = vpop.f32.mrb[117].mxu0  ;;  %v4179_v21 = vsel %vm4123_vm1, %v4170_v30, %v4178_v29  ;;  %v4186_v6 = vrot.slane %v6591_v56, 1  ;;  %v6595_v56 = vld [vmem:[%s6744_s30 + $0x144] ss:$16 sps:$4 sm:$0xff]  }
 0x20b   : > { %v2400_v60 = vpop.f32.mrb[117].mxu1  ;;  %v2232_v53 = vpop.f32.mrb[118].mxu0 }
 0x20c   : > { %v8456_v52 = vadd.f32 %v2398_v18, %v2230_v62  ;;  %v2233_v27 = vadd.f32 %v2232_v53, %v7877_v41  ;;  %v2401_v46 = vpop.f32.mrb[118].mxu1  ;;  %v2234_v3 = vpop.f32.mrb[119].mxu0  ;;  %v6590_v41 = vld [vmem:[%s6744_s30 + $0x108] ss:$16 sps:$4 sm:$0xff]   ;;  %v4190_v62 = vrot.slane %v6592_v47, 1  ;;  %v4177_v53 = vsel %vm4123_vm1, %v4168_v13, %v4176_v32 }
 0x20d   : > { %v2403_v37 = vpop.f32.mrb[119].mxu1  ;;  %v4180_v24 = vrot.slane %v6590_v41, 1  ;;  %v6593_v13 = vld [vmem:[%s6744_s30 + $0x120] ss:$16 sps:$4 sm:$0xff]  }
 0x20e   : > { %v8462_v63 = vadd.f32 %v2401_v46, %v2233_v27  ;;  %4597 = vmatmul.mubr.bf16.gmra.mrb[224].mxu0 %v4169_v10  ;;  %v4191_v37 = vsel %vm4123_vm1, %v4182_v11, %v4190_v62  ;;  %v4184_v59 = vrot.slane %v6593_v13, 1 }
 0x20f   : > { %4766 = vmatmul.mubr.bf16.gmra.mrb[224].mxu1 %v4173_v50  ;;  %4604 = vmatprep.mubr.bf16.mxu0 %v4179_v21  ;;  %v4181_v50 = vsel %vm4123_vm1, %v4172_v4, %v4180_v24  ;;  %v6596_v4 = vld [vmem:[%s6744_s30 + $0x14c] ss:$16 sps:$4 sm:$0xff]  }
 0x210   : > { %4773 = vmatprep.mubr.bf16.mxu1 %v4183_v43 }
 0x211   : > { %v2237_v38 = vpop.f32.mrb[120].mxu0 }
 0x212   : > { %v2238_v30 = vadd.f32 %v2237_v38, %v7909_v54  ;;  %v2406_v18 = vpop.f32.mrb[120].mxu1  ;;  %v2239_v15 = vpop.f32.mrb[121].mxu0  ;;  %v4187_v54 = vsel %vm4123_vm1, %v4178_v29, %v4186_v6  ;;  %v4194_v38 = vrot.slane %v6595_v56, 1  ;;  %v6598_v56 = vld [vmem:[%s6744_s30 + $0x148] ss:$16 sps:$4 sm:$0xff]  }
 0x213   : > { %v2408_v12 = vpop.f32.mrb[121].mxu1  ;;  %v2240_v60 = vpop.f32.mrb[122].mxu0 }
 0x214   : > { %v8470_v10 = vadd.f32 %v2406_v18, %v2238_v30  ;;  %v2241_v27 = vadd.f32 %v2240_v60, %v7921_v26  ;;  %v2409_v46 = vpop.f32.mrb[122].mxu1  ;;  %v2242_v3 = vpop.f32.mrb[123].mxu0  ;;  %v6594_v26 = vld [vmem:[%s6744_s30 + $0x128] ss:$16 sps:$4 sm:$0xff]   ;;  %v4198_v30 = vrot.slane %v6596_v4, 1  ;;  %v4185_v60 = vsel %vm4123_vm1, %v4176_v32, %v4184_v59 }
 0x215   : > { %v2411_v21 = vpop.f32.mrb[123].mxu1  ;;  %v4188_v41 = vrot.slane %v6594_v26, 1  ;;  %v6597_v32 = vld [vmem:[%s6744_s30 + $0x140] ss:$16 sps:$4 sm:$0xff]   ;;  %v6599_v4 = vld [vmem:[%s6744_s30 + $0x164] ss:$16 sps:$4 sm:$0xff]  }
 0x216   : > { %v8476_v43 = vadd.f32 %v2409_v46, %v2241_v27  ;;  %4605 = vmatmul.mubr.bf16.gmra.mrb[228].mxu0 %v4177_v53  ;;  %v8789_v27 = vld [vmem:[#allocation2_spill] sm:$0xff]  ;;  %v4192_v26 = vrot.slane %v6597_v32, 1 }
 0x217   : > { %4774 = vmatmul.mubr.bf16.gmra.mrb[228].mxu1 %v4181_v50  ;;  %4612 = vmatprep.mubr.bf16.mxu0 %v4187_v54  ;;  %v4189_v54 = vsel %vm4123_vm1, %v4180_v24, %v4188_v41  ;;  %v6600_v24 = vld [vmem:[%s6744_s30 + $0x16c] ss:$16 sps:$4 sm:$0xff]  }
 0x218   : > { %4781 = vmatprep.mubr.bf16.mxu1 %v4191_v37  ;;  %v4199_v37 = vsel %vm4123_vm1, %v4190_v62, %v4198_v30 }
 0x219   : > { %v2245_v47 = vpop.f32.mrb[124].mxu0 }
 0x21a   : > { %v2246_v29 = vadd.f32 %v2245_v47, %v7955_v44  ;;  %v2414_v18 = vpop.f32.mrb[124].mxu1  ;;  %v2247_v15 = vpop.f32.mrb[125].mxu0  ;;  %v4195_v44 = vsel %vm4123_vm1, %v4186_v6, %v4194_v38  ;;  %v4196_v47 = vrot.slane %v6598_v56, 1 }
 0x21b   : > { %v2416_v11 = vpop.f32.mrb[125].mxu1  ;;  %v2248_v12 = vpop.f32.mrb[126].mxu0  ;;  %v4206_v15 = vrot.slane %v6600_v24, 1 }
 0x21c   : > { %v8484_v53 = vadd.f32 %v2414_v18, %v2246_v29  ;;  %v2249_v46 = vadd.f32 %v2248_v12, %v8789_v27  ;;  %v2417_v3 = vpop.f32.mrb[126].mxu1  ;;  %v2250_v50 = vpop.f32.mrb[127].mxu0  ;;  %v4202_v29 = vrot.slane %v6599_v4, 1  ;;  %v8790_v11 = vld [vmem:[#allocation3_spill] sm:$0xff] }
 0x21d   : > { %v2419_v21 = vpop.f32.mrb[127].mxu1  ;;  %v8791_v50 = vld [vmem:[#allocation4_spill] sm:$0xff]  ;;  %v4207_v4 = vsel %vm4123_vm1, %v4198_v30, %v4206_v15 }
 0x21e   : > { %v8490_v13 = vadd.f32 %v2417_v3, %v2249_v46  ;;  %4613 = vmatmul.mubr.bf16.gmra.mrb[232].mxu0 %v4185_v60  ;;  %v4193_v60 = vsel %vm4123_vm1, %v4184_v59, %v4192_v26  ;;  %v4203_v32 = vsel %vm4123_vm1, %v4194_v38, %v4202_v29  ;;  %v6601_v59 = vld [vmem:[%s6744_s30 + $0x160] ss:$16 sps:$4 sm:$0xff]  }
 0x21f   : > { %4782 = vmatmul.mubr.bf16.gmra.mrb[232].mxu1 %v4189_v54  ;;  %4620 = vmatprep.mubr.bf16.mxu0 %v4195_v44  ;;  %v4200_v24 = vrot.slane %v6601_v59, 1 }
 0x220   : > { %4789 = vmatprep.mubr.bf16.mxu1 %v4199_v37  ;;  %v4197_v37 = vsel %vm4123_vm1, %v4188_v41, %v4196_v47  ;;  %v6604_v41 = vld [vmem:[%s6744_s30 + $0x18c] ss:$16 sps:$4 sm:$0xff]  }
 0x221   : > { %v2253_v18 = vpop.f32.mrb[128].mxu0 }
 0x222   : > { %v2254_v6 = vadd.f32 %v2253_v18, %v8790_v11  ;;  %v2422_v12 = vpop.f32.mrb[128].mxu1  ;;  %v2255_v27 = vpop.f32.mrb[129].mxu0  ;;  %v6602_v11 = vld [vmem:[%s6744_s30 + $0x168] ss:$16 sps:$4 sm:$0xff]  }
 0x223   : > { %v2424_v62 = vpop.f32.mrb[129].mxu1  ;;  %v2256_v46 = vpop.f32.mrb[130].mxu0 }
 0x224   : > { %v8498_v3 = vadd.f32 %v2422_v12, %v2254_v6  ;;  %v2257_v54 = vadd.f32 %v2256_v46, %v8791_v50  ;;  %v2425_v44 = vpop.f32.mrb[130].mxu1  ;;  %v2258_v21 = vpop.f32.mrb[131].mxu0  ;;  %v4204_v6 = vrot.slane %v6602_v11, 1  ;;  %v6603_v12 = vld [vmem:[%s6744_s30 + $0x184] ss:$16 sps:$4 sm:$0xff]   ;;  %v4214_v46 = vrot.slane %v6604_v41, 1 }
 0x225   : > { %v2427_v56 = vpop.f32.mrb[131].mxu1  ;;  %v4210_v27 = vrot.slane %v6603_v12, 1 }
 0x226   : > { %v8504_v18 = vadd.f32 %v2425_v44, %v2257_v54  ;;  %4621 = vmatmul.mubr.bf16.gmra.mrb[236].mxu0 %v4193_v60  ;;  %v4201_v60 = vsel %vm4123_vm1, %v4192_v26, %v4200_v24  ;;  %v4215_v11 = vsel %vm4123_vm1, %v4206_v15, %v4214_v46  ;;  %v6605_v26 = vld [vmem:[%s6744_s30 + $0x180] ss:$16 sps:$4 sm:$0xff]  }
 0x227   : > { %4790 = vmatmul.mubr.bf16.gmra.mrb[236].mxu1 %v4197_v37  ;;  %4628 = vmatprep.mubr.bf16.mxu0 %v4203_v32 }
 0x228   : > { %4797 = vmatprep.mubr.bf16.mxu1 %v4207_v4  ;;  %v4205_v4 = vsel %vm4123_vm1, %v4196_v47, %v4204_v6  ;;  %v6608_v47 = vld [vmem:[%s6744_s30 + $0x1ac] ss:$16 sps:$4 sm:$0xff]  }
 0x229   : > { %v2261_v62 = vpop.f32.mrb[132].mxu0 }
 0x22a   : > { %v2262_v38 = vadd.f32 %v2261_v62, %v8027_v7  ;;  %v2430_v50 = vpop.f32.mrb[132].mxu1  ;;  %v2263_v21 = vpop.f32.mrb[133].mxu0  ;;  %v4211_v7 = vsel %vm4123_vm1, %v4202_v29, %v4210_v27  ;;  %v4208_v62 = vrot.slane %v6605_v26, 1 }
 0x22b   : > { %v2432_v30 = vpop.f32.mrb[133].mxu1  ;;  %v2264_v54 = vpop.f32.mrb[134].mxu0 }
 0x22c   : > { %v8512_v44 = vadd.f32 %v2430_v50, %v2262_v38  ;;  %v2265_v37 = vadd.f32 %v2264_v54, %v8034_v5  ;;  %v2433_v32 = vpop.f32.mrb[134].mxu1  ;;  %v2266_v56 = vpop.f32.mrb[135].mxu0  ;;  %v6606_v5 = vld [vmem:[%s6744_s30 + $0x188] ss:$16 sps:$4 sm:$0xff]   ;;  %v6607_v38 = vld [vmem:[%s6744_s30 + $0x1a4] ss:$16 sps:$4 sm:$0xff]  }
 0x22d   : > { %v2435_v59 = vpop.f32.mrb[135].mxu1  ;;  %v4212_v41 = vrot.slane %v6606_v5, 1  ;;  %v4218_v50 = vrot.slane %v6607_v38, 1  ;;  %v4222_v30 = vrot.slane %v6608_v47, 1 }
 0x22e   : > { %v8518_v12 = vadd.f32 %v2433_v32, %v2265_v37  ;;  %4629 = vmatmul.mubr.bf16.gmra.mrb[240].mxu0 %v4201_v60  ;;  %v4209_v60 = vsel %vm4123_vm1, %v4200_v24, %v4208_v62  ;;  %v6609_v24 = vld [vmem:[%s6744_s30 + $0x1a0] ss:$16 sps:$4 sm:$0xff]  }
 0x22f   : > { %4798 = vmatmul.mubr.bf16.gmra.mrb[240].mxu1 %v4205_v4  ;;  %4636 = vmatprep.mubr.bf16.mxu0 %v4211_v7  ;;  %v4213_v7 = vsel %vm4123_vm1, %v4204_v6, %v4212_v41  ;;  %v4219_v59 = vsel %vm4123_vm1, %v4210_v27, %v4218_v50  ;;  %v4223_v38 = vsel %vm4123_vm1, %v4214_v46, %v4222_v30  ;;  %v4216_v47 = vrot.slane %v6609_v24, 1  ;;  %v6610_v6 = vld [vmem:[%s6744_s30 + $0x1a8] ss:$16 sps:$4 sm:$0xff]   ;;  %v6611_v27 = vld [vmem:[%s6744_s30 + $0x1c4] ss:$16 sps:$4 sm:$0xff]  }
 0x230   : > { %4805 = vmatprep.mubr.bf16.mxu1 %v4215_v11 }
 0x231   : > { %v3708_v21 = vpop.f32.mrb[136].mxu0 }
 0x232   : > { %v3877_v54 = vpop.f32.mrb[136].mxu1  ;;  %v3710_v29 = vpop.f32.mrb[137].mxu0 }
 0x233   : > { %v3878_v56 = vadd.f32 %v3877_v54, %v3708_v21  ;;  %v3879_v15 = vpop.f32.mrb[137].mxu1  ;;  %v3711_v37 = vpop.f32.mrb[138].mxu0  ;;  %v4220_v54 = vrot.slane %v6610_v6, 1  ;;  %v4226_v29 = vrot.slane %v6611_v27, 1 }
 0x234   : > { %v3880_v32 = vpop.f32.mrb[138].mxu1  ;;  %v3713_v4 = vpop.f32.mrb[139].mxu0 }
 0x235   : > { %v8528_v11 = vadd.f32 %v3878_v56, %v8059_v34  ;;  %v3881_v26 = vadd.f32 %v3880_v32, %v3711_v37  ;;  %v3882_v5 = vpop.f32.mrb[139].mxu1  ;;  %v6612_v56 = vld [vmem:[%s6744_s30 + $0x1cc] ss:$16 sps:$4 sm:$0xff]  }
 0x236   : > { %4637 = vmatmul.mubr.bf16.gmra.mrb[244].mxu0 %v4209_v60  ;;  %v4230_v15 = vrot.slane %v6612_v56, 1  ;;  %v4227_v5 = vsel %vm4123_vm1, %v4218_v50, %v4226_v29  ;;  %v6615_v50 = vld [vmem:[%s6744_s30 + $0x1e4] ss:$16 sps:$4 sm:$0xff]  }
 0x237   : > { %v8532_v21 = vadd.f32 %v3881_v26, %v8067_v0  ;;  %4806 = vmatmul.mubr.bf16.gmra.mrb[244].mxu1 %v4213_v7  ;;  %4644 = vmatprep.mubr.bf16.mxu0 %v4219_v59  ;;  %v4217_v0 = vsel %vm4123_vm1, %v4208_v62, %v4216_v47  ;;  %v4221_v26 = vsel %vm4123_vm1, %v4212_v41, %v4220_v54  ;;  %v6613_v62 = vld [vmem:[%s6744_s30 + $0x1c0] ss:$16 sps:$4 sm:$0xff]   ;;  %v6614_v41 = vld [vmem:[%s6744_s30 + $0x1c8] ss:$16 sps:$4 sm:$0xff]  }
 0x238   : > { %4813 = vmatprep.mubr.bf16.mxu1 %v4223_v38  ;;  %v4231_v27 = vsel %vm4123_vm1, %v4222_v30, %v4230_v15  ;;  %v4224_v56 = vrot.slane %v6613_v62, 1 }
 0x239   : > { %v3716_v34 = vpop.f32.mrb[140].mxu0 }
 0x23a   : > { %v3885_v37 = vpop.f32.mrb[140].mxu1  ;;  %v3718_v32 = vpop.f32.mrb[141].mxu0 }
 0x23b   : > { %v3886_v4 = vadd.f32 %v3885_v37, %v3716_v34  ;;  %v3887_v46 = vpop.f32.mrb[141].mxu1  ;;  %v3719_v60 = vpop.f32.mrb[142].mxu0  ;;  %v4228_v37 = vrot.slane %v6614_v41, 1  ;;  %v4234_v32 = vrot.slane %v6615_v50, 1 }
 0x23c   : > { %v3888_v7 = vpop.f32.mrb[142].mxu1  ;;  %v3721_v59 = vpop.f32.mrb[143].mxu0 }
 0x23d   : > { %v8542_v38 = vadd.f32 %v3886_v4, %v8089_v55  ;;  %v3889_v24 = vadd.f32 %v3888_v7, %v3719_v60  ;;  %v3890_v6 = vpop.f32.mrb[143].mxu1  ;;  %v6616_v4 = vld [vmem:[%s6744_s30 + $0x1ec] ss:$16 sps:$4 sm:$0xff]  }
 0x23e   : > { %4645 = vmatmul.mubr.bf16.gmra.mrb[248].mxu0 %v4217_v0  ;;  %v4238_v46 = vrot.slane %v6616_v4, 1  ;;  %v4235_v6 = vsel %vm4123_vm1, %v4226_v29, %v4234_v32  ;;  %v8793_v4 = vld [vmem:[#allocation6_spill] sm:$0xff] }
 0x23f   : > { %v8546_v34 = vadd.f32 %v3889_v24, %v8100_v22  ;;  %4814 = vmatmul.mubr.bf16.gmra.mrb[248].mxu1 %v4221_v26  ;;  %4652 = vmatprep.mubr.bf16.mxu0 %v4227_v5  ;;  %v4225_v22 = vsel %vm4123_vm1, %v4216_v47, %v4224_v56  ;;  %v4229_v24 = vsel %vm4123_vm1, %v4220_v54, %v4228_v37  ;;  %v6617_v47 = vld [vmem:[%s6744_s30 + $0x1e0] ss:$16 sps:$4 sm:$0xff]   ;;  %v6619_v29 = vld [vmem:[%s6744_s30 + $0x204] ss:$16 sps:$4 sm:$0xff]  }
 0x240   : > { %4821 = vmatprep.mubr.bf16.mxu1 %v4231_v27  ;;  %v8792_v27 = vld [vmem:[#allocation5_spill] sm:$0xff] }
 0x241   : > { %v3724_v55 = vpop.f32.mrb[144].mxu0 }
 0x242   : > { %v3893_v60 = vpop.f32.mrb[144].mxu1  ;;  %v3726_v7 = vpop.f32.mrb[145].mxu0 }
 0x243   : > { %v3894_v30 = vadd.f32 %v3893_v60, %v3724_v55  ;;  %v3895_v0 = vpop.f32.mrb[145].mxu1  ;;  %v3727_v59 = vpop.f32.mrb[146].mxu0  ;;  %v4239_v55 = vsel %vm4123_vm1, %v4230_v15, %v4238_v46  ;;  %v4232_v7 = vrot.slane %v6617_v47, 1  ;;  %v8795_v47 = vld [vmem:[#allocation7_spill] sm:$0xff] }
 0x244   : > { %v3896_v26 = vpop.f32.mrb[146].mxu1  ;;  %v3729_v5 = vpop.f32.mrb[147].mxu0  ;;  %v6618_v0 = vld [vmem:[%s6744_s30 + $0x1e8] ss:$16 sps:$4 sm:$0xff]  }
 0x245   : > { %v8556_v62 = vadd.f32 %v3894_v30, %v8792_v27  ;;  %v3897_v41 = vadd.f32 %v3896_v26, %v3727_v59  ;;  %v3898_v50 = vpop.f32.mrb[147].mxu1  ;;  %v4236_v54 = vrot.slane %v6618_v0, 1  ;;  %v4242_v5 = vrot.slane %v6619_v29, 1  ;;  %v6620_v27 = vld [vmem:[%s6744_s30 + $0x20c] ss:$16 sps:$4 sm:$0xff]  }
 0x246   : > { %4653 = vmatmul.mubr.bf16.gmra.mrb[252].mxu0 %v4225_v22  ;;  %v4246_v49 = vrot.slane %v6620_v27, 1  ;;  %v4233_v15 = vsel %vm4123_vm1, %v4224_v56, %v4232_v7  ;;  %v8796_v56 = vld [vmem:[#allocation8_spill] sm:$0xff] }
 0x247   : > { %v8560_v60 = vadd.f32 %v3897_v41, %v8793_v4  ;;  %4822 = vmatmul.mubr.bf16.gmra.mrb[252].mxu1 %v4229_v24  ;;  %4660 = vmatprep.mubr.bf16.mxu0 %v4235_v6  ;;  %v4237_v4 = vsel %vm4123_vm1, %v4228_v37, %v4236_v54  ;;  %v6621_v37 = vld [vmem:[%s6744_s30 + $0x224] ss:$16 sps:$4 sm:$0xff]  }
 0x248   : > { %4829 = vmatprep.mubr.bf16.mxu1 %v4239_v55  ;;  %v4243_v55 = vsel %vm4123_vm1, %v4234_v32, %v4242_v5 }
 0x249   : > { %8794 = vst [vmem:[#allocation2_spill] sm:$0xff] %v8560_v60  ;;  %v3732_v30 = vpop.f32.mrb[148].mxu0 }
 0x24a   : > { %v3901_v59 = vpop.f32.mrb[148].mxu1  ;;  %v3734_v26 = vpop.f32.mrb[149].mxu0 }
 0x24b   : > { %v3902_v22 = vadd.f32 %v3901_v59, %v3732_v30  ;;  %v3903_v41 = vpop.f32.mrb[149].mxu1  ;;  %v3735_v50 = vpop.f32.mrb[150].mxu0  ;;  %v4247_v26 = vsel %vm4123_vm1, %v4238_v46, %v4246_v49  ;;  %v4250_v59 = vrot.slane %v6621_v37, 1 }
 0x24c   : > { %v3904_v24 = vpop.f32.mrb[150].mxu1  ;;  %v3737_v6 = vpop.f32.mrb[151].mxu0 }
 0x24d   : > { %v8570_v0 = vadd.f32 %v3902_v22, %v8795_v47  ;;  %v3905_v29 = vadd.f32 %v3904_v24, %v3735_v50  ;;  %v3906_v27 = vpop.f32.mrb[151].mxu1  ;;  %v6622_v6 = vld [vmem:[%s6744_s30 + $0x22c] ss:$16 sps:$4 sm:$0xff]   ;;  %v8797_v24 = vrot.slane %v8120_v40, 1 }
 0x24e   : > { %4661 = vmatmul.mubr.bf16.gmra.mrb[0].mxu0 %v4233_v15  ;;  %v4254_v57 = vrot.slane %v6622_v6, 1  ;;  %v4251_v27 = vsel %vm4123_vm1, %v4242_v5, %v4250_v59 }
 0x24f   : > { %v8574_v30 = vadd.f32 %v3905_v29, %v8796_v56  ;;  %4830 = vmatmul.mubr.bf16.gmra.mrb[0].mxu1 %v4237_v4  ;;  %4668 = vmatprep.mubr.bf16.mxu0 %v4243_v55  ;;  %v4241_v46 = vsel %vm4123_vm1, %v4232_v7, %v8797_v24  ;;  %v8798_v4 = vrot.slane %v8134_v16, 1  ;;  %v4258_v16 = vrot.slane %v8176_v14, 1 }
 0x250   : > { %4837 = vmatprep.mubr.bf16.mxu1 %v4247_v26  ;;  %v4255_v37 = vsel %vm4123_vm1, %v4246_v49, %v4254_v57 }
 0x251   : > { %v3740_v41 = vpop.f32.mrb[152].mxu0  ;;  %v4245_v55 = vsel %vm4123_vm1, %v4236_v54, %v8798_v4  ;;  %v4262_v54 = vrot.slane %v8179_v17, 1  ;;  %v4259_v49 = vsel %vm4123_vm1, %v4250_v59, %v4258_v16 }
 0x252   : > { %v3909_v32 = vpop.f32.mrb[152].mxu1  ;;  %v3742_v60 = vpop.f32.mrb[153].mxu0 }
 0x253   : > { %v3910_v22 = vadd.f32 %v3909_v32, %v3740_v41  ;;  %v3911_v47 = vpop.f32.mrb[153].mxu1  ;;  %v3743_v50 = vpop.f32.mrb[154].mxu0 }
 0x254   : > { %v3912_v15 = vpop.f32.mrb[154].mxu1  ;;  %v3745_v29 = vpop.f32.mrb[155].mxu0 }
 0x255   : > { %v8586_v26 = vadd.f32 %v3910_v22, %v8191_v36  ;;  %v3913_v56 = vadd.f32 %v3912_v15, %v3743_v50  ;;  %v3914_v60 = vpop.f32.mrb[155].mxu1 }
 0x256   : > { %4669 = vmatmul.mubr.bf16.gmra.mrb[4].mxu0 %v4241_v46  ;;  %v4263_v46 = vsel %vm4123_vm1, %v4254_v57, %v4262_v54 }
 0x257   : > { %v8590_v40 = vadd.f32 %v3913_v56, %v8205_v35  ;;  %4838 = vmatmul.mubr.bf16.gmra.mrb[4].mxu1 %v4245_v55  ;;  %4676 = vmatprep.mubr.bf16.mxu0 %v4251_v27 }
 0x258   : > { %4845 = vmatprep.mubr.bf16.mxu1 %v4255_v37 }
 0x259   : > { %v3748_v7 = vpop.f32.mrb[156].mxu0 }
 0x25a   : > { %v3917_v5 = vpop.f32.mrb[156].mxu1  ;;  %v3750_v41 = vpop.f32.mrb[157].mxu0 }
 0x25b   : > { %v3918_v36 = vadd.f32 %v3917_v5, %v3748_v7  ;;  %v3919_v6 = vpop.f32.mrb[157].mxu1  ;;  %v3751_v32 = vpop.f32.mrb[158].mxu0 }
 0x25c   : > { %v3920_v22 = vpop.f32.mrb[158].mxu1  ;;  %v3753_v47 = vpop.f32.mrb[159].mxu0 }
 0x25d   : > { %v8596_v35 = vadd.f32 %v3918_v36, %v8230_v58  ;;  %v3921_v50 = vadd.f32 %v3920_v22, %v3751_v32  ;;  %v3922_v24 = vpop.f32.mrb[159].mxu1 }
 0x25e   : > { %4677 = vmatmul.mubr.bf16.gmra.mrb[8].mxu0 %v8296_v20 }
 0x25f   : > { %v8601_v14 = vadd.f32 %v3921_v50, %v8245_v48  ;;  %4846 = vmatmul.mubr.bf16.gmra.mrb[8].mxu1 %v8303_v19  ;;  %4684 = vmatprep.mubr.bf16.mxu0 %v4259_v49 }
 0x260   : > { %4853 = vmatprep.mubr.bf16.mxu1 %v4263_v46 }
 0x261   : > { %v3756_v17 = vpop.f32.mrb[160].mxu0 }
 0x262   : > { %v3925_v15 = vpop.f32.mrb[160].mxu1  ;;  %v3758_v29 = vpop.f32.mrb[161].mxu0 }
 0x263   : > { %v3926_v59 = vadd.f32 %v3925_v15, %v3756_v17  ;;  %v3927_v4 = vpop.f32.mrb[161].mxu1  ;;  %v3759_v58 = vpop.f32.mrb[162].mxu0 }
 0x264   : > { %v3928_v55 = vpop.f32.mrb[162].mxu1  ;;  %v3761_v27 = vpop.f32.mrb[163].mxu0 }
 0x265   : > { %v8605_v56 = vadd.f32 %v3926_v59, %v8267_v33  ;;  %v3929_v57 = vadd.f32 %v3928_v55, %v3759_v58  ;;  %v3930_v20 = vpop.f32.mrb[163].mxu1 }
 0x266   : > { %4685 = vmatmul.mubr.bf16.gmra.mrb[12].mxu0 %v8340_v2 }
 0x267   : > { %v8609_v48 = vadd.f32 %v3929_v57, %v8285_v45  ;;  %4854 = vmatmul.mubr.bf16.gmra.mrb[12].mxu1 %v8345_v39 }
 0x269   : > { %v3764_v19 = vpop.f32.mrb[164].mxu0 }
 0x26a   : > { %v3933_v60 = vpop.f32.mrb[164].mxu1  ;;  %v3766_v37 = vpop.f32.mrb[165].mxu0 }
 0x26b   : > { %v3934_v16 = vadd.f32 %v3933_v60, %v3764_v19  ;;  %v3935_v7 = vpop.f32.mrb[165].mxu1  ;;  %v3767_v54 = vpop.f32.mrb[166].mxu0 }
 0x26c   : > { %v3936_v5 = vpop.f32.mrb[166].mxu1  ;;  %v3769_v41 = vpop.f32.mrb[167].mxu0 }
 0x26d   : > { %v8613_v33 = vadd.f32 %v3934_v16, %v8318_v25  ;;  %v3937_v36 = vadd.f32 %v3936_v5, %v3767_v54  ;;  %v3938_v6 = vpop.f32.mrb[167].mxu1 }
 0x26f   : > { %v8616_v2 = vadd.f32 %v3937_v36, %v8334_v51 }
 0x271   : > { %v3772_v45 = vpop.f32.mrb[168].mxu0 }
 0x272   : > { %v3941_v32 = vpop.f32.mrb[168].mxu1  ;;  %v3774_v22 = vpop.f32.mrb[169].mxu0 }
 0x273   : > { %v3942_v39 = vadd.f32 %v3941_v32, %v3772_v45  ;;  %v3943_v47 = vpop.f32.mrb[169].mxu1  ;;  %v3775_v49 = vpop.f32.mrb[170].mxu0 }
 0x274   : > { %v3944_v50 = vpop.f32.mrb[170].mxu1  ;;  %v3777_v24 = vpop.f32.mrb[171].mxu0 }
 0x275   : > { %v8619_v46 = vadd.f32 %v3942_v39, %v8358_v1  ;;  %v3945_v17 = vadd.f32 %v3944_v50, %v3775_v49  ;;  %v3946_v15 = vpop.f32.mrb[171].mxu1 }
 0x277   : > { %v8622_v25 = vadd.f32 %v3945_v17, %v8370_v31 }
 0x279   : > { %v3780_v29 = vpop.f32.mrb[172].mxu0 }
 0x27a   : > { %v3949_v59 = vpop.f32.mrb[172].mxu1  ;;  %v3782_v51 = vpop.f32.mrb[173].mxu0 }
 0x27b   : > { %v3950_v4 = vadd.f32 %v3949_v59, %v3780_v29  ;;  %v3951_v58 = vpop.f32.mrb[173].mxu1  ;;  %v3783_v55 = vpop.f32.mrb[174].mxu0 }
 0x27c   : > { %v3952_v27 = vpop.f32.mrb[174].mxu1  ;;  %v3785_v57 = vpop.f32.mrb[175].mxu0 }
 0x27d   : > { %v8625_v20 = vadd.f32 %v3950_v4, %v8384_v28  ;;  %v3953_v19 = vadd.f32 %v3952_v27, %v3783_v55  ;;  %v3954_v60 = vpop.f32.mrb[175].mxu1 }
 0x27f   : > { %v8628_v1 = vadd.f32 %v3953_v19, %v8396_v9 }
 0x281   : > { %v3788_v37 = vpop.f32.mrb[176].mxu0 }
 0x282   : > { %v3957_v16 = vpop.f32.mrb[176].mxu1  ;;  %v3790_v31 = vpop.f32.mrb[177].mxu0 }
 0x283   : > { %v3958_v7 = vadd.f32 %v3957_v16, %v3788_v37  ;;  %v3959_v54 = vpop.f32.mrb[177].mxu1  ;;  %v3791_v5 = vpop.f32.mrb[178].mxu0 }
 0x284   : > { %v3960_v41 = vpop.f32.mrb[178].mxu1  ;;  %v3793_v36 = vpop.f32.mrb[179].mxu0 }
 0x285   : > { %v8631_v6 = vadd.f32 %v3958_v7, %v8410_v8  ;;  %v3961_v45 = vadd.f32 %v3960_v41, %v3791_v5  ;;  %v3962_v32 = vpop.f32.mrb[179].mxu1 }
 0x287   : > { %v8634_v28 = vadd.f32 %v3961_v45, %v8422_v42 }
 0x289   : > { %v3796_v22 = vpop.f32.mrb[180].mxu0 }
 0x28a   : > { %v3965_v39 = vpop.f32.mrb[180].mxu1  ;;  %v3798_v9 = vpop.f32.mrb[181].mxu0 }
 0x28b   : > { %v3966_v47 = vadd.f32 %v3965_v39, %v3796_v22  ;;  %v3967_v49 = vpop.f32.mrb[181].mxu1  ;;  %v3799_v50 = vpop.f32.mrb[182].mxu0 }
 0x28c   : > { %v3968_v24 = vpop.f32.mrb[182].mxu1  ;;  %v3801_v17 = vpop.f32.mrb[183].mxu0 }
 0x28d   : > { %v8637_v15 = vadd.f32 %v3966_v47, %v8436_v23  ;;  %v3969_v29 = vadd.f32 %v3968_v24, %v3799_v50  ;;  %v3970_v59 = vpop.f32.mrb[183].mxu1 }
 0x28f   : > { %v8640_v8 = vadd.f32 %v3969_v29, %v8448_v61 }
 0x291   : > { %v3804_v51 = vpop.f32.mrb[184].mxu0 }
 0x292   : > { %v3973_v4 = vpop.f32.mrb[184].mxu1  ;;  %v3806_v42 = vpop.f32.mrb[185].mxu0 }
 0x293   : > { %v3974_v58 = vadd.f32 %v3973_v4, %v3804_v51  ;;  %v3975_v55 = vpop.f32.mrb[185].mxu1  ;;  %v3807_v27 = vpop.f32.mrb[186].mxu0 }
 0x294   : > { %v3976_v57 = vpop.f32.mrb[186].mxu1  ;;  %v3809_v19 = vpop.f32.mrb[187].mxu0 }
 0x295   : > { %v8643_v60 = vadd.f32 %v3974_v58, %v8456_v52  ;;  %v3977_v37 = vadd.f32 %v3976_v57, %v3807_v27  ;;  %v3978_v16 = vpop.f32.mrb[187].mxu1 }
 0x297   : > { %v8646_v23 = vadd.f32 %v3977_v37, %v8462_v63 }
 0x299   : > { %v3812_v31 = vpop.f32.mrb[188].mxu0 }
 0x29a   : > { %v3981_v7 = vpop.f32.mrb[188].mxu1  ;;  %v3814_v61 = vpop.f32.mrb[189].mxu0 }
 0x29b   : > { %v3982_v54 = vadd.f32 %v3981_v7, %v3812_v31  ;;  %v3983_v5 = vpop.f32.mrb[189].mxu1  ;;  %v3815_v41 = vpop.f32.mrb[190].mxu0 }
 0x29c   : > { %v3984_v36 = vpop.f32.mrb[190].mxu1  ;;  %v3817_v45 = vpop.f32.mrb[191].mxu0 }
 0x29d   : > { %v8649_v32 = vadd.f32 %v3982_v54, %v8470_v10  ;;  %v3985_v22 = vadd.f32 %v3984_v36, %v3815_v41  ;;  %v3986_v39 = vpop.f32.mrb[191].mxu1 }
 0x29f   : > { %v8652_v52 = vadd.f32 %v3985_v22, %v8476_v43 }
 0x2a1   : > { %v3820_v9 = vpop.f32.mrb[192].mxu0 }
 0x2a2   : > { %v3989_v47 = vpop.f32.mrb[192].mxu1  ;;  %v3822_v63 = vpop.f32.mrb[193].mxu0 }
 0x2a3   : > { %v3990_v49 = vadd.f32 %v3989_v47, %v3820_v9  ;;  %v3991_v50 = vpop.f32.mrb[193].mxu1  ;;  %v3823_v24 = vpop.f32.mrb[194].mxu0 }
 0x2a4   : > { %v3992_v17 = vpop.f32.mrb[194].mxu1  ;;  %v3825_v29 = vpop.f32.mrb[195].mxu0 }
 0x2a5   : > { %v8655_v59 = vadd.f32 %v3990_v49, %v8484_v53  ;;  %v3993_v51 = vadd.f32 %v3992_v17, %v3823_v24  ;;  %v3994_v4 = vpop.f32.mrb[195].mxu1  ;;  %v4974_v49 = vpop.permute.xlu0 %4973 }
 0x2a7   : > { %v8658_v10 = vadd.f32 %v3993_v51, %v8490_v13 }
 0x2a9   : > { %v3828_v42 = vpop.f32.mrb[196].mxu0 }
 0x2aa   : > { %v3997_v58 = vpop.f32.mrb[196].mxu1  ;;  %v3830_v43 = vpop.f32.mrb[197].mxu0 }
 0x2ab   : > { %v3998_v55 = vadd.f32 %v3997_v58, %v3828_v42  ;;  %v3999_v27 = vpop.f32.mrb[197].mxu1  ;;  %v3831_v57 = vpop.f32.mrb[198].mxu0 }
 0x2ac   : > { %v4000_v19 = vpop.f32.mrb[198].mxu1  ;;  %v3833_v37 = vpop.f32.mrb[199].mxu0 }
 0x2ad   : > { %v8661_v16 = vadd.f32 %v3998_v55, %v8498_v3  ;;  %v4001_v31 = vadd.f32 %v4000_v19, %v3831_v57  ;;  %v4002_v7 = vpop.f32.mrb[199].mxu1  ;;  %v4979_v27 = vpop.permute.xlu0 %4978 }
 0x2af   : > { %v8664_v53 = vadd.f32 %v4001_v31, %v8504_v18  ;;  %v4984_v31 = vpop.permute.xlu1 %4983 }
 0x2b1   : > { %v3836_v61 = vpop.f32.mrb[200].mxu0 }
 0x2b2   : > { %v4005_v54 = vpop.f32.mrb[200].mxu1  ;;  %v3838_v13 = vpop.f32.mrb[201].mxu0 }
 0x2b3   : > { %v4006_v5 = vadd.f32 %v4005_v54, %v3836_v61  ;;  %v4007_v41 = vpop.f32.mrb[201].mxu1  ;;  %v3839_v36 = vpop.f32.mrb[202].mxu0 }
 0x2b4   : > { %v4008_v45 = vpop.f32.mrb[202].mxu1  ;;  %v3841_v22 = vpop.f32.mrb[203].mxu0 }
 0x2b5   : > { %v8667_v39 = vadd.f32 %v4006_v5, %v8512_v44  ;;  %v4009_v9 = vadd.f32 %v4008_v45, %v3839_v36  ;;  %v4010_v47 = vpop.f32.mrb[203].mxu1  ;;  %v8675_v44 = vld [vmem:[%s8773_s2] ss:$0 sm:$0xff] }
 0x2b7   : > { %v8670_v3 = vadd.f32 %v4009_v9, %v8518_v12 }
 0x2b9   : > { %v4558_v63 = vpop.f32.mrb[204].mxu0 }
 0x2ba   : > { %v4727_v18 = vpop.f32.mrb[204].mxu1  ;;  %v4560_v50 = vpop.f32.mrb[205].mxu0 }
 0x2bb   : > { %v4728_v24 = vadd.f32 %v4727_v18, %v4558_v63  ;;  %v4729_v17 = vpop.f32.mrb[205].mxu1  ;;  %v4561_v29 = vpop.f32.mrb[206].mxu0 }
 0x2bc   : > { %v4730_v51 = vpop.f32.mrb[206].mxu1  ;;  %v4563_v4 = vpop.f32.mrb[207].mxu0 }
 0x2bd   : > { %v4862_v42 = vadd.f32 %v4728_v24, %v8528_v11  ;;  %v4731_v58 = vadd.f32 %v4730_v51, %v4561_v29  ;;  %v4732_v12 = vpop.f32.mrb[207].mxu1  ;;  %v4989_v29 = vpop.permute.xlu1 %4988 }
 0x2bf   : > { %v4863_v43 = vadd.f32 %v4731_v58, %v8532_v21  ;;  %v4937_v55 = vadd.f32 %v8675_v44, %v4862_v42 }
 0x2c1   : > { %v5141_v57 = vmul.f32 %v4974_v49, %v4937_v55  ;;  %v4938_v19 = vadd.f32 %v8675_v44, %v4863_v43  ;;  %v4566_v37 = vpop.f32.mrb[208].mxu0 }
 0x2c2   : > { %v4735_v7 = vpop.f32.mrb[208].mxu1  ;;  %v4568_v61 = vpop.f32.mrb[209].mxu0 }
 0x2c3   : > { %v5209_v54 = vmul.f32 0.2, %v5141_v57  ;;  %v5142_v13 = vmul.f32 %v4979_v27, %v4938_v19  ;;  %v4736_v5 = vadd.f32 %v4735_v7, %v4566_v37  ;;  %v4737_v41 = vpop.f32.mrb[209].mxu1  ;;  %v4569_v11 = vpop.f32.mrb[210].mxu0  ;;  %vm5175_vm2 = vcmp.gt.f32.partialorder %v5141_v57, 0.0 }
 0x2c4   : > { %v4738_v36 = vpop.f32.mrb[210].mxu1  ;;  %v4571_v45 = vpop.f32.mrb[211].mxu0 }
 0x2c5   : > { %vm5176_vm3 = vcmp.gt.f32.partialorder %v5142_v13, 0.0  ;;  %v5210_v21 = vmul.f32 0.2, %v5142_v13  ;;  %v4864_v22 = vadd.f32 %v4736_v5, %v8542_v38  ;;  %v4740_v9 = vpop.f32.mrb[211].mxu1  ;;  %v4739_v47 = vadd.f32 %v4738_v36, %v4569_v11  ;;  %v4994_v11 = vpop.permute.xlu0 %4993 }
 0x2c6   : > { %v5243_v63 = vsel %vm5175_vm2, %v5141_v57, %v5209_v54  ;;  %v8799_v54 = vld [vmem:[#allocation2_spill] sm:$0xff]  ;;  %v4999_v45 = vpop.permute.xlu1 %4998 }
 0x2c7   : > { %v5244_v49 = vsel %vm5176_vm3, %v5142_v13, %v5210_v21  ;;  %v4939_v18 = vadd.f32 %v8675_v44, %v4864_v22  ;;  %v4865_v24 = vadd.f32 %v4739_v47, %v8546_v34 }
 0x2c8   : > { %v6051_v50 = vpack.c.bf16 %v5244_v49, %v5243_v63 }
 0x2c9   : > { %v5143_v17 = vmul.f32 %v4984_v31, %v4939_v18  ;;  %v4574_v51 = vpop.f32.mrb[212].mxu0  ;;  %v4940_v38 = vadd.f32 %v8675_v44, %v4865_v24 }
 0x2ca   : > { %6052 = vst [vmem:[%s8686_s25] sm:$0xff] %v6051_v50   ;;  %v4743_v4 = vpop.f32.mrb[212].mxu1  ;;  %v4576_v42 = vpop.f32.mrb[213].mxu0 }
 0x2cb   : > { %v4744_v58 = vadd.f32 %v4743_v4, %v4574_v51  ;;  %v4745_v12 = vpop.f32.mrb[213].mxu1  ;;  %v4577_v43 = vpop.f32.mrb[214].mxu0  ;;  %v5211_v55 = vmul.f32 0.2, %v5143_v17  ;;  %v5144_v27 = vmul.f32 %v4989_v29, %v4940_v38  ;;  %vm5177_vm4 = vcmp.gt.f32.partialorder %v5143_v17, 0.0 }
 0x2cc   : > { %v4746_v57 = vpop.f32.mrb[214].mxu1  ;;  %v4579_v19 = vpop.f32.mrb[215].mxu0 }
 0x2cd   : > { %v4866_v37 = vadd.f32 %v4744_v58, %v8556_v62  ;;  %v4747_v7 = vadd.f32 %v4746_v57, %v4577_v43  ;;  %v4748_v34 = vpop.f32.mrb[215].mxu1  ;;  %vm5178_vm5 = vcmp.gt.f32.partialorder %v5144_v27, 0.0  ;;  %v5212_v31 = vmul.f32 0.2, %v5144_v27  ;;  %v5009_v19 = vpop.permute.xlu1 %5008 }
 0x2ce   : > { %v5245_v5 = vsel %vm5177_vm4, %v5143_v17, %v5211_v55 }
 0x2cf   : > { %v4941_v61 = vadd.f32 %v8675_v44, %v4866_v37  ;;  %v4867_v13 = vadd.f32 %v4747_v7, %v8799_v54  ;;  %v5246_v41 = vsel %vm5178_vm5, %v5144_v27, %v5212_v31  ;;  %v5004_v27 = vpop.permute.xlu0 %5003 }
 0x2d0   : > { %v6056_v36 = vpack.c.bf16 %v5246_v41, %v5245_v5 }
 0x2d1   : > { %v5145_v21 = vmul.f32 %v4994_v11, %v4941_v61  ;;  %v4942_v22 = vadd.f32 %v8675_v44, %v4867_v13  ;;  %v4582_v9 = vpop.f32.mrb[216].mxu0 }
 0x2d2   : > { %v4751_v47 = vpop.f32.mrb[216].mxu1  ;;  %v4584_v62 = vpop.f32.mrb[217].mxu0  ;;  %6133 = vst [vmem:[%s8686_s25 + $0x8] sm:$0xff] %v6056_v36  }
 0x2d3   : > { %v5213_v63 = vmul.f32 0.2, %v5145_v21  ;;  %v5146_v49 = vmul.f32 %v4999_v45, %v4942_v22  ;;  %v4752_v18 = vadd.f32 %v4751_v47, %v4582_v9  ;;  %v4753_v50 = vpop.f32.mrb[217].mxu1  ;;  %v4585_v24 = vpop.f32.mrb[218].mxu0  ;;  %vm5179_vm6 = vcmp.gt.f32.partialorder %v5145_v21, 0.0 }
 0x2d4   : > { %v4754_v29 = vpop.f32.mrb[218].mxu1  ;;  %v4587_v17 = vpop.f32.mrb[219].mxu0 }
 0x2d5   : > { %vm5180_vm7 = vcmp.gt.f32.partialorder %v5146_v49, 0.0  ;;  %v5214_v51 = vmul.f32 0.2, %v5146_v49  ;;  %v4868_v38 = vadd.f32 %v4752_v18, %v8570_v0  ;;  %v4756_v4 = vpop.f32.mrb[219].mxu1  ;;  %v4755_v42 = vadd.f32 %v4754_v29, %v4585_v24  ;;  %v5019_v18 = vpop.permute.xlu1 %5018 }
 0x2d6   : > { %v5247_v58 = vsel %vm5179_vm6, %v5145_v21, %v5213_v63  ;;  %v5014_v63 = vpop.permute.xlu0 %5013 }
 0x2d7   : > { %v5248_v12 = vsel %vm5180_vm7, %v5146_v49, %v5214_v51  ;;  %v4943_v43 = vadd.f32 %v8675_v44, %v4868_v38  ;;  %v4869_v57 = vadd.f32 %v4755_v42, %v8574_v30 }
 0x2d8   : > { %v6061_v55 = vpack.c.bf16 %v5248_v12, %v5247_v58 }
 0x2d9   : > { %v5147_v37 = vmul.f32 %v5004_v27, %v4943_v43  ;;  %v4590_v7 = vpop.f32.mrb[220].mxu0  ;;  %v4944_v34 = vadd.f32 %v8675_v44, %v4869_v57 }
 0x2da   : > { %6134 = vst [vmem:[%s8686_s25 + $0x10] sm:$0xff] %v6061_v55   ;;  %v4759_v31 = vpop.f32.mrb[220].mxu1  ;;  %v4592_v61 = vpop.f32.mrb[221].mxu0 }
 0x2db   : > { %v4760_v54 = vadd.f32 %v4759_v31, %v4590_v7  ;;  %v4761_v0 = vpop.f32.mrb[221].mxu1  ;;  %v4593_v13 = vpop.f32.mrb[222].mxu0  ;;  %v5215_v5 = vmul.f32 0.2, %v5147_v37  ;;  %v5148_v41 = vmul.f32 %v5009_v19, %v4944_v34  ;;  %vm5181_vm8 = vcmp.gt.f32.partialorder %v5147_v37, 0.0 }
 0x2dc   : > { %v4762_v11 = vpop.f32.mrb[222].mxu1  ;;  %v4595_v36 = vpop.f32.mrb[223].mxu0 }
 0x2dd   : > { %v4870_v45 = vadd.f32 %v4760_v54, %v8586_v26  ;;  %v4763_v21 = vadd.f32 %v4762_v11, %v4593_v13  ;;  %v4764_v30 = vpop.f32.mrb[223].mxu1  ;;  %vm5182_vm9 = vcmp.gt.f32.partialorder %v5148_v41, 0.0  ;;  %v5216_v22 = vmul.f32 0.2, %v5148_v41  ;;  %v5024_v31 = vpop.permute.xlu0 %5023 }
 0x2de   : > { %v5249_v62 = vsel %vm5181_vm8, %v5147_v37, %v5215_v5  ;;  %v5029_v0 = vpop.permute.xlu1 %5028 }
 0x2df   : > { %v4945_v9 = vadd.f32 %v8675_v44, %v4870_v45  ;;  %v4871_v47 = vadd.f32 %v4763_v21, %v8590_v40  ;;  %v5250_v49 = vsel %vm5182_vm9, %v5148_v41, %v5216_v22 }
 0x2e0   : > { %v6066_v50 = vpack.c.bf16 %v5250_v49, %v5249_v62 }
 0x2e1   : > { %v5149_v24 = vmul.f32 %v5014_v63, %v4945_v9  ;;  %v4946_v29 = vadd.f32 %v8675_v44, %v4871_v47  ;;  %v4598_v17 = vpop.f32.mrb[224].mxu0 }
 0x2e2   : > { %v4767_v51 = vpop.f32.mrb[224].mxu1  ;;  %v4600_v26 = vpop.f32.mrb[225].mxu0  ;;  %6135 = vst [vmem:[%s8686_s25 + $0x18] sm:$0xff] %v6066_v50  }
 0x2e3   : > { %v5217_v38 = vmul.f32 0.2, %v5149_v24  ;;  %v5150_v4 = vmul.f32 %v5019_v18, %v4946_v29  ;;  %v4768_v42 = vadd.f32 %v4767_v51, %v4598_v17  ;;  %v4769_v58 = vpop.f32.mrb[225].mxu1  ;;  %v4601_v12 = vpop.f32.mrb[226].mxu0  ;;  %vm5183_vm10 = vcmp.gt.f32.partialorder %v5149_v24, 0.0 }
 0x2e4   : > { %v4770_v43 = vpop.f32.mrb[226].mxu1  ;;  %v4603_v40 = vpop.f32.mrb[227].mxu0 }
 0x2e5   : > { %vm5184_vm11 = vcmp.gt.f32.partialorder %v5150_v4, 0.0  ;;  %v5218_v55 = vmul.f32 0.2, %v5150_v4  ;;  %v4872_v27 = vadd.f32 %v4768_v42, %v8596_v35  ;;  %v4772_v57 = vpop.f32.mrb[227].mxu1  ;;  %v4771_v19 = vadd.f32 %v4770_v43, %v4601_v12  ;;  %v5039_v51 = vpop.permute.xlu1 %5038 }
 0x2e6   : > { %v5251_v37 = vsel %vm5183_vm10, %v5149_v24, %v5217_v38  ;;  %v5034_v24 = vpop.permute.xlu0 %5033 }
 0x2e7   : > { %v5252_v7 = vsel %vm5184_vm11, %v5150_v4, %v5218_v55  ;;  %v4947_v34 = vadd.f32 %v8675_v44, %v4872_v27  ;;  %v4873_v54 = vadd.f32 %v4771_v19, %v8601_v14 }
 0x2e8   : > { %v6071_v61 = vpack.c.bf16 %v5252_v7, %v5251_v37 }
 0x2e9   : > { %v5151_v13 = vmul.f32 %v5024_v31, %v4947_v34  ;;  %v4606_v5 = vpop.f32.mrb[228].mxu0  ;;  %v4948_v41 = vadd.f32 %v8675_v44, %v4873_v54 }
 0x2ea   : > { %6136 = vst [vmem:[%s8686_s25 + $0x20] sm:$0xff] %v6071_v61   ;;  %v4775_v11 = vpop.f32.mrb[228].mxu1  ;;  %v4608_v36 = vpop.f32.mrb[229].mxu0 }
 0x2eb   : > { %v4776_v45 = vadd.f32 %v4775_v11, %v4606_v5  ;;  %v4777_v35 = vpop.f32.mrb[229].mxu1  ;;  %v4609_v21 = vpop.f32.mrb[230].mxu0  ;;  %v5219_v30 = vmul.f32 0.2, %v5151_v13  ;;  %v5152_v22 = vmul.f32 %v5029_v0, %v4948_v41  ;;  %vm5185_vm12 = vcmp.gt.f32.partialorder %v5151_v13, 0.0 }
 0x2ec   : > { %v4778_v9 = vpop.f32.mrb[230].mxu1  ;;  %v4611_v47 = vpop.f32.mrb[231].mxu0 }
 0x2ed   : > { %v4874_v62 = vadd.f32 %v4776_v45, %v8605_v56  ;;  %v4779_v63 = vadd.f32 %v4778_v9, %v4609_v21  ;;  %v4780_v14 = vpop.f32.mrb[231].mxu1  ;;  %vm5186_vm13 = vcmp.gt.f32.partialorder %v5152_v22, 0.0  ;;  %v5220_v49 = vmul.f32 0.2, %v5152_v22  ;;  %v5044_v0 = vpop.permute.xlu0 %5043 }
 0x2ee   : > { %v5253_v29 = vsel %vm5185_vm12, %v5151_v13, %v5219_v30  ;;  %v5049_v41 = vpop.permute.xlu1 %5048 }
 0x2ef   : > { %v4949_v18 = vadd.f32 %v8675_v44, %v4874_v62  ;;  %v4875_v50 = vadd.f32 %v4779_v63, %v8609_v48  ;;  %v5254_v17 = vsel %vm5186_vm13, %v5152_v22, %v5220_v49 }
 0x2f0   : > { %v6076_v26 = vpack.c.bf16 %v5254_v17, %v5253_v29 }
 0x2f1   : > { %v5153_v38 = vmul.f32 %v5034_v24, %v4949_v18  ;;  %v4950_v4 = vadd.f32 %v8675_v44, %v4875_v50  ;;  %v4614_v42 = vpop.f32.mrb[232].mxu0  ;;  %v5054_v29 = vpop.permute.xlu0 %5053 }
 0x2f2   : > { %v4783_v58 = vpop.f32.mrb[232].mxu1  ;;  %v4616_v56 = vpop.f32.mrb[233].mxu0  ;;  %6137 = vst [vmem:[%s8686_s25 + $0x28] sm:$0xff] %v6076_v26  }
 0x2f3   : > { %v5221_v12 = vmul.f32 0.2, %v5153_v38  ;;  %v5154_v43 = vmul.f32 %v5039_v51, %v4950_v4  ;;  %v4784_v40 = vadd.f32 %v4783_v58, %v4614_v42  ;;  %v4785_v55 = vpop.f32.mrb[233].mxu1  ;;  %v4617_v27 = vpop.f32.mrb[234].mxu0  ;;  %vm5187_vm14 = vcmp.gt.f32.partialorder %v5153_v38, 0.0 }
 0x2f4   : > { %v4786_v57 = vpop.f32.mrb[234].mxu1  ;;  %v4619_v48 = vpop.f32.mrb[235].mxu0 }
 0x2f5   : > { %vm5188_vm15 = vcmp.gt.f32.partialorder %v5154_v43, 0.0  ;;  %v5222_v19 = vmul.f32 0.2, %v5154_v43  ;;  %v4876_v37 = vadd.f32 %v4784_v40, %v8613_v33  ;;  %v4788_v7 = vpop.f32.mrb[235].mxu1  ;;  %v4787_v34 = vadd.f32 %v4786_v57, %v4617_v27  ;;  %v5059_v26 = vpop.permute.xlu1 %5058 }
 0x2f6   : > { %v5255_v31 = vsel %vm5187_vm14, %v5153_v38, %v5221_v12 }
 0x2f7   : > { %v5256_v61 = vsel %vm5188_vm15, %v5154_v43, %v5222_v19  ;;  %v4951_v54 = vadd.f32 %v8675_v44, %v4876_v37  ;;  %v4877_v5 = vadd.f32 %v4787_v34, %v8616_v2 }
 0x2f8   : > { %v6081_v13 = vpack.c.bf16 %v5256_v61, %v5255_v31 }
 0x2f9   : > { %v5155_v11 = vmul.f32 %v5044_v0, %v4951_v54  ;;  %v4622_v36 = vpop.f32.mrb[236].mxu0  ;;  %v4952_v45 = vadd.f32 %v8675_v44, %v4877_v5  ;;  %v5064_v54 = vpop.permute.xlu0 %5063 }
 0x2fa   : > { %6138 = vst [vmem:[%s8686_s25 + $0x30] sm:$0xff] %v6081_v13   ;;  %v4791_v35 = vpop.f32.mrb[236].mxu1  ;;  %v4624_v21 = vpop.f32.mrb[237].mxu0 }
 0x2fb   : > { %v4792_v30 = vadd.f32 %v4791_v35, %v4622_v36  ;;  %v4793_v33 = vpop.f32.mrb[237].mxu1  ;;  %v4625_v22 = vpop.f32.mrb[238].mxu0  ;;  %v5223_v9 = vmul.f32 0.2, %v5155_v11  ;;  %v5156_v47 = vmul.f32 %v5049_v41, %v4952_v45  ;;  %vm5189_vm0 = vcmp.gt.f32.partialorder %v5155_v11, 0.0 }
 0x2fc   : > { %v4794_v62 = vpop.f32.mrb[238].mxu1  ;;  %v4627_v63 = vpop.f32.mrb[239].mxu0 }
 0x2fd   : > { %v4878_v14 = vadd.f32 %v4792_v30, %v8619_v46  ;;  %v4795_v49 = vadd.f32 %v4794_v62, %v4625_v22  ;;  %v4796_v2 = vpop.f32.mrb[239].mxu1  ;;  %vm5190_vm1 = vcmp.gt.f32.partialorder %v5156_v47, 0.0  ;;  %v5224_v18 = vmul.f32 0.2, %v5156_v47  ;;  %v5069_v5 = vpop.permute.xlu1 %5068 }
 0x2fe   : > { %v5257_v17 = vsel %vm5189_vm0, %v5155_v11, %v5223_v9 }
 0x2ff   : > { %v4953_v50 = vadd.f32 %v8675_v44, %v4878_v14  ;;  %v4879_v24 = vadd.f32 %v4795_v49, %v8622_v25  ;;  %v5258_v51 = vsel %vm5190_vm1, %v5156_v47, %v5224_v18  ;;  %v5074_v18 = vpop.permute.xlu0 %5073 }
 0x300   : > { %v6086_v38 = vpack.c.bf16 %v5258_v51, %v5257_v17 }
 0x301   : > { %v5157_v4 = vmul.f32 %v5054_v29, %v4953_v50  ;;  %v4954_v42 = vadd.f32 %v8675_v44, %v4879_v24  ;;  %v4630_v58 = vpop.f32.mrb[240].mxu0  ;;  %v5079_v29 = vpop.permute.xlu1 %5078 }
 0x302   : > { %v4799_v56 = vpop.f32.mrb[240].mxu1  ;;  %v4632_v46 = vpop.f32.mrb[241].mxu0  ;;  %6139 = vst [vmem:[%s8686_s25 + $0x38] sm:$0xff] %v6086_v38  }
 0x303   : > { %v5225_v12 = vmul.f32 0.2, %v5157_v4  ;;  %v5158_v43 = vmul.f32 %v5059_v26, %v4954_v42  ;;  %v4800_v40 = vadd.f32 %v4799_v56, %v4630_v58  ;;  %v4801_v55 = vpop.f32.mrb[241].mxu1  ;;  %v4633_v27 = vpop.f32.mrb[242].mxu0  ;;  %vm5191_vm2 = vcmp.gt.f32.partialorder %v5157_v4, 0.0 }
 0x304   : > { %v4802_v57 = vpop.f32.mrb[242].mxu1  ;;  %v4635_v25 = vpop.f32.mrb[243].mxu0 }
 0x305   : > { %vm5192_vm3 = vcmp.gt.f32.partialorder %v5158_v43, 0.0  ;;  %v5226_v48 = vmul.f32 0.2, %v5158_v43  ;;  %v4880_v19 = vadd.f32 %v4800_v40, %v8625_v20  ;;  %v4804_v37 = vpop.f32.mrb[243].mxu1  ;;  %v4803_v7 = vadd.f32 %v4802_v57, %v4633_v27 }
 0x306   : > { %v5259_v34 = vsel %vm5191_vm2, %v5157_v4, %v5225_v12  ;;  %v5084_v37 = vpop.permute.xlu0 %5083 }
 0x307   : > { %v5260_v31 = vsel %vm5192_vm3, %v5158_v43, %v5226_v48  ;;  %v4955_v61 = vadd.f32 %v8675_v44, %v4880_v19  ;;  %v4881_v13 = vadd.f32 %v4803_v7, %v8628_v1 }
 0x308   : > { %v6091_v0 = vpack.c.bf16 %v5260_v31, %v5259_v34  ;;  %v5089_v31 = vpop.permute.xlu1 %5088 }
 0x309   : > { %v5159_v41 = vmul.f32 %v5064_v54, %v4955_v61  ;;  %v4638_v11 = vpop.f32.mrb[244].mxu0  ;;  %v4956_v36 = vadd.f32 %v8675_v44, %v4881_v13 }
 0x30a   : > { %6140 = vst [vmem:[%s8686_s25 + $0x40] sm:$0xff] %v6091_v0   ;;  %v4807_v45 = vpop.f32.mrb[244].mxu1  ;;  %v4640_v35 = vpop.f32.mrb[245].mxu0 }
 0x30b   : > { %v4808_v21 = vadd.f32 %v4807_v45, %v4638_v11  ;;  %v4809_v20 = vpop.f32.mrb[245].mxu1  ;;  %v4641_v30 = vpop.f32.mrb[246].mxu0  ;;  %v5227_v33 = vmul.f32 0.2, %v5159_v41  ;;  %v5160_v22 = vmul.f32 %v5069_v5, %v4956_v36  ;;  %vm5193_vm4 = vcmp.gt.f32.partialorder %v5159_v41, 0.0 }
 0x30c   : > { %v4810_v9 = vpop.f32.mrb[246].mxu1  ;;  %v4643_v47 = vpop.f32.mrb[247].mxu0 }
 0x30d   : > { %v4882_v62 = vadd.f32 %v4808_v21, %v8631_v6  ;;  %v4811_v63 = vadd.f32 %v4810_v9, %v4641_v30  ;;  %v4812_v1 = vpop.f32.mrb[247].mxu1  ;;  %vm5194_vm5 = vcmp.gt.f32.partialorder %v5160_v22, 0.0  ;;  %v5228_v14 = vmul.f32 0.2, %v5160_v22  ;;  %v5094_v47 = vpop.permute.xlu0 %5093 }
 0x30e   : > { %v5261_v50 = vsel %vm5193_vm4, %v5159_v41, %v5227_v33  ;;  %v5099_v1 = vpop.permute.xlu1 %5098 }
 0x30f   : > { %v4957_v49 = vadd.f32 %v8675_v44, %v4882_v62  ;;  %v4883_v2 = vadd.f32 %v4811_v63, %v8634_v28  ;;  %v5262_v24 = vsel %vm5194_vm5, %v5160_v22, %v5228_v14 }
 0x310   : > { %v6096_v17 = vpack.c.bf16 %v5262_v24, %v5261_v50 }
 0x311   : > { %v5161_v51 = vmul.f32 %v5074_v18, %v4957_v49  ;;  %v4958_v26 = vadd.f32 %v8675_v44, %v4883_v2  ;;  %v4646_v38 = vpop.f32.mrb[248].mxu0 }
 0x312   : > { %v4815_v4 = vpop.f32.mrb[248].mxu1  ;;  %v4648_v6 = vpop.f32.mrb[249].mxu0  ;;  %6141 = vst [vmem:[%s8686_s25 + $0x48] sm:$0xff] %v6096_v17  }
 0x313   : > { %v5229_v42 = vmul.f32 0.2, %v5161_v51  ;;  %v5162_v58 = vmul.f32 %v5079_v29, %v4958_v26  ;;  %v4816_v56 = vadd.f32 %v4815_v4, %v4646_v38  ;;  %v4817_v46 = vpop.f32.mrb[249].mxu1  ;;  %v4649_v12 = vpop.f32.mrb[250].mxu0  ;;  %vm5195_vm6 = vcmp.gt.f32.partialorder %v5161_v51, 0.0 }
 0x314   : > { %v4818_v43 = vpop.f32.mrb[250].mxu1  ;;  %v4651_v28 = vpop.f32.mrb[251].mxu0 }
 0x315   : > { %vm5196_vm7 = vcmp.gt.f32.partialorder %v5162_v58, 0.0  ;;  %v5230_v40 = vmul.f32 0.2, %v5162_v58  ;;  %v4884_v55 = vadd.f32 %v4816_v56, %v8637_v15  ;;  %v4820_v27 = vpop.f32.mrb[251].mxu1  ;;  %v4819_v57 = vadd.f32 %v4818_v43, %v4649_v12  ;;  %v5104_v43 = vpop.permute.xlu0 %5103 }
 0x316   : > { %v5263_v25 = vsel %vm5195_vm6, %v5161_v51, %v5229_v42 }
 0x317   : > { %v5264_v48 = vsel %vm5196_vm7, %v5162_v58, %v5230_v40  ;;  %v4959_v19 = vadd.f32 %v8675_v44, %v4884_v55  ;;  %v4885_v34 = vadd.f32 %v4819_v57, %v8640_v8  ;;  %v5109_v55 = vpop.permute.xlu1 %5108 }
 0x318   : > { %v6101_v7 = vpack.c.bf16 %v5264_v48, %v5263_v25 }
 0x319   : > { %v5163_v61 = vmul.f32 %v5084_v37, %v4959_v19  ;;  %v4654_v54 = vpop.f32.mrb[252].mxu0  ;;  %v4960_v0 = vadd.f32 %v8675_v44, %v4885_v34 }
 0x31a   : > { %6142 = vst [vmem:[%s8686_s25 + $0x50] sm:$0xff] %v6101_v7   ;;  %v4823_v13 = vpop.f32.mrb[252].mxu1  ;;  %v4656_v5 = vpop.f32.mrb[253].mxu0 }
 0x31b   : > { %v4824_v41 = vadd.f32 %v4823_v13, %v4654_v54  ;;  %v4825_v15 = vpop.f32.mrb[253].mxu1  ;;  %v4657_v11 = vpop.f32.mrb[254].mxu0  ;;  %v5231_v36 = vmul.f32 0.2, %v5163_v61  ;;  %v5164_v45 = vmul.f32 %v5089_v31, %v4960_v0  ;;  %vm5197_vm8 = vcmp.gt.f32.partialorder %v5163_v61, 0.0 }
 0x31c   : > { %v4826_v35 = vpop.f32.mrb[254].mxu1  ;;  %v4659_v21 = vpop.f32.mrb[255].mxu0 }
 0x31d   : > { %v4886_v20 = vadd.f32 %v4824_v41, %v8643_v60  ;;  %v4827_v30 = vadd.f32 %v4826_v35, %v4657_v11  ;;  %v4828_v8 = vpop.f32.mrb[255].mxu1  ;;  %vm5198_vm9 = vcmp.gt.f32.partialorder %v5164_v45, 0.0  ;;  %v5232_v33 = vmul.f32 0.2, %v5164_v45  ;;  %v5114_v11 = vpop.permute.xlu0 %5113 }
 0x31e   : > { %v5265_v62 = vsel %vm5197_vm8, %v5163_v61, %v5231_v36  ;;  %v5119_v35 = vpop.permute.xlu1 %5118 }
 0x31f   : > { %v4961_v22 = vadd.f32 %v8675_v44, %v4886_v20  ;;  %v4887_v9 = vadd.f32 %v4827_v30, %v8646_v23  ;;  %v5266_v63 = vsel %vm5198_vm9, %v5164_v45, %v5232_v33 }
 0x320   : > { %v6106_v14 = vpack.c.bf16 %v5266_v63, %v5265_v62 }
 0x321   : > { %v5165_v49 = vmul.f32 %v5094_v47, %v4961_v22  ;;  %v4962_v2 = vadd.f32 %v8675_v44, %v4887_v9  ;;  %v4662_v18 = vpop.f32.mrb[0].mxu0 }
 0x322   : > { %v4831_v50 = vpop.f32.mrb[0].mxu1  ;;  %v4664_v60 = vpop.f32.mrb[1].mxu0  ;;  %6143 = vst [vmem:[%s8686_s25 + $0x58] sm:$0xff] %v6106_v14  }
 0x323   : > { %v5233_v24 = vmul.f32 0.2, %v5165_v49  ;;  %v5166_v29 = vmul.f32 %v5099_v1, %v4962_v2  ;;  %v4832_v17 = vadd.f32 %v4831_v50, %v4662_v18  ;;  %v4833_v51 = vpop.f32.mrb[1].mxu1  ;;  %v4665_v26 = vpop.f32.mrb[2].mxu0  ;;  %vm5199_vm10 = vcmp.gt.f32.partialorder %v5165_v49, 0.0 }
 0x324   : > { %v4834_v38 = vpop.f32.mrb[2].mxu1  ;;  %v4667_v23 = vpop.f32.mrb[3].mxu0 }
 0x325   : > { %vm5200_vm11 = vcmp.gt.f32.partialorder %v5166_v29, 0.0  ;;  %v5234_v4 = vmul.f32 0.2, %v5166_v29  ;;  %v4888_v6 = vadd.f32 %v4832_v17, %v8649_v32  ;;  %v4836_v42 = vpop.f32.mrb[3].mxu1  ;;  %v4835_v58 = vadd.f32 %v4834_v38, %v4665_v26  ;;  %v5129_v26 = vpop.permute.xlu1 %5128 }
 0x326   : > { %v5267_v56 = vsel %vm5199_vm10, %v5165_v49, %v5233_v24 }
 0x327   : > { %v5268_v46 = vsel %vm5200_vm11, %v5166_v29, %v5234_v4  ;;  %v4963_v12 = vadd.f32 %v8675_v44, %v4888_v6  ;;  %v4889_v40 = vadd.f32 %v4835_v58, %v8652_v52  ;;  %v5124_v29 = vpop.permute.xlu0 %5123 }
 0x328   : > { %v6111_v28 = vpack.c.bf16 %v5268_v46, %v5267_v56 }
 0x329   : > { %v5167_v27 = vmul.f32 %v5104_v43, %v4963_v12  ;;  %v4670_v57 = vpop.f32.mrb[4].mxu0  ;;  %v4964_v25 = vadd.f32 %v8675_v44, %v4889_v40 }
 0x32a   : > { %6144 = vst [vmem:[%s8686_s25 + $0x60] sm:$0xff] %v6111_v28   ;;  %v4839_v48 = vpop.f32.mrb[4].mxu1  ;;  %v4672_v19 = vpop.f32.mrb[5].mxu0 }
 0x32b   : > { %v4840_v37 = vadd.f32 %v4839_v48, %v4670_v57  ;;  %v4841_v32 = vpop.f32.mrb[5].mxu1  ;;  %v4673_v7 = vpop.f32.mrb[6].mxu0  ;;  %v5235_v34 = vmul.f32 0.2, %v5167_v27  ;;  %v5168_v31 = vmul.f32 %v5109_v55, %v4964_v25  ;;  %vm5201_vm12 = vcmp.gt.f32.partialorder %v5167_v27, 0.0 }
 0x32c   : > { %v4842_v61 = vpop.f32.mrb[6].mxu1  ;;  %v4675_v54 = vpop.f32.mrb[7].mxu0 }
 0x32d   : > { %v4890_v0 = vadd.f32 %v4840_v37, %v8655_v59  ;;  %v4843_v13 = vadd.f32 %v4842_v61, %v4673_v7  ;;  %v4844_v52 = vpop.f32.mrb[7].mxu1  ;;  %vm5202_vm13 = vcmp.gt.f32.partialorder %v5168_v31, 0.0  ;;  %v5236_v5 = vmul.f32 0.2, %v5168_v31  ;;  %v5134_v48 = vpop.permute.xlu0 %5133 }
 0x32e   : > { %v5269_v36 = vsel %vm5201_vm12, %v5167_v27, %v5235_v34 }
 0x32f   : > { %v4965_v41 = vadd.f32 %v8675_v44, %v4890_v0  ;;  %v4891_v15 = vadd.f32 %v4843_v13, %v8658_v10  ;;  %v5270_v45 = vsel %vm5202_vm13, %v5168_v31, %v5236_v5  ;;  %v5139_v31 = vpop.permute.xlu1 %5138 }
 0x330   : > { %v6116_v21 = vpack.c.bf16 %v5270_v45, %v5269_v36 }
 0x331   : > { %v5169_v20 = vmul.f32 %v5114_v11, %v4965_v41  ;;  %v4966_v30 = vadd.f32 %v8675_v44, %v4891_v15  ;;  %v4678_v8 = vpop.f32.mrb[8].mxu0 }
 0x332   : > { %v4847_v33 = vpop.f32.mrb[8].mxu1  ;;  %v4680_v59 = vpop.f32.mrb[9].mxu0  ;;  %6145 = vst [vmem:[%s8686_s25 + $0x68] sm:$0xff] %v6116_v21  }
 0x333   : > { %v5237_v22 = vmul.f32 0.2, %v5169_v20  ;;  %v5170_v9 = vmul.f32 %v5119_v35, %v4966_v30  ;;  %v4848_v47 = vadd.f32 %v4847_v33, %v4678_v8  ;;  %v4849_v62 = vpop.f32.mrb[9].mxu1  ;;  %v4681_v63 = vpop.f32.mrb[10].mxu0  ;;  %vm5203_vm14 = vcmp.gt.f32.partialorder %v5169_v20, 0.0 }
 0x334   : > { %v4850_v1 = vpop.f32.mrb[10].mxu1  ;;  %v4683_v10 = vpop.f32.mrb[11].mxu0 }
 0x335   : > { %vm5204_vm15 = vcmp.gt.f32.partialorder %v5170_v9, 0.0  ;;  %v5238_v14 = vmul.f32 0.2, %v5170_v9  ;;  %v4892_v49 = vadd.f32 %v4848_v47, %v8661_v16  ;;  %v4852_v2 = vpop.f32.mrb[11].mxu1  ;;  %v4851_v18 = vadd.f32 %v4850_v1, %v4681_v63 }
 0x336   : > { %v5271_v50 = vsel %vm5203_vm14, %v5169_v20, %v5237_v22 }
 0x337   : > { %v5272_v60 = vsel %vm5204_vm15, %v5170_v9, %v5238_v14  ;;  %v4967_v24 = vadd.f32 %v8675_v44, %v4892_v49  ;;  %v4893_v51 = vadd.f32 %v4851_v18, %v8664_v53 }
 0x338   : > { %v6121_v17 = vpack.c.bf16 %v5272_v60, %v5271_v50 }
 0x339   : > { %v5171_v38 = vmul.f32 %v5124_v29, %v4967_v24  ;;  %v4686_v23 = vpop.f32.mrb[12].mxu0  ;;  %v4968_v4 = vadd.f32 %v8675_v44, %v4893_v51 }
 0x33a   : > { %6146 = vst [vmem:[%s8686_s25 + $0x70] sm:$0xff] %v6121_v17   ;;  %v4855_v6 = vpop.f32.mrb[12].mxu1  ;;  %v4688_v42 = vpop.f32.mrb[13].mxu0 }
 0x33b   : > { %v4856_v58 = vadd.f32 %v4855_v6, %v4686_v23  ;;  %v4857_v16 = vpop.f32.mrb[13].mxu1  ;;  %v4689_v56 = vpop.f32.mrb[14].mxu0  ;;  %v5239_v46 = vmul.f32 0.2, %v5171_v38  ;;  %v5172_v12 = vmul.f32 %v5129_v26, %v4968_v4  ;;  %vm5205_vm0 = vcmp.gt.f32.partialorder %v5171_v38, 0.0 }
 0x33c   : > { %v4858_v43 = vpop.f32.mrb[14].mxu1  ;;  %v4691_v28 = vpop.f32.mrb[15].mxu0 }
 0x33d   : > { %v4894_v40 = vadd.f32 %v4856_v58, %v8667_v39  ;;  %v4859_v53 = vadd.f32 %v4858_v43, %v4689_v56  ;;  %v4860_v55 = vpop.f32.mrb[15].mxu1  ;;  %vm5206_vm1 = vcmp.gt.f32.partialorder %v5172_v12, 0.0  ;;  %v5240_v27 = vmul.f32 0.2, %v5172_v12 }
 0x33e   : > { %v5273_v19 = vsel %vm5205_vm0, %v5171_v38, %v5239_v46 }
 0x33f   : > { %v4969_v57 = vadd.f32 %v8675_v44, %v4894_v40  ;;  %v4895_v25 = vadd.f32 %v4859_v53, %v8670_v3  ;;  %v5274_v37 = vsel %vm5206_vm1, %v5172_v12, %v5240_v27 }
 0x340   : > { %v6126_v32 = vpack.c.bf16 %v5274_v37, %v5273_v19 }
 0x341   : > { %v5173_v7 = vmul.f32 %v5134_v48, %v4969_v57  ;;  %v4970_v34 = vadd.f32 %v8675_v44, %v4895_v25 }
 0x342   : > { %6147 = vst [vmem:[%s8686_s25 + $0x78] sm:$0xff] %v6126_v32  }
 0x343   : > { %v5241_v61 = vmul.f32 0.2, %v5173_v7  ;;  %v5174_v39 = vmul.f32 %v5139_v31, %v4970_v34  ;;  %vm5207_vm2 = vcmp.gt.f32.partialorder %v5173_v7, 0.0 }
 0x345   : > { %vm5208_vm3 = vcmp.gt.f32.partialorder %v5174_v39, 0.0  ;;  %v5242_v54 = vmul.f32 0.2, %v5174_v39  ;;  %v5275_v0 = vsel %vm5207_vm2, %v5173_v7, %v5241_v61 }
 0x347   : > { %v5276_v13 = vsel %vm5208_vm3, %v5174_v39, %v5242_v54 }
 0x348   : > { %v6131_v52 = vpack.c.bf16 %v5276_v13, %v5275_v0 }
 0x34a   : > { %6148 = vst [vmem:[%s8686_s25 + $0x80] sm:$0xff] %v6131_v52  }
 0x34b PF: > { %s14_s15 = sadd.s32 1, %s6629_s15  }
 0x34c   : > { %p11_p4 = scmp.ge.s32.totalorder %s14_s15, 4  }
 0x34e   :  { %13 = sbr.rel (!%p11_p4) target bundleno = 1 (0x1), region = 69 }

// kernel: discriminator_forward.6
= control target key start
LH: loop header
LB: loop body
LE: loop exit
PB: predicated region body
PF: predicated region fallthrough
CT: control target
= control target key end

     0   :  { %s3751_s15 = smov 0   ;;  %s4765_s0 = inlined_call_operand.vmem [shape: bf16[2,88,512], index: 0, kind: input, shape index: {}]   ;;  %s4766_s1 = inlined_call_operand.vmem [shape: bf16[4,512,128], index: 1, kind: input, shape index: {}]   ;;  %s4767_s2 = inlined_call_operand.vmem [shape: f32[1,128], index: 2, kind: input, shape index: {}]   ;;  %s4768_s3 = inlined_call_operand.vmem [shape: f32[72,1], index: 3, kind: input, shape index: {}]   ;;  %s4769_s4 = inlined_call_operand.vmem [shape: bf16[2,72,128], index: 4, kind: output, shape index: {}]  }
   0x1 LB: > { %s2735_s16 = sadd.s32 4294967295, %s3723_s15   ;;  %p2739_p0 = scmp.ge.s32.totalorder %s3723_s15, 1  ;;  %s3723_s15 = sphi %s3751_s15, %s14_s15  }
   0x2   : > { %p162_p1 = scmp.lt.s32.totalorder %s3723_s15, 3 }
   0x4   : > { %p163_p2 = pnand %p2739_p0, %p162_p1 }
   0x5   : > { %v3535_v0 = vld [vmem:[%s4766_s1 + $0x140] sm:$0xff] (!%p163_p2)   ;;  %v3539_v4 = vld [vmem:[%s4766_s1 + $0x148] sm:$0xff] (!%p163_p2)   ;;  %v3543_v8 = vld [vmem:[%s4766_s1 + $0x150] sm:$0xff] (!%p163_p2)   ;;  %p188_p3 = scmp.lt.s32.totalorder (!%p163_p2), %s2735_s16, 1  ;;  %vm428_vm0 = vsmask.f32 (!%p163_p2), 7424 }
   0x6   : > { %166 = sbr.rel (%p163_p2) target bundleno = 464 (0x1d0), region = 36  ;;  %v3536_v1 = vld [vmem:[%s4766_s1 + $0x1c0] sm:$0xff] (!%p163_p2)   ;;  %3154 = vmatprep.subr.bf16.mxu0 (!%p163_p2), %v3535_v0  ;;  %v3540_v5 = vld [vmem:[%s4766_s1 + $0x1c8] sm:$0xff] (!%p163_p2)   ;;  %v3544_v9 = vld [vmem:[%s4766_s1 + $0x1d0] sm:$0xff] (!%p163_p2)   ;;  %vm2064_vm1 = vcmask (!%p163_p2), 1046528  }
   0x7   : > { %v3537_v2 = vld [vmem:[%s4766_s1 + $0x100] sm:$0xff] (!%p163_p2)   ;;  %3200 = vmatprep.subr.bf16.mxu1 (!%p163_p2), %v3536_v1  ;;  %v3541_v6 = vld [vmem:[%s4766_s1 + $0x108] sm:$0xff] (!%p163_p2)   ;;  %v3545_v10 = vld [vmem:[%s4766_s1 + $0x110] sm:$0xff] (!%p163_p2)  }
   0x8   : > { %v3538_v3 = vld [vmem:[%s4766_s1 + $0x180] sm:$0xff] (!%p163_p2)   ;;  %3155 = vmatpush3.bf16.msra.mxu0 (!%p163_p2), %v3537_v2  ;;  %v3542_v7 = vld [vmem:[%s4766_s1 + $0x188] sm:$0xff] (!%p163_p2)   ;;  %v3546_v11 = vld [vmem:[%s4766_s1 + $0x190] sm:$0xff] (!%p163_p2)  }
   0x9   : > { %3201 = vmatpush3.bf16.msra.mxu1 (!%p163_p2), %v3538_v3  ;;  %3156 = vmatprep.subr.bf16.mxu0 (!%p163_p2), %v3539_v4  ;;  %v3547_v12 = vld [vmem:[%s4766_s1 + $0x158] sm:$0xff] (!%p163_p2)   ;;  %v3551_v16 = vld [vmem:[%s4766_s1 + $0x160] sm:$0xff] (!%p163_p2)   ;;  %v3555_v20 = vld [vmem:[%s4766_s1 + $0x168] sm:$0xff] (!%p163_p2)  }
   0xa   : > { %3202 = vmatprep.subr.bf16.mxu1 (!%p163_p2), %v3540_v5  ;;  %v3548_v13 = vld [vmem:[%s4766_s1 + $0x1d8] sm:$0xff] (!%p163_p2)   ;;  %v3552_v17 = vld [vmem:[%s4766_s1 + $0x1e0] sm:$0xff] (!%p163_p2)   ;;  %v3556_v21 = vld [vmem:[%s4766_s1 + $0x1e8] sm:$0xff] (!%p163_p2)  }
   0xb   : > { %v3549_v14 = vld [vmem:[%s4766_s1 + $0x118] sm:$0xff] (!%p163_p2)   ;;  %v3553_v18 = vld [vmem:[%s4766_s1 + $0x120] sm:$0xff] (!%p163_p2)   ;;  %v3557_v22 = vld [vmem:[%s4766_s1 + $0x128] sm:$0xff] (!%p163_p2)  }
   0xc   : > { %3157 = vmatpush3.bf16.msra.mxu0 (!%p163_p2), %v3541_v6  ;;  %v3550_v15 = vld [vmem:[%s4766_s1 + $0x198] sm:$0xff] (!%p163_p2)   ;;  %v3554_v19 = vld [vmem:[%s4766_s1 + $0x1a0] sm:$0xff] (!%p163_p2)   ;;  %v3558_v23 = vld [vmem:[%s4766_s1 + $0x1a8] sm:$0xff] (!%p163_p2)  }
   0xd   : > { %3203 = vmatpush3.bf16.msra.mxu1 %v3542_v7  ;;  %3158 = vmatprep.subr.bf16.mxu0 %v3543_v8  ;;  %s4771_s16 = smov (!%p188_p3, %s2735_s16), 1  ;;  %v3559_v24 = vld [vmem:[%s4766_s1 + $0x170] sm:$0xff]   ;;  %v3563_v28 = vld [vmem:[%s4766_s1 + $0x178] sm:$0xff]   ;;  %v3575_v50 = vld [vmem:[%s4766_s1 + $0x40] sm:$0xff]  }
   0xe   : > { %3204 = vmatprep.subr.bf16.mxu1 %v3544_v9  ;;  %v3560_v25 = vld [vmem:[%s4766_s1 + $0x1f0] sm:$0xff]   ;;  %s3522_s21 = smul.u32 176, %s4771_s16  ;;  %v3564_v29 = vld [vmem:[%s4766_s1 + $0x1f8] sm:$0xff]   ;;  %v3576_v59 = vld [vmem:[%s4766_s1 + $0xc0] sm:$0xff]  }
   0xf   : > { %v3561_v26 = vld [vmem:[%s4766_s1 + $0x130] sm:$0xff]   ;;  %v3565_v30 = vld [vmem:[%s4766_s1 + $0x138] sm:$0xff]   ;;  %v3577_v7 = vld [vmem:[%s4766_s1] sm:$0xff]   ;;  %s3523_s17 = smul.u32 36, %s4771_s16 }
  0x10   : > { %3159 = vmatpush3.bf16.msra.mxu0 %v3545_v10  ;;  %v3562_v27 = vld [vmem:[%s4766_s1 + $0x1b0] sm:$0xff]   ;;  %s3859_s6 = scalar_lea.vmem %s4765_s0, %s3522_s21  ;;  %v3566_v31 = vld [vmem:[%s4766_s1 + $0x1b8] sm:$0xff]   ;;  %v3579_v10 = vld [vmem:[%s4766_s1 + $0x48] sm:$0xff]  }
  0x11   : > { %3205 = vmatpush3.bf16.msra.mxu1 %v3546_v11  ;;  %3160 = vmatprep.subr.bf16.mxu0 %v3547_v12  ;;  %v199_v32 = vld [vmem:[%s3859_s6] sm:$0xff]  ;;  %v3869_v33 = vld [vmem:[%s3859_s6 + $0x10] sm:$0xff]  ;;  %v200_v37 = vld [vmem:[%s3859_s6 + $0x8] sm:$0xff]  ;;  %s197_s19 = scalar_lea.vmem %s4769_s4, %s3523_s17 }
  0x12   : > { %3206 = vmatprep.subr.bf16.mxu1 %v3548_v13  ;;  %v3872_v34 = vld [vmem:[%s3859_s6 + $0x20] sm:$0xff]  ;;  %v3875_v35 = vld [vmem:[%s3859_s6 + $0x30] sm:$0xff]  ;;  %v3878_v36 = vcombine.high %v199_v32, %v3869_v33  ;;  %v3882_v38 = vld [vmem:[%s3859_s6 + $0x18] sm:$0xff]  ;;  %v3885_v39 = vcombine.low %v199_v32, %v3869_v33 }
  0x13   : > { %v3889_v40 = vcombine.high %v3872_v34, %v3875_v35  ;;  %v3892_v41 = vld [vmem:[%s3859_s6 + $0x28] sm:$0xff]  ;;  %v3895_v42 = vld [vmem:[%s3859_s6 + $0x38] sm:$0xff]  ;;  %v3898_v43 = vcombine.high %v200_v37, %v3882_v38  ;;  %v3902_v44 = vcombine.low %v3872_v34, %v3875_v35  ;;  %v3905_v45 = vcombine.low %v200_v37, %v3882_v38 }
  0x14   : > { %3161 = vmatpush3.bf16.msra.mxu0 %v3549_v14  ;;  %v442_v46 = vshrl.u32 %v3878_v36, 16  ;;  %v444_v47 = vshll.u32 %v3878_v36, 16  ;;  %v3911_v48 = vcombine.high %v3892_v41, %v3895_v42  ;;  %v430_v49 = vshrl.u32 %v3885_v39, 16  ;;  %v3578_v14 = vld [vmem:[%s4766_s1 + $0x80] sm:$0xff]  }
  0x15   : > { %3207 = vmatpush3.bf16.msra.mxu1 %v3550_v15  ;;  %3162 = vmatprep.subr.bf16.mxu0 %v3551_v16  ;;  %v449_v51 = vshll.u32 %v3889_v40, 16  ;;  %v466_v52 = vshrl.u32 %v3898_v43, 16  ;;  %v468_v53 = vshll.u32 %v3898_v43, 16  ;;  %v432_v54 = vshll.u32 %v3885_v39, 16  ;;  %v3580_v16 = vld [vmem:[%s4766_s1 + $0xc8] sm:$0xff]  }
  0x16   : > { %3208 = vmatprep.subr.bf16.mxu1 %v3552_v17  ;;  %v446_v55 = vrot.slane %v444_v47, 1  ;;  %v473_v56 = vshll.u32 %v3911_v48, 16  ;;  %v437_v57 = vshll.u32 %v3902_v44, 16  ;;  %v3925_v58 = vcombine.low %v3892_v41, %v3895_v42 }
  0x17   : > { %v451_v60 = vrot.slane %v449_v51, 1  ;;  %v470_v61 = vrot.slane %v468_v53, 1  ;;  %v434_v62 = vrot.slane %v432_v54, 1  ;;  %v454_v63 = vshrl.u32 %v3905_v45, 16  ;;  %v3589_v53 = vld [vmem:[%s4766_s1 + $0x10] sm:$0xff]  }
  0x18   : > { %3163 = vmatpush3.bf16.msra.mxu0 %v3553_v18  ;;  %v447_v0 = vor.u32 %v446_v55, %v442_v46  ;;  %v475_v1 = vrot.slane %v473_v56, 1  ;;  %v439_v2 = vrot.slane %v437_v57, 1  ;;  %v456_v3 = vshll.u32 %v3905_v45, 16  ;;  %v3581_v18 = vld [vmem:[%s4766_s1 + $0x8] sm:$0xff]  }
  0x19   : > { %3209 = vmatpush3.bf16.msra.mxu1 %v3554_v19  ;;  %3164 = vmatprep.subr.bf16.mxu0 %v3555_v20  ;;  %v471_v4 = vor.u32 %v470_v61, %v466_v52  ;;  %v435_v5 = vor.u32 %v434_v62, %v430_v49  ;;  %v461_v6 = vshll.u32 %v3925_v58, 16  ;;  %v485_v17 = vshrl.u32 %v3889_v40, 16  ;;  %v3587_v49 = vld [vmem:[%s4766_s1 + $0x50] sm:$0xff]  }
  0x1a   : > { %3210 = vmatprep.subr.bf16.mxu1 %v3556_v21  ;;  %v452_v8 = vsel %vm428_vm0, %v447_v0, %v451_v60  ;;  %v458_v9 = vrot.slane %v456_v3, 1  ;;  %v501_v19 = vshrl.u32 %v3911_v48, 16  ;;  %v3582_v21 = vld [vmem:[%s4766_s1 + $0x88] sm:$0xff]   ;;  %v3588_v52 = vld [vmem:[%s4766_s1 + $0xd0] sm:$0xff]  }
  0x1b   : > { %829 = vmatprep.mubr.bf16.mxu0 %v452_v8  ;;  %v476_v11 = vsel %vm428_vm0, %v471_v4, %v475_v1  ;;  %v440_v12 = vsel %vm428_vm0, %v435_v5, %v439_v2  ;;  %v463_v13 = vrot.slane %v461_v6, 1  ;;  %v212_v4 = vld [vmem:[%s3859_s6 + $0x68] sm:$0xff]  ;;  %v4014_v5 = vld [vmem:[%s3859_s6 + $0x78] sm:$0xff] }
  0x1c   : > { %3165 = vmatpush3.bf16.msra.mxu0 %v3557_v22  ;;  %901 = vmatprep.mubr.bf16.mxu1 %v476_v11  ;;  %v459_v15 = vor.u32 %v458_v9, %v454_v63  ;;  %v207_v22 = vld [vmem:[%s3859_s6 + $0x40] sm:$0xff]  ;;  %v503_v37 = vor.u32 %v501_v19, %v475_v1 }
  0x1d   : > { %3211 = vmatpush3.bf16.msra.mxu1 %v3558_v23  ;;  %3166 = vmatprep.subr.bf16.mxu0 %v3559_v24  ;;  %v3959_v23 = vld [vmem:[%s3859_s6 + $0x50] sm:$0xff]  ;;  %v208_v24 = vld [vmem:[%s3859_s6 + $0x48] sm:$0xff]  ;;  %v3994_v54 = vcombine.high %v3875_v35, %v207_v22  ;;  %v211_v63 = vld [vmem:[%s3859_s6 + $0x60] sm:$0xff] }
  0x1e   : > { %3212 = vmatprep.subr.bf16.mxu1 %v3560_v25  ;;  %v464_v20 = vsel %vm428_vm0, %v459_v15, %v463_v13  ;;  %v477_v25 = vshrl.u32 %v3902_v44, 16  ;;  %v3997_v55 = vcombine.low %v3895_v42, %v208_v24  ;;  %v3594_v15 = vld [vmem:[%s4766_s1 + $0xd8] sm:$0xff]  }
  0x20   : > { %3167 = vmatpush3.bf16.msra.mxu0 %v3561_v26  ;;  %v493_v26 = vshrl.u32 %v3925_v58, 16  ;;  %v479_v46 = vor.u32 %v477_v25, %v439_v2  ;;  %v4009_v2 = vld [vmem:[%s3859_s6 + $0x70] sm:$0xff]  ;;  %v3598_v25 = vld [vmem:[%s4766_s1 + $0x98] sm:$0xff]  }
  0x21   : > { %3213 = vmatpush3.bf16.msra.mxu1 %v3562_v27  ;;  %3168 = vmatprep.subr.bf16.mxu0 %v3563_v28  ;;  %v3965_v27 = vcombine.high %v207_v22, %v3959_v23  ;;  %v487_v28 = vor.u32 %v485_v17, %v451_v60  ;;  %v4002_v60 = vcombine.high %v3895_v42, %v208_v24 }
  0x22   : > { %3214 = vmatprep.subr.bf16.mxu1 %v3564_v29  ;;  %v3968_v29 = vld [vmem:[%s3859_s6 + $0x58] sm:$0xff]  ;;  %v495_v57 = vor.u32 %v493_v26, %v463_v13  ;;  %v4017_v42 = vcombine.high %v3959_v23, %v211_v63  ;;  %v4022_v8 = vcombine.high %v211_v63, %v4009_v2 }
  0x23   : > { %v3977_v32 = vcombine.high %v208_v24, %v3968_v29  ;;  %v3980_v47 = vcombine.low %v208_v24, %v3968_v29  ;;  %v517_v3 = vshrl.u32 %v3965_v27, 16  ;;  %v3597_v24 = vld [vmem:[%s4766_s1 + $0x18] sm:$0xff]   ;;  %v4053_v26 = vcombine.high %v3968_v29, %v212_v4 }
  0x24   : > { %3169 = vmatpush3.bf16.msra.mxu0 %v3565_v30  ;;  %v3971_v30 = vcombine.low %v207_v22, %v3959_v23 }
  0x25   : > { %3215 = vmatpush3.bf16.msra.mxu1 %v3566_v31  ;;  %3246 = vmatprep.subr.bf16.mxu0 %v3575_v50  ;;  %v3974_v31 = vcombine.low %v3875_v35, %v207_v22  ;;  %v489_v50 = vshll.u32 %v3965_v27, 16  ;;  %v505_v56 = vshll.u32 %v3977_v32, 16  ;;  %v3590_v35 = vld [vmem:[%s4766_s1 + $0x90] sm:$0xff]   ;;  %v533_v9 = vshrl.u32 %v3977_v32, 16 }
  0x26   : > { %3292 = vmatprep.subr.bf16.mxu1 %v3576_v59  ;;  %v481_v51 = vshll.u32 %v3971_v30, 16  ;;  %v497_v59 = vshll.u32 %v3980_v47, 16  ;;  %v509_v19 = vshrl.u32 %v3971_v30, 16  ;;  %v525_v22 = vshrl.u32 %v3980_v47, 16 }
  0x27   : > { %830 = vmatmul.mubr.bf16.vlgmr.msra.gmra.mrb[0].mxu0 %v440_v12  ;;  %v491_v61 = vrot.slane %v489_v50, 1  ;;  %v507_v0 = vrot.slane %v505_v56, 1  ;;  %v3600_v56 = vld [vmem:[%s4766_s1 + $0xe0] sm:$0xff]  }
  0x28   : > { %3247 = vmatpush3.bf16.msra.mxu0 %v3577_v7  ;;  %902 = vmatmul.mubr.bf16.vlgmr.msra.gmra.mrb[0].mxu1 %v464_v20  ;;  %v483_v62 = vrot.slane %v481_v51, 1  ;;  %v499_v1 = vrot.slane %v497_v59, 1 }
  0x29   : > { %3248 = vmatprep.subr.bf16.mxu0 %v3579_v10  ;;  %3293 = vmatpush3.bf16.msra.mxu1 %v3578_v14  ;;  %v492_v6 = vsel %vm428_vm0, %v487_v28, %v491_v61  ;;  %v3593_v10 = vld [vmem:[%s4766_s1 + $0x58] sm:$0xff]   ;;  %v508_v11 = vsel %vm428_vm0, %v503_v37, %v507_v0  ;;  %v519_v13 = vor.u32 %v517_v3, %v491_v61  ;;  %v3601_v61 = vld [vmem:[%s4766_s1 + $0x20] sm:$0xff]  }
  0x2a   : > { %3294 = vmatprep.subr.bf16.mxu1 %v3580_v16  ;;  %v484_v7 = vsel %vm428_vm0, %v479_v46, %v483_v62  ;;  %837 = vmatprep.mubr.bf16.mxu0 %v492_v6  ;;  %v500_v12 = vsel %vm428_vm0, %v495_v57, %v499_v1  ;;  %v4031_v14 = vcombine.high %v212_v4, %v4014_v5  ;;  %v521_v16 = vshll.u32 %v4022_v8, 16  ;;  %v4085_v6 = vld [vmem:[%s3859_s6 + $0x88] sm:$0xff] }
  0x2b   : > { %909 = vmatprep.mubr.bf16.mxu1 %v508_v11  ;;  %v535_v17 = vor.u32 %v533_v9, %v507_v0  ;;  %v511_v37 = vor.u32 %v509_v19, %v483_v62  ;;  %v527_v51 = vor.u32 %v525_v22, %v499_v1  ;;  %v4067_v57 = vcombine.low %v3968_v29, %v212_v4  ;;  %v3602_v29 = vld [vmem:[%s4766_s1 + $0xa0] sm:$0xff]  }
  0x2c   : > { %3249 = vmatpush3.bf16.msra.mxu0 %v3581_v18  ;;  %v4038_v18 = vcombine.low %v211_v63, %v4009_v2  ;;  %v537_v20 = vshll.u32 %v4031_v14, 16  ;;  %v523_v28 = vrot.slane %v521_v16, 1  ;;  %v4079_v0 = vld [vmem:[%s3859_s6 + $0x80] sm:$0xff]  ;;  %v549_v1 = vshrl.u32 %v4022_v8, 16 }
  0x2d   : > { %3250 = vmatprep.subr.bf16.mxu0 %v3587_v49  ;;  %3295 = vmatpush3.bf16.msra.mxu1 %v3582_v21  ;;  %v4043_v21 = vcombine.low %v212_v4, %v4014_v5  ;;  %v4057_v49 = vcombine.low %v3959_v23, %v211_v63  ;;  %v281_v4 = vld [vmem:[%s3859_s6 + $0x90] sm:$0x11]  ;;  %v565_v9 = vshrl.u32 %v4031_v14, 16 }
  0x2e   : > { %3296 = vmatprep.subr.bf16.mxu1 %v3588_v52  ;;  %v513_v46 = vshll.u32 %v4038_v18, 16  ;;  %v539_v50 = vrot.slane %v537_v20, 1  ;;  %v524_v23 = vsel %vm428_vm0, %v519_v13, %v523_v28  ;;  %v3607_v13 = vld [vmem:[%s4766_s1 + $0x68] sm:$0xff]   ;;  %v541_v16 = vshrl.u32 %v4038_v18, 16 }
  0x2f   : > { %838 = vmatmul.mubr.bf16.gmra.mrb[4].mxu0 %v484_v7  ;;  %v529_v52 = vshll.u32 %v4043_v21, 16  ;;  %v282_v7 = vld [vmem:[%s3859_s6 + $0x98] sm:$0x11]  ;;  %v557_v19 = vshrl.u32 %v4043_v21, 16 }
  0x30   : > { %3251 = vmatpush3.bf16.msra.mxu0 %v3589_v53  ;;  %910 = vmatmul.mubr.bf16.gmra.mrb[4].mxu1 %v500_v12  ;;  %v3599_v53 = vld [vmem:[%s4766_s1 + $0x60] sm:$0xff]   ;;  %v515_v59 = vrot.slane %v513_v46, 1  ;;  %v540_v62 = vsel %vm428_vm0, %v535_v17, %v539_v50  ;;  %v2825_v11 = vcombine.high %v4085_v6, %v282_v7  ;;  %v2822_v12 = vcombine.low %v4079_v0, %v281_v4 }
  0x31   : > { %3252 = vmatprep.subr.bf16.mxu0 %v3593_v10  ;;  %3297 = vmatpush3.bf16.msra.mxu1 %v3590_v35  ;;  %v531_v35 = vrot.slane %v529_v52, 1  ;;  %v2823_v10 = vcombine.high %v4079_v0, %v281_v4  ;;  %v2824_v17 = vcombine.low %v4085_v6, %v282_v7  ;;  %v567_v22 = vor.u32 %v565_v9, %v539_v50  ;;  %v3610_v50 = vld [vmem:[%s4766_s1 + $0xa8] sm:$0xff]   ;;  %v3612_v7 = vld [vmem:[%s4766_s1 + $0xf0] sm:$0xff]  }
  0x32   : > { %3298 = vmatprep.subr.bf16.mxu1 %v3594_v15  ;;  %845 = vmatprep.mubr.bf16.mxu0 %v524_v23  ;;  %v516_v63 = vsel %vm428_vm0, %v511_v37, %v515_v59  ;;  %v551_v15 = vor.u32 %v549_v1, %v523_v28  ;;  %v3608_v37 = vld [vmem:[%s4766_s1 + $0xe8] sm:$0xff]   ;;  %v543_v46 = vor.u32 %v541_v16, %v515_v59  ;;  %v3611_v59 = vld [vmem:[%s4766_s1 + $0x70] sm:$0xff]  }
  0x33   : > { %917 = vmatprep.mubr.bf16.mxu1 %v540_v62  ;;  %v532_v3 = vsel %vm428_vm0, %v527_v51, %v531_v35  ;;  %v553_v20 = vshll.u32 %v2823_v10, 16  ;;  %v559_v51 = vor.u32 %v557_v19, %v531_v35  ;;  %v561_v52 = vshll.u32 %v2824_v17, 16  ;;  %v3609_v28 = vld [vmem:[%s4766_s1 + $0x28] sm:$0xff]   ;;  %v3614_v19 = vld [vmem:[%s4766_s1 + $0xb0] sm:$0xff]  }
  0x34   : > { %3253 = vmatpush3.bf16.msra.mxu0 %v3597_v24  ;;  %v569_v24 = vshll.u32 %v2825_v11, 16  ;;  %v4116_v35 = vcombine.high %v4014_v5, %v4085_v6  ;;  %v576_v9 = vshrl.u32 %v2823_v10, 16  ;;  %v573_v10 = vshrl.u32 %v2822_v12, 16 }
  0x35   : > { %3254 = vmatprep.subr.bf16.mxu0 %v3599_v53  ;;  %3299 = vmatpush3.bf16.msra.mxu1 %v3598_v25  ;;  %v545_v25 = vshll.u32 %v2822_v12, 16  ;;  %v555_v53 = vrot.slane %v553_v20, 1  ;;  %v563_v62 = vrot.slane %v561_v52, 1  ;;  %v3617_v12 = vld [vmem:[%s4766_s1 + $0x38] sm:$0xff]   ;;  %v2961_v52 = vcombine.high %v3882_v38, %v3892_v41 }
  0x36   : > { %3300 = vmatprep.subr.bf16.mxu1 %v3600_v56  ;;  %v571_v56 = vrot.slane %v569_v24, 1  ;;  %v3616_v24 = vld [vmem:[%s4766_s1 + $0xf8] sm:$0xff]  }
  0x37   : > { %846 = vmatmul.mubr.bf16.gmra.mrb[8].mxu0 %v516_v63  ;;  %v547_v23 = vrot.slane %v545_v25, 1  ;;  %v4124_v63 = vcombine.low %v4014_v5, %v4085_v6  ;;  %v556_v1 = vsel %vm428_vm0, %v551_v15, %v555_v53  ;;  %v3613_v5 = vld [vmem:[%s4766_s1 + $0x30] sm:$0xff]   ;;  %v2959_v15 = vcombine.high %v3869_v33, %v3872_v34 }
  0x38   : > { %3255 = vmatpush3.bf16.msra.mxu0 %v3601_v61  ;;  %918 = vmatmul.mubr.bf16.gmra.mrb[8].mxu1 %v532_v3  ;;  %v4109_v61 = vcombine.high %v4009_v2, %v4079_v0  ;;  %v572_v3 = vsel %vm428_vm0, %v567_v22, %v571_v56  ;;  %v578_v16 = vor.u32 %v576_v9, %v555_v53  ;;  %v579_v22 = vshrl.u32 %v2824_v17, 16  ;;  %v3618_v17 = vld [vmem:[%s4766_s1 + $0xb8] sm:$0xff]   ;;  %v3619_v53 = vld [vmem:[%s4766_s1 + $0x240] sm:$0xff]  }
  0x39   : > { %3301 = vmatpush3.bf16.msra.mxu1 %v3602_v29  ;;  %3256 = vmatprep.subr.bf16.mxu0 %v3607_v13  ;;  %v4120_v29 = vcombine.low %v4009_v2, %v4079_v0  ;;  %v548_v4 = vsel %vm428_vm0, %v543_v46, %v547_v23  ;;  %v564_v2 = vsel %vm428_vm0, %v559_v51, %v563_v62  ;;  %v582_v13 = vshrl.u32 %v2825_v11, 16  ;;  %v3615_v11 = vld [vmem:[%s4766_s1 + $0x78] sm:$0xff]  }
  0x3a   : > { %3302 = vmatprep.subr.bf16.mxu1 %v3608_v37  ;;  %853 = vmatprep.mubr.bf16.mxu0 %v556_v1  ;;  %v1479_v25 = vshrl.u32 %v2959_v15, 16  ;;  %v1481_v37 = vshll.u32 %v2959_v15, 16  ;;  %v575_v46 = vor.u32 %v573_v10, %v547_v23  ;;  %v1486_v51 = vshll.u32 %v3994_v54, 16  ;;  %v3620_v23 = vld [vmem:[%s4766_s1 + $0x2c0] sm:$0xff]  }
  0x3b   : > { %925 = vmatprep.mubr.bf16.mxu1 %v572_v3  ;;  %v584_v20 = vor.u32 %v582_v13, %v571_v56  ;;  %v1503_v1 = vshrl.u32 %v2961_v52, 16  ;;  %v1505_v3 = vshll.u32 %v2961_v52, 16  ;;  %v1474_v10 = vshll.u32 %v3974_v31, 16  ;;  %v3631_v52 = vld [vmem:[%s4766_s1 + $0x258] sm:$0xff]  }
  0x3c   : > { %3257 = vmatpush3.bf16.msra.mxu0 %v3609_v28  ;;  %v581_v28 = vor.u32 %v579_v22, %v563_v62  ;;  %v1483_v56 = vrot.slane %v1481_v37, 1  ;;  %v2958_v62 = vcombine.low %v3869_v33, %v3872_v34  ;;  %v3623_v33 = vld [vmem:[%s4766_s1 + $0x248] sm:$0xff]  }
  0x3d   : > { %3303 = vmatpush3.bf16.msra.mxu1 %v3610_v50  ;;  %3258 = vmatprep.subr.bf16.mxu0 %v3611_v59  ;;  %v1488_v50 = vrot.slane %v1486_v51, 1  ;;  %v1507_v9 = vrot.slane %v1505_v3, 1  ;;  %v1538_v3 = vshrl.u32 %v4002_v60, 16 }
  0x3e   : > { %3304 = vmatprep.subr.bf16.mxu1 %v3612_v7  ;;  %v1484_v59 = vor.u32 %v1483_v56, %v1479_v25  ;;  %v1510_v7 = vshll.u32 %v4002_v60, 16  ;;  %v1469_v15 = vshll.u32 %v2958_v62, 16  ;;  %v1526_v56 = vshll.u32 %v4017_v42, 16 }
  0x3f   : > { %854 = vmatmul.mubr.bf16.gmra.mrb[12].mxu0 %v548_v4  ;;  %v1508_v34 = vor.u32 %v1507_v9, %v1503_v1 }
  0x40   : > { %926 = vmatmul.mubr.bf16.gmra.mrb[12].mxu1 %v564_v2  ;;  %861 = vmatprep.mubr.bf16.mxu0 %v578_v16  ;;  %v4166_v4 = vsel %vm428_vm0, %v1484_v59, %v1488_v50  ;;  %v3621_v2 = vld [vmem:[%s4766_s1 + $0x200] sm:$0xff]   ;;  %v1512_v13 = vrot.slane %v1510_v7, 1  ;;  %v2960_v16 = vcombine.low %v3882_v38, %v3892_v41  ;;  %v1471_v22 = vrot.slane %v1469_v15, 1  ;;  %v3627_v38 = vld [vmem:[%s4766_s1 + $0x250] sm:$0xff]  }
  0x41   : > { %3259 = vmatpush3.bf16.msra.mxu0 %v3613_v5  ;;  %933 = vmatprep.mubr.bf16.mxu1 %v584_v20  ;;  %v1467_v5 = vshrl.u32 %v2958_v62, 16  ;;  %v3625_v20 = vld [vmem:[%s4766_s1 + $0x208] sm:$0xff]   ;;  %v3634_v62 = vld [vmem:[%s4766_s1 + $0x298] sm:$0xff]   ;;  %v1528_v7 = vrot.slane %v1526_v56, 1  ;;  %v1546_v56 = vshrl.u32 %v4057_v49, 16 }
  0x42   : > { %3305 = vmatpush3.bf16.msra.mxu1 %v3614_v19  ;;  %3260 = vmatprep.subr.bf16.mxu0 %v3615_v11  ;;  %v4185_v19 = vsel %vm428_vm0, %v1508_v34, %v1512_v13  ;;  %v3626_v11 = vld [vmem:[%s4766_s1 + $0x288] sm:$0xff]   ;;  %v1491_v25 = vshrl.u32 %v2960_v16, 16  ;;  %v1540_v9 = vor.u32 %v1538_v3, %v1512_v13  ;;  %v1518_v34 = vshll.u32 %v4057_v49, 16  ;;  %v3653_v3 = vld [vmem:[%s4766_s1 + $0x238] sm:$0xff]  }
  0x43   : > { %3306 = vmatprep.subr.bf16.mxu1 %v3616_v24  ;;  %v1476_v24 = vrot.slane %v1474_v10, 1  ;;  %v1472_v41 = vor.u32 %v1471_v22, %v1467_v5  ;;  %v3639_v5 = vld [vmem:[%s4766_s1 + $0x268] sm:$0xff]  }
  0x44   : > { %v1520_v10 = vrot.slane %v1518_v34, 1 }
  0x45   : > { %3261 = vmatpush3.bf16.msra.mxu0 %v3617_v12  ;;  %v1493_v12 = vshll.u32 %v2960_v16, 16  ;;  %v4204_v37 = vsel %vm428_vm0, %v1472_v41, %v1476_v24  ;;  %v3640_v16 = vld [vmem:[%s4766_s1 + $0x2e8] sm:$0xff]   ;;  %v1554_v41 = vshrl.u32 %v4017_v42, 16 }
  0x46   : > { %3307 = vmatpush3.bf16.msra.mxu1 %v3618_v17  ;;  %3338 = vmatprep.subr.bf16.mxu0 %v3619_v53  ;;  %v3632_v53 = vld [vmem:[%s4766_s1 + $0x2d8] sm:$0xff]  }
  0x47   : > { %862 = vmatmul.mubr.bf16.gmra.mrb[16].mxu0 %v575_v46  ;;  %3384 = vmatprep.subr.bf16.mxu1 %v3620_v23  ;;  %v3629_v46 = vld [vmem:[%s4766_s1 + $0x210] sm:$0xff]   ;;  %v1495_v17 = vrot.slane %v1493_v12, 1  ;;  %v3633_v23 = vld [vmem:[%s4766_s1 + $0x218] sm:$0xff]   ;;  %v1556_v12 = vor.u32 %v1554_v41, %v1528_v7  ;;  %v2077_v41 = vrot.slane %v4057_v49, 1 }
  0x48   : > { %934 = vmatmul.mubr.bf16.gmra.mrb[16].mxu1 %v581_v28  ;;  %1189 = vmatprep.mubr.bf16.mxu0 %v3878_v36  ;;  %v3622_v36 = vld [vmem:[%s4766_s1 + $0x280] sm:$0xff]  }
  0x49   : > { %1261 = vmatprep.mubr.bf16.mxu1 %v3898_v43  ;;  %v3624_v43 = vld [vmem:[%s4766_s1 + $0x2c8] sm:$0xff]   ;;  %v1496_v28 = vor.u32 %v1495_v17, %v1491_v25 }
  0x4f   : > { %1190 = vmatmul.mubr.bf16.vlgmr.msra.gmra.mrb[20].mxu0 %v3885_v39  ;;  %v3628_v39 = vld [vmem:[%s4766_s1 + $0x2d0] sm:$0xff]  }
  0x50   : > { %1262 = vmatmul.mubr.bf16.vlgmr.msra.gmra.mrb[20].mxu1 %v3905_v45  ;;  %3339 = vmatpush3.bf16.msra.mxu0 %v3621_v2  ;;  %v1498_v45 = vshll.u32 %v3997_v55, 16 }
  0x51   : > { %3385 = vmatpush3.bf16.msra.mxu1 %v3622_v36  ;;  %3340 = vmatprep.subr.bf16.mxu0 %v3623_v33  ;;  %v1514_v36 = vshrl.u32 %v3974_v31, 16 }
  0x52   : > { %3386 = vmatprep.subr.bf16.mxu1 %v3624_v43  ;;  %1197 = vmatprep.mubr.bf16.mxu0 %v3889_v40  ;;  %v3630_v40 = vld [vmem:[%s4766_s1 + $0x290] sm:$0xff]   ;;  %v1500_v51 = vrot.slane %v1498_v45, 1  ;;  %v1530_v43 = vshrl.u32 %v3997_v55, 16 }
  0x53   : > { %1269 = vmatprep.mubr.bf16.mxu1 %v3911_v48  ;;  %v1522_v48 = vshrl.u32 %v3994_v54, 16  ;;  %v1516_v33 = vor.u32 %v1514_v36, %v1476_v24  ;;  %v3642_v24 = vld [vmem:[%s4766_s1 + $0x2a8] sm:$0xff]   ;;  %v3664_v36 = vld [vmem:[%s4766_s1 + $0x3c0] sm:$0xff]  }
  0x54   : > { %3341 = vmatpush3.bf16.msra.mxu0 %v3625_v20  ;;  %v4227_v59 = vsel %vm428_vm0, %v1496_v28, %v1500_v51  ;;  %v3641_v20 = vld [vmem:[%s4766_s1 + $0x228] sm:$0xff]   ;;  %v1532_v22 = vor.u32 %v1530_v43, %v1500_v51  ;;  %v3648_v51 = vld [vmem:[%s4766_s1 + $0x2b0] sm:$0xff]   ;;  %v1574_v28 = vshll.u32 %v4116_v35, 16 }
  0x55   : > { %3387 = vmatpush3.bf16.msra.mxu1 %v3626_v11  ;;  %3342 = vmatprep.subr.bf16.mxu0 %v3627_v38  ;;  %v1524_v1 = vor.u32 %v1522_v48, %v1488_v50  ;;  %v1542_v50 = vshll.u32 %v4053_v26, 16  ;;  %v1534_v11 = vshll.u32 %v4067_v57, 16  ;;  %v4274_v38 = vsel %vm428_vm0, %v1516_v33, %v1520_v10  ;;  %v3651_v48 = vld [vmem:[%s4766_s1 + $0x278] sm:$0xff]   ;;  %v3667_v43 = vld [vmem:[%s4766_s1 + $0x348] sm:$0xff]  }
  0x56   : > { %3388 = vmatprep.subr.bf16.mxu1 %v3628_v39  ;;  %v1558_v39 = vshll.u32 %v4109_v61, 16 }
  0x57   : > { %1198 = vmatmul.mubr.bf16.gmra.mrb[24].mxu0 %v3902_v44  ;;  %v3635_v44 = vld [vmem:[%s4766_s1 + $0x260] sm:$0xff]   ;;  %v4244_v2 = vsel %vm428_vm0, %v1524_v1, %v1528_v7  ;;  %v1544_v13 = vrot.slane %v1542_v50, 1  ;;  %v1536_v25 = vrot.slane %v1534_v11, 1  ;;  %v4315_v1 = vrot.slane %v1574_v28, 1 }
  0x58   : > { %1270 = vmatmul.mubr.bf16.gmra.mrb[24].mxu1 %v3925_v58  ;;  %3343 = vmatpush3.bf16.msra.mxu0 %v3629_v46  ;;  %v3636_v58 = vld [vmem:[%s4766_s1 + $0x2e0] sm:$0xff]   ;;  %v2859_v46 = vcombine.high %v4079_v0, %v4079_v0  ;;  %v4295_v17 = vrot.slane %v1558_v39, 1  ;;  %v1550_v7 = vshll.u32 %v4120_v29, 16  ;;  %v2066_v11 = vrot.slane %v3974_v31, 1  ;;  %v3677_v39 = vld [vmem:[%s4766_s1 + $0x310] sm:$0xff]  }
  0x59   : > { %3389 = vmatpush3.bf16.msra.mxu1 %v3630_v40  ;;  %1205 = vmatprep.mubr.bf16.mxu0 %v3965_v27  ;;  %v3637_v27 = vld [vmem:[%s4766_s1 + $0x220] sm:$0xff]   ;;  %v4258_v15 = vsel %vm428_vm0, %v1540_v9, %v1544_v13  ;;  %v4287_v45 = vsel %vm428_vm0, %v1532_v22, %v1536_v25  ;;  %v2861_v40 = vcombine.high %v4085_v6, %v4085_v6  ;;  %v2083_v22 = vrot.slane %v4053_v26, 1 }
  0x5a   : > { %1277 = vmatprep.mubr.bf16.mxu1 %v3977_v32  ;;  %3344 = vmatprep.subr.bf16.mxu0 %v3631_v52  ;;  %v3638_v32 = vld [vmem:[%s4766_s1 + $0x2a0] sm:$0xff]   ;;  %v4333_v50 = vrot.slane %v1550_v7, 1  ;;  %v1594_v7 = vshrl.u32 %v4124_v63, 16 }
  0x5b   : > { %3390 = vmatprep.subr.bf16.mxu1 %v3632_v53  ;;  %v4308_v53 = vsel %vm428_vm0, %v1556_v12, %v4295_v17  ;;  %v3663_v9 = vld [vmem:[%s4766_s1 + $0x340] sm:$0xff]  }
  0x5c   : > { %3345 = vmatpush3.bf16.msra.mxu0 %v3633_v23  ;;  %v3652_v23 = vld [vmem:[%s4766_s1 + $0x2f8] sm:$0xff]   ;;  %v4410_v12 = vld [vmem:[%s3859_s6 + $0x94] ss:$16 sps:$4 sm:$0x1f]  }
  0x5d   : > { %3391 = vmatpush3.bf16.msra.mxu1 %v3634_v62  ;;  %3346 = vmatprep.subr.bf16.mxu0 %v3635_v44  ;;  %v1548_v62 = vor.u32 %v1546_v56, %v1520_v10  ;;  %v3669_v10 = vld [vmem:[%s4766_s1 + $0x308] sm:$0xff]   ;;  %v1590_v28 = vshll.u32 %v4410_v12, 16  ;;  %v3686_v56 = vld [vmem:[%s4766_s1 + $0x398] sm:$0xff]   ;;  %v2095_v31 = vrot.slane %v4410_v12, 1 }
  0x5e   : > { %3392 = vmatprep.subr.bf16.mxu1 %v3636_v58  ;;  %v2858_v58 = vcombine.low %v4079_v0, %v4079_v0 }
  0x5f   : > { %1206 = vmatmul.mubr.bf16.gmra.mrb[28].mxu0 %v3971_v30  ;;  %v3643_v30 = vld [vmem:[%s4766_s1 + $0x270] sm:$0xff]   ;;  %v4345_v33 = vsel %vm428_vm0, %v1548_v62, %v4333_v50  ;;  %v3687_v62 = vld [vmem:[%s4766_s1 + $0x360] sm:$0xff]  }
  0x60   : > { %1278 = vmatmul.mubr.bf16.gmra.mrb[28].mxu1 %v3980_v47  ;;  %3347 = vmatpush3.bf16.msra.mxu0 %v3637_v27  ;;  %v3644_v47 = vld [vmem:[%s4766_s1 + $0x2f0] sm:$0xff]  }
  0x61   : > { %3393 = vmatpush3.bf16.msra.mxu1 %v3638_v32  ;;  %1213 = vmatprep.mubr.bf16.mxu0 %v4022_v8  ;;  %v1570_v8 = vshrl.u32 %v4053_v26, 16  ;;  %v2860_v32 = vcombine.low %v4085_v6, %v4085_v6  ;;  %v3665_v6 = vld [vmem:[%s4766_s1 + $0x300] sm:$0xff]  }
  0x62   : > { %1285 = vmatprep.mubr.bf16.mxu1 %v4031_v14  ;;  %3348 = vmatprep.subr.bf16.mxu0 %v3639_v5  ;;  %v3647_v14 = vld [vmem:[%s4766_s1 + $0x230] sm:$0xff]   ;;  %v3666_v5 = vld [vmem:[%s4766_s1 + $0x380] sm:$0xff]  }
  0x63   : > { %3394 = vmatprep.subr.bf16.mxu1 %v3640_v16  ;;  %v1572_v52 = vor.u32 %v1570_v8, %v1544_v13  ;;  %v1566_v13 = vshll.u32 %v4124_v63, 16  ;;  %v3668_v16 = vld [vmem:[%s4766_s1 + $0x3c8] sm:$0xff]  }
  0x64   : > { %3349 = vmatpush3.bf16.msra.mxu0 %v3641_v20  ;;  %v2075_v20 = vrot.slane %v4002_v60, 1  ;;  %v4417_v8 = vld [vmem:[%s3859_s6 + $0x9c] ss:$16 sps:$4 sm:$0x1f]  }
  0x65   : > { %3395 = vmatpush3.bf16.msra.mxu1 %v3642_v24  ;;  %3350 = vmatprep.subr.bf16.mxu0 %v3643_v30  ;;  %v4327_v44 = vsel %vm428_vm0, %v1572_v52, %v4315_v1  ;;  %v4347_v34 = vrot.slane %v1566_v13, 1  ;;  %v3670_v30 = vld [vmem:[%s4766_s1 + $0x388] sm:$0xff]   ;;  %v3685_v52 = vld [vmem:[%s4766_s1 + $0x318] sm:$0xff]   ;;  %v1619_v26 = vshrl.u32 %v4417_v8, 16 }
  0x66   : > { %3396 = vmatprep.subr.bf16.mxu1 %v3644_v47  ;;  %v3676_v47 = vld [vmem:[%s4766_s1 + $0x3d0] sm:$0xff]   ;;  %v2471_v60 = vld [vmem:[%s4768_s3 + $0x28] sm:$0xff] }
  0x67   : > { %1214 = vmatmul.mubr.bf16.gmra.mrb[32].mxu0 %v4038_v18  ;;  %v3654_v18 = vld [vmem:[%s4766_s1 + $0x2b8] sm:$0xff]  }
  0x68   : > { %1286 = vmatmul.mubr.bf16.gmra.mrb[32].mxu1 %v4043_v21  ;;  %1221 = vmatprep.mubr.bf16.mxu0 %v2859_v46  ;;  %v1562_v21 = vshrl.u32 %v4067_v57, 16  ;;  %v3681_v46 = vld [vmem:[%s4766_s1 + $0x358] sm:$0xff]  }
  0x69   : > { %1293 = vmatprep.mubr.bf16.mxu1 %v2861_v40  ;;  %3351 = vmatpush3.bf16.msra.mxu0 %v3647_v14  ;;  %v1586_v14 = vshrl.u32 %v4109_v61, 16  ;;  %v3682_v40 = vld [vmem:[%s4766_s1 + $0x3d8] sm:$0xff]  }
  0x6a   : > { %3397 = vmatpush3.bf16.msra.mxu1 %v3648_v51  ;;  %3352 = vmatprep.subr.bf16.mxu0 %v3651_v48  ;;  %v1564_v27 = vor.u32 %v1562_v21, %v1536_v25  ;;  %v3675_v25 = vld [vmem:[%s4766_s1 + $0x350] sm:$0xff]   ;;  %v1578_v51 = vshrl.u32 %v4120_v29, 16 }
  0x6b   : > { %3398 = vmatprep.subr.bf16.mxu1 %v3652_v23  ;;  %v4436_v48 = vld [vmem:[%s3859_s6 + $0x90] ss:$16 sps:$4 sm:$0x1f]   ;;  %v1606_v23 = vshll.u32 %v4417_v8, 16  ;;  %v1588_v21 = vor.u32 %v1586_v14, %v4295_v17  ;;  %v2087_v17 = vrot.slane %v4109_v61, 1 }
  0x6c   : > { %v4351_v0 = vsel %vm428_vm0, %v1564_v27, %v4347_v34  ;;  %v1582_v27 = vshll.u32 %v4436_v48, 16 }
  0x6d   : > { %3353 = vmatpush3.bf16.msra.mxu0 %v3653_v3  ;;  %v4444_v3 = vld [vmem:[%s3859_s6 + $0x98] ss:$16 sps:$4 sm:$0x1f]  }
  0x6e   : > { %3399 = vmatpush3.bf16.msra.mxu1 %v3654_v18  ;;  %3430 = vmatprep.subr.bf16.mxu0 %v3663_v9  ;;  %v2072_v18 = vrot.slane %v3997_v55, 1  ;;  %v1592_v9 = vrot.slane %v1590_v28, 1  ;;  %v1598_v13 = vshll.u32 %v4444_v3, 16  ;;  %v3703_v28 = vld [vmem:[%s4766_s1 + $0x330] sm:$0xff]   ;;  %v2099_v55 = vrot.slane %v4417_v8, 1 }
  0x6f   : > { %1222 = vmatmul.mubr.bf16.gmra.mrb[36].mxu0 %v2858_v58  ;;  %3476 = vmatprep.subr.bf16.mxu1 %v3664_v36  ;;  %v1608_v36 = vrot.slane %v1606_v23, 1 }
  0x70   : > { %1294 = vmatmul.mubr.bf16.gmra.mrb[36].mxu1 %v2860_v32  ;;  %1866 = vmatprep.mubr.bf16.mxu0 %v4166_v4  ;;  %v2069_v4 = vrot.slane %v3994_v54, 1  ;;  %v1593_v32 = vsel %vm428_vm0, %v1588_v21, %v1592_v9  ;;  %v3725_v21 = vmov 0   ;;  %v2472_v54 = vld [vmem:[%s4768_s3 + $0x30] sm:$0xff] }
  0x71   : > { %1938 = vmatprep.mubr.bf16.mxu1 %v4185_v19  ;;  %v2079_v19 = vrot.slane %v4017_v42, 1  ;;  %3533 = vset.pattern.permute.xlu0 %v3725_v21 }
  0x72   : > { %3534 = vset.pattern.permute.xlu1 %v3725_v21 }
  0x73   : > { %v4381_v24 = vsel %vm2064_vm1, %v2069_v4, %v2079_v19 }
  0x77   : > { %1867 = vmatmul.mubr.bf16.vlgmr.msra.gmra.mrb[40].mxu0 %v4204_v37  ;;  %v4393_v37 = vsel %vm2064_vm1, %v2075_v20, %v2083_v22 }
  0x78   : > { %1939 = vmatmul.mubr.bf16.vlgmr.msra.gmra.mrb[40].mxu1 %v4227_v59  ;;  %3431 = vmatpush3.bf16.msra.mxu0 %v3665_v6  ;;  %v4403_v59 = vsel %vm2064_vm1, %v2066_v11, %v2077_v41  ;;  %v3697_v6 = vld [vmem:[%s4766_s1 + $0x368] sm:$0xff]  }
  0x79   : > { %3477 = vmatpush3.bf16.msra.mxu1 %v3666_v5  ;;  %3432 = vmatprep.subr.bf16.mxu0 %v3667_v43  ;;  %v1580_v43 = vor.u32 %v1578_v51, %v4333_v50  ;;  %v3699_v50 = vld [vmem:[%s4766_s1 + $0x328] sm:$0xff]  }
  0x7a   : > { %3478 = vmatprep.subr.bf16.mxu1 %v3668_v16  ;;  %1874 = vmatprep.mubr.bf16.mxu0 %v4244_v2  ;;  %v3678_v2 = vld [vmem:[%s4766_s1 + $0x390] sm:$0xff]   ;;  %v3698_v16 = vld [vmem:[%s4766_s1 + $0x3e8] sm:$0xff]  }
  0x7b   : > { %1946 = vmatprep.mubr.bf16.mxu1 %v4258_v15  ;;  %v1602_v15 = vshrl.u32 %v4116_v35, 16 }
  0x7c   : > { %3433 = vmatpush3.bf16.msra.mxu0 %v3669_v10  ;;  %v4490_v10 = vsel %vm2064_vm1, %v2079_v19, %v2087_v17  ;;  %v2089_v19 = vrot.slane %v4124_v63, 1 }
  0x7d   : > { %3479 = vmatpush3.bf16.msra.mxu1 %v3670_v30  ;;  %3434 = vmatprep.subr.bf16.mxu0 %v3675_v25  ;;  %v1604_v58 = vor.u32 %v1602_v15, %v4315_v1  ;;  %v2085_v30 = vrot.slane %v4120_v29, 1  ;;  %v1613_v25 = vshrl.u32 %v4410_v12, 16  ;;  %v1988_v15 = vld [vmem:[%s3859_s6 + $0x18] sm:$0xee] }
  0x7e   : > { %3480 = vmatprep.subr.bf16.mxu1 %v3676_v47  ;;  %v1600_v47 = vrot.slane %v1598_v13, 1  ;;  %v3708_v13 = vld [vmem:[%s4766_s1 + $0x3b8] sm:$0xff]  }
  0x7f   : > { %1875 = vmatmul.mubr.bf16.gmra.mrb[44].mxu0 %v4274_v38  ;;  %v3688_v38 = vld [vmem:[%s4766_s1 + $0x3e0] sm:$0xff]   ;;  %v1609_v5 = vsel %vm428_vm0, %v1604_v58, %v1608_v36  ;;  %v1616_v58 = vshrl.u32 %v4444_v3, 16 }
  0x80   : > { %1947 = vmatmul.mubr.bf16.gmra.mrb[44].mxu1 %v4287_v45  ;;  %3435 = vmatpush3.bf16.msra.mxu0 %v3677_v39  ;;  %v3689_v45 = vld [vmem:[%s4766_s1 + $0x320] sm:$0xff]   ;;  %v3700_v39 = vld [vmem:[%s4766_s1 + $0x3a8] sm:$0xff]  }
  0x81   : > { %3481 = vmatpush3.bf16.msra.mxu1 %v3678_v2  ;;  %1882 = vmatprep.mubr.bf16.mxu0 %v4308_v53  ;;  %v3690_v53 = vld [vmem:[%s4766_s1 + $0x3a0] sm:$0xff]   ;;  %v3701_v2 = vld [vmem:[%s4766_s1 + $0x370] sm:$0xff]  }
  0x82   : > { %1954 = vmatprep.mubr.bf16.mxu1 %v4327_v44  ;;  %3436 = vmatprep.subr.bf16.mxu0 %v3681_v46  ;;  %v2081_v44 = vrot.slane %v4067_v57, 1  ;;  %v2091_v57 = vrot.slane %v4116_v35, 1  ;;  %v1987_v46 = vld [vmem:[%s3859_s6 + $0x10] sm:$0xee] }
  0x83   : > { %3482 = vmatprep.subr.bf16.mxu1 %v3682_v40  ;;  %v2466_v40 = vld [vmem:[%s4768_s3] sm:$0xff] }
  0x84   : > { %3437 = vmatpush3.bf16.msra.mxu0 %v3685_v52  ;;  %v4476_v1 = vsel %vm2064_vm1, %v2072_v18, %v2081_v44  ;;  %v4503_v42 = vsel %vm2064_vm1, %v2083_v22, %v2091_v57  ;;  %v4519_v22 = vsel %vm2064_vm1, %v2077_v41, %v2085_v30  ;;  %v4528_v14 = vsel %vm2064_vm1, %v2081_v44, %v2089_v19 }
  0x85   : > { %3483 = vmatpush3.bf16.msra.mxu1 %v3686_v56  ;;  %3438 = vmatprep.subr.bf16.mxu0 %v3687_v62  ;;  %v1615_v41 = vor.u32 %v1613_v25, %v1592_v9  ;;  %v1621_v52 = vor.u32 %v1619_v26, %v1608_v36  ;;  %v3715_v56 = vld [vmem:[%s3859_s6 + $0x20] sm:$0xff]  ;;  %v3704_v62 = vld [vmem:[%s4766_s1 + $0x3b0] sm:$0xff]   ;;  %v1610_v9 = vshrl.u32 %v4436_v48, 16  ;;  %v2467_v36 = vld [vmem:[%s4768_s3 + $0x8] sm:$0xff] }
  0x86   : > { %3484 = vmatprep.subr.bf16.mxu1 %v3688_v38  ;;  %v3075_v23 = vcombine.high %v1987_v46, %v3715_v56  ;;  %v3716_v38 = vld [vmem:[%s3859_s6 + $0x28] sm:$0xff]  ;;  %2493 = vperm.xlu0 %3533, %v2466_v40  }
  0x87   : > { %1883 = vmatmul.mubr.bf16.gmra.mrb[48].mxu0 %v4345_v33  ;;  %v1584_v33 = vrot.slane %v1582_v27, 1  ;;  %v3707_v27 = vld [vmem:[%s4766_s1 + $0x338] sm:$0xff]  }
  0x88   : > { %1955 = vmatmul.mubr.bf16.gmra.mrb[48].mxu1 %v4351_v0  ;;  %3439 = vmatpush3.bf16.msra.mxu0 %v3689_v45  ;;  %v1596_v0 = vor.u32 %v1594_v7, %v4347_v34  ;;  %v3702_v34 = vld [vmem:[%s4766_s1 + $0x3f0] sm:$0xff]   ;;  %v3705_v7 = vld [vmem:[%s4766_s1 + $0x378] sm:$0xff]   ;;  %v3077_v45 = vcombine.high %v1988_v15, %v3716_v38  ;;  %v2068_v44 = vrot.slane %v3075_v23, 1 }
  0x89   : > { %3485 = vmatpush3.bf16.msra.mxu1 %v3690_v53  ;;  %1890 = vmatprep.mubr.bf16.mxu0 %v1593_v32  ;;  %v1585_v49 = vsel %vm428_vm0, %v1580_v43, %v1584_v33  ;;  %v3706_v53 = vld [vmem:[%s4766_s1 + $0x3f8] sm:$0xff]   ;;  %v1618_v43 = vor.u32 %v1616_v58, %v1600_v47 }
  0x8a   : > { %1962 = vmatprep.mubr.bf16.mxu1 %v1609_v5  ;;  %3440 = vmatprep.subr.bf16.mxu0 %v3697_v6  ;;  %v1601_v51 = vsel %vm428_vm0, %v1596_v0, %v1600_v47  ;;  %v2074_v32 = vrot.slane %v3077_v45, 1  ;;  %v2468_v6 = vld [vmem:[%s4768_s3 + $0x10] sm:$0xff]  ;;  %v1612_v5 = vor.u32 %v1610_v9, %v1584_v33  ;;  %v2070_v25 = vsel %vm2064_vm1, %v2068_v44, %v2069_v4  ;;  %v2469_v47 = vld [vmem:[%s4768_s3 + $0x18] sm:$0xff] }
  0x8b   : > { %3486 = vmatprep.subr.bf16.mxu1 %v3698_v16  ;;  %2498 = vperm.xlu0 %3533, %v2467_v36   ;;  %v3074_v16 = vcombine.low %v1987_v46, %v3715_v56  ;;  %v3076_v0 = vcombine.low %v1988_v15, %v3716_v38 }
  0x8c   : > { %3441 = vmatpush3.bf16.msra.mxu0 %v3699_v50  ;;  %v2470_v50 = vld [vmem:[%s4768_s3 + $0x20] sm:$0xff]  ;;  %2503 = vperm.xlu1 %3534, %v2468_v6   ;;  %v2076_v33 = vsel %vm2064_vm1, %v2074_v32, %v2075_v20 }
  0x8d   : > { %3487 = vmatpush3.bf16.msra.mxu1 %v3700_v39  ;;  %3442 = vmatprep.subr.bf16.mxu0 %v3701_v2  ;;  %v2065_v39 = vrot.slane %v3074_v16, 1  ;;  %v2071_v4 = vrot.slane %v3076_v0, 1  ;;  %v2474_v2 = vld [vmem:[%s4768_s3 + $0x40] sm:$0xff] }
  0x8e   : > { %3488 = vmatprep.subr.bf16.mxu1 %v3702_v34  ;;  %v2473_v34 = vld [vmem:[%s4768_s3 + $0x38] sm:$0xff] }
  0x8f   : > { %1891 = vmatmul.mubr.bf16.gmra.mrb[52].mxu0 %v1585_v49  ;;  %2513 = vperm.xlu0 %3533, %v2470_v50   ;;  %v2067_v20 = vsel %vm2064_vm1, %v2065_v39, %v2066_v11  ;;  %v2073_v26 = vsel %vm2064_vm1, %v2071_v4, %v2072_v18  ;;  %v2096_v11 = vsel %vm2064_vm1, %v2087_v17, %v2095_v31 }
  0x90   : > { %1963 = vmatmul.mubr.bf16.gmra.mrb[52].mxu1 %v1601_v51  ;;  %1898 = vmatprep.mubr.bf16.mxu0 %v1615_v41 }
  0x91   : > { %1970 = vmatprep.mubr.bf16.mxu1 %v1621_v52  ;;  %3443 = vmatpush3.bf16.msra.mxu0 %v3703_v28 }
  0x92   : > { %3489 = vmatpush3.bf16.msra.mxu1 %v3704_v62  ;;  %3444 = vmatprep.subr.bf16.mxu0 %v3705_v7 }
  0x93   : > { %3490 = vmatprep.subr.bf16.mxu1 %v3706_v53  ;;  %2508 = vperm.xlu1 %3534, %v2469_v47  }
  0x94   : > { %2523 = vperm.xlu0 %3533, %v2472_v54  }
  0x95   : > { %3445 = vmatpush3.bf16.msra.mxu0 %v3707_v27 }
  0x96   : > { %3491 = vmatpush3.bf16.msra.mxu1 %v3708_v13 }
  0x97   : > { %1899 = vmatmul.mubr.bf16.gmra.mrb[56].mxu0 %v1612_v5  ;;  %2518 = vperm.xlu1 %3534, %v2471_v60  }
  0x98   : > { %1971 = vmatmul.mubr.bf16.gmra.mrb[56].mxu1 %v1618_v43  ;;  %2345 = vmatprep.mubr.bf16.mxu0 %v2070_v25 }
  0x99   : > { %2417 = vmatprep.mubr.bf16.mxu1 %v2076_v33  ;;  %2533 = vperm.xlu0 %3533, %v2474_v2  }
  0x9b   : > { %2528 = vperm.xlu1 %3534, %v2473_v34  }
  0x9f   : > { %2346 = vmatmul.mubr.bf16.vlgmr.msra.gmra.mrb[60].mxu0 %v2067_v20 }
  0xa0   : > { %2418 = vmatmul.mubr.bf16.vlgmr.msra.gmra.mrb[60].mxu1 %v2073_v26  ;;  %2353 = vmatprep.mubr.bf16.mxu0 %v4381_v24  ;;  %v2100_v24 = vsel %vm2064_vm1, %v2091_v57, %v2099_v55 }
  0xa1   : > { %2425 = vmatprep.mubr.bf16.mxu1 %v4393_v37  ;;  %v2093_v37 = vrot.slane %v4436_v48, 1 }
  0xa3   : > { %v2094_v61 = vsel %vm2064_vm1, %v2085_v30, %v2093_v37 }
  0xa7   : > { %2354 = vmatmul.mubr.bf16.gmra.mrb[64].mxu0 %v4403_v59  ;;  %v2097_v59 = vrot.slane %v4444_v3, 1 }
  0xa8   : > { %2426 = vmatmul.mubr.bf16.gmra.mrb[64].mxu1 %v4476_v1  ;;  %2361 = vmatprep.mubr.bf16.mxu0 %v4490_v10 }
  0xa9   : > { %2433 = vmatprep.mubr.bf16.mxu1 %v4503_v42  ;;  %v2098_v35 = vsel %vm2064_vm1, %v2089_v19, %v2097_v59 }
  0xaf   : > { %2362 = vmatmul.mubr.bf16.gmra.mrb[68].mxu0 %v4519_v22 }
  0xb0   : > { %2434 = vmatmul.mubr.bf16.gmra.mrb[68].mxu1 %v4528_v14  ;;  %2369 = vmatprep.mubr.bf16.mxu0 %v2096_v11 }
  0xb1   : > { %2441 = vmatprep.mubr.bf16.mxu1 %v2100_v24 }
  0xb7   : > { %2370 = vmatmul.mubr.bf16.gmra.mrb[72].mxu0 %v2094_v61 }
  0xb8   : > { %2442 = vmatmul.mubr.bf16.gmra.mrb[72].mxu1 %v2098_v35  ;;  %2377 = vmatprep.mubr.bf16.mxu0 %v2095_v31 }
  0xb9   : > { %2449 = vmatprep.mubr.bf16.mxu1 %v2099_v55 }
  0xbf   : > { %2378 = vmatmul.mubr.bf16.gmra.mrb[76].mxu0 %v2093_v37 }
  0xc0   : > { %2450 = vmatmul.mubr.bf16.gmra.mrb[76].mxu1 %v2097_v59 }
  0xfa   : > { %v3170_v12 = vpop.f32.mrb[0].mxu0 }
  0xfb   : > { %v3171_v8 = vpop.f32.mrb[1].mxu0  ;;  %v3216_v17 = vpop.f32.mrb[0].mxu1 }
  0xfc   : > { %v3172_v48 = vadd.f32 %v3171_v8, %v3170_v12  ;;  %v3173_v18 = vpop.f32.mrb[2].mxu0  ;;  %v3217_v1 = vpop.f32.mrb[1].mxu1 }
  0xfd   : > { %v3174_v3 = vpop.f32.mrb[3].mxu0  ;;  %v3218_v57 = vadd.f32 %v3217_v1, %v3216_v17  ;;  %v3219_v10 = vpop.f32.mrb[2].mxu1 }
  0xfe   : > { %v3175_v29 = vadd.f32 %v3174_v3, %v3173_v18  ;;  %v3220_v30 = vpop.f32.mrb[3].mxu1 }
  0xff   : > { %v4618_v63 = vadd.f32 %v3218_v57, %v3172_v48  ;;  %v3221_v42 = vadd.f32 %v3220_v30, %v3219_v10 }
 0x101   : > { %v4620_v19 = vadd.f32 %v3221_v42, %v3175_v29 }
 0x102   : > { %v3176_v22 = vpop.f32.mrb[4].mxu0 }
 0x103   : > { %v3222_v46 = vpop.f32.mrb[4].mxu1  ;;  %v3177_v14 = vpop.f32.mrb[5].mxu0 }
 0x104   : > { %v3178_v15 = vadd.f32 %v3177_v14, %v3176_v22  ;;  %v3223_v49 = vpop.f32.mrb[5].mxu1  ;;  %v3179_v41 = vpop.f32.mrb[6].mxu0 }
 0x105   : > { %v3224_v40 = vadd.f32 %v3223_v49, %v3222_v46  ;;  %v3225_v51 = vpop.f32.mrb[6].mxu1  ;;  %v3180_v52 = vpop.f32.mrb[7].mxu0 }
 0x106   : > { %v3181_v28 = vadd.f32 %v3180_v52, %v3179_v41  ;;  %v3226_v56 = vpop.f32.mrb[7].mxu1 }
 0x107   : > { %v4622_v23 = vadd.f32 %v3224_v40, %v3178_v15  ;;  %v3227_v62 = vadd.f32 %v3226_v56, %v3225_v51 }
 0x109   : > { %v4624_v7 = vadd.f32 %v3227_v62, %v3181_v28 }
 0x10a   : > { %v3182_v38 = vpop.f32.mrb[8].mxu0 }
 0x10b   : > { %v3228_v45 = vpop.f32.mrb[8].mxu1  ;;  %v3183_v21 = vpop.f32.mrb[9].mxu0 }
 0x10c   : > { %v3184_v9 = vadd.f32 %v3183_v21, %v3182_v38  ;;  %v3229_v53 = vpop.f32.mrb[9].mxu1  ;;  %v3185_v58 = vpop.f32.mrb[10].mxu0 }
 0x10d   : > { %v3230_v36 = vadd.f32 %v3229_v53, %v3228_v45  ;;  %v3231_v27 = vpop.f32.mrb[10].mxu1  ;;  %v3186_v44 = vpop.f32.mrb[11].mxu0 }
 0x10e   : > { %v3187_v13 = vadd.f32 %v3186_v44, %v3185_v58  ;;  %v3232_v32 = vpop.f32.mrb[11].mxu1 }
 0x10f   : > { %v4626_v6 = vadd.f32 %v3230_v36, %v3184_v9  ;;  %v3233_v5 = vadd.f32 %v3232_v32, %v3231_v27 }
 0x111   : > { %v4628_v43 = vadd.f32 %v3233_v5, %v3187_v13 }
 0x112   : > { %v3188_v16 = vpop.f32.mrb[12].mxu0 }
 0x113   : > { %v3234_v50 = vpop.f32.mrb[12].mxu1  ;;  %v3189_v25 = vpop.f32.mrb[13].mxu0 }
 0x114   : > { %v3190_v0 = vadd.f32 %v3189_v25, %v3188_v16  ;;  %v3235_v33 = vpop.f32.mrb[13].mxu1  ;;  %v3191_v47 = vpop.f32.mrb[14].mxu0 }
 0x115   : > { %v3236_v39 = vadd.f32 %v3235_v33, %v3234_v50  ;;  %v3237_v54 = vpop.f32.mrb[14].mxu1  ;;  %v3192_v4 = vpop.f32.mrb[15].mxu0 }
 0x116   : > { %v3193_v60 = vadd.f32 %v3192_v4, %v3191_v47  ;;  %v3238_v20 = vpop.f32.mrb[15].mxu1 }
 0x117   : > { %v4630_v2 = vadd.f32 %v3236_v39, %v3190_v0  ;;  %v3239_v26 = vadd.f32 %v3238_v20, %v3237_v54 }
 0x119   : > { %v4632_v34 = vadd.f32 %v3239_v26, %v3193_v60 }
 0x11a   : > { %v3194_v31 = vpop.f32.mrb[16].mxu0 }
 0x11b   : > { %v3240_v55 = vpop.f32.mrb[16].mxu1  ;;  %v3195_v11 = vpop.f32.mrb[17].mxu0 }
 0x11c   : > { %v3196_v24 = vadd.f32 %v3195_v11, %v3194_v31  ;;  %v3241_v37 = vpop.f32.mrb[17].mxu1  ;;  %v3197_v59 = vpop.f32.mrb[18].mxu0 }
 0x11d   : > { %v3242_v61 = vadd.f32 %v3241_v37, %v3240_v55  ;;  %v3243_v35 = vpop.f32.mrb[18].mxu1  ;;  %v3198_v12 = vpop.f32.mrb[19].mxu0 }
 0x11e   : > { %v3244_v8 = vpop.f32.mrb[19].mxu1 }
 0x11f   : > { %v4634_v48 = vadd.f32 %v3242_v61, %v3196_v24 }
 0x122   : > { %v3262_v18 = vpop.f32.mrb[20].mxu0 }
 0x123   : > { %v3308_v17 = vpop.f32.mrb[20].mxu1  ;;  %v3263_v3 = vpop.f32.mrb[21].mxu0 }
 0x124   : > { %v3264_v1 = vadd.f32 %v3263_v3, %v3262_v18  ;;  %v3309_v29 = vpop.f32.mrb[21].mxu1  ;;  %v3265_v57 = vpop.f32.mrb[22].mxu0 }
 0x125   : > { %v3310_v10 = vadd.f32 %v3309_v29, %v3308_v17  ;;  %v3311_v30 = vpop.f32.mrb[22].mxu1  ;;  %v3266_v42 = vpop.f32.mrb[23].mxu0 }
 0x126   : > { %v1192_v22 = vadd.f32 %v3264_v1, %v4618_v63  ;;  %v3267_v46 = vadd.f32 %v3266_v42, %v3265_v57  ;;  %v3312_v14 = vpop.f32.mrb[23].mxu1 }
 0x127   : > { %v3313_v15 = vadd.f32 %v3312_v14, %v3311_v30 }
 0x128   : > { %v4637_v49 = vadd.f32 %v3310_v10, %v1192_v22  ;;  %v1195_v41 = vadd.f32 %v3267_v46, %v4620_v19 }
 0x12a   : > { %v4640_v40 = vadd.f32 %v3313_v15, %v1195_v41  ;;  %v3268_v51 = vpop.f32.mrb[24].mxu0 }
 0x12b   : > { %v3314_v52 = vpop.f32.mrb[24].mxu1  ;;  %v3269_v28 = vpop.f32.mrb[25].mxu0 }
 0x12c   : > { %v3270_v56 = vadd.f32 %v3269_v28, %v3268_v51  ;;  %v3315_v62 = vpop.f32.mrb[25].mxu1  ;;  %v3271_v38 = vpop.f32.mrb[26].mxu0 }
 0x12d   : > { %v3316_v45 = vadd.f32 %v3315_v62, %v3314_v52  ;;  %v3317_v21 = vpop.f32.mrb[26].mxu1  ;;  %v3272_v9 = vpop.f32.mrb[27].mxu0 }
 0x12e   : > { %v1200_v63 = vadd.f32 %v3270_v56, %v4622_v23  ;;  %v3273_v53 = vadd.f32 %v3272_v9, %v3271_v38  ;;  %v3318_v58 = vpop.f32.mrb[27].mxu1 }
 0x12f   : > { %v3319_v36 = vadd.f32 %v3318_v58, %v3317_v21 }
 0x130   : > { %v4643_v27 = vadd.f32 %v3316_v45, %v1200_v63  ;;  %v1203_v19 = vadd.f32 %v3273_v53, %v4624_v7 }
 0x132   : > { %v4646_v44 = vadd.f32 %v3319_v36, %v1203_v19  ;;  %v3274_v13 = vpop.f32.mrb[28].mxu0 }
 0x133   : > { %v3320_v32 = vpop.f32.mrb[28].mxu1  ;;  %v3275_v5 = vpop.f32.mrb[29].mxu0 }
 0x134   : > { %v3276_v16 = vadd.f32 %v3275_v5, %v3274_v13  ;;  %v3321_v50 = vpop.f32.mrb[29].mxu1  ;;  %v3277_v25 = vpop.f32.mrb[30].mxu0 }
 0x135   : > { %v3322_v0 = vadd.f32 %v3321_v50, %v3320_v32  ;;  %v3323_v33 = vpop.f32.mrb[30].mxu1  ;;  %v3278_v47 = vpop.f32.mrb[31].mxu0 }
 0x136   : > { %v1208_v23 = vadd.f32 %v3276_v16, %v4626_v6  ;;  %v3279_v39 = vadd.f32 %v3278_v47, %v3277_v25  ;;  %v3324_v54 = vpop.f32.mrb[31].mxu1 }
 0x137   : > { %v3325_v4 = vadd.f32 %v3324_v54, %v3323_v33 }
 0x138   : > { %v4649_v60 = vadd.f32 %v3322_v0, %v1208_v23  ;;  %v1211_v7 = vadd.f32 %v3279_v39, %v4628_v43 }
 0x13a   : > { %v4652_v20 = vadd.f32 %v3325_v4, %v1211_v7  ;;  %v3280_v26 = vpop.f32.mrb[32].mxu0 }
 0x13b   : > { %v3326_v31 = vpop.f32.mrb[32].mxu1  ;;  %v3281_v55 = vpop.f32.mrb[33].mxu0 }
 0x13c   : > { %v3282_v11 = vadd.f32 %v3281_v55, %v3280_v26  ;;  %v3327_v24 = vpop.f32.mrb[33].mxu1  ;;  %v3283_v37 = vpop.f32.mrb[34].mxu0 }
 0x13d   : > { %v3328_v59 = vadd.f32 %v3327_v24, %v3326_v31  ;;  %v3329_v61 = vpop.f32.mrb[34].mxu1  ;;  %v3284_v35 = vpop.f32.mrb[35].mxu0 }
 0x13e   : > { %v1216_v6 = vadd.f32 %v3282_v11, %v4630_v2  ;;  %v3285_v12 = vadd.f32 %v3284_v35, %v3283_v37  ;;  %v3330_v8 = vpop.f32.mrb[35].mxu1 }
 0x13f   : > { %v3331_v18 = vadd.f32 %v3330_v8, %v3329_v61 }
 0x140   : > { %v4655_v17 = vadd.f32 %v3328_v59, %v1216_v6  ;;  %v1219_v43 = vadd.f32 %v3285_v12, %v4632_v34 }
 0x142   : > { %v4658_v3 = vadd.f32 %v3331_v18, %v1219_v43  ;;  %v3286_v1 = vpop.f32.mrb[36].mxu0 }
 0x143   : > { %v3332_v29 = vpop.f32.mrb[36].mxu1  ;;  %v3287_v57 = vpop.f32.mrb[37].mxu0 }
 0x144   : > { %v3288_v10 = vadd.f32 %v3287_v57, %v3286_v1  ;;  %v3333_v30 = vpop.f32.mrb[37].mxu1  ;;  %v3289_v42 = vpop.f32.mrb[38].mxu0 }
 0x145   : > { %v3334_v22 = vadd.f32 %v3333_v30, %v3332_v29  ;;  %v3335_v46 = vpop.f32.mrb[38].mxu1  ;;  %v3290_v14 = vpop.f32.mrb[39].mxu0 }
 0x146   : > { %v1224_v2 = vadd.f32 %v3288_v10, %v4634_v48  ;;  %v3336_v15 = vpop.f32.mrb[39].mxu1 }
 0x148   : > { %v4661_v41 = vadd.f32 %v3334_v22, %v1224_v2 }
 0x14a   : > { %v3354_v51 = vpop.f32.mrb[40].mxu0 }
 0x14b   : > { %v3400_v52 = vpop.f32.mrb[40].mxu1  ;;  %v3355_v28 = vpop.f32.mrb[41].mxu0 }
 0x14c   : > { %v3356_v34 = vadd.f32 %v3355_v28, %v3354_v51  ;;  %v3401_v56 = vpop.f32.mrb[41].mxu1  ;;  %v3357_v62 = vpop.f32.mrb[42].mxu0 }
 0x14d   : > { %v3402_v38 = vadd.f32 %v3401_v56, %v3400_v52  ;;  %v3403_v45 = vpop.f32.mrb[42].mxu1  ;;  %v3358_v21 = vpop.f32.mrb[43].mxu0 }
 0x14e   : > { %v3359_v9 = vadd.f32 %v3358_v21, %v3357_v62  ;;  %v3404_v63 = vpop.f32.mrb[43].mxu1 }
 0x14f   : > { %v1941_v53 = vadd.f32 %v3402_v38, %v3356_v34  ;;  %v3405_v58 = vadd.f32 %v3404_v63, %v3403_v45 }
 0x151   : > { %v4664_v36 = vadd.f32 %v1941_v53, %v4637_v49  ;;  %v1944_v48 = vadd.f32 %v3405_v58, %v3359_v9 }
 0x152   : > { %v3360_v19 = vpop.f32.mrb[44].mxu0 }
 0x153   : > { %v4667_v13 = vadd.f32 %v1944_v48, %v4640_v40  ;;  %v3406_v32 = vpop.f32.mrb[44].mxu1  ;;  %v3361_v5 = vpop.f32.mrb[45].mxu0 }
 0x154   : > { %v3362_v16 = vadd.f32 %v3361_v5, %v3360_v19  ;;  %v3407_v50 = vpop.f32.mrb[45].mxu1  ;;  %v3363_v25 = vpop.f32.mrb[46].mxu0 }
 0x155   : > { %v3408_v0 = vadd.f32 %v3407_v50, %v3406_v32  ;;  %v3409_v33 = vpop.f32.mrb[46].mxu1  ;;  %v3364_v47 = vpop.f32.mrb[47].mxu0 }
 0x156   : > { %v3365_v23 = vadd.f32 %v3364_v47, %v3363_v25  ;;  %v3410_v39 = vpop.f32.mrb[47].mxu1  ;;  %v2494_v32 = vpop.permute.xlu0 %2493 }
 0x157   : > { %v1949_v54 = vadd.f32 %v3408_v0, %v3362_v16  ;;  %v3411_v4 = vadd.f32 %v3410_v39, %v3409_v33 }
 0x159   : > { %v4670_v49 = vadd.f32 %v1949_v54, %v4643_v27  ;;  %v1952_v7 = vadd.f32 %v3411_v4, %v3365_v23 }
 0x15a   : > { %v3366_v26 = vpop.f32.mrb[48].mxu0 }
 0x15b   : > { %v4673_v40 = vadd.f32 %v1952_v7, %v4646_v44  ;;  %v3412_v31 = vpop.f32.mrb[48].mxu1  ;;  %v3367_v55 = vpop.f32.mrb[49].mxu0  ;;  %v4693_v7 = vld [vmem:[%s4767_s2] ss:$0 sm:$0xff] }
 0x15c   : > { %v3368_v11 = vadd.f32 %v3367_v55, %v3366_v26  ;;  %v3413_v24 = vpop.f32.mrb[49].mxu1  ;;  %v3369_v37 = vpop.f32.mrb[50].mxu0 }
 0x15d   : > { %v3414_v59 = vadd.f32 %v3413_v24, %v3412_v31  ;;  %v3415_v61 = vpop.f32.mrb[50].mxu1  ;;  %v3370_v35 = vpop.f32.mrb[51].mxu0 }
 0x15e   : > { %v3371_v6 = vadd.f32 %v3370_v35, %v3369_v37  ;;  %v3416_v12 = vpop.f32.mrb[51].mxu1  ;;  %v2499_v31 = vpop.permute.xlu0 %2498 }
 0x15f   : > { %v1957_v8 = vadd.f32 %v3414_v59, %v3368_v11  ;;  %v3417_v18 = vadd.f32 %v3416_v12, %v3415_v61  ;;  %v2504_v11 = vpop.permute.xlu1 %2503 }
 0x161   : > { %v4676_v27 = vadd.f32 %v1957_v8, %v4649_v60  ;;  %v1960_v43 = vadd.f32 %v3417_v18, %v3371_v6 }
 0x162   : > { %v3372_v1 = vpop.f32.mrb[52].mxu0 }
 0x163   : > { %v4679_v44 = vadd.f32 %v1960_v43, %v4652_v20  ;;  %v3418_v29 = vpop.f32.mrb[52].mxu1  ;;  %v3373_v57 = vpop.f32.mrb[53].mxu0 }
 0x164   : > { %v3374_v10 = vadd.f32 %v3373_v57, %v3372_v1  ;;  %v3419_v30 = vpop.f32.mrb[53].mxu1  ;;  %v3375_v42 = vpop.f32.mrb[54].mxu0 }
 0x165   : > { %v3420_v22 = vadd.f32 %v3419_v30, %v3418_v29  ;;  %v3421_v46 = vpop.f32.mrb[54].mxu1  ;;  %v3376_v14 = vpop.f32.mrb[55].mxu0 }
 0x166   : > { %v3377_v2 = vadd.f32 %v3376_v14, %v3375_v42  ;;  %v3422_v15 = vpop.f32.mrb[55].mxu1 }
 0x167   : > { %v1965_v51 = vadd.f32 %v3420_v22, %v3374_v10  ;;  %v3423_v52 = vadd.f32 %v3422_v15, %v3421_v46 }
 0x169   : > { %v4682_v60 = vadd.f32 %v1965_v51, %v4655_v17  ;;  %v1968_v28 = vadd.f32 %v3423_v52, %v3377_v2  ;;  %v2509_v51 = vpop.permute.xlu1 %2508 }
 0x16a   : > { %v3378_v34 = vpop.f32.mrb[56].mxu0 }
 0x16b   : > { %v4685_v20 = vadd.f32 %v1968_v28, %v4658_v3  ;;  %v3424_v56 = vpop.f32.mrb[56].mxu1  ;;  %v3379_v62 = vpop.f32.mrb[57].mxu0 }
 0x16c   : > { %v3380_v38 = vadd.f32 %v3379_v62, %v3378_v34  ;;  %v3425_v45 = vpop.f32.mrb[57].mxu1  ;;  %v3381_v21 = vpop.f32.mrb[58].mxu0 }
 0x16d   : > { %v3426_v9 = vadd.f32 %v3425_v45, %v3424_v56  ;;  %v3427_v63 = vpop.f32.mrb[58].mxu1  ;;  %v3382_v53 = vpop.f32.mrb[59].mxu0 }
 0x16e   : > { %v3428_v58 = vpop.f32.mrb[59].mxu1 }
 0x16f   : > { %v1973_v48 = vadd.f32 %v3426_v9, %v3380_v38 }
 0x171   : > { %v4688_v19 = vadd.f32 %v1973_v48, %v4661_v41 }
 0x172   : > { %v3446_v17 = vpop.f32.mrb[60].mxu0 }
 0x173   : > { %v3492_v5 = vpop.f32.mrb[60].mxu1  ;;  %v3447_v16 = vpop.f32.mrb[61].mxu0 }
 0x174   : > { %v3448_v50 = vadd.f32 %v3447_v16, %v3446_v17  ;;  %v3493_v3 = vpop.f32.mrb[61].mxu1  ;;  %v3449_v25 = vpop.f32.mrb[62].mxu0 }
 0x175   : > { %v3494_v0 = vadd.f32 %v3493_v3, %v3492_v5  ;;  %v3495_v33 = vpop.f32.mrb[62].mxu1  ;;  %v3450_v47 = vpop.f32.mrb[63].mxu0 }
 0x176   : > { %v3451_v23 = vadd.f32 %v3450_v47, %v3449_v25  ;;  %v3496_v39 = vpop.f32.mrb[63].mxu1  ;;  %v2514_v47 = vpop.permute.xlu0 %2513 }
 0x177   : > { %v2420_v54 = vadd.f32 %v3494_v0, %v3448_v50  ;;  %v3497_v4 = vadd.f32 %v3496_v39, %v3495_v33 }
 0x179   : > { %v2423_v41 = vadd.f32 %v3497_v4, %v3451_v23  ;;  %v2457_v26 = vadd.f32 %v2420_v54, %v4664_v36 }
 0x17a   : > { %v3452_v55 = vpop.f32.mrb[64].mxu0 }
 0x17b   : > { %v2482_v24 = vadd.f32 %v4693_v7, %v2457_v26  ;;  %v3498_v37 = vpop.f32.mrb[64].mxu1  ;;  %v3453_v59 = vpop.f32.mrb[65].mxu0  ;;  %v2458_v61 = vadd.f32 %v2423_v41, %v4667_v13 }
 0x17c   : > { %v3454_v35 = vadd.f32 %v3453_v59, %v3452_v55  ;;  %v3499_v6 = vpop.f32.mrb[65].mxu1  ;;  %v3455_v12 = vpop.f32.mrb[66].mxu0 }
 0x17d   : > { %v4698_v8 = vmul.f32 %v2494_v32, %v2482_v24  ;;  %v3500_v18 = vadd.f32 %v3499_v6, %v3498_v37  ;;  %v3501_v43 = vpop.f32.mrb[66].mxu1  ;;  %v2483_v1 = vadd.f32 %v4693_v7, %v2458_v61  ;;  %v3456_v29 = vpop.f32.mrb[67].mxu0 }
 0x17e   : > { %v3457_v36 = vadd.f32 %v3456_v29, %v3455_v12  ;;  %v3502_v57 = vpop.f32.mrb[67].mxu1 }
 0x17f   : > { %v2428_v10 = vadd.f32 %v3500_v18, %v3454_v35  ;;  %v4701_v30 = vmul.f32 %v2499_v31, %v2483_v1  ;;  %v3503_v42 = vadd.f32 %v3502_v57, %v3501_v43  ;;  %v2559_v22 = vmul.f32 %v4698_v8, %v4698_v8  ;;  %v2519_v18 = vpop.permute.xlu1 %2518 }
 0x181   : > { %v2545_v13 = vadd.f32 %v4701_v30, %v4698_v8  ;;  %v2560_v46 = vmul.f32 %v4701_v30, %v4701_v30  ;;  %v2431_v14 = vadd.f32 %v3503_v42, %v3457_v36  ;;  %v2459_v2 = vadd.f32 %v2428_v10, %v4670_v49 }
 0x182   : > { %v3458_v15 = vpop.f32.mrb[68].mxu0 }
 0x183   : > { %v2568_v52 = vadd.f32 %v2560_v46, %v2559_v22  ;;  %v2484_v28 = vadd.f32 %v4693_v7, %v2459_v2  ;;  %v3504_v34 = vpop.f32.mrb[68].mxu1  ;;  %v3459_v56 = vpop.f32.mrb[69].mxu0  ;;  %v2460_v62 = vadd.f32 %v2431_v14, %v4673_v40 }
 0x184   : > { %v3460_v38 = vadd.f32 %v3459_v56, %v3458_v15  ;;  %v3505_v45 = vpop.f32.mrb[69].mxu1  ;;  %v3461_v21 = vpop.f32.mrb[70].mxu0 }
 0x185   : > { %v4712_v9 = vmul.f32 %v2504_v11, %v2484_v28  ;;  %v3506_v63 = vadd.f32 %v3505_v45, %v3504_v34  ;;  %v3507_v53 = vpop.f32.mrb[70].mxu1  ;;  %v2485_v58 = vadd.f32 %v4693_v7, %v2460_v62  ;;  %v3462_v48 = vpop.f32.mrb[71].mxu0 }
 0x186   : > { %v3463_v49 = vadd.f32 %v3462_v48, %v3461_v21  ;;  %v3508_v17 = vpop.f32.mrb[71].mxu1  ;;  %v2524_v22 = vpop.permute.xlu0 %2523 }
 0x187   : > { %v2546_v32 = vadd.f32 %v2545_v13, %v4712_v9  ;;  %v2561_v5 = vmul.f32 %v4712_v9, %v4712_v9  ;;  %v2436_v16 = vadd.f32 %v3506_v63, %v3460_v38  ;;  %v4718_v50 = vmul.f32 %v2509_v51, %v2485_v58 }
 0x188   : > { %v3509_v40 = vadd.f32 %v3508_v17, %v3507_v53  ;;  %v2529_v53 = vpop.permute.xlu1 %2528 }
 0x189   : > { %v2569_v3 = vadd.f32 %v2568_v52, %v2561_v5  ;;  %v2461_v25 = vadd.f32 %v2436_v16, %v4676_v27  ;;  %v2547_v0 = vadd.f32 %v2546_v32, %v4718_v50  ;;  %v2562_v33 = vmul.f32 %v4718_v50, %v4718_v50 }
 0x18a   : > { %v2439_v23 = vadd.f32 %v3509_v40, %v3463_v49  ;;  %v3464_v39 = vpop.f32.mrb[72].mxu0 }
 0x18b   : > { %v2486_v54 = vadd.f32 %v4693_v7, %v2461_v25  ;;  %v2570_v4 = vadd.f32 %v2569_v3, %v2562_v33  ;;  %v3510_v41 = vpop.f32.mrb[72].mxu1  ;;  %v3465_v26 = vpop.f32.mrb[73].mxu0 }
 0x18c   : > { %v2462_v31 = vadd.f32 %v2439_v23, %v4679_v44  ;;  %v3466_v55 = vadd.f32 %v3465_v26, %v3464_v39  ;;  %v3511_v11 = vpop.f32.mrb[73].mxu1  ;;  %v3467_v24 = vpop.f32.mrb[74].mxu0 }
 0x18d   : > { %v4726_v37 = vmul.f32 %v2514_v47, %v2486_v54  ;;  %v3512_v27 = vadd.f32 %v3511_v11, %v3510_v41  ;;  %v3513_v59 = vpop.f32.mrb[74].mxu1  ;;  %v3468_v61 = vpop.f32.mrb[75].mxu0 }
 0x18e   : > { %v2487_v35 = vadd.f32 %v4693_v7, %v2462_v31  ;;  %v3469_v6 = vadd.f32 %v3468_v61, %v3467_v24  ;;  %v3514_v12 = vpop.f32.mrb[75].mxu1 }
 0x18f   : > { %v2548_v43 = vadd.f32 %v2547_v0, %v4726_v37  ;;  %v2563_v1 = vmul.f32 %v4726_v37, %v4726_v37  ;;  %v2444_v29 = vadd.f32 %v3512_v27, %v3466_v55  ;;  %v3515_v44 = vadd.f32 %v3514_v12, %v3513_v59  ;;  %v2534_v0 = vpop.permute.xlu0 %2533 }
 0x190   : > { %v4732_v36 = vmul.f32 %v2519_v18, %v2487_v35 }
 0x191   : > { %v2571_v57 = vadd.f32 %v2570_v4, %v2563_v1  ;;  %v2463_v10 = vadd.f32 %v2444_v29, %v4682_v60  ;;  %v2447_v42 = vadd.f32 %v3515_v44, %v3469_v6 }
 0x192   : > { %v2549_v13 = vadd.f32 %v2548_v43, %v4732_v36  ;;  %v2564_v46 = vmul.f32 %v4732_v36, %v4732_v36  ;;  %v3470_v14 = vpop.f32.mrb[76].mxu0 }
 0x193   : > { %v2488_v2 = vadd.f32 %v4693_v7, %v2463_v10  ;;  %v2464_v15 = vadd.f32 %v2447_v42, %v4685_v20  ;;  %v3516_v51 = vpop.f32.mrb[76].mxu1  ;;  %v3471_v52 = vpop.f32.mrb[77].mxu0 }
 0x194   : > { %v2572_v28 = vadd.f32 %v2571_v57, %v2564_v46  ;;  %v3472_v34 = vadd.f32 %v3471_v52, %v3470_v14  ;;  %v3517_v56 = vpop.f32.mrb[77].mxu1  ;;  %v3473_v62 = vpop.f32.mrb[78].mxu0 }
 0x195   : > { %v2542_v38 = vmul.f32 %v2524_v22, %v2488_v2  ;;  %v2489_v60 = vadd.f32 %v4693_v7, %v2464_v15  ;;  %v3518_v45 = vadd.f32 %v3517_v56, %v3516_v51  ;;  %v3519_v21 = vpop.f32.mrb[78].mxu1  ;;  %v3474_v63 = vpop.f32.mrb[79].mxu0 }
 0x196   : > { %v3520_v58 = vpop.f32.mrb[79].mxu1 }
 0x197   : > { %v2543_v48 = vmul.f32 %v2529_v53, %v2489_v60  ;;  %v2550_v49 = vadd.f32 %v2549_v13, %v2542_v38  ;;  %v2565_v17 = vmul.f32 %v2542_v38, %v2542_v38  ;;  %v2452_v32 = vadd.f32 %v3518_v45, %v3472_v34 }
 0x199   : > { %v2551_v5 = vadd.f32 %v2550_v49, %v2543_v48  ;;  %v2566_v20 = vmul.f32 %v2543_v48, %v2543_v48  ;;  %v2573_v16 = vadd.f32 %v2572_v28, %v2565_v17  ;;  %v2465_v40 = vadd.f32 %v2452_v32, %v4688_v19 }
 0x19b   : > { %v2574_v3 = vadd.f32 %v2573_v16, %v2566_v20  ;;  %v2490_v25 = vadd.f32 %v4693_v7, %v2465_v40 }
 0x19d   : > { %v2544_v33 = vmul.f32 %v2534_v0, %v2490_v25 }
 0x19f   : > { %v2552_v47 = vadd.f32 %v2551_v5, %v2544_v33  ;;  %v2567_v23 = vmul.f32 %v2544_v33, %v2544_v33 }
 0x1a1   : > { %v2553_v39 = vrot.slane %v2552_v47, 4  ;;  %v2575_v54 = vadd.f32 %v2574_v3, %v2567_v23 }
 0x1a3   : > { %v2554_v4 = vadd.f32 %v2553_v39, %v2552_v47  ;;  %v2576_v41 = vrot.slane %v2575_v54, 4 }
 0x1a5   : > { %v2555_v26 = vrot.slane %v2554_v4, 2  ;;  %v2577_v31 = vadd.f32 %v2576_v41, %v2575_v54 }
 0x1a7   : > { %v2556_v55 = vadd.f32 %v2555_v26, %v2554_v4  ;;  %v2578_v11 = vrot.slane %v2577_v31, 2 }
 0x1a9   : > { %v2557_v24 = vrot.slane %v2556_v55, 1  ;;  %v2579_v27 = vadd.f32 %v2578_v11, %v2577_v31 }
 0x1ab   : > { %v2558_v59 = vadd.f32 %v2557_v24, %v2556_v55  ;;  %v2580_v61 = vrot.slane %v2579_v27, 1 }
 0x1ad   : > { %v2581_v19 = vadd.f32 %v2580_v61, %v2579_v27  ;;  %v2582_v35 = vmul.f32 0.015625, %v2558_v59 }
 0x1af   : > { %v2583_v6 = vmul.f32 0.015625, %v2581_v19  ;;  %v2584_v7 = vmul.f32 %v2582_v35, %v2582_v35  ;;  %v2587_v12 = vsub.f32 %v4698_v8, %v2582_v35  ;;  %v2588_v18 = vsub.f32 %v4701_v30, %v2582_v35 }
 0x1b0   : > { %v2589_v43 = vsub.f32 %v4712_v9, %v2582_v35  ;;  %v2590_v1 = vsub.f32 %v4718_v50, %v2582_v35  ;;  %v2591_v29 = vsub.f32 %v4726_v37, %v2582_v35  ;;  %v2592_v44 = vsub.f32 %v4732_v36, %v2582_v35 }
 0x1b1   : > { %v2585_v57 = vsub.f32 %v2583_v6, %v2584_v7  ;;  %v2593_v10 = vsub.f32 %v2542_v38, %v2582_v35  ;;  %v2594_v42 = vsub.f32 %v2543_v48, %v2582_v35  ;;  %v2595_v22 = vsub.f32 %v2544_v33, %v2582_v35 }
 0x1b3   : > { %v2586_v13 = vmax.f32 %v2585_v57, 0.0 }
 0x1b5   : > { %v2596_v46 = vadd.f32 1e-05, %v2586_v13 }
 0x1b7   : > { %3713 = vrsqrt.f32 %v2596_v46 }
 0x1c1   : > { %v3714_v14 = vpop.eup %3713 }
 0x1c2   : > { %v2598_v8 = vmul.f32 %v3714_v14, %v2587_v12  ;;  %v2599_v2 = vmul.f32 %v3714_v14, %v2588_v18  ;;  %v2600_v30 = vmul.f32 %v3714_v14, %v2589_v43  ;;  %v2601_v15 = vmul.f32 %v3714_v14, %v2590_v1 }
 0x1c3   : > { %v2602_v9 = vmul.f32 %v3714_v14, %v2591_v29  ;;  %v2603_v51 = vmul.f32 %v3714_v14, %v2592_v44  ;;  %v2604_v50 = vmul.f32 %v3714_v14, %v2593_v10  ;;  %v2605_v52 = vmul.f32 %v3714_v14, %v2594_v42 }
 0x1c4   : > { %v2606_v37 = vmul.f32 %v3714_v14, %v2595_v22  ;;  %vm2607_vm2 = vcmp.gt.f32.partialorder %v2598_v8, 0.0  ;;  %vm2608_vm3 = vcmp.gt.f32.partialorder %v2599_v2, 0.0  ;;  %vm2609_vm4 = vcmp.gt.f32.partialorder %v2600_v30, 0.0 }
 0x1c5   : > { %vm2610_vm5 = vcmp.gt.f32.partialorder %v2601_v15, 0.0  ;;  %vm2611_vm6 = vcmp.gt.f32.partialorder %v2602_v9, 0.0  ;;  %vm2612_vm7 = vcmp.gt.f32.partialorder %v2603_v51, 0.0  ;;  %vm2613_vm8 = vcmp.gt.f32.partialorder %v2604_v50, 0.0 }
 0x1c6   : > { %vm2614_vm9 = vcmp.gt.f32.partialorder %v2605_v52, 0.0  ;;  %vm2615_vm10 = vcmp.gt.f32.partialorder %v2606_v37, 0.0  ;;  %v2616_v36 = vmul.f32 0.2, %v2598_v8  ;;  %v2617_v28 = vmul.f32 0.2, %v2599_v2 }
 0x1c7   : > { %v2618_v34 = vmul.f32 0.2, %v2600_v30  ;;  %v2619_v56 = vmul.f32 0.2, %v2601_v15  ;;  %v2620_v62 = vmul.f32 0.2, %v2602_v9 }
 0x1c8   : > { %v2621_v38 = vmul.f32 0.2, %v2603_v51  ;;  %v2622_v60 = vmul.f32 0.2, %v2604_v50  ;;  %v2623_v45 = vmul.f32 0.2, %v2605_v52  ;;  %v2625_v21 = vsel %vm2607_vm2, %v2598_v8, %v2616_v36 }
 0x1c9   : > { %v2624_v63 = vmul.f32 0.2, %v2606_v37  ;;  %v2626_v53 = vsel %vm2608_vm3, %v2599_v2, %v2617_v28  ;;  %v2627_v58 = vsel %vm2609_vm4, %v2600_v30, %v2618_v34  ;;  %v2628_v48 = vsel %vm2610_vm5, %v2601_v15, %v2619_v56 }
 0x1ca   : > { %v2629_v49 = vsel %vm2611_vm6, %v2602_v9, %v2620_v62  ;;  %v2630_v17 = vsel %vm2612_vm7, %v2603_v51, %v2621_v38  ;;  %v2631_v32 = vsel %vm2613_vm8, %v2604_v50, %v2622_v60  ;;  %v2632_v5 = vsel %vm2614_vm9, %v2605_v52, %v2623_v45 }
 0x1cb   : > { %v2633_v20 = vsel %vm2615_vm10, %v2606_v37, %v2624_v63  ;;  %v3134_v16 = vpack.c.bf16 %v2626_v53, %v2625_v21  ;;  %v3139_v40 = vpack.c.bf16 %v2628_v48, %v2627_v58  ;;  %v3144_v3 = vpack.c.bf16 %v2630_v17, %v2629_v49 }
 0x1cc   : > { %v3130_v25 = vpack.c.bf16 %v2633_v20, %v2633_v20  ;;  %v3149_v0 = vpack.c.bf16 %v2632_v5, %v2631_v32 }
 0x1cd   : > { %3135 = vst [vmem:[%s197_s19] sm:$0xff] %v3134_v16   ;;  %3151 = vst [vmem:[%s197_s19 + $0x8] sm:$0xff] %v3139_v40  }
 0x1ce   : > { %3152 = vst [vmem:[%s197_s19 + $0x10] sm:$0xff] %v3144_v3   ;;  %3153 = vst [vmem:[%s197_s19 + $0x18] sm:$0xff] %v3149_v0  }
 0x1cf   : > { %2679 = vst [vmem:[%s197_s19 + $0x20] sm:$0xf] %v3130_v25 }
 0x1d0 PF: > { %s14_s15 = sadd.s32 1, %s3723_s15  }
 0x1d1   : > { %p11_p4 = scmp.ge.s32.totalorder %s14_s15, 4  }
 0x1d3   :  { %13 = sbr.rel (!%p11_p4) target bundleno = 1 (0x1), region = 69 }

// kernel: discriminator_forward.7
= control target key start
LH: loop header
LB: loop body
LE: loop exit
PB: predicated region body
PF: predicated region fallthrough
CT: control target
= control target key end

     0   :  { %s2828_s15 = smov 0   ;;  %s3341_s0 = inlined_call_operand.vmem [shape: bf16[2,32,512], index: 0, kind: input, shape index: {}]   ;;  %s3342_s1 = inlined_call_operand.vmem [shape: bf16[4,512,128], index: 1, kind: input, shape index: {}]   ;;  %s3343_s2 = inlined_call_operand.vmem [shape: f32[1,128], index: 2, kind: input, shape index: {}]   ;;  %s3344_s3 = inlined_call_operand.vmem [shape: f32[20,1], index: 3, kind: input, shape index: {}]   ;;  %s3345_s4 = inlined_call_operand.vmem [shape: bf16[2,20,128], index: 4, kind: output, shape index: {}]  }
   0x1 LB: > { %s2033_s16 = sadd.s32 4294967295, %s2800_s15   ;;  %p2037_p0 = scmp.ge.s32.totalorder %s2800_s15, 1  ;;  %s2800_s15 = sphi %s2828_s15, %s14_s15  }
   0x2   : > { %p162_p1 = scmp.lt.s32.totalorder %s2800_s15, 3 }
   0x4   : > { %p163_p2 = pnand %p2037_p0, %p162_p1 }
   0x5   : > { %v2636_v0 = vld [vmem:[%s3342_s1 + $0x140] sm:$0xff] (!%p163_p2)   ;;  %v2640_v4 = vld [vmem:[%s3342_s1 + $0x148] sm:$0xff] (!%p163_p2)   ;;  %v2644_v8 = vld [vmem:[%s3342_s1 + $0x150] sm:$0xff] (!%p163_p2)   ;;  %p188_p3 = scmp.lt.s32.totalorder (!%p163_p2), %s2033_s16, 1  ;;  %vm362_vm0 = vsmask.f32 (!%p163_p2), 7424 }
   0x6   : > { %166 = sbr.rel (%p163_p2) target bundleno = 413 (0x19d), region = 36  ;;  %v2637_v1 = vld [vmem:[%s3342_s1 + $0x1c0] sm:$0xff] (!%p163_p2)   ;;  %2400 = vmatprep.subr.bf16.mxu0 (!%p163_p2), %v2636_v0  ;;  %v2641_v5 = vld [vmem:[%s3342_s1 + $0x1c8] sm:$0xff] (!%p163_p2)   ;;  %v2645_v9 = vld [vmem:[%s3342_s1 + $0x1d0] sm:$0xff] (!%p163_p2)   ;;  %vm1130_vm1 = vsmask.f32 (!%p163_p2), 5376 }
   0x7   : > { %v2638_v2 = vld [vmem:[%s3342_s1 + $0x100] sm:$0xff] (!%p163_p2)   ;;  %2428 = vmatprep.subr.bf16.mxu1 (!%p163_p2), %v2637_v1  ;;  %v2642_v6 = vld [vmem:[%s3342_s1 + $0x108] sm:$0xff] (!%p163_p2)   ;;  %v2646_v10 = vld [vmem:[%s3342_s1 + $0x110] sm:$0xff] (!%p163_p2)   ;;  %vm1575_vm2 = vcmask (!%p163_p2), 1044480   ;;  %vm1919_vm3 = vcmask (!%p163_p2), 1043456  }
   0x8   : > { %v2639_v3 = vld [vmem:[%s3342_s1 + $0x180] sm:$0xff] (!%p163_p2)   ;;  %2401 = vmatpush3.bf16.msra.mxu0 (!%p163_p2), %v2638_v2  ;;  %v2643_v7 = vld [vmem:[%s3342_s1 + $0x188] sm:$0xff] (!%p163_p2)   ;;  %v2647_v11 = vld [vmem:[%s3342_s1 + $0x190] sm:$0xff] (!%p163_p2)  }
   0x9   : > { %2429 = vmatpush3.bf16.msra.mxu1 (!%p163_p2), %v2639_v3  ;;  %2402 = vmatprep.subr.bf16.mxu0 (!%p163_p2), %v2640_v4  ;;  %v2648_v12 = vld [vmem:[%s3342_s1 + $0x158] sm:$0xff] (!%p163_p2)   ;;  %v2652_v16 = vld [vmem:[%s3342_s1 + $0x160] sm:$0xff] (!%p163_p2)   ;;  %v2656_v20 = vld [vmem:[%s3342_s1 + $0x168] sm:$0xff] (!%p163_p2)  }
   0xa   : > { %2430 = vmatprep.subr.bf16.mxu1 (!%p163_p2), %v2641_v5  ;;  %v2649_v13 = vld [vmem:[%s3342_s1 + $0x1d8] sm:$0xff] (!%p163_p2)   ;;  %v2653_v17 = vld [vmem:[%s3342_s1 + $0x1e0] sm:$0xff] (!%p163_p2)   ;;  %v2657_v21 = vld [vmem:[%s3342_s1 + $0x1e8] sm:$0xff] (!%p163_p2)  }
   0xb   : > { %v2650_v14 = vld [vmem:[%s3342_s1 + $0x118] sm:$0xff] (!%p163_p2)   ;;  %v2654_v18 = vld [vmem:[%s3342_s1 + $0x120] sm:$0xff] (!%p163_p2)   ;;  %v2658_v22 = vld [vmem:[%s3342_s1 + $0x128] sm:$0xff] (!%p163_p2)  }
   0xc   : > { %2403 = vmatpush3.bf16.msra.mxu0 (!%p163_p2), %v2642_v6  ;;  %v2651_v15 = vld [vmem:[%s3342_s1 + $0x198] sm:$0xff] (!%p163_p2)   ;;  %v2655_v19 = vld [vmem:[%s3342_s1 + $0x1a0] sm:$0xff] (!%p163_p2)   ;;  %v2659_v23 = vld [vmem:[%s3342_s1 + $0x1a8] sm:$0xff] (!%p163_p2)  }
   0xd   : > { %2431 = vmatpush3.bf16.msra.mxu1 %v2643_v7  ;;  %2404 = vmatprep.subr.bf16.mxu0 %v2644_v8  ;;  %s3347_s16 = smov (!%p188_p3, %s2033_s16), 1  ;;  %v2660_v24 = vld [vmem:[%s3342_s1 + $0x170] sm:$0xff]   ;;  %v2664_v28 = vld [vmem:[%s3342_s1 + $0x178] sm:$0xff]   ;;  %v2676_v46 = vld [vmem:[%s3342_s1 + $0x40] sm:$0xff]  }
   0xe   : > { %2432 = vmatprep.subr.bf16.mxu1 %v2645_v9  ;;  %v2661_v25 = vld [vmem:[%s3342_s1 + $0x1f0] sm:$0xff]   ;;  %s2391_s23 = sshll.u32 %s3347_s16, 6  ;;  %v2665_v29 = vld [vmem:[%s3342_s1 + $0x1f8] sm:$0xff]   ;;  %v2677_v59 = vld [vmem:[%s3342_s1 + $0xc0] sm:$0xff]   ;;  %s2624_s28 = smul.u32 12, %s3347_s16 }
   0xf   : > { %v2662_v26 = vld [vmem:[%s3342_s1 + $0x130] sm:$0xff]   ;;  %s2936_s6 = scalar_lea.vmem %s3341_s0, %s2391_s23  ;;  %v2666_v30 = vld [vmem:[%s3342_s1 + $0x138] sm:$0xff]   ;;  %v2678_v0 = vld [vmem:[%s3342_s1] sm:$0xff]  }
  0x10   : > { %2405 = vmatpush3.bf16.msra.mxu0 %v2646_v10  ;;  %v2663_v27 = vld [vmem:[%s3342_s1 + $0x1b0] sm:$0xff]   ;;  %v2667_v31 = vld [vmem:[%s3342_s1 + $0x1b8] sm:$0xff]   ;;  %v199_v32 = vld [vmem:[%s2936_s6] sm:$0xff]  ;;  %s197_s5 = scalar_lea.vmem %s3345_s4, %s2624_s28 }
  0x11   : > { %2433 = vmatpush3.bf16.msra.mxu1 %v2647_v11  ;;  %2406 = vmatprep.subr.bf16.mxu0 %v2648_v12  ;;  %v2946_v33 = vld [vmem:[%s2936_s6 + $0x10] sm:$0xff]  ;;  %v269_v34 = vld [vmem:[%s2936_s6 + $0x20] sm:$0x77]  ;;  %v200_v37 = vld [vmem:[%s2936_s6 + $0x8] sm:$0xff] }
  0x12   : > { %2434 = vmatprep.subr.bf16.mxu1 %v2649_v13  ;;  %v2950_v35 = vcombine.high %v199_v32, %v2946_v33  ;;  %v2110_v36 = vcombine.high %v269_v34, %v269_v34  ;;  %v2954_v38 = vld [vmem:[%s2936_s6 + $0x18] sm:$0xff]  ;;  %v270_v39 = vld [vmem:[%s2936_s6 + $0x28] sm:$0x77]  ;;  %v2958_v40 = vcombine.low %v199_v32, %v2946_v33  ;;  %v2960_v41 = vcombine.low %v269_v34, %v269_v34  ;;  %v2679_v7 = vld [vmem:[%s3342_s1 + $0x80] sm:$0xff]  }
  0x13   : > { %v2963_v42 = vcombine.high %v200_v37, %v2954_v38  ;;  %v2112_v43 = vcombine.high %v270_v39, %v270_v39  ;;  %v2966_v44 = vcombine.low %v200_v37, %v2954_v38  ;;  %v2968_v45 = vcombine.low %v270_v39, %v270_v39  ;;  %v2680_v10 = vld [vmem:[%s3342_s1 + $0x48] sm:$0xff]   ;;  %v2689_v32 = vld [vmem:[%s3342_s1 + $0xd8] sm:$0xff]   ;;  %v2692_v37 = vld [vmem:[%s3342_s1 + $0x60] sm:$0xff]  }
  0x14   : > { %2407 = vmatpush3.bf16.msra.mxu0 %v2650_v14  ;;  %v376_v47 = vshrl.u32 %v2950_v35, 16  ;;  %v378_v48 = vshll.u32 %v2950_v35, 16  ;;  %v383_v49 = vshll.u32 %v2110_v36, 16  ;;  %v364_v50 = vshrl.u32 %v2958_v40, 16  ;;  %v2681_v14 = vld [vmem:[%s3342_s1 + $0xc8] sm:$0xff]   ;;  %v2690_v34 = vld [vmem:[%s3342_s1 + $0x18] sm:$0xff]  }
  0x15   : > { %2435 = vmatpush3.bf16.msra.mxu1 %v2651_v15  ;;  %2408 = vmatprep.subr.bf16.mxu0 %v2652_v16  ;;  %v400_v51 = vshrl.u32 %v2963_v42, 16  ;;  %v402_v52 = vshll.u32 %v2963_v42, 16  ;;  %v407_v53 = vshll.u32 %v2112_v43, 16  ;;  %v366_v54 = vshll.u32 %v2958_v40, 16  ;;  %v2682_v16 = vld [vmem:[%s3342_s1 + $0x8] sm:$0xff]   ;;  %v2693_v39 = vld [vmem:[%s3342_s1 + $0xe0] sm:$0xff]  }
  0x16   : > { %2436 = vmatprep.subr.bf16.mxu1 %v2653_v17  ;;  %v380_v55 = vrot.slane %v378_v48, 1  ;;  %v385_v56 = vrot.slane %v383_v49, 1  ;;  %v371_v57 = vshll.u32 %v2960_v41, 16  ;;  %v388_v58 = vshrl.u32 %v2966_v44, 16  ;;  %v2701_v48 = vld [vmem:[%s3342_s1 + $0xf0] sm:$0xff]  }
  0x17   : > { %v404_v60 = vrot.slane %v402_v52, 1  ;;  %v409_v61 = vrot.slane %v407_v53, 1  ;;  %v368_v62 = vrot.slane %v366_v54, 1  ;;  %v390_v63 = vshll.u32 %v2966_v44, 16  ;;  %v2702_v49 = vld [vmem:[%s3342_s1 + $0x30] sm:$0xff]   ;;  %v2705_v52 = vld [vmem:[%s3342_s1 + $0xf8] sm:$0xff]  }
  0x18   : > { %2409 = vmatpush3.bf16.msra.mxu0 %v2654_v18  ;;  %v381_v1 = vor.u32 %v380_v55, %v376_v47  ;;  %v373_v2 = vrot.slane %v371_v57, 1  ;;  %v395_v3 = vshll.u32 %v2968_v45, 16  ;;  %v414_v15 = vshrl.u32 %v2110_v36, 16  ;;  %v2691_v36 = vld [vmem:[%s3342_s1 + $0x98] sm:$0xff]   ;;  %v2700_v47 = vld [vmem:[%s3342_s1 + $0x70] sm:$0xff]   ;;  %v2708_v55 = vld [vmem:[%s3342_s1 + $0x240] sm:$0xff]  }
  0x19   : > { %2437 = vmatpush3.bf16.msra.mxu1 %v2655_v19  ;;  %2410 = vmatprep.subr.bf16.mxu0 %v2656_v20  ;;  %v405_v4 = vor.u32 %v404_v60, %v400_v51  ;;  %v369_v5 = vor.u32 %v368_v62, %v364_v50  ;;  %v392_v6 = vrot.slane %v390_v63, 1  ;;  %v420_v17 = vshrl.u32 %v2112_v43, 16  ;;  %v2683_v19 = vld [vmem:[%s3342_s1 + $0x88] sm:$0xff]   ;;  %v2703_v50 = vld [vmem:[%s3342_s1 + $0xb0] sm:$0xff]   ;;  %v2704_v51 = vld [vmem:[%s3342_s1 + $0x78] sm:$0xff]  }
  0x1a   : > { %2438 = vmatprep.subr.bf16.mxu1 %v2657_v21  ;;  %v386_v8 = vsel %vm362_vm0, %v381_v1, %v385_v56  ;;  %v397_v9 = vrot.slane %v395_v3, 1  ;;  %v416_v20 = vor.u32 %v414_v15, %v385_v56  ;;  %v411_v21 = vshrl.u32 %v2960_v41, 16  ;;  %v2694_v41 = vld [vmem:[%s3342_s1 + $0x20] sm:$0xff]   ;;  %v2696_v43 = vld [vmem:[%s3342_s1 + $0x68] sm:$0xff]   ;;  %v2706_v53 = vld [vmem:[%s3342_s1 + $0x38] sm:$0xff]  }
  0x1b   : > { %655 = vmatprep.mubr.bf16.mxu0 %v386_v8  ;;  %v410_v11 = vsel %vm362_vm0, %v405_v4, %v409_v61  ;;  %v374_v12 = vsel %vm362_vm0, %v369_v5, %v373_v2  ;;  %v393_v13 = vor.u32 %v392_v6, %v388_v58  ;;  %v2707_v54 = vld [vmem:[%s3342_s1 + $0xb8] sm:$0xff]   ;;  %v2709_v56 = vld [vmem:[%s3342_s1 + $0x2c0] sm:$0xff]   ;;  %v2713_v60 = vld [vmem:[%s3342_s1 + $0x2c8] sm:$0xff]  }
  0x1c   : > { %2411 = vmatpush3.bf16.msra.mxu0 %v2658_v22  ;;  %703 = vmatprep.mubr.bf16.mxu1 %v410_v11  ;;  %v2684_v22 = vld [vmem:[%s3342_s1 + $0x50] sm:$0xff]   ;;  %v2710_v57 = vld [vmem:[%s3342_s1 + $0x200] sm:$0xff]   ;;  %v2715_v62 = vld [vmem:[%s3342_s1 + $0x288] sm:$0xff]  }
  0x1d   : > { %2439 = vmatpush3.bf16.msra.mxu1 %v2659_v23  ;;  %2412 = vmatprep.subr.bf16.mxu0 %v2660_v24  ;;  %v398_v18 = vsel %vm362_vm0, %v393_v13, %v397_v9  ;;  %v422_v23 = vor.u32 %v420_v17, %v409_v61  ;;  %v417_v24 = vshrl.u32 %v2968_v45, 16  ;;  %v2698_v45 = vld [vmem:[%s3342_s1 + $0x28] sm:$0xff]   ;;  %v2711_v58 = vld [vmem:[%s3342_s1 + $0x280] sm:$0xff]   ;;  %v2718_v1 = vld [vmem:[%s3342_s1 + $0x250] sm:$0xff]  }
  0x1e   : > { %2440 = vmatprep.subr.bf16.mxu1 %v2661_v25  ;;  %v2685_v25 = vld [vmem:[%s3342_s1 + $0xd0] sm:$0xff]   ;;  %v2714_v61 = vld [vmem:[%s3342_s1 + $0x208] sm:$0xff]   ;;  %v203_v63 = vld [vmem:[%s2936_s6 + $0x20] sm:$0x33] }
  0x1f   : > { %v204_v3 = vld [vmem:[%s2936_s6 + $0x28] sm:$0x33]  ;;  %v2722_v5 = vld [vmem:[%s3342_s1 + $0x290] sm:$0xff]   ;;  %v2725_v8 = vld [vmem:[%s3342_s1 + $0x2d8] sm:$0xff]  }
  0x20   : > { %2413 = vmatpush3.bf16.msra.mxu0 %v2662_v26  ;;  %v2686_v26 = vld [vmem:[%s3342_s1 + $0x10] sm:$0xff]   ;;  %v2148_v4 = vcombine.high %v204_v3, %v204_v3  ;;  %v2147_v6 = vcombine.low %v204_v3, %v204_v3  ;;  %v2728_v11 = vld [vmem:[%s3342_s1 + $0x260] sm:$0xff]   ;;  %v2732_v15 = vld [vmem:[%s3342_s1 + $0x268] sm:$0xff]  }
  0x21   : > { %2441 = vmatpush3.bf16.msra.mxu1 %v2663_v27  ;;  %2414 = vmatprep.subr.bf16.mxu0 %v2664_v28  ;;  %v413_v27 = vor.u32 %v411_v21, %v373_v2  ;;  %v2687_v28 = vld [vmem:[%s3342_s1 + $0x90] sm:$0xff]   ;;  %v2145_v2 = vcombine.low %v203_v63, %v203_v63  ;;  %v2730_v13 = vld [vmem:[%s3342_s1 + $0x220] sm:$0xff]   ;;  %v2734_v17 = vld [vmem:[%s3342_s1 + $0x228] sm:$0xff]  }
  0x22   : > { %2442 = vmatprep.subr.bf16.mxu1 %v2665_v29  ;;  %v2802_v29 = vmov 0   ;;  %v2738_v21 = vld [vmem:[%s3342_s1 + $0x230] sm:$0xff]  }
  0x23   : > { %2634 = vset.pattern.permute.xlu0 %v2802_v29  ;;  %2635 = vset.pattern.permute.xlu1 %v2802_v29 }
  0x24   : > { %2415 = vmatpush3.bf16.msra.mxu0 %v2666_v30  ;;  %v2688_v30 = vld [vmem:[%s3342_s1 + $0x58] sm:$0xff]  }
  0x25   : > { %2443 = vmatpush3.bf16.msra.mxu1 %v2667_v31  ;;  %2456 = vmatprep.subr.bf16.mxu0 %v2676_v46  ;;  %v419_v31 = vor.u32 %v417_v24, %v397_v9  ;;  %v2699_v46 = vld [vmem:[%s3342_s1 + $0xa8] sm:$0xff]   ;;  %v2726_v9 = vld [vmem:[%s3342_s1 + $0x218] sm:$0xff]  }
  0x26   : > { %2484 = vmatprep.subr.bf16.mxu1 %v2677_v59  ;;  %v2712_v59 = vld [vmem:[%s3342_s1 + $0x248] sm:$0xff]   ;;  %v2741_v24 = vld [vmem:[%s3342_s1 + $0x2f8] sm:$0xff]  }
  0x27   : > { %656 = vmatmul.mubr.bf16.vlgmr.msra.gmra.mrb[0].mxu0 %v374_v12  ;;  %v2729_v12 = vld [vmem:[%s3342_s1 + $0x2e0] sm:$0xff]  }
  0x28   : > { %2457 = vmatpush3.bf16.msra.mxu0 %v2678_v0  ;;  %704 = vmatmul.mubr.bf16.vlgmr.msra.gmra.mrb[0].mxu1 %v398_v18  ;;  %v2146_v0 = vcombine.high %v203_v63, %v203_v63  ;;  %v2735_v18 = vld [vmem:[%s3342_s1 + $0x2a8] sm:$0xff]  }
  0x29   : > { %2458 = vmatprep.subr.bf16.mxu0 %v2680_v10  ;;  %2485 = vmatpush3.bf16.msra.mxu1 %v2679_v7  ;;  %v2724_v7 = vld [vmem:[%s3342_s1 + $0x258] sm:$0xff]  }
  0x2a   : > { %663 = vmatprep.mubr.bf16.mxu0 %v416_v20  ;;  %2486 = vmatprep.subr.bf16.mxu1 %v2681_v14  ;;  %v2727_v10 = vld [vmem:[%s3342_s1 + $0x298] sm:$0xff]   ;;  %v2731_v14 = vld [vmem:[%s3342_s1 + $0x2a0] sm:$0xff]   ;;  %v2737_v20 = vld [vmem:[%s3342_s1 + $0x2f0] sm:$0xff]  }
  0x2b   : > { %711 = vmatprep.mubr.bf16.mxu1 %v422_v23  ;;  %v2740_v23 = vld [vmem:[%s3342_s1 + $0x278] sm:$0xff]  }
  0x2c   : > { %2459 = vmatpush3.bf16.msra.mxu0 %v2682_v16  ;;  %v2733_v16 = vld [vmem:[%s3342_s1 + $0x2e8] sm:$0xff]  }
  0x2d   : > { %2460 = vmatprep.subr.bf16.mxu0 %v2684_v22  ;;  %2487 = vmatpush3.bf16.msra.mxu1 %v2683_v19  ;;  %v2736_v19 = vld [vmem:[%s3342_s1 + $0x270] sm:$0xff]  }
  0x2e   : > { %2488 = vmatprep.subr.bf16.mxu1 %v2685_v25  ;;  %v2739_v22 = vld [vmem:[%s3342_s1 + $0x2b0] sm:$0xff]   ;;  %v2742_v25 = vld [vmem:[%s3342_s1 + $0x238] sm:$0xff]  }
  0x2f   : > { %664 = vmatmul.mubr.bf16.gmra.mrb[4].mxu0 %v413_v27  ;;  %v2743_v27 = vld [vmem:[%s3342_s1 + $0x2b8] sm:$0xff]  }
  0x30   : > { %2461 = vmatpush3.bf16.msra.mxu0 %v2686_v26  ;;  %961 = vmatprep.mubr.bf16.mxu0 %v2950_v35  ;;  %v2695_v35 = vld [vmem:[%s3342_s1 + $0xa0] sm:$0xff]  }
  0x31   : > { %2462 = vmatprep.subr.bf16.mxu0 %v2688_v30  ;;  %712 = vmatmul.mubr.bf16.gmra.mrb[4].mxu1 %v419_v31  ;;  %v1025_v26 = vld [vmem:[%s2936_s6] sm:$0xcc]  ;;  %v1026_v31 = vld [vmem:[%s2936_s6 + $0x8] sm:$0xcc] }
  0x32   : > { %2489 = vmatpush3.bf16.msra.mxu1 %v2687_v28  ;;  %1009 = vmatprep.mubr.bf16.mxu1 %v2963_v42  ;;  %v2697_v42 = vld [vmem:[%s3342_s1 + $0xe8] sm:$0xff]   ;;  %v2245_v28 = vcombine.low %v1025_v26, %v2946_v33  ;;  %v2246_v29 = vcombine.high %v1025_v26, %v2946_v33  ;;  %v3188_v30 = vld [vmem:[%s2936_s6 + $0x24] ss:$16 sps:$4 sm:$0x1f]  }
  0x33   : > { %2490 = vmatprep.subr.bf16.mxu1 %v2689_v32  ;;  %v2754_v32 = vld [vmem:[%s3342_s1 + $0x340] sm:$0xff]   ;;  %v1157_v33 = vshrl.u32 %v3188_v30, 16  ;;  %v2763_v26 = vld [vmem:[%s3342_s1 + $0x3d0] sm:$0xff]  }
  0x34   : > { %2463 = vmatpush3.bf16.msra.mxu0 %v2690_v34  ;;  %v1149_v34 = vshrl.u32 %v2246_v29, 16 }
  0x35   : > { %2464 = vmatprep.subr.bf16.mxu0 %v2692_v37  ;;  %v2248_v37 = vcombine.high %v1026_v31, %v2954_v38 }
  0x36   : > { %2491 = vmatpush3.bf16.msra.mxu1 %v2691_v36  ;;  %v1152_v36 = vshll.u32 %v2246_v29, 16  ;;  %v2765_v29 = vld [vmem:[%s3342_s1 + $0x390] sm:$0xff]  }
  0x37   : > { %2492 = vmatprep.subr.bf16.mxu1 %v2693_v39  ;;  %v3196_v39 = vld [vmem:[%s2936_s6 + $0x20] ss:$16 sps:$4 sm:$0x1f]  }
  0x38   : > { %2465 = vmatpush3.bf16.msra.mxu0 %v2694_v41  ;;  %v1160_v41 = vshll.u32 %v3188_v30, 16  ;;  %v1143_v63 = vshll.u32 %v3196_v39, 16 }
  0x39   : > { %2466 = vmatprep.subr.bf16.mxu0 %v2696_v43  ;;  %v1151_v43 = vrot.slane %v1149_v34, 2  ;;  %v2770_v34 = vld [vmem:[%s3342_s1 + $0x360] sm:$0xff]  }
  0x3a   : > { %2493 = vmatpush3.bf16.msra.mxu1 %v2695_v35  ;;  %v1132_v35 = vshrl.u32 %v2245_v28, 16 }
  0x3b   : > { %2494 = vmatprep.subr.bf16.mxu1 %v2697_v42  ;;  %v1154_v42 = vrot.slane %v1152_v36, 3  ;;  %v2769_v36 = vld [vmem:[%s3342_s1 + $0x398] sm:$0xff]  }
  0x3c   : > { %2467 = vmatpush3.bf16.msra.mxu0 %v2698_v45  ;;  %v2247_v45 = vcombine.low %v1026_v31, %v2954_v38  ;;  %v2767_v31 = vld [vmem:[%s3342_s1 + $0x3d8] sm:$0xff]  }
  0x3d   : > { %2468 = vmatprep.subr.bf16.mxu0 %v2700_v47  ;;  %v1183_v47 = vshrl.u32 %v2248_v37, 16 }
  0x3e   : > { %2495 = vmatpush3.bf16.msra.mxu1 %v2699_v46  ;;  %v3202_v46 = vld [vmem:[%s2936_s6 + $0x2c] ss:$16 sps:$4 sm:$0x1f]  }
  0x3f   : > { %2496 = vmatprep.subr.bf16.mxu1 %v2701_v48  ;;  %v1159_v48 = vrot.slane %v1157_v33, 2  ;;  %v2772_v33 = vld [vmem:[%s3342_s1 + $0x320] sm:$0xff]  }
  0x40   : > { %2469 = vmatpush3.bf16.msra.mxu0 %v2702_v49  ;;  %v1162_v49 = vrot.slane %v1160_v41, 3  ;;  %v2774_v41 = vld [vmem:[%s3342_s1 + $0x368] sm:$0xff]  }
  0x41   : > { %2470 = vmatprep.subr.bf16.mxu0 %v2704_v51  ;;  %v1186_v51 = vshll.u32 %v2248_v37, 16  ;;  %v2771_v37 = vld [vmem:[%s3342_s1 + $0x3e0] sm:$0xff]  }
  0x42   : > { %2497 = vmatpush3.bf16.msra.mxu1 %v2703_v50  ;;  %v3205_v50 = vld [vmem:[%s2936_s6 + $0x28] ss:$16 sps:$4 sm:$0x1f]   ;;  %v1163_v38 = vor.u32 %v1162_v49, %v1159_v48  ;;  %v2779_v48 = vld [vmem:[%s3342_s1 + $0x3f0] sm:$0xff]  }
  0x43   : > { %2498 = vmatprep.subr.bf16.mxu1 %v2705_v52  ;;  %v1134_v52 = vrot.slane %v1132_v35, 2  ;;  %v2773_v35 = vld [vmem:[%s3342_s1 + $0x3a0] sm:$0xff]   ;;  %v2780_v49 = vld [vmem:[%s3342_s1 + $0x330] sm:$0xff]  }
  0x44   : > { %2471 = vmatpush3.bf16.msra.mxu0 %v2706_v53  ;;  %v1155_v53 = vor.u32 %v1154_v42, %v1151_v43  ;;  %v2775_v43 = vld [vmem:[%s3342_s1 + $0x3e8] sm:$0xff]  }
  0x45   : > { %2512 = vmatprep.subr.bf16.mxu0 %v2708_v55  ;;  %v1191_v55 = vshrl.u32 %v3202_v46, 16  ;;  %v2776_v42 = vld [vmem:[%s3342_s1 + $0x328] sm:$0xff]  }
  0x46   : > { %2499 = vmatpush3.bf16.msra.mxu1 %v2707_v54  ;;  %v1185_v54 = vrot.slane %v1183_v47, 2  ;;  %v2777_v47 = vld [vmem:[%s3342_s1 + $0x3a8] sm:$0xff]  }
  0x47   : > { %962 = vmatmul.mubr.bf16.vlgmr.msra.gmra.mrb[8].mxu0 %v2958_v40  ;;  %2540 = vmatprep.subr.bf16.mxu1 %v2709_v56  ;;  %v2719_v40 = vld [vmem:[%s3342_s1 + $0x2d0] sm:$0xff]   ;;  %v1194_v56 = vshll.u32 %v3202_v46, 16 }
  0x48   : > { %2513 = vmatpush3.bf16.msra.mxu0 %v2710_v57  ;;  %969 = vmatprep.mubr.bf16.mxu0 %v2146_v0  ;;  %v2755_v57 = vld [vmem:[%s3342_s1 + $0x3c0] sm:$0xff]   ;;  %v1166_v0 = vshrl.u32 %v2247_v45, 16 }
  0x49   : > { %1010 = vmatmul.mubr.bf16.vlgmr.msra.gmra.mrb[8].mxu1 %v2966_v44  ;;  %2514 = vmatprep.subr.bf16.mxu0 %v2712_v59  ;;  %v2721_v44 = vld [vmem:[%s3342_s1 + $0x210] sm:$0xff]   ;;  %v1135_v59 = vshll.u32 %v2245_v28, 16  ;;  %v2766_v28 = vld [vmem:[%s3342_s1 + $0x358] sm:$0xff]  }
  0x4a   : > { %2541 = vmatpush3.bf16.msra.mxu1 %v2711_v58  ;;  %1017 = vmatprep.mubr.bf16.mxu1 %v2148_v4  ;;  %v1188_v58 = vrot.slane %v1186_v51, 3  ;;  %v2782_v51 = vld [vmem:[%s3342_s1 + $0x378] sm:$0xff]  }
  0x4b   : > { %2542 = vmatprep.subr.bf16.mxu1 %v2713_v60  ;;  %v1140_v60 = vshrl.u32 %v3196_v39, 16 }
  0x4c   : > { %2515 = vmatpush3.bf16.msra.mxu0 %v2714_v61  ;;  %v1193_v61 = vrot.slane %v1191_v55, 2  ;;  %v1580_v55 = vrot.slane %v3188_v30, 3  ;;  %v1889_v30 = vld [vmem:[%s3344_s3 + $0x10] sm:$0xf] }
  0x4d   : > { %2516 = vmatprep.subr.bf16.mxu0 %v2718_v1  ;;  %v1164_v1 = vsel %vm1130_vm1, %v1155_v53, %v1163_v38  ;;  %v1142_v3 = vrot.slane %v1140_v60, 2  ;;  %v2783_v53 = vld [vmem:[%s3342_s1 + $0x3f8] sm:$0xff]   ;;  %1912 = vperm.xlu1 %2635, %v1889_v30  }
  0x4e   : > { %2543 = vmatpush3.bf16.msra.mxu1 %v2715_v62  ;;  %v1196_v62 = vrot.slane %v1194_v56, 3  ;;  %v1499_v56 = vld [vmem:[%s2936_s6 + $0x8] sm:$0x88]  ;;  %v2793_v60 = vld [vmem:[%s2936_s6 + $0x18] sm:$0xff] }
  0x4f   : > { %970 = vmatmul.mubr.bf16.gmra.mrb[12].mxu0 %v2145_v2  ;;  %2544 = vmatprep.subr.bf16.mxu1 %v2719_v40  ;;  %v1189_v40 = vor.u32 %v1188_v58, %v1185_v54  ;;  %v1137_v2 = vrot.slane %v1135_v59, 3  ;;  %v1498_v54 = vld [vmem:[%s2936_s6] sm:$0x88] }
  0x50   : > { %2517 = vmatpush3.bf16.msra.mxu0 %v2721_v44  ;;  %1431 = vmatprep.mubr.bf16.mxu0 %v1164_v1  ;;  %v1197_v4 = vor.u32 %v1196_v62, %v1193_v61  ;;  %v1145_v44 = vrot.slane %v1143_v63, 3  ;;  %v2351_v61 = vcombine.low %v1499_v56, %v2793_v60  ;;  %v1577_v62 = vrot.slane %v3196_v39, 3  ;;  %v1887_v63 = vld [vmem:[%s3344_s3] sm:$0xff]  ;;  %v1888_v39 = vld [vmem:[%s3344_s3 + $0x8] sm:$0xff] }
  0x51   : > { %1018 = vmatmul.mubr.bf16.gmra.mrb[12].mxu1 %v2147_v6  ;;  %2518 = vmatprep.subr.bf16.mxu0 %v2724_v7  ;;  %v1169_v6 = vshll.u32 %v2247_v45, 16  ;;  %v1138_v7 = vor.u32 %v1137_v2, %v1134_v52  ;;  %v2778_v45 = vld [vmem:[%s3342_s1 + $0x370] sm:$0xff]   ;;  %v1586_v1 = vrot.slane %v3202_v46, 3 }
  0x52   : > { %2545 = vmatpush3.bf16.msra.mxu1 %v2722_v5  ;;  %v1168_v5 = vrot.slane %v1166_v0, 2  ;;  %v2781_v52 = vld [vmem:[%s3342_s1 + $0x3b0] sm:$0xff]   ;;  %v2352_v0 = vcombine.high %v1499_v56, %v2793_v60  ;;  %1902 = vperm.xlu0 %2634, %v1887_v63  }
  0x53   : > { %2546 = vmatprep.subr.bf16.mxu1 %v2725_v8  ;;  %v1174_v8 = vshrl.u32 %v3205_v50, 16 }
  0x54   : > { %2519 = vmatpush3.bf16.msra.mxu0 %v2726_v9  ;;  %v1177_v9 = vshll.u32 %v3205_v50, 16 }
  0x55   : > { %2520 = vmatprep.subr.bf16.mxu0 %v2728_v11  ;;  %v1146_v11 = vor.u32 %v1145_v44, %v1142_v3  ;;  %v2785_v3 = vld [vmem:[%s3342_s1 + $0x3b8] sm:$0xff]   ;;  %v1585_v44 = vrot.slane %v2352_v0, 3 }
  0x56   : > { %2547 = vmatpush3.bf16.msra.mxu1 %v2727_v10  ;;  %v1198_v10 = vsel %vm1130_vm1, %v1189_v40, %v1197_v4  ;;  %1907 = vperm.xlu0 %2634, %v1888_v39  }
  0x57   : > { %2548 = vmatprep.subr.bf16.mxu1 %v2729_v12  ;;  %v1171_v12 = vrot.slane %v1169_v6, 3  ;;  %1479 = vmatprep.mubr.bf16.mxu1 %v1198_v10 }
  0x58   : > { %2521 = vmatpush3.bf16.msra.mxu0 %v2730_v13  ;;  %v2756_v13 = vld [vmem:[%s3342_s1 + $0x300] sm:$0xff]  }
  0x59   : > { %2522 = vmatprep.subr.bf16.mxu0 %v2732_v15  ;;  %v1179_v15 = vrot.slane %v1177_v9, 3 }
  0x5a   : > { %2549 = vmatpush3.bf16.msra.mxu1 %v2731_v14  ;;  %v1176_v14 = vrot.slane %v1174_v8, 2 }
  0x5b   : > { %2550 = vmatprep.subr.bf16.mxu1 %v2733_v16  ;;  %v2757_v16 = vld [vmem:[%s3342_s1 + $0x380] sm:$0xff]  }
  0x5c   : > { %2523 = vmatpush3.bf16.msra.mxu0 %v2734_v17  ;;  %v2758_v17 = vld [vmem:[%s3342_s1 + $0x348] sm:$0xff]  }
  0x5d   : > { %2524 = vmatprep.subr.bf16.mxu0 %v2736_v19  ;;  %v1172_v19 = vor.u32 %v1171_v12, %v1168_v5  ;;  %v1583_v5 = vrot.slane %v3205_v50, 3 }
  0x5e   : > { %2551 = vmatpush3.bf16.msra.mxu1 %v2735_v18  ;;  %v1147_v18 = vsel %vm1130_vm1, %v1138_v7, %v1146_v11  ;;  %v1587_v7 = vsel %vm1575_vm2, %v1585_v44, %v1586_v1 }
  0x5f   : > { %2552 = vmatprep.subr.bf16.mxu1 %v2737_v20  ;;  %v1180_v20 = vor.u32 %v1179_v15, %v1176_v14 }
  0x60   : > { %2525 = vmatpush3.bf16.msra.mxu0 %v2738_v21  ;;  %v2759_v21 = vld [vmem:[%s3342_s1 + $0x3c8] sm:$0xff]  }
  0x61   : > { %2526 = vmatprep.subr.bf16.mxu0 %v2740_v23  ;;  %v1181_v23 = vsel %vm1130_vm1, %v1172_v19, %v1180_v20 }
  0x62   : > { %2553 = vmatpush3.bf16.msra.mxu1 %v2739_v22  ;;  %v2760_v22 = vld [vmem:[%s3342_s1 + $0x308] sm:$0xff]  }
  0x63   : > { %2554 = vmatprep.subr.bf16.mxu1 %v2741_v24  ;;  %v2762_v24 = vld [vmem:[%s3342_s1 + $0x350] sm:$0xff]  }
  0x64   : > { %2527 = vmatpush3.bf16.msra.mxu0 %v2742_v25  ;;  %v2761_v25 = vld [vmem:[%s3342_s1 + $0x388] sm:$0xff]  }
  0x65   : > { %2568 = vmatprep.subr.bf16.mxu0 %v2754_v32  ;;  %v2768_v32 = vld [vmem:[%s3342_s1 + $0x318] sm:$0xff]  }
  0x66   : > { %2555 = vmatpush3.bf16.msra.mxu1 %v2743_v27  ;;  %v2764_v27 = vld [vmem:[%s3342_s1 + $0x310] sm:$0xff]  }
  0x67   : > { %2596 = vmatprep.subr.bf16.mxu1 %v2755_v57  ;;  %1432 = vmatmul.mubr.bf16.vlgmr.msra.gmra.mrb[16].mxu0 %v1147_v18  ;;  %v2784_v57 = vld [vmem:[%s3342_s1 + $0x338] sm:$0xff]  }
  0x68   : > { %2569 = vmatpush3.bf16.msra.mxu0 %v2756_v13  ;;  %1439 = vmatprep.mubr.bf16.mxu0 %v1163_v38  ;;  %v2792_v38 = vld [vmem:[%s2936_s6 + $0x10] sm:$0xff] }
  0x69   : > { %2570 = vmatprep.subr.bf16.mxu0 %v2758_v17  ;;  %1480 = vmatmul.mubr.bf16.vlgmr.msra.gmra.mrb[16].mxu1 %v1181_v23  ;;  %v2349_v58 = vcombine.low %v1498_v54, %v2792_v38  ;;  %v2350_v59 = vcombine.high %v1498_v54, %v2792_v38 }
  0x6a   : > { %2597 = vmatpush3.bf16.msra.mxu1 %v2757_v16  ;;  %1487 = vmatprep.mubr.bf16.mxu1 %v1197_v4  ;;  %v1582_v4 = vrot.slane %v2351_v61, 3 }
  0x6b   : > { %2598 = vmatprep.subr.bf16.mxu1 %v2759_v21  ;;  %v1576_v40 = vrot.slane %v2349_v58, 3  ;;  %v1579_v2 = vrot.slane %v2350_v59, 3 }
  0x6c   : > { %2571 = vmatpush3.bf16.msra.mxu0 %v2760_v22  ;;  %v1584_v8 = vsel %vm1575_vm2, %v1582_v4, %v1583_v5 }
  0x6d   : > { %2572 = vmatprep.subr.bf16.mxu0 %v2762_v24  ;;  %v1581_v46 = vsel %vm1575_vm2, %v1579_v2, %v1580_v55  ;;  %v1578_v6 = vsel %vm1575_vm2, %v1576_v40, %v1577_v62 }
  0x6e   : > { %2599 = vmatpush3.bf16.msra.mxu1 %v2761_v25 }
  0x6f   : > { %1440 = vmatmul.mubr.bf16.gmra.mrb[20].mxu0 %v1146_v11  ;;  %2600 = vmatprep.subr.bf16.mxu1 %v2763_v26 }
  0x70   : > { %2573 = vmatpush3.bf16.msra.mxu0 %v2764_v27  ;;  %1820 = vmatprep.mubr.bf16.mxu0 %v1581_v46 }
  0x71   : > { %2574 = vmatprep.subr.bf16.mxu0 %v2766_v28  ;;  %1488 = vmatmul.mubr.bf16.gmra.mrb[20].mxu1 %v1180_v20 }
  0x72   : > { %2601 = vmatpush3.bf16.msra.mxu1 %v2765_v29  ;;  %1868 = vmatprep.mubr.bf16.mxu1 %v1587_v7 }
  0x73   : > { %2602 = vmatprep.subr.bf16.mxu1 %v2767_v31 }
  0x74   : > { %2575 = vmatpush3.bf16.msra.mxu0 %v2768_v32 }
  0x75   : > { %2576 = vmatprep.subr.bf16.mxu0 %v2770_v34 }
  0x76   : > { %2603 = vmatpush3.bf16.msra.mxu1 %v2769_v36 }
  0x77   : > { %2604 = vmatprep.subr.bf16.mxu1 %v2771_v37 }
  0x78   : > { %2577 = vmatpush3.bf16.msra.mxu0 %v2772_v33 }
  0x79   : > { %2578 = vmatprep.subr.bf16.mxu0 %v2774_v41 }
  0x7a   : > { %2605 = vmatpush3.bf16.msra.mxu1 %v2773_v35 }
  0x7b   : > { %2606 = vmatprep.subr.bf16.mxu1 %v2775_v43 }
  0x7c   : > { %2579 = vmatpush3.bf16.msra.mxu0 %v2776_v42 }
  0x7d   : > { %2580 = vmatprep.subr.bf16.mxu0 %v2778_v45 }
  0x7e   : > { %2607 = vmatpush3.bf16.msra.mxu1 %v2777_v47 }
  0x7f   : > { %2608 = vmatprep.subr.bf16.mxu1 %v2779_v48 }
  0x80   : > { %2581 = vmatpush3.bf16.msra.mxu0 %v2780_v49 }
  0x81   : > { %2582 = vmatprep.subr.bf16.mxu0 %v2782_v51 }
  0x82   : > { %2609 = vmatpush3.bf16.msra.mxu1 %v2781_v52 }
  0x83   : > { %2610 = vmatprep.subr.bf16.mxu1 %v2783_v53 }
  0x84   : > { %2583 = vmatpush3.bf16.msra.mxu0 %v2784_v57 }
  0x86   : > { %2611 = vmatpush3.bf16.msra.mxu1 %v2785_v3 }
  0x87   : > { %1821 = vmatmul.mubr.bf16.vlgmr.msra.gmra.mrb[24].mxu0 %v1578_v6 }
  0x88   : > { %1828 = vmatprep.mubr.bf16.mxu0 %v1580_v55 }
  0x89   : > { %1869 = vmatmul.mubr.bf16.vlgmr.msra.gmra.mrb[24].mxu1 %v1584_v8 }
  0x8a   : > { %1876 = vmatprep.mubr.bf16.mxu1 %v1586_v1 }
  0x8f   : > { %1829 = vmatmul.mubr.bf16.gmra.mrb[28].mxu0 %v1577_v62 }
  0x91   : > { %1877 = vmatmul.mubr.bf16.gmra.mrb[28].mxu1 %v1583_v5 }
  0xfa   : > { %v2416_v50 = vpop.f32.mrb[0].mxu0 }
  0xfb   : > { %v2417_v9 = vpop.f32.mrb[1].mxu0  ;;  %v2444_v10 = vpop.f32.mrb[0].mxu1 }
  0xfc   : > { %v2418_v11 = vadd.f32 %v2417_v9, %v2416_v50  ;;  %v2419_v12 = vpop.f32.mrb[2].mxu0  ;;  %v2445_v13 = vpop.f32.mrb[1].mxu1 }
  0xfd   : > { %v2420_v14 = vpop.f32.mrb[3].mxu0  ;;  %v2446_v15 = vadd.f32 %v2445_v13, %v2444_v10  ;;  %v2447_v16 = vpop.f32.mrb[2].mxu1 }
  0xfe   : > { %v2421_v17 = vadd.f32 %v2420_v14, %v2419_v12  ;;  %v2448_v18 = vpop.f32.mrb[3].mxu1 }
  0xff   : > { %v706_v19 = vadd.f32 %v2446_v15, %v2418_v11  ;;  %v2449_v20 = vadd.f32 %v2448_v18, %v2447_v16 }
 0x101   : > { %v709_v21 = vadd.f32 %v2449_v20, %v2421_v17 }
 0x102   : > { %v2422_v22 = vpop.f32.mrb[4].mxu0 }
 0x103   : > { %v2423_v23 = vpop.f32.mrb[5].mxu0 }
 0x104   : > { %v2450_v24 = vpop.f32.mrb[4].mxu1  ;;  %v2424_v25 = vadd.f32 %v2423_v23, %v2422_v22  ;;  %v2425_v26 = vpop.f32.mrb[6].mxu0 }
 0x105   : > { %v2451_v27 = vpop.f32.mrb[5].mxu1  ;;  %v2426_v28 = vpop.f32.mrb[7].mxu0 }
 0x106   : > { %v2452_v29 = vadd.f32 %v2451_v27, %v2450_v24  ;;  %v2453_v31 = vpop.f32.mrb[6].mxu1 }
 0x107   : > { %v2454_v32 = vpop.f32.mrb[7].mxu1 }
 0x108   : > { %v714_v34 = vadd.f32 %v2452_v29, %v2424_v25 }
 0x11a   : > { %v2472_v36 = vpop.f32.mrb[8].mxu0 }
 0x11b   : > { %v2473_v37 = vpop.f32.mrb[9].mxu0 }
 0x11c   : > { %v2500_v33 = vpop.f32.mrb[8].mxu1  ;;  %v2474_v41 = vadd.f32 %v2473_v37, %v2472_v36  ;;  %v2475_v35 = vpop.f32.mrb[10].mxu0 }
 0x11d   : > { %v2501_v43 = vpop.f32.mrb[9].mxu1  ;;  %v2476_v42 = vpop.f32.mrb[11].mxu0 }
 0x11e   : > { %v964_v45 = vadd.f32 %v2474_v41, %v706_v19  ;;  %v2502_v47 = vadd.f32 %v2501_v43, %v2500_v33  ;;  %v2503_v48 = vpop.f32.mrb[10].mxu1  ;;  %v2477_v49 = vadd.f32 %v2476_v42, %v2475_v35  ;;  %v1903_v41 = vpop.permute.xlu0 %1902  ;;  %v2385_v42 = vld [vmem:[%s3343_s2] ss:$0 sm:$0xff] }
 0x11f   : > { %v2504_v51 = vpop.f32.mrb[11].mxu1 }
 0x120   : > { %v1012_v52 = vadd.f32 %v2502_v47, %v964_v45  ;;  %v967_v53 = vadd.f32 %v2477_v49, %v709_v21  ;;  %v2505_v54 = vadd.f32 %v2504_v51, %v2503_v48 }
 0x122   : > { %v1015_v55 = vadd.f32 %v2505_v54, %v967_v53  ;;  %v2478_v56 = vpop.f32.mrb[12].mxu0 }
 0x123   : > { %v2479_v57 = vpop.f32.mrb[13].mxu0 }
 0x124   : > { %v2480_v38 = vadd.f32 %v2479_v57, %v2478_v56  ;;  %v2506_v58 = vpop.f32.mrb[12].mxu1  ;;  %v2481_v59 = vpop.f32.mrb[14].mxu0 }
 0x125   : > { %v2507_v60 = vpop.f32.mrb[13].mxu1  ;;  %v2482_v61 = vpop.f32.mrb[15].mxu0 }
 0x126   : > { %v972_v62 = vadd.f32 %v2480_v38, %v714_v34  ;;  %v2508_v63 = vadd.f32 %v2507_v60, %v2506_v58  ;;  %v2509_v30 = vpop.f32.mrb[14].mxu1  ;;  %v1908_v38 = vpop.permute.xlu0 %1907 }
 0x127   : > { %v2510_v0 = vpop.f32.mrb[15].mxu1 }
 0x128   : > { %v1020_v1 = vadd.f32 %v2508_v63, %v972_v62 }
 0x13a   : > { %v2528_v40 = vpop.f32.mrb[16].mxu0 }
 0x13b   : > { %v2529_v2 = vpop.f32.mrb[17].mxu0 }
 0x13c   : > { %v2530_v39 = vadd.f32 %v2529_v2, %v2528_v40  ;;  %v2531_v3 = vpop.f32.mrb[18].mxu0  ;;  %v2556_v4 = vpop.f32.mrb[16].mxu1 }
 0x13d   : > { %v2532_v44 = vpop.f32.mrb[19].mxu0  ;;  %v2557_v5 = vpop.f32.mrb[17].mxu1 }
 0x13e   : > { %v2533_v46 = vadd.f32 %v2532_v44, %v2531_v3  ;;  %v2558_v6 = vadd.f32 %v2557_v5, %v2556_v4  ;;  %v2559_v7 = vpop.f32.mrb[18].mxu1 }
 0x13f   : > { %v2560_v8 = vpop.f32.mrb[19].mxu1 }
 0x140   : > { %v1482_v50 = vadd.f32 %v2558_v6, %v2530_v39  ;;  %v2561_v9 = vadd.f32 %v2560_v8, %v2559_v7  ;;  %v1913_v39 = vpop.permute.xlu1 %1912 }
 0x142   : > { %v2534_v10 = vpop.f32.mrb[20].mxu0  ;;  %v1495_v11 = vadd.f32 %v1482_v50, %v1012_v52  ;;  %v1485_v12 = vadd.f32 %v2561_v9, %v2533_v46 }
 0x143   : > { %v2535_v13 = vpop.f32.mrb[21].mxu0 }
 0x144   : > { %v2536_v14 = vadd.f32 %v2535_v13, %v2534_v10  ;;  %v2537_v15 = vpop.f32.mrb[22].mxu0  ;;  %v1496_v16 = vadd.f32 %v1485_v12, %v1015_v55  ;;  %v2562_v17 = vpop.f32.mrb[20].mxu1 }
 0x145   : > { %v2538_v18 = vpop.f32.mrb[23].mxu0  ;;  %v2563_v19 = vpop.f32.mrb[21].mxu1 }
 0x146   : > { %v2564_v20 = vadd.f32 %v2563_v19, %v2562_v17  ;;  %v2565_v21 = vpop.f32.mrb[22].mxu1 }
 0x147   : > { %v2566_v22 = vpop.f32.mrb[23].mxu1 }
 0x148   : > { %v1490_v23 = vadd.f32 %v2564_v20, %v2536_v14 }
 0x14a   : > { %v1497_v24 = vadd.f32 %v1490_v23, %v1020_v1 }
 0x15a   : > { %v2584_v25 = vpop.f32.mrb[24].mxu0 }
 0x15b   : > { %v2585_v26 = vpop.f32.mrb[25].mxu0 }
 0x15c   : > { %v2586_v27 = vadd.f32 %v2585_v26, %v2584_v25  ;;  %v2587_v28 = vpop.f32.mrb[26].mxu0  ;;  %v2612_v29 = vpop.f32.mrb[24].mxu1 }
 0x15d   : > { %v2588_v31 = vpop.f32.mrb[27].mxu0  ;;  %v2613_v32 = vpop.f32.mrb[25].mxu1 }
 0x15e   : > { %v2589_v34 = vadd.f32 %v2588_v31, %v2587_v28  ;;  %v2614_v36 = vadd.f32 %v2613_v32, %v2612_v29  ;;  %v2615_v37 = vpop.f32.mrb[26].mxu1 }
 0x15f   : > { %v2616_v33 = vpop.f32.mrb[27].mxu1 }
 0x160   : > { %v1871_v35 = vadd.f32 %v2614_v36, %v2586_v27  ;;  %v2617_v43 = vadd.f32 %v2616_v33, %v2615_v37 }
 0x162   : > { %v2590_v45 = vpop.f32.mrb[28].mxu0  ;;  %v1874_v47 = vadd.f32 %v2617_v43, %v2589_v34  ;;  %v1884_v48 = vadd.f32 %v1871_v35, %v1495_v11 }
 0x163   : > { %v2591_v49 = vpop.f32.mrb[29].mxu0 }
 0x164   : > { %v2592_v51 = vadd.f32 %v2591_v49, %v2590_v45  ;;  %v2593_v52 = vpop.f32.mrb[30].mxu0  ;;  %v1897_v53 = vadd.f32 %v2385_v42, %v1884_v48  ;;  %v2618_v54 = vpop.f32.mrb[28].mxu1  ;;  %v1885_v55 = vadd.f32 %v1874_v47, %v1496_v16 }
 0x165   : > { %v2594_v56 = vpop.f32.mrb[31].mxu0  ;;  %v2619_v57 = vpop.f32.mrb[29].mxu1 }
 0x166   : > { %v1915_v58 = vmul.f32 %v1903_v41, %v1897_v53  ;;  %v2620_v59 = vadd.f32 %v2619_v57, %v2618_v54  ;;  %v2621_v60 = vpop.f32.mrb[30].mxu1  ;;  %v1898_v61 = vadd.f32 %v2385_v42, %v1885_v55 }
 0x167   : > { %v2622_v62 = vpop.f32.mrb[31].mxu1 }
 0x168   : > { %v1879_v63 = vadd.f32 %v2620_v59, %v2592_v51  ;;  %v1916_v30 = vmul.f32 %v1908_v38, %v1898_v61  ;;  %v1928_v0 = vmul.f32 %v1915_v58, %v1915_v58 }
 0x16a   : > { %v1918_v1 = vadd.f32 %v1916_v30, %v1915_v58  ;;  %v1929_v40 = vmul.f32 %v1916_v30, %v1916_v30  ;;  %v1886_v2 = vadd.f32 %v1879_v63, %v1497_v24 }
 0x16c   : > { %v1931_v3 = vadd.f32 %v1929_v40, %v1928_v0  ;;  %v1899_v4 = vadd.f32 %v2385_v42, %v1886_v2 }
 0x16e   : > { %v1917_v44 = vmul.f32 %v1913_v39, %v1899_v4 }
 0x170   : > { %v1920_v5 = vsel %vm1919_vm3, %v1917_v44, 0.0  ;;  %v1930_v46 = vmul.f32 %v1917_v44, %v1917_v44 }
 0x171   : > { %v1921_v6 = vadd.f32 %v1920_v5, %v1918_v1 }
 0x172   : > { %v1932_v7 = vsel %vm1919_vm3, %v1930_v46, 0.0 }
 0x173   : > { %v1922_v8 = vrot.slane %v1921_v6, 4  ;;  %v1933_v50 = vadd.f32 %v1932_v7, %v1931_v3 }
 0x175   : > { %v1923_v9 = vadd.f32 %v1922_v8, %v1921_v6  ;;  %v1934_v10 = vrot.slane %v1933_v50, 4 }
 0x177   : > { %v1924_v11 = vrot.slane %v1923_v9, 2  ;;  %v1935_v12 = vadd.f32 %v1934_v10, %v1933_v50 }
 0x179   : > { %v1925_v13 = vadd.f32 %v1924_v11, %v1923_v9  ;;  %v1936_v14 = vrot.slane %v1935_v12, 2 }
 0x17b   : > { %v1926_v15 = vrot.slane %v1925_v13, 1  ;;  %v1937_v16 = vadd.f32 %v1936_v14, %v1935_v12 }
 0x17d   : > { %v1927_v17 = vadd.f32 %v1926_v15, %v1925_v13  ;;  %v1938_v18 = vrot.slane %v1937_v16, 1 }
 0x17f   : > { %v1939_v19 = vadd.f32 %v1938_v18, %v1937_v16  ;;  %v1940_v20 = vmul.f32 0.0625, %v1927_v17 }
 0x181   : > { %v1941_v21 = vmul.f32 0.0625, %v1939_v19  ;;  %v1942_v22 = vmul.f32 %v1940_v20, %v1940_v20  ;;  %v1945_v23 = vsub.f32 %v1915_v58, %v1940_v20  ;;  %v1946_v24 = vsub.f32 %v1916_v30, %v1940_v20 }
 0x182   : > { %v1947_v25 = vsub.f32 %v1917_v44, %v1940_v20 }
 0x183   : > { %v1943_v26 = vsub.f32 %v1941_v21, %v1942_v22 }
 0x185   : > { %v1944_v27 = vmax.f32 %v1943_v26, 0.0 }
 0x187   : > { %v1948_v28 = vadd.f32 1e-05, %v1944_v27 }
 0x189   : > { %2790 = vrsqrt.f32 %v1948_v28 }
 0x193   : > { %v2791_v29 = vpop.eup %2790 }
 0x194   : > { %v1950_v31 = vmul.f32 %v2791_v29, %v1945_v23  ;;  %v1951_v32 = vmul.f32 %v2791_v29, %v1946_v24  ;;  %v1952_v34 = vmul.f32 %v2791_v29, %v1947_v25 }
 0x196   : > { %vm1953_vm4 = vcmp.gt.f32.partialorder %v1950_v31, 0.0  ;;  %vm1954_vm5 = vcmp.gt.f32.partialorder %v1951_v32, 0.0  ;;  %vm1955_vm6 = vcmp.gt.f32.partialorder %v1952_v34, 0.0  ;;  %v1956_v36 = vmul.f32 0.2, %v1950_v31 }
 0x197   : > { %v1957_v37 = vmul.f32 0.2, %v1951_v32  ;;  %v1958_v33 = vmul.f32 0.2, %v1952_v34 }
 0x198   : > { %v1959_v41 = vsel %vm1953_vm4, %v1950_v31, %v1956_v36 }
 0x199   : > { %v1960_v35 = vsel %vm1954_vm5, %v1951_v32, %v1957_v37  ;;  %v1961_v43 = vsel %vm1955_vm6, %v1952_v34, %v1958_v33 }
 0x19a   : > { %v2394_v42 = vpack.c.bf16 %v1961_v43, %v1961_v43  ;;  %v2398_v45 = vpack.c.bf16 %v1960_v35, %v1959_v41 }
 0x19c   : > { %2399 = vst [vmem:[%s197_s5] sm:$0xff] %v2398_v45   ;;  %1977 = vst [vmem:[%s197_s5 + $0x8] sm:$0x3] %v2394_v42 }
 0x19d PF: > { %s14_s15 = sadd.s32 1, %s2800_s15  }
 0x19e   : > { %p11_p4 = scmp.ge.s32.totalorder %s14_s15, 4  }
 0x1a0   :  { %13 = sbr.rel (!%p11_p4) target bundleno = 1 (0x1), region = 69 }

// kernel: discriminator_forward.8
= control target key start
LH: loop header
LB: loop body
LE: loop exit
PB: predicated region body
PF: predicated region fallthrough
CT: control target
= control target key end

     0   :  { %s3576_s15 = smov 0   ;;  %s4148_s0 = inlined_call_operand.vmem [shape: bf16[2,40,128], index: 0, kind: input, shape index: {}]   ;;  %s4149_s1 = inlined_call_operand.vmem [shape: bf16[16,128,128], index: 1, kind: input, shape index: {}]   ;;  %s4150_s2 = inlined_call_operand.vmem [shape: f32[1,128], index: 2, kind: input, shape index: {}]   ;;  %s4151_s3 = inlined_call_operand.vmem [shape: f32[18,1], index: 3, kind: input, shape index: {}]   ;;  %s4152_s4 = inlined_call_operand.vmem [shape: bf16[2,18,128], index: 4, kind: output, shape index: {}]  }
   0x1 LB: > { %s2484_s16 = sadd.s32 4294967295, %s3548_s15   ;;  %p2488_p0 = scmp.ge.s32.totalorder %s3548_s15, 1  ;;  %s3548_s15 = sphi %s3576_s15, %s14_s15  }
   0x2   : > { %p162_p1 = scmp.lt.s32.totalorder %s3548_s15, 3 }
   0x4   : > { %p163_p2 = pnand %p2488_p0, %p162_p1 }
   0x5   : > { %v3389_v0 = vld [vmem:[%s4149_s1 + $0x40] sm:$0xff] (!%p163_p2)   ;;  %p188_p3 = scmp.lt.s32.totalorder (!%p163_p2), %s2484_s16, 1  ;;  %v3391_v2 = vld [vmem:[%s4149_s1 + $0x48] sm:$0xff] (!%p163_p2)   ;;  %v3393_v4 = vld [vmem:[%s4149_s1 + $0x50] sm:$0xff] (!%p163_p2)   ;;  %vm244_vm0 = vsmask.f32 (!%p163_p2), 7424 }
   0x6   : > { %166 = sbr.rel (%p163_p2) target bundleno = 531 (0x213), region = 36  ;;  %v3390_v1 = vld [vmem:[%s4149_s1] sm:$0xff] (!%p163_p2)   ;;  %3056 = vmatprep.subr.bf16.mxu0 (!%p163_p2), %v3389_v0  ;;  %v3392_v3 = vld [vmem:[%s4149_s1 + $0x8] sm:$0xff] (!%p163_p2)   ;;  %v3394_v5 = vld [vmem:[%s4149_s1 + $0x10] sm:$0xff] (!%p163_p2)   ;;  %vm480_vm1 = vcmask (!%p163_p2), 1046528   ;;  %vm750_vm3 = vcmask (!%p163_p2), 1044480  }
   0x7   : > { %3076 = vmatprep.subr.bf16.mxu1 (!%p163_p2), %v3390_v1  ;;  %3057 = vmatpush3.bf16.msra.mxu0 (!%p163_p2), %v3389_v0  ;;  %v3395_v6 = vld [vmem:[%s4149_s1 + $0x58] sm:$0xff] (!%p163_p2)   ;;  %v3397_v8 = vld [vmem:[%s4149_s1 + $0x60] sm:$0xff] (!%p163_p2)   ;;  %v3399_v10 = vld [vmem:[%s4149_s1 + $0x68] sm:$0xff] (!%p163_p2)   ;;  %vm606_vm2 = vsmask.f32 (!%p163_p2), 6400  ;;  %vm1287_vm5 = vcmask (!%p163_p2), 1045504  }
   0x8   : > { %3077 = vmatpush3.bf16.msra.mxu1 (!%p163_p2), %v3390_v1  ;;  %3058 = vmatprep.subr.bf16.mxu0 (!%p163_p2), %v3391_v2  ;;  %v3396_v7 = vld [vmem:[%s4149_s1 + $0x18] sm:$0xff] (!%p163_p2)   ;;  %v3398_v9 = vld [vmem:[%s4149_s1 + $0x20] sm:$0xff] (!%p163_p2)   ;;  %v3400_v13 = vld [vmem:[%s4149_s1 + $0x28] sm:$0xff] (!%p163_p2)   ;;  %vm886_vm4 = vsmask.f32 (!%p163_p2), 4352  ;;  %vm2370_vm7 = vcmask (!%p163_p2), 1041408  }
   0x9   : > { %3078 = vmatprep.subr.bf16.mxu1 (!%p163_p2), %v3392_v3  ;;  %v3401_v16 = vld [vmem:[%s4149_s1 + $0x70] sm:$0xff] (!%p163_p2)   ;;  %v3403_v24 = vld [vmem:[%s4149_s1 + $0x78] sm:$0xff] (!%p163_p2)   ;;  %v3408_v28 = vld [vmem:[%s4149_s1 + $0x80] sm:$0xff] (!%p163_p2)   ;;  %vm1413_vm6 = vsmask.f32 (!%p163_p2), 5376 }
   0xa   : > { %v3402_v17 = vld [vmem:[%s4149_s1 + $0x30] sm:$0xff] (!%p163_p2)   ;;  %v3404_v25 = vld [vmem:[%s4149_s1 + $0x38] sm:$0xff] (!%p163_p2)   ;;  %v3409_v30 = vld [vmem:[%s4149_s1 + $0xc0] sm:$0xff] (!%p163_p2)  }
   0xb   : > { %3059 = vmatpush3.bf16.msra.mxu0 (!%p163_p2), %v3391_v2  ;;  %v3410_v32 = vld [vmem:[%s4149_s1 + $0x88] sm:$0xff] (!%p163_p2)   ;;  %v3412_v35 = vld [vmem:[%s4149_s1 + $0x90] sm:$0xff] (!%p163_p2)   ;;  %v3414_v45 = vld [vmem:[%s4149_s1 + $0x98] sm:$0xff] (!%p163_p2)  }
   0xc   : > { %3079 = vmatpush3.bf16.msra.mxu1 (!%p163_p2), %v3392_v3  ;;  %3060 = vmatprep.subr.bf16.mxu0 (!%p163_p2), %v3393_v4  ;;  %v3411_v33 = vld [vmem:[%s4149_s1 + $0xc8] sm:$0xff] (!%p163_p2)   ;;  %v3413_v36 = vld [vmem:[%s4149_s1 + $0xd0] sm:$0xff] (!%p163_p2)   ;;  %v3415_v50 = vld [vmem:[%s4149_s1 + $0xd8] sm:$0xff] (!%p163_p2)  }
   0xd   : > { %s4154_s16 = smov (!%p188_p3, %s2484_s16), 1  ;;  %3080 = vmatprep.subr.bf16.mxu1 %v3394_v5  ;;  %v3416_v54 = vld [vmem:[%s4149_s1 + $0xa0] sm:$0xff]   ;;  %v3418_v57 = vld [vmem:[%s4149_s1 + $0xa8] sm:$0xff]   ;;  %v3420_v59 = vld [vmem:[%s4149_s1 + $0xb0] sm:$0xff]  }
   0xe   : > { %s3376_s7 = smul.u32 20, %s4154_s16  ;;  %v3417_v55 = vld [vmem:[%s4149_s1 + $0xe0] sm:$0xff]   ;;  %v3419_v58 = vld [vmem:[%s4149_s1 + $0xe8] sm:$0xff]   ;;  %v3421_v60 = vld [vmem:[%s4149_s1 + $0xf0] sm:$0xff]  }
   0xf   : > { %3061 = vmatpush3.bf16.msra.mxu0 %v3393_v4  ;;  %v3422_v2 = vld [vmem:[%s4149_s1 + $0xb8] sm:$0xff]   ;;  %s3377_s28 = smul.u32 12, %s4154_s16 }
  0x10   : > { %3081 = vmatpush3.bf16.msra.mxu1 %v3394_v5  ;;  %3062 = vmatprep.subr.bf16.mxu0 %v3395_v6  ;;  %s3620_s14 = scalar_lea.vmem %s4148_s0, %s3376_s7 }
  0x11   : > { %3082 = vmatprep.subr.bf16.mxu1 %v3396_v7  ;;  %v199_v11 = vld [vmem:[%s3620_s14] sm:$0xf]  ;;  %v3627_v12 = vld [vmem:[%s3620_s14 + $0x4] sm:$0xf]  ;;  %v3711_v0 = vld [vmem:[%s3620_s14 + $0x8] sm:$0xf]  ;;  %s197_s5 = scalar_lea.vmem %s4152_s4, %s3377_s28 }
  0x12   : > { %v2507_v14 = vcombine.low %v199_v11, %v3627_v12  ;;  %v3634_v15 = vld [vmem:[%s3620_s14 + $0x8] ss:$0 sps:$4 sm:$0x33]   ;;  %v459_v34 = vld [vmem:[%s3620_s14] sm:$0xe] }
  0x13   : > { %3063 = vmatpush3.bf16.msra.mxu0 %v3395_v6  ;;  %v253_v20 = vshll.u32 %v3634_v15, 16  ;;  %v257_v27 = vshrl.u32 %v3634_v15, 16  ;;  %v3407_v29 = vld [vmem:[%s3620_s14 + $0x8] ss:$0 sps:$4 sm:$0x11]   ;;  %v2542_v37 = vcombine.low %v459_v34, %v3627_v12  ;;  %v482_v38 = vrot.slane %v3634_v15, 1 }
  0x14   : > { %3083 = vmatpush3.bf16.msra.mxu1 %v3396_v7  ;;  %3064 = vmatprep.subr.bf16.mxu0 %v3397_v8  ;;  %v246_v18 = vshrl.u32 %v2507_v14, 16  ;;  %v248_v19 = vshll.u32 %v2507_v14, 16  ;;  %v3425_v39 = vld [vmem:[%s3620_s14 + $0x8] ss:$0 sps:$4 sm:$0x77]   ;;  %v3423_v6 = vld [vmem:[%s4149_s1 + $0xf8] sm:$0xff]  }
  0x15   : > { %3084 = vmatprep.subr.bf16.mxu1 %v3398_v9  ;;  %3092 = vmatprep.mubr.bf16.mxu1 %v2507_v14  ;;  %v255_v22 = vrot.slane %v253_v20, 1  ;;  %v481_v40 = vrot.slane %v2542_v37, 1  ;;  %v608_v41 = vshrl.u32 %v2542_v37, 16  ;;  %v611_v42 = vshll.u32 %v2542_v37, 16  ;;  %v725_v61 = vld [vmem:[%s3620_s14] sm:$0x8] }
  0x16   : > { %v250_v21 = vrot.slane %v248_v19, 1  ;;  %v616_v43 = vshrl.u32 %v3425_v39, 16  ;;  %v619_v44 = vshll.u32 %v3425_v39, 16  ;;  %v855_v62 = vld [vmem:[%s3620_s14] sm:$0x8]  ;;  %v2592_v3 = vcombine.low %v725_v61, %v3627_v12  ;;  %v3431_v15 = vld [vmem:[%s4149_s1 + $0x150] sm:$0xff]  }
  0x17   : > { %3065 = vmatpush3.bf16.msra.mxu0 %v3397_v8  ;;  %v259_v31 = vor.u32 %v257_v27, %v255_v22  ;;  %v483_v46 = vsel %vm480_vm1, %v481_v40, %v482_v38  ;;  %v610_v47 = vrot.slane %v608_v41, 1  ;;  %v613_v48 = vrot.slane %v611_v42, 2  ;;  %v3708_v63 = vld [vmem:[%s3620_s14 + $0x4] sm:$0xf]  ;;  %v3714_v1 = vld [vmem:[%s3620_s14 + $0xc] sm:$0x1] }
  0x18   : > { %3085 = vmatpush3.bf16.msra.mxu1 %v3398_v9  ;;  %3066 = vmatprep.subr.bf16.mxu0 %v3399_v10  ;;  %v251_v23 = vor.u32 %v250_v21, %v246_v18  ;;  %v618_v49 = vrot.slane %v616_v43, 1  ;;  %v621_v51 = vrot.slane %v619_v44, 2  ;;  %v2618_v4 = vcombine.low %v855_v62, %v3708_v63  ;;  %v3727_v7 = vld [vmem:[%s3620_s14 + $0x8] ss:$0 sps:$4 sm:$0xff]   ;;  %v3426_v8 = vld [vmem:[%s4149_s1 + $0x100] sm:$0xff]   ;;  %v3430_v27 = vld [vmem:[%s4149_s1 + $0x110] sm:$0xff]  }
  0x19   : > { %3086 = vmatprep.subr.bf16.mxu1 %v3400_v13  ;;  %v614_v52 = vor.u32 %v613_v48, %v610_v47  ;;  %v2619_v5 = vcombine.low %v3711_v0, %v3714_v1  ;;  %v3427_v12 = vld [vmem:[%s4149_s1 + $0x140] sm:$0xff]   ;;  %v751_v14 = vrot.slane %v2592_v3, 3  ;;  %v752_v19 = vrot.slane %v3727_v7, 3  ;;  %v3428_v21 = vld [vmem:[%s4149_s1 + $0x108] sm:$0xff]   ;;  %v3440_v39 = vld [vmem:[%s4149_s1 + $0x138] sm:$0xff]  }
  0x1a   : > { %v256_v26 = vsel %vm244_vm0, %v251_v23, %v255_v22  ;;  %v3683_v53 = vor.u32 %v621_v51, %v618_v49  ;;  %v888_v9 = vshrl.u32 %v2618_v4, 16  ;;  %v2644_v34 = vcombine.low %v3708_v63, %v3711_v0  ;;  %v3785_v37 = vld [vmem:[%s3620_s14 + $0xc] ss:$0 sps:$4 sm:$0x33]   ;;  %v3441_v40 = vld [vmem:[%s4149_s1 + $0x178] sm:$0xff]   ;;  %v3446_v44 = vld [vmem:[%s4149_s1 + $0x180] sm:$0xff]  }
  0x1b   : > { %3067 = vmatpush3.bf16.msra.mxu0 %v3399_v10  ;;  %3072 = vmatprep.mubr.bf16.mxu0 %v256_v26  ;;  %v891_v10 = vshll.u32 %v2618_v4, 16  ;;  %v896_v11 = vshrl.u32 %v2619_v5, 16  ;;  %v1154_v43 = vshll.u32 %v3785_v37, 16  ;;  %v3448_v48 = vld [vmem:[%s4149_s1 + $0x188] sm:$0xff]   ;;  %v3450_v51 = vld [vmem:[%s4149_s1 + $0x190] sm:$0xff]  }
  0x1c   : > { %3087 = vmatpush3.bf16.msra.mxu1 %v3400_v13  ;;  %3068 = vmatprep.subr.bf16.mxu0 %v3401_v16  ;;  %v623_v56 = vsel %vm606_vm2, %v614_v52, %v3683_v53  ;;  %v899_v13 = vshll.u32 %v2619_v5, 16  ;;  %v1147_v41 = vshrl.u32 %v2644_v34, 16  ;;  %v3449_v49 = vld [vmem:[%s4149_s1 + $0x1c8] sm:$0xff]   ;;  %v3451_v52 = vld [vmem:[%s4149_s1 + $0x1d0] sm:$0xff]   ;;  %v1262_v61 = vld [vmem:[%s3620_s14 + $0x4] sm:$0xc] }
  0x1d   : > { %3088 = vmatprep.subr.bf16.mxu1 %v3402_v17  ;;  %v898_v18 = vrot.slane %v896_v11, 3  ;;  %v3800_v47 = vrot.slane %v1154_v43, 1  ;;  %v3456_v62 = vld [vmem:[%s4149_s1 + $0x1a8] sm:$0xff]   ;;  %v2695_v3 = vcombine.low %v1262_v61, %v3711_v0  ;;  %v3458_v5 = vld [vmem:[%s4149_s1 + $0x1b0] sm:$0xff]  }
  0x1e   : > { %v901_v20 = vrot.slane %v899_v13, 4  ;;  %v3862_v11 = vld [vmem:[%s3620_s14 + $0xc] ss:$0 sps:$4 sm:$0x77]   ;;  %v1158_v13 = vshrl.u32 %v3785_v37, 16  ;;  %v3477_v43 = vld [vmem:[%s4149_s1 + $0x230] sm:$0xff]  }
  0x1f   : > { %3069 = vmatpush3.bf16.msra.mxu0 %v3401_v16  ;;  %v890_v16 = vrot.slane %v888_v9, 3  ;;  %v1415_v7 = vshrl.u32 %v2695_v3, 16  ;;  %v3916_v37 = vld [vmem:[%s3620_s14 + $0xc] sm:$0xf] }
  0x20   : > { %3089 = vmatpush3.bf16.msra.mxu1 %v3402_v17  ;;  %3070 = vmatprep.subr.bf16.mxu0 %v3403_v24  ;;  %v893_v17 = vrot.slane %v891_v10, 4  ;;  %v3739_v23 = vor.u32 %v901_v20, %v898_v18  ;;  %v3460_v10 = vld [vmem:[%s4149_s1 + $0x1b8] sm:$0xff]   ;;  %v3466_v20 = vld [vmem:[%s4149_s1 + $0x240] sm:$0xff]  }
  0x21   : > { %3090 = vmatprep.subr.bf16.mxu1 %v3404_v25 }
  0x22   : > { %v894_v22 = vor.u32 %v893_v17, %v890_v16 }
  0x23   : > { %3071 = vmatpush3.bf16.msra.mxu0 %v3403_v24  ;;  %v3429_v24 = vld [vmem:[%s4149_s1 + $0x148] sm:$0xff]  }
  0x24   : > { %3091 = vmatpush3.bf16.msra.mxu1 %v3404_v25  ;;  %3096 = vmatprep.subr.bf16.mxu0 %v3408_v28  ;;  %v753_v25 = vsel %vm750_vm3, %v751_v14, %v752_v19  ;;  %v903_v26 = vsel %vm886_vm4, %v894_v22, %v3739_v23  ;;  %v1417_v14 = vrot.slane %v1415_v7, 2  ;;  %v1288_v22 = vrot.slane %v2695_v3, 2 }
  0x25   : > { %3116 = vmatprep.subr.bf16.mxu1 %v3409_v30 }
  0x26   : > { %3073 = vmatmul.mubr.bf16.vlgmr.msra.gmra.mrb[0].mxu0 %v259_v31  ;;  %v3435_v31 = vld [vmem:[%s4149_s1 + $0x160] sm:$0xff]  }
  0x27   : > { %3093 = vmatmul.mubr.bf16.vlgmr.msra.gmra.mrb[0].mxu1 %v3407_v29  ;;  %3097 = vmatpush3.bf16.msra.mxu0 %v3408_v28  ;;  %v3432_v28 = vld [vmem:[%s4149_s1 + $0x118] sm:$0xff]  }
  0x28   : > { %3117 = vmatpush3.bf16.msra.mxu1 %v3409_v30  ;;  %3098 = vmatprep.subr.bf16.mxu0 %v3410_v32  ;;  %v3433_v29 = vld [vmem:[%s4149_s1 + $0x158] sm:$0xff]   ;;  %v3434_v30 = vld [vmem:[%s4149_s1 + $0x120] sm:$0xff]  }
  0x29   : > { %3118 = vmatprep.subr.bf16.mxu1 %v3411_v33  ;;  %3112 = vmatprep.mubr.bf16.mxu0 %v483_v46 }
  0x2a   : > { %3132 = vmatprep.mubr.bf16.mxu1 %v623_v56  ;;  %v3455_v56 = vld [vmem:[%s4149_s1 + $0x1e0] sm:$0xff]  }
  0x2b   : > { %3099 = vmatpush3.bf16.msra.mxu0 %v3410_v32  ;;  %v3436_v32 = vld [vmem:[%s4149_s1 + $0x128] sm:$0xff]  }
  0x2c   : > { %3119 = vmatpush3.bf16.msra.mxu1 %v3411_v33  ;;  %3100 = vmatprep.subr.bf16.mxu0 %v3412_v35  ;;  %v3437_v33 = vld [vmem:[%s4149_s1 + $0x168] sm:$0xff]  }
  0x2d   : > { %3120 = vmatprep.subr.bf16.mxu1 %v3413_v36 }
  0x2f   : > { %3101 = vmatpush3.bf16.msra.mxu0 %v3412_v35  ;;  %v3438_v35 = vld [vmem:[%s4149_s1 + $0x130] sm:$0xff]  }
  0x30   : > { %3121 = vmatpush3.bf16.msra.mxu1 %v3413_v36  ;;  %3102 = vmatprep.subr.bf16.mxu0 %v3414_v45  ;;  %v3439_v36 = vld [vmem:[%s4149_s1 + $0x170] sm:$0xff]  }
  0x31   : > { %3122 = vmatprep.subr.bf16.mxu1 %v3415_v50 }
  0x33   : > { %3103 = vmatpush3.bf16.msra.mxu0 %v3414_v45  ;;  %v3447_v45 = vld [vmem:[%s4149_s1 + $0x1c0] sm:$0xff]  }
  0x34   : > { %3123 = vmatpush3.bf16.msra.mxu1 %v3415_v50  ;;  %3104 = vmatprep.subr.bf16.mxu0 %v3416_v54 }
  0x35   : > { %3124 = vmatprep.subr.bf16.mxu1 %v3417_v55 }
  0x37   : > { %3105 = vmatpush3.bf16.msra.mxu0 %v3416_v54  ;;  %v3453_v54 = vld [vmem:[%s4149_s1 + $0x1d8] sm:$0xff]  }
  0x38   : > { %3125 = vmatpush3.bf16.msra.mxu1 %v3417_v55  ;;  %3106 = vmatprep.subr.bf16.mxu0 %v3418_v57  ;;  %v3454_v55 = vld [vmem:[%s4149_s1 + $0x1a0] sm:$0xff]  }
  0x39   : > { %3126 = vmatprep.subr.bf16.mxu1 %v3419_v58 }
  0x3b   : > { %3107 = vmatpush3.bf16.msra.mxu0 %v3418_v57  ;;  %v3832_v57 = vld [vmem:[%s3620_s14 + $0xc] ss:$0 sps:$4 sm:$0xff]  }
  0x3c   : > { %3127 = vmatpush3.bf16.msra.mxu1 %v3419_v58  ;;  %3108 = vmatprep.subr.bf16.mxu0 %v3420_v59  ;;  %v1532_v58 = vld [vmem:[%s3620_s14 + $0x4] sm:$0x8]  ;;  %v1426_v9 = vshll.u32 %v3832_v57, 16 }
  0x3d   : > { %3128 = vmatprep.subr.bf16.mxu1 %v3421_v60 }
  0x3e   : > { %v1428_v18 = vrot.slane %v1426_v9, 3 }
  0x3f   : > { %3109 = vmatpush3.bf16.msra.mxu0 %v3420_v59  ;;  %v2746_v59 = vcombine.low %v1532_v58, %v3711_v0  ;;  %v1418_v0 = vshll.u32 %v2695_v3, 16  ;;  %v3479_v58 = vld [vmem:[%s4149_s1 + $0x238] sm:$0xff]  }
  0x40   : > { %3129 = vmatpush3.bf16.msra.mxu1 %v3421_v60  ;;  %3110 = vmatprep.subr.bf16.mxu0 %v3422_v2  ;;  %v1554_v60 = vrot.slane %v3832_v57, 3 }
  0x41   : > { %3130 = vmatprep.subr.bf16.mxu1 %v3423_v6  ;;  %v1553_v63 = vrot.slane %v2746_v59, 3  ;;  %v1420_v16 = vrot.slane %v1418_v0, 3 }
  0x43   : > { %3111 = vmatpush3.bf16.msra.mxu0 %v3422_v2  ;;  %v3457_v2 = vld [vmem:[%s4149_s1 + $0x1e8] sm:$0xff]   ;;  %v3848_v4 = vsel %vm750_vm3, %v1553_v63, %v1554_v60 }
  0x44   : > { %3131 = vmatpush3.bf16.msra.mxu1 %v3423_v6  ;;  %3136 = vmatprep.subr.bf16.mxu0 %v3426_v8  ;;  %v3459_v6 = vld [vmem:[%s4149_s1 + $0x1f0] sm:$0xff]  }
  0x45   : > { %3156 = vmatprep.subr.bf16.mxu1 %v3427_v12 }
  0x46   : > { %3113 = vmatmul.mubr.bf16.vlgmr.msra.gmra.mrb[4].mxu0 %v482_v38  ;;  %v1149_v38 = vshll.u32 %v2644_v34, 16 }
  0x47   : > { %3133 = vmatmul.mubr.bf16.vlgmr.msra.gmra.mrb[4].mxu1 %v3683_v53  ;;  %3137 = vmatpush3.bf16.msra.mxu0 %v3426_v8  ;;  %v3452_v53 = vld [vmem:[%s4149_s1 + $0x198] sm:$0xff]   ;;  %v1423_v8 = vshrl.u32 %v3832_v57, 16  ;;  %v3508_v57 = vld [vmem:[%s4149_s1 + $0x350] sm:$0xff]  }
  0x48   : > { %3157 = vmatpush3.bf16.msra.mxu1 %v3427_v12  ;;  %3138 = vmatprep.subr.bf16.mxu0 %v3428_v21  ;;  %v1151_v42 = vrot.slane %v1149_v38, 1  ;;  %v3461_v12 = vld [vmem:[%s4149_s1 + $0x1f8] sm:$0xff]   ;;  %v1660_v38 = vld [vmem:[%s3620_s14 + $0x10] sm:$0x1] }
  0x49   : > { %3158 = vmatprep.subr.bf16.mxu1 %v3429_v24  ;;  %3152 = vmatprep.mubr.bf16.mxu0 %v753_v25  ;;  %v1425_v17 = vrot.slane %v1423_v8, 2  ;;  %v3467_v25 = vld [vmem:[%s4149_s1 + $0x208] sm:$0xff]  }
  0x4a   : > { %3172 = vmatprep.mubr.bf16.mxu1 %v903_v26  ;;  %v1152_v46 = vor.u32 %v1151_v42, %v1147_v41  ;;  %v1421_v26 = vor.u32 %v1420_v16, %v1417_v14  ;;  %v2772_v41 = vcombine.low %v3916_v37, %v1660_v38  ;;  %v2074_v42 = vld [vmem:[%s3620_s14 + $0x8] sm:$0xc] }
  0x4b   : > { %3139 = vmatpush3.bf16.msra.mxu0 %v3428_v21  ;;  %v2645_v21 = vcombine.low %v3714_v1, %v3714_v1  ;;  %v3468_v1 = vld [vmem:[%s4149_s1 + $0x248] sm:$0xff]  }
  0x4c   : > { %3159 = vmatpush3.bf16.msra.mxu1 %v3429_v24  ;;  %3140 = vmatprep.subr.bf16.mxu0 %v3430_v27  ;;  %v1157_v50 = vsel %vm244_vm0, %v1152_v46, %v3800_v47  ;;  %v1160_v24 = vor.u32 %v1158_v13, %v3800_v47  ;;  %v3539_v46 = vld [vmem:[%s3620_s14 + $0x10] ss:$0 sps:$4 sm:$0xff]  }
  0x4d   : > { %3160 = vmatprep.subr.bf16.mxu1 %v3431_v15  ;;  %v3478_v47 = vld [vmem:[%s4149_s1 + $0x270] sm:$0xff]  }
  0x4f   : > { %3141 = vmatpush3.bf16.msra.mxu0 %v3430_v27  ;;  %v3881_v27 = vor.u32 %v1428_v18, %v1425_v17  ;;  %v3486_v17 = vld [vmem:[%s4149_s1 + $0x288] sm:$0xff]  }
  0x50   : > { %3161 = vmatpush3.bf16.msra.mxu1 %v3431_v15  ;;  %3142 = vmatprep.subr.bf16.mxu0 %v3432_v28  ;;  %v3487_v18 = vld [vmem:[%s4149_s1 + $0x2c8] sm:$0xff]  }
  0x51   : > { %3162 = vmatprep.subr.bf16.mxu1 %v3433_v29 }
  0x53   : > { %3143 = vmatpush3.bf16.msra.mxu0 %v3432_v28  ;;  %v1430_v28 = vsel %vm1413_vm6, %v1421_v26, %v3881_v27  ;;  %v3495_v26 = vld [vmem:[%s4149_s1 + $0x2e8] sm:$0xff]  }
  0x54   : > { %3163 = vmatpush3.bf16.msra.mxu1 %v3433_v29  ;;  %3144 = vmatprep.subr.bf16.mxu0 %v3434_v30  ;;  %v3469_v29 = vld [vmem:[%s4149_s1 + $0x210] sm:$0xff]  }
  0x55   : > { %3164 = vmatprep.subr.bf16.mxu1 %v3435_v31 }
  0x57   : > { %3145 = vmatpush3.bf16.msra.mxu0 %v3434_v30  ;;  %v3470_v30 = vld [vmem:[%s4149_s1 + $0x250] sm:$0xff]  }
  0x58   : > { %3165 = vmatpush3.bf16.msra.mxu1 %v3435_v31  ;;  %3146 = vmatprep.subr.bf16.mxu0 %v3436_v32  ;;  %v3471_v31 = vld [vmem:[%s4149_s1 + $0x218] sm:$0xff]  }
  0x59   : > { %3166 = vmatprep.subr.bf16.mxu1 %v3437_v33 }
  0x5b   : > { %3147 = vmatpush3.bf16.msra.mxu0 %v3436_v32  ;;  %v3472_v32 = vld [vmem:[%s4149_s1 + $0x258] sm:$0xff]  }
  0x5c   : > { %3167 = vmatpush3.bf16.msra.mxu1 %v3437_v33  ;;  %3148 = vmatprep.subr.bf16.mxu0 %v3438_v35  ;;  %v3473_v33 = vld [vmem:[%s4149_s1 + $0x220] sm:$0xff]  }
  0x5d   : > { %3168 = vmatprep.subr.bf16.mxu1 %v3439_v36 }
  0x5f   : > { %3149 = vmatpush3.bf16.msra.mxu0 %v3438_v35  ;;  %v3475_v35 = vld [vmem:[%s4149_s1 + $0x228] sm:$0xff]  }
  0x60   : > { %3169 = vmatpush3.bf16.msra.mxu1 %v3439_v36  ;;  %3150 = vmatprep.subr.bf16.mxu0 %v3440_v39  ;;  %v3476_v36 = vld [vmem:[%s4149_s1 + $0x268] sm:$0xff]  }
  0x61   : > { %3170 = vmatprep.subr.bf16.mxu1 %v3441_v40 }
  0x63   : > { %3151 = vmatpush3.bf16.msra.mxu0 %v3440_v39  ;;  %v3920_v39 = vld [vmem:[%s3620_s14 + $0x10] ss:$0 sps:$4 sm:$0x77]  }
  0x64   : > { %3171 = vmatpush3.bf16.msra.mxu1 %v3441_v40  ;;  %3176 = vmatprep.subr.bf16.mxu0 %v3446_v44  ;;  %v3501_v40 = vld [vmem:[%s3620_s14 + $0x4] sm:$0xf8]  }
  0x65   : > { %3196 = vmatprep.subr.bf16.mxu1 %v3447_v45 }
  0x66   : > { %3153 = vmatmul.mubr.bf16.vlgmr.msra.gmra.mrb[8].mxu0 %v752_v19  ;;  %v3465_v19 = vld [vmem:[%s4149_s1 + $0x200] sm:$0xff]  }
  0x67   : > { %3173 = vmatmul.mubr.bf16.vlgmr.msra.gmra.mrb[8].mxu1 %v3739_v23  ;;  %3177 = vmatpush3.bf16.msra.mxu0 %v3446_v44  ;;  %v1289_v23 = vrot.slane %v3862_v11, 2  ;;  %v2848_v44 = vcombine.low %v2074_v42, %v3916_v37  ;;  %v3490_v11 = vld [vmem:[%s4149_s1 + $0x298] sm:$0xff]  }
  0x68   : > { %3197 = vmatpush3.bf16.msra.mxu1 %v3447_v45  ;;  %3178 = vmatprep.subr.bf16.mxu0 %v3448_v48  ;;  %v2096_v45 = vrot.slane %v3920_v39, 2 }
  0x69   : > { %3198 = vmatprep.subr.bf16.mxu1 %v3449_v49  ;;  %3192 = vmatprep.mubr.bf16.mxu0 %v2644_v34  ;;  %v1290_v15 = vsel %vm1287_vm5, %v1288_v22, %v1289_v23  ;;  %v3474_v34 = vld [vmem:[%s4149_s1 + $0x260] sm:$0xff]   ;;  %v3491_v22 = vld [vmem:[%s4149_s1 + $0x2d8] sm:$0xff]  }
  0x6a   : > { %3212 = vmatprep.mubr.bf16.mxu1 %v1157_v50  ;;  %v2221_v50 = vshrl.u32 %v2848_v44, 16 }
  0x6b   : > { %3179 = vmatpush3.bf16.msra.mxu0 %v3448_v48  ;;  %v1689_v48 = vshrl.u32 %v3501_v40, 16 }
  0x6c   : > { %3199 = vmatpush3.bf16.msra.mxu1 %v3449_v49  ;;  %3180 = vmatprep.subr.bf16.mxu0 %v3450_v51  ;;  %v2095_v49 = vrot.slane %v2848_v44, 2  ;;  %v2223_v61 = vrot.slane %v2221_v50, 2 }
  0x6d   : > { %3200 = vmatprep.subr.bf16.mxu1 %v3451_v52 }
  0x6e   : > { %v3940_v59 = vsel %vm1287_vm5, %v2095_v49, %v2096_v45 }
  0x6f   : > { %3181 = vmatpush3.bf16.msra.mxu0 %v3450_v51  ;;  %v2224_v51 = vshll.u32 %v2848_v44, 16 }
  0x70   : > { %3201 = vmatpush3.bf16.msra.mxu1 %v3451_v52  ;;  %3182 = vmatprep.subr.bf16.mxu0 %v3452_v53  ;;  %v2229_v52 = vshrl.u32 %v3539_v46, 16 }
  0x71   : > { %3202 = vmatprep.subr.bf16.mxu1 %v3453_v54 }
  0x72   : > { %v2231_v63 = vrot.slane %v2229_v52, 2  ;;  %v3510_v52 = vld [vmem:[%s4149_s1 + $0x358] sm:$0xff]  }
  0x73   : > { %3183 = vmatpush3.bf16.msra.mxu0 %v3452_v53  ;;  %v1692_v53 = vshll.u32 %v3501_v40, 16  ;;  %v3503_v40 = vld [vmem:[%s4149_s1 + $0x300] sm:$0xff]  }
  0x74   : > { %3203 = vmatpush3.bf16.msra.mxu1 %v3453_v54  ;;  %3184 = vmatprep.subr.bf16.mxu0 %v3454_v55  ;;  %v1697_v54 = vshrl.u32 %v2772_v41, 16 }
  0x75   : > { %3204 = vmatprep.subr.bf16.mxu1 %v3455_v56  ;;  %v1694_v7 = vrot.slane %v1692_v53, 4  ;;  %v3511_v53 = vld [vmem:[%s4149_s1 + $0x320] sm:$0xff]  }
  0x76   : > { %v1699_v0 = vrot.slane %v1697_v54, 3  ;;  %v3512_v54 = vld [vmem:[%s4149_s1 + $0x360] sm:$0xff]  }
  0x77   : > { %3185 = vmatpush3.bf16.msra.mxu0 %v3454_v55  ;;  %v1700_v55 = vshll.u32 %v2772_v41, 16  ;;  %v3504_v41 = vld [vmem:[%s4149_s1 + $0x340] sm:$0xff]  }
  0x78   : > { %3205 = vmatpush3.bf16.msra.mxu1 %v3455_v56  ;;  %3186 = vmatprep.subr.bf16.mxu0 %v3456_v62  ;;  %v2232_v56 = vshll.u32 %v3539_v46, 16 }
  0x79   : > { %3206 = vmatprep.subr.bf16.mxu1 %v3457_v2  ;;  %v1702_v8 = vrot.slane %v1700_v55, 4  ;;  %v3513_v55 = vld [vmem:[%s4149_s1 + $0x328] sm:$0xff]  }
  0x7a   : > { %v2234_v3 = vrot.slane %v2232_v56, 3  ;;  %v3514_v56 = vld [vmem:[%s4149_s1 + $0x368] sm:$0xff]  }
  0x7b   : > { %3187 = vmatpush3.bf16.msra.mxu0 %v3456_v62  ;;  %v2226_v62 = vrot.slane %v2224_v51, 3  ;;  %v3957_v16 = vor.u32 %v1702_v8, %v1699_v0  ;;  %v3507_v51 = vld [vmem:[%s4149_s1 + $0x310] sm:$0xff]   ;;  %v3523_v0 = vld [vmem:[%s4149_s1 + $0x3c0] sm:$0xff]   ;;  %v3524_v8 = vld [vmem:[%s4149_s1 + $0x388] sm:$0xff]  }
  0x7c   : > { %3207 = vmatpush3.bf16.msra.mxu1 %v3457_v2  ;;  %3188 = vmatprep.subr.bf16.mxu0 %v3458_v5  ;;  %v3480_v2 = vld [vmem:[%s4149_s1 + $0x278] sm:$0xff]   ;;  %v3945_v9 = vor.u32 %v2234_v3, %v2231_v63  ;;  %v2338_v63 = vld [vmem:[%s4151_s3] sm:$0xff] }
  0x7d   : > { %3208 = vmatprep.subr.bf16.mxu1 %v3459_v6  ;;  %v3518_v3 = vld [vmem:[%s4149_s1 + $0x378] sm:$0xff]  }
  0x7f   : > { %3189 = vmatpush3.bf16.msra.mxu0 %v3458_v5  ;;  %v1691_v5 = vrot.slane %v1689_v48, 3  ;;  %v3506_v48 = vld [vmem:[%s4149_s1 + $0x348] sm:$0xff]  }
  0x80   : > { %3209 = vmatpush3.bf16.msra.mxu1 %v3459_v6  ;;  %3190 = vmatprep.subr.bf16.mxu0 %v3460_v10  ;;  %v2227_v6 = vor.u32 %v2226_v62, %v2223_v61  ;;  %v3516_v61 = vld [vmem:[%s4149_s1 + $0x370] sm:$0xff]   ;;  %v3550_v62 = vmov 0  }
  0x81   : > { %3210 = vmatprep.subr.bf16.mxu1 %v3461_v12  ;;  %v1695_v14 = vor.u32 %v1694_v7, %v1691_v5  ;;  %3387 = vset.pattern.permute.xlu0 %v3550_v62  ;;  %v2339_v5 = vld [vmem:[%s4151_s3 + $0x8] sm:$0xff]  ;;  %v3522_v7 = vld [vmem:[%s4149_s1 + $0x380] sm:$0xff]  }
  0x82   : > { %v3955_v13 = vsel %vm1413_vm6, %v2227_v6, %v3945_v9  ;;  %2353 = vperm.xlu0 %3387, %v2338_v63   ;;  %3388 = vset.pattern.permute.xlu1 %v3550_v62  ;;  %v2340_v6 = vld [vmem:[%s4151_s3 + $0x10] sm:$0x3] }
  0x83   : > { %3191 = vmatpush3.bf16.msra.mxu0 %v3460_v10  ;;  %v3484_v10 = vld [vmem:[%s4149_s1 + $0x280] sm:$0xff]   ;;  %2363 = vperm.xlu1 %3388, %v2340_v6  }
  0x84   : > { %3211 = vmatpush3.bf16.msra.mxu1 %v3461_v12  ;;  %3216 = vmatprep.subr.bf16.mxu0 %v3465_v19  ;;  %v3485_v12 = vld [vmem:[%s4149_s1 + $0x2c0] sm:$0xff]  }
  0x85   : > { %3236 = vmatprep.subr.bf16.mxu1 %v3466_v20 }
  0x86   : > { %3193 = vmatmul.mubr.bf16.vlgmr.msra.gmra.mrb[12].mxu0 %v2645_v21  ;;  %v3489_v21 = vld [vmem:[%s4149_s1 + $0x2d0] sm:$0xff]   ;;  %2358 = vperm.xlu0 %3387, %v2339_v5  }
  0x87   : > { %3213 = vmatmul.mubr.bf16.vlgmr.msra.gmra.mrb[12].mxu1 %v1160_v24  ;;  %3217 = vmatpush3.bf16.msra.mxu0 %v3465_v19  ;;  %v1704_v19 = vsel %vm886_vm4, %v1695_v14, %v3957_v16  ;;  %v3494_v24 = vld [vmem:[%s4149_s1 + $0x2a8] sm:$0xff]   ;;  %v3527_v14 = vld [vmem:[%s4149_s1 + $0x3d0] sm:$0xff]  }
  0x88   : > { %3237 = vmatpush3.bf16.msra.mxu1 %v3466_v20  ;;  %3218 = vmatprep.subr.bf16.mxu0 %v3467_v25  ;;  %v3488_v20 = vld [vmem:[%s4149_s1 + $0x290] sm:$0xff]  }
  0x89   : > { %3238 = vmatprep.subr.bf16.mxu1 %v3468_v1  ;;  %3232 = vmatprep.mubr.bf16.mxu0 %v1290_v15  ;;  %v3497_v15 = vld [vmem:[%s4149_s1 + $0x2f0] sm:$0xff]  }
  0x8a   : > { %3252 = vmatprep.mubr.bf16.mxu1 %v1430_v28 }
  0x8b   : > { %3219 = vmatpush3.bf16.msra.mxu0 %v3467_v25  ;;  %v1806_v25 = vld [vmem:[%s3620_s14 + $0x8] sm:$0xe] }
  0x8c   : > { %3239 = vmatpush3.bf16.msra.mxu1 %v3468_v1  ;;  %3220 = vmatprep.subr.bf16.mxu0 %v3469_v29  ;;  %v3496_v1 = vld [vmem:[%s4149_s1 + $0x2b0] sm:$0xff]  }
  0x8d   : > { %3240 = vmatprep.subr.bf16.mxu1 %v3470_v30 }
  0x8f   : > { %3221 = vmatpush3.bf16.msra.mxu0 %v3469_v29 }
  0x90   : > { %3241 = vmatpush3.bf16.msra.mxu1 %v3470_v30  ;;  %3222 = vmatprep.subr.bf16.mxu0 %v3471_v31  ;;  %v1965_v30 = vshrl.u32 %v3920_v39, 16 }
  0x91   : > { %3242 = vmatprep.subr.bf16.mxu1 %v3472_v32 }
  0x93   : > { %3223 = vmatpush3.bf16.msra.mxu0 %v3471_v31  ;;  %v1968_v31 = vshll.u32 %v3920_v39, 16 }
  0x94   : > { %3243 = vmatpush3.bf16.msra.mxu1 %v3472_v32  ;;  %3224 = vmatprep.subr.bf16.mxu0 %v3473_v33  ;;  %v3498_v32 = vld [vmem:[%s4149_s1 + $0x2b8] sm:$0xff]  }
  0x95   : > { %3244 = vmatprep.subr.bf16.mxu1 %v3474_v34  ;;  %v1970_v38 = vrot.slane %v1968_v31, 2 }
  0x97   : > { %3225 = vmatpush3.bf16.msra.mxu0 %v3473_v33  ;;  %v3499_v33 = vld [vmem:[%s4149_s1 + $0x2f8] sm:$0xff]  }
  0x98   : > { %3245 = vmatpush3.bf16.msra.mxu1 %v3474_v34  ;;  %3226 = vmatprep.subr.bf16.mxu0 %v3475_v35  ;;  %v4012_v34 = vld [vmem:[%s3620_s14 + $0x10] ss:$0 sps:$4 sm:$0x33]  }
  0x99   : > { %3246 = vmatprep.subr.bf16.mxu1 %v3476_v36 }
  0x9b   : > { %3227 = vmatpush3.bf16.msra.mxu0 %v3475_v35 }
  0x9c   : > { %3247 = vmatpush3.bf16.msra.mxu1 %v3476_v36  ;;  %3228 = vmatprep.subr.bf16.mxu0 %v3477_v43 }
  0x9d   : > { %3248 = vmatprep.subr.bf16.mxu1 %v3478_v47 }
  0x9f   : > { %3229 = vmatpush3.bf16.msra.mxu0 %v3477_v43  ;;  %v1832_v43 = vrot.slane %v4012_v34, 1 }
  0xa0   : > { %3249 = vmatpush3.bf16.msra.mxu1 %v3478_v47  ;;  %3230 = vmatprep.subr.bf16.mxu0 %v3479_v58  ;;  %v3505_v47 = vld [vmem:[%s4149_s1 + $0x308] sm:$0xff]  }
  0xa1   : > { %3250 = vmatprep.subr.bf16.mxu1 %v3480_v2 }
  0xa3   : > { %3231 = vmatpush3.bf16.msra.mxu0 %v3479_v58  ;;  %v3515_v58 = vld [vmem:[%s4149_s1 + $0x330] sm:$0xff]  }
  0xa4   : > { %3251 = vmatpush3.bf16.msra.mxu1 %v3480_v2  ;;  %3256 = vmatprep.subr.bf16.mxu0 %v3484_v10  ;;  %v3517_v2 = vld [vmem:[%s4149_s1 + $0x338] sm:$0xff]  }
  0xa5   : > { %3276 = vmatprep.subr.bf16.mxu1 %v3485_v12 }
  0xa6   : > { %3233 = vmatmul.mubr.bf16.vlgmr.msra.gmra.mrb[16].mxu0 %v1289_v23  ;;  %v3493_v23 = vld [vmem:[%s4149_s1 + $0x2e0] sm:$0xff]  }
  0xa7   : > { %3253 = vmatmul.mubr.bf16.vlgmr.msra.gmra.mrb[16].mxu1 %v3881_v27  ;;  %3257 = vmatpush3.bf16.msra.mxu0 %v3484_v10  ;;  %v2797_v27 = vcombine.low %v1806_v25, %v3916_v37  ;;  %v1967_v37 = vrot.slane %v1965_v30, 1  ;;  %v3525_v10 = vld [vmem:[%s4149_s1 + $0x3c8] sm:$0xff]  }
  0xa8   : > { %3277 = vmatpush3.bf16.msra.mxu1 %v3485_v12  ;;  %3258 = vmatprep.subr.bf16.mxu0 %v3486_v17  ;;  %v3526_v12 = vld [vmem:[%s4149_s1 + $0x390] sm:$0xff]  }
  0xa9   : > { %3278 = vmatprep.subr.bf16.mxu1 %v3487_v18  ;;  %3272 = vmatprep.mubr.bf16.mxu0 %v3848_v4  ;;  %v3492_v4 = vld [vmem:[%s4149_s1 + $0x2a0] sm:$0xff]   ;;  %v1957_v28 = vshrl.u32 %v2797_v27, 16  ;;  %v1960_v29 = vshll.u32 %v2797_v27, 16  ;;  %v1831_v42 = vrot.slane %v2797_v27, 1  ;;  %v4021_v46 = vor.u32 %v1970_v38, %v1967_v37 }
  0xaa   : > { %3292 = vmatprep.mubr.bf16.mxu1 %v1704_v19  ;;  %v3533_v19 = vld [vmem:[%s4149_s1 + $0x3e8] sm:$0xff]  }
  0xab   : > { %3259 = vmatpush3.bf16.msra.mxu0 %v3486_v17  ;;  %v1959_v35 = vrot.slane %v1957_v28, 1  ;;  %v1962_v36 = vrot.slane %v1960_v29, 2  ;;  %v1833_v49 = vsel %vm480_vm1, %v1831_v42, %v1832_v43  ;;  %v3529_v17 = vld [vmem:[%s4149_s1 + $0x3d8] sm:$0xff]  }
  0xac   : > { %3279 = vmatpush3.bf16.msra.mxu1 %v3487_v18  ;;  %3260 = vmatprep.subr.bf16.mxu0 %v3488_v20  ;;  %v3532_v18 = vld [vmem:[%s4149_s1 + $0x3a8] sm:$0xff]   ;;  %v3537_v29 = vld [vmem:[%s4149_s1 + $0x3f8] sm:$0xff]  }
  0xad   : > { %3280 = vmatprep.subr.bf16.mxu1 %v3489_v21  ;;  %v1963_v44 = vor.u32 %v1962_v36, %v1959_v35 }
  0xaf   : > { %3261 = vmatpush3.bf16.msra.mxu0 %v3488_v20  ;;  %v1972_v50 = vsel %vm606_vm2, %v1963_v44, %v4021_v46  ;;  %v3534_v20 = vld [vmem:[%s4149_s1 + $0x3b0] sm:$0xff]  }
  0xb0   : > { %3281 = vmatpush3.bf16.msra.mxu1 %v3489_v21  ;;  %3262 = vmatprep.subr.bf16.mxu0 %v3490_v11 }
  0xb1   : > { %3282 = vmatprep.subr.bf16.mxu1 %v3491_v22 }
  0xb3   : > { %3263 = vmatpush3.bf16.msra.mxu0 %v3490_v11  ;;  %v3535_v11 = vld [vmem:[%s4149_s1 + $0x3f0] sm:$0xff]  }
  0xb4   : > { %3283 = vmatpush3.bf16.msra.mxu1 %v3491_v22  ;;  %3264 = vmatprep.subr.bf16.mxu0 %v3492_v4 }
  0xb5   : > { %3284 = vmatprep.subr.bf16.mxu1 %v3493_v23 }
  0xb7   : > { %3265 = vmatpush3.bf16.msra.mxu0 %v3492_v4 }
  0xb8   : > { %3285 = vmatpush3.bf16.msra.mxu1 %v3493_v23  ;;  %3266 = vmatprep.subr.bf16.mxu0 %v3494_v24 }
  0xb9   : > { %3286 = vmatprep.subr.bf16.mxu1 %v3495_v26 }
  0xbb   : > { %3267 = vmatpush3.bf16.msra.mxu0 %v3494_v24 }
  0xbc   : > { %3287 = vmatpush3.bf16.msra.mxu1 %v3495_v26  ;;  %3268 = vmatprep.subr.bf16.mxu0 %v3496_v1 }
  0xbd   : > { %3288 = vmatprep.subr.bf16.mxu1 %v3497_v15 }
  0xbf   : > { %3269 = vmatpush3.bf16.msra.mxu0 %v3496_v1 }
  0xc0   : > { %3289 = vmatpush3.bf16.msra.mxu1 %v3497_v15  ;;  %3270 = vmatprep.subr.bf16.mxu0 %v3498_v32  ;;  %v3536_v15 = vld [vmem:[%s4149_s1 + $0x3b8] sm:$0xff]  }
  0xc1   : > { %3290 = vmatprep.subr.bf16.mxu1 %v3499_v33 }
  0xc3   : > { %3271 = vmatpush3.bf16.msra.mxu0 %v3498_v32 }
  0xc4   : > { %3291 = vmatpush3.bf16.msra.mxu1 %v3499_v33  ;;  %3296 = vmatprep.subr.bf16.mxu0 %v3503_v40 }
  0xc5   : > { %3316 = vmatprep.subr.bf16.mxu1 %v3504_v41 }
  0xc6   : > { %3273 = vmatmul.mubr.bf16.vlgmr.msra.gmra.mrb[20].mxu0 %v1554_v60  ;;  %v3509_v60 = vld [vmem:[%s4149_s1 + $0x318] sm:$0xff]  }
  0xc7   : > { %3293 = vmatmul.mubr.bf16.vlgmr.msra.gmra.mrb[20].mxu1 %v3957_v16  ;;  %3297 = vmatpush3.bf16.msra.mxu0 %v3503_v40  ;;  %v3528_v16 = vld [vmem:[%s4149_s1 + $0x398] sm:$0xff]  }
  0xc8   : > { %3317 = vmatpush3.bf16.msra.mxu1 %v3504_v41  ;;  %3298 = vmatprep.subr.bf16.mxu0 %v3505_v47 }
  0xc9   : > { %3318 = vmatprep.subr.bf16.mxu1 %v3506_v48  ;;  %3312 = vmatprep.mubr.bf16.mxu0 %v1833_v49 }
  0xca   : > { %3332 = vmatprep.mubr.bf16.mxu1 %v1972_v50 }
  0xcb   : > { %3299 = vmatpush3.bf16.msra.mxu0 %v3505_v47 }
  0xcc   : > { %3319 = vmatpush3.bf16.msra.mxu1 %v3506_v48  ;;  %3300 = vmatprep.subr.bf16.mxu0 %v3507_v51 }
  0xcd   : > { %3320 = vmatprep.subr.bf16.mxu1 %v3508_v57 }
  0xcf   : > { %3301 = vmatpush3.bf16.msra.mxu0 %v3507_v51 }
  0xd0   : > { %3321 = vmatpush3.bf16.msra.mxu1 %v3508_v57  ;;  %3302 = vmatprep.subr.bf16.mxu0 %v3509_v60 }
  0xd1   : > { %3322 = vmatprep.subr.bf16.mxu1 %v3510_v52 }
  0xd3   : > { %3303 = vmatpush3.bf16.msra.mxu0 %v3509_v60 }
  0xd4   : > { %3323 = vmatpush3.bf16.msra.mxu1 %v3510_v52  ;;  %3304 = vmatprep.subr.bf16.mxu0 %v3511_v53 }
  0xd5   : > { %3324 = vmatprep.subr.bf16.mxu1 %v3512_v54 }
  0xd7   : > { %3305 = vmatpush3.bf16.msra.mxu0 %v3511_v53 }
  0xd8   : > { %3325 = vmatpush3.bf16.msra.mxu1 %v3512_v54  ;;  %3306 = vmatprep.subr.bf16.mxu0 %v3513_v55 }
  0xd9   : > { %3326 = vmatprep.subr.bf16.mxu1 %v3514_v56 }
  0xdb   : > { %3307 = vmatpush3.bf16.msra.mxu0 %v3513_v55 }
  0xdc   : > { %3327 = vmatpush3.bf16.msra.mxu1 %v3514_v56  ;;  %3308 = vmatprep.subr.bf16.mxu0 %v3515_v58 }
  0xdd   : > { %3328 = vmatprep.subr.bf16.mxu1 %v3516_v61 }
  0xdf   : > { %3309 = vmatpush3.bf16.msra.mxu0 %v3515_v58 }
  0xe0   : > { %3329 = vmatpush3.bf16.msra.mxu1 %v3516_v61  ;;  %3310 = vmatprep.subr.bf16.mxu0 %v3517_v2 }
  0xe1   : > { %3330 = vmatprep.subr.bf16.mxu1 %v3518_v3 }
  0xe3   : > { %3311 = vmatpush3.bf16.msra.mxu0 %v3517_v2 }
  0xe4   : > { %3331 = vmatpush3.bf16.msra.mxu1 %v3518_v3  ;;  %3336 = vmatprep.subr.bf16.mxu0 %v3522_v7 }
  0xe5   : > { %3356 = vmatprep.subr.bf16.mxu1 %v3523_v0 }
  0xe6   : > { %3313 = vmatmul.mubr.bf16.vlgmr.msra.gmra.mrb[24].mxu0 %v1832_v43 }
  0xe7   : > { %3333 = vmatmul.mubr.bf16.vlgmr.msra.gmra.mrb[24].mxu1 %v4021_v46  ;;  %3337 = vmatpush3.bf16.msra.mxu0 %v3522_v7 }
  0xe8   : > { %3357 = vmatpush3.bf16.msra.mxu1 %v3523_v0  ;;  %3338 = vmatprep.subr.bf16.mxu0 %v3524_v8 }
  0xe9   : > { %3358 = vmatprep.subr.bf16.mxu1 %v3525_v10  ;;  %3352 = vmatprep.mubr.bf16.mxu0 %v3940_v59  ;;  %v3530_v59 = vld [vmem:[%s4149_s1 + $0x3a0] sm:$0xff]  }
  0xea   : > { %3372 = vmatprep.mubr.bf16.mxu1 %v3955_v13  ;;  %v3531_v13 = vld [vmem:[%s4149_s1 + $0x3e0] sm:$0xff]  }
  0xeb   : > { %3339 = vmatpush3.bf16.msra.mxu0 %v3524_v8 }
  0xec   : > { %3359 = vmatpush3.bf16.msra.mxu1 %v3525_v10  ;;  %3340 = vmatprep.subr.bf16.mxu0 %v3526_v12 }
  0xed   : > { %3360 = vmatprep.subr.bf16.mxu1 %v3527_v14 }
  0xef   : > { %3341 = vmatpush3.bf16.msra.mxu0 %v3526_v12 }
  0xf0   : > { %3361 = vmatpush3.bf16.msra.mxu1 %v3527_v14  ;;  %3342 = vmatprep.subr.bf16.mxu0 %v3528_v16 }
  0xf1   : > { %3362 = vmatprep.subr.bf16.mxu1 %v3529_v17 }
  0xf3   : > { %3343 = vmatpush3.bf16.msra.mxu0 %v3528_v16 }
  0xf4   : > { %3363 = vmatpush3.bf16.msra.mxu1 %v3529_v17  ;;  %3344 = vmatprep.subr.bf16.mxu0 %v3530_v59 }
  0xf5   : > { %3364 = vmatprep.subr.bf16.mxu1 %v3531_v13 }
  0xf7   : > { %3345 = vmatpush3.bf16.msra.mxu0 %v3530_v59 }
  0xf8   : > { %3365 = vmatpush3.bf16.msra.mxu1 %v3531_v13  ;;  %3346 = vmatprep.subr.bf16.mxu0 %v3532_v18 }
  0xf9   : > { %v3074_v21 = vpop.f32.mrb[0].mxu0  ;;  %3366 = vmatprep.subr.bf16.mxu1 %v3533_v19 }
  0xfa   : > { %v3094_v22 = vpop.f32.mrb[0].mxu1  ;;  %v344_v4 = vpop.f32.mrb[1].mxu0 }
  0xfb   : > { %v454_v23 = vadd.f32 %v3094_v22, %v3074_v21  ;;  %v445_v24 = vpop.f32.mrb[1].mxu1  ;;  %v3075_v25 = vpop.f32.mrb[2].mxu0  ;;  %3347 = vmatpush3.bf16.msra.mxu0 %v3532_v18 }
  0xfc   : > { %v446_v26 = vadd.f32 %v445_v24, %v344_v4  ;;  %v3095_v27 = vpop.f32.mrb[2].mxu1  ;;  %3367 = vmatpush3.bf16.msra.mxu1 %v3533_v19  ;;  %v347_v1 = vpop.f32.mrb[3].mxu0  ;;  %3348 = vmatprep.subr.bf16.mxu0 %v3534_v20 }
  0xfd   : > { %v448_v28 = vpop.f32.mrb[3].mxu1  ;;  %3368 = vmatprep.subr.bf16.mxu1 %v3535_v11 }
  0xfe   : > { %v449_v30 = vadd.f32 %v448_v28, %v347_v1 }
  0xff   : > { %3349 = vmatpush3.bf16.msra.mxu0 %v3534_v20 }
 0x100   : > { %3369 = vmatpush3.bf16.msra.mxu1 %v3535_v11  ;;  %3350 = vmatprep.subr.bf16.mxu0 %v3536_v15 }
 0x101   : > { %3370 = vmatprep.subr.bf16.mxu1 %v3537_v29 }
 0x103   : > { %3351 = vmatpush3.bf16.msra.mxu0 %v3536_v15 }
 0x104   : > { %3371 = vmatpush3.bf16.msra.mxu1 %v3537_v29 }
 0x106   : > { %3353 = vmatmul.mubr.bf16.vlgmr.msra.gmra.mrb[28].mxu0 %v2096_v45 }
 0x107   : > { %3373 = vmatmul.mubr.bf16.vlgmr.msra.gmra.mrb[28].mxu1 %v3945_v9 }
 0x119   : > { %v3114_v31 = vpop.f32.mrb[4].mxu0 }
 0x11a   : > { %v584_v32 = vadd.f32 %v3114_v31, %v454_v23  ;;  %v3134_v33 = vpop.f32.mrb[4].mxu1  ;;  %v568_v34 = vpop.f32.mrb[5].mxu0 }
 0x11b   : > { %v582_v35 = vadd.f32 %v568_v34, %v446_v26  ;;  %v708_v36 = vpop.f32.mrb[5].mxu1  ;;  %v3115_v37 = vpop.f32.mrb[6].mxu0 }
 0x11c   : > { %v724_v38 = vadd.f32 %v3134_v33, %v584_v32  ;;  %v3135_v40 = vpop.f32.mrb[6].mxu1  ;;  %v571_v41 = vpop.f32.mrb[7].mxu0 }
 0x11d   : > { %v722_v42 = vadd.f32 %v708_v36, %v582_v35  ;;  %v583_v43 = vadd.f32 %v571_v41, %v449_v30  ;;  %v711_v44 = vpop.f32.mrb[7].mxu1 }
 0x11f   : > { %v723_v46 = vadd.f32 %v711_v44, %v583_v43 }
 0x139   : > { %v3154_v47 = vpop.f32.mrb[8].mxu0 }
 0x13a   : > { %v854_v48 = vadd.f32 %v3154_v47, %v724_v38  ;;  %v3174_v39 = vpop.f32.mrb[8].mxu1  ;;  %v838_v45 = vpop.f32.mrb[9].mxu0 }
 0x13b   : > { %v852_v49 = vadd.f32 %v838_v45, %v722_v42  ;;  %v988_v9 = vpop.f32.mrb[9].mxu1  ;;  %v3155_v50 = vpop.f32.mrb[10].mxu0 }
 0x13c   : > { %v1004_v51 = vadd.f32 %v3174_v39, %v854_v48  ;;  %v3175_v57 = vpop.f32.mrb[10].mxu1  ;;  %v841_v60 = vpop.f32.mrb[11].mxu0 }
 0x13d   : > { %v1002_v52 = vadd.f32 %v988_v9, %v852_v49  ;;  %v853_v53 = vadd.f32 %v841_v60, %v723_v46  ;;  %v991_v54 = vpop.f32.mrb[11].mxu1 }
 0x13f   : > { %v1003_v55 = vadd.f32 %v991_v54, %v853_v53 }
 0x159   : > { %v3194_v56 = vpop.f32.mrb[12].mxu0 }
 0x15a   : > { %v1124_v58 = vadd.f32 %v3194_v56, %v1004_v51  ;;  %v3214_v61 = vpop.f32.mrb[12].mxu1  ;;  %v1108_v62 = vpop.f32.mrb[13].mxu0 }
 0x15b   : > { %v1122_v63 = vadd.f32 %v1108_v62, %v1002_v52  ;;  %v1245_v2 = vpop.f32.mrb[13].mxu1  ;;  %v3195_v3 = vpop.f32.mrb[14].mxu0 }
 0x15c   : > { %v1261_v5 = vadd.f32 %v3214_v61, %v1124_v58  ;;  %v3215_v6 = vpop.f32.mrb[14].mxu1  ;;  %v1111_v7 = vpop.f32.mrb[15].mxu0 }
 0x15d   : > { %v1259_v0 = vadd.f32 %v1245_v2, %v1122_v63  ;;  %v1123_v8 = vadd.f32 %v1111_v7, %v1003_v55  ;;  %v1248_v10 = vpop.f32.mrb[15].mxu1  ;;  %v2354_v51 = vpop.permute.xlu0 %2353  ;;  %v2882_v55 = vld [vmem:[%s4150_s2] ss:$0 sm:$0xff] }
 0x15f   : > { %v1260_v12 = vadd.f32 %v1248_v10, %v1123_v8 }
 0x179   : > { %v3234_v14 = vpop.f32.mrb[16].mxu0 }
 0x17a   : > { %v1391_v16 = vadd.f32 %v3234_v14, %v1261_v5  ;;  %v3254_v17 = vpop.f32.mrb[16].mxu1  ;;  %v1375_v59 = vpop.f32.mrb[17].mxu0 }
 0x17b   : > { %v1389_v13 = vadd.f32 %v1375_v59, %v1259_v0  ;;  %v1515_v18 = vpop.f32.mrb[17].mxu1  ;;  %v3235_v19 = vpop.f32.mrb[18].mxu0 }
 0x17c   : > { %v1531_v20 = vadd.f32 %v3254_v17, %v1391_v16  ;;  %v3255_v21 = vpop.f32.mrb[18].mxu1  ;;  %v1378_v11 = vpop.f32.mrb[19].mxu0 }
 0x17d   : > { %v1529_v22 = vadd.f32 %v1515_v18, %v1389_v13  ;;  %v1390_v4 = vadd.f32 %v1378_v11, %v1260_v12  ;;  %v1518_v23 = vpop.f32.mrb[19].mxu1  ;;  %v2364_v5 = vpop.permute.xlu1 %2363 }
 0x17e   : > { %v2359_v14 = vpop.permute.xlu0 %2358 }
 0x17f   : > { %v1530_v24 = vadd.f32 %v1518_v23, %v1390_v4 }
 0x199   : > { %v3274_v25 = vpop.f32.mrb[20].mxu0 }
 0x19a   : > { %v1656_v26 = vadd.f32 %v3274_v25, %v1531_v20  ;;  %v3294_v27 = vpop.f32.mrb[20].mxu1  ;;  %v1640_v1 = vpop.f32.mrb[21].mxu0 }
 0x19b   : > { %v1654_v15 = vadd.f32 %v1640_v1, %v1529_v22  ;;  %v1789_v28 = vpop.f32.mrb[21].mxu1  ;;  %v3275_v29 = vpop.f32.mrb[22].mxu0 }
 0x19c   : > { %v1805_v30 = vadd.f32 %v3294_v27, %v1656_v26  ;;  %v3295_v31 = vpop.f32.mrb[22].mxu1  ;;  %v1643_v32 = vpop.f32.mrb[23].mxu0 }
 0x19d   : > { %v1803_v33 = vadd.f32 %v1789_v28, %v1654_v15  ;;  %v1655_v34 = vadd.f32 %v1643_v32, %v1530_v24  ;;  %v1792_v35 = vpop.f32.mrb[23].mxu1 }
 0x19f   : > { %v1804_v36 = vadd.f32 %v1792_v35, %v1655_v34 }
 0x1b9   : > { %v3314_v37 = vpop.f32.mrb[24].mxu0 }
 0x1ba   : > { %v1934_v38 = vadd.f32 %v3314_v37, %v1805_v30  ;;  %v3334_v40 = vpop.f32.mrb[24].mxu1  ;;  %v1918_v41 = vpop.f32.mrb[25].mxu0 }
 0x1bb   : > { %v1932_v42 = vadd.f32 %v1918_v41, %v1803_v33  ;;  %v2057_v43 = vpop.f32.mrb[25].mxu1  ;;  %v3315_v44 = vpop.f32.mrb[26].mxu0 }
 0x1bc   : > { %v2073_v46 = vadd.f32 %v3334_v40, %v1934_v38  ;;  %v3335_v47 = vpop.f32.mrb[26].mxu1  ;;  %v1921_v48 = vpop.f32.mrb[27].mxu0 }
 0x1bd   : > { %v2071_v39 = vadd.f32 %v2057_v43, %v1932_v42  ;;  %v1933_v45 = vadd.f32 %v1921_v48, %v1804_v36  ;;  %v2060_v49 = vpop.f32.mrb[27].mxu1 }
 0x1bf   : > { %v2072_v9 = vadd.f32 %v2060_v49, %v1933_v45 }
 0x1d9   : > { %v3354_v50 = vpop.f32.mrb[28].mxu0 }
 0x1da   : > { %v2198_v57 = vadd.f32 %v3354_v50, %v2073_v46  ;;  %v3374_v60 = vpop.f32.mrb[28].mxu1  ;;  %v2182_v52 = vpop.f32.mrb[29].mxu0 }
 0x1db   : > { %v2196_v53 = vadd.f32 %v2182_v52, %v2071_v39  ;;  %v2321_v54 = vpop.f32.mrb[29].mxu1  ;;  %v3355_v56 = vpop.f32.mrb[30].mxu0 }
 0x1dc   : > { %v2337_v58 = vadd.f32 %v3374_v60, %v2198_v57  ;;  %v3375_v61 = vpop.f32.mrb[30].mxu1  ;;  %v2185_v62 = vpop.f32.mrb[31].mxu0 }
 0x1dd   : > { %v2335_v63 = vadd.f32 %v2321_v54, %v2196_v53  ;;  %v2197_v2 = vadd.f32 %v2185_v62, %v2072_v9  ;;  %v2324_v3 = vpop.f32.mrb[31].mxu1 }
 0x1de   : > { %v2350_v6 = vadd.f32 %v2882_v55, %v2337_v58 }
 0x1df   : > { %v2348_v7 = vadd.f32 %v2882_v55, %v2335_v63  ;;  %v2336_v0 = vadd.f32 %v2324_v3, %v2197_v2 }
 0x1e0   : > { %v2368_v8 = vmul.f32 %v2364_v5, %v2350_v6 }
 0x1e1   : > { %v2366_v10 = vmul.f32 %v2354_v51, %v2348_v7  ;;  %v2349_v12 = vadd.f32 %v2882_v55, %v2336_v0 }
 0x1e2   : > { %v2381_v17 = vmul.f32 %v2368_v8, %v2368_v8  ;;  %v2371_v19 = vsel %vm2370_vm7, %v2368_v8, 0.0 }
 0x1e3   : > { %v2367_v16 = vmul.f32 %v2359_v14, %v2349_v12  ;;  %v2379_v13 = vmul.f32 %v2366_v10, %v2366_v10 }
 0x1e4   : > { %v2383_v11 = vsel %vm2370_vm7, %v2381_v17, 0.0 }
 0x1e5   : > { %v2369_v59 = vadd.f32 %v2367_v16, %v2366_v10  ;;  %v2380_v18 = vmul.f32 %v2367_v16, %v2367_v16 }
 0x1e7   : > { %v2382_v20 = vadd.f32 %v2380_v18, %v2379_v13  ;;  %v2372_v21 = vadd.f32 %v2371_v19, %v2369_v59 }
 0x1e9   : > { %v2373_v22 = vrot.slane %v2372_v21, 4  ;;  %v2384_v4 = vadd.f32 %v2383_v11, %v2382_v20 }
 0x1eb   : > { %v2374_v23 = vadd.f32 %v2373_v22, %v2372_v21  ;;  %v2385_v24 = vrot.slane %v2384_v4, 4 }
 0x1ed   : > { %v2375_v25 = vrot.slane %v2374_v23, 2  ;;  %v2386_v26 = vadd.f32 %v2385_v24, %v2384_v4 }
 0x1ef   : > { %v2376_v27 = vadd.f32 %v2375_v25, %v2374_v23  ;;  %v2387_v1 = vrot.slane %v2386_v26, 2 }
 0x1f1   : > { %v2377_v15 = vrot.slane %v2376_v27, 1  ;;  %v2388_v28 = vadd.f32 %v2387_v1, %v2386_v26 }
 0x1f3   : > { %v2378_v29 = vadd.f32 %v2377_v15, %v2376_v27  ;;  %v2389_v30 = vrot.slane %v2388_v28, 1 }
 0x1f5   : > { %v2390_v31 = vadd.f32 %v2389_v30, %v2388_v28  ;;  %v2391_v32 = vmul.f32 0.11111111, %v2378_v29 }
 0x1f7   : > { %v2392_v33 = vmul.f32 0.11111111, %v2390_v31  ;;  %v2393_v34 = vmul.f32 %v2391_v32, %v2391_v32  ;;  %v2396_v35 = vsub.f32 %v2366_v10, %v2391_v32  ;;  %v2397_v36 = vsub.f32 %v2367_v16, %v2391_v32 }
 0x1f8   : > { %v2398_v37 = vsub.f32 %v2368_v8, %v2391_v32 }
 0x1f9   : > { %v2394_v38 = vsub.f32 %v2392_v33, %v2393_v34 }
 0x1fb   : > { %v2395_v40 = vmax.f32 %v2394_v38, 0.0 }
 0x1fd   : > { %v2399_v41 = vadd.f32 1e-05, %v2395_v40 }
 0x1ff   : > { %3540 = vrsqrt.f32 %v2399_v41 }
 0x209   : > { %v3541_v42 = vpop.eup %3540 }
 0x20a   : > { %v2401_v43 = vmul.f32 %v3541_v42, %v2396_v35  ;;  %v2402_v44 = vmul.f32 %v3541_v42, %v2397_v36  ;;  %v2403_v46 = vmul.f32 %v3541_v42, %v2398_v37 }
 0x20c   : > { %vm2404_vm8 = vcmp.gt.f32.partialorder %v2401_v43, 0.0  ;;  %vm2405_vm9 = vcmp.gt.f32.partialorder %v2402_v44, 0.0  ;;  %vm2406_vm10 = vcmp.gt.f32.partialorder %v2403_v46, 0.0  ;;  %v2407_v47 = vmul.f32 0.2, %v2401_v43 }
 0x20d   : > { %v2408_v48 = vmul.f32 0.2, %v2402_v44  ;;  %v2409_v39 = vmul.f32 0.2, %v2403_v46 }
 0x20e   : > { %v2410_v45 = vsel %vm2404_vm8, %v2401_v43, %v2407_v47 }
 0x20f   : > { %v2411_v49 = vsel %vm2405_vm9, %v2402_v44, %v2408_v48  ;;  %v2412_v9 = vsel %vm2406_vm10, %v2403_v46, %v2409_v39 }
 0x210   : > { %v2890_v50 = vpack.c.bf16 %v2412_v9, %v2412_v9  ;;  %v2894_v51 = vpack.c.bf16 %v2411_v49, %v2410_v45 }
 0x212   : > { %2895 = vst [vmem:[%s197_s5] sm:$0xff] %v2894_v51   ;;  %2428 = vst [vmem:[%s197_s5 + $0x8] sm:$0x1] %v2890_v50 }
 0x213 PF: > { %s14_s15 = sadd.s32 1, %s3548_s15  }
 0x214   : > { %p11_p4 = scmp.ge.s32.totalorder %s14_s15, 4  }
 0x216   :  { %13 = sbr.rel (!%p11_p4) target bundleno = 1 (0x1), region = 81 }

// kernel: discriminator_forward.9
= control target key start
LH: loop header
LB: loop body
LE: loop exit
PB: predicated region body
PF: predicated region fallthrough
CT: control target
= control target key end

     0   :  { %s3269_s15 = smov 0   ;;  %s3881_s0 = inlined_call_operand.vmem [shape: bf16[2,32,128], index: 0, kind: input, shape index: {}]   ;;  %s3882_s1 = inlined_call_operand.vmem [shape: bf16[16,128,128], index: 1, kind: input, shape index: {}]   ;;  %s3883_s2 = inlined_call_operand.vmem [shape: f32[1,128], index: 2, kind: input, shape index: {}]   ;;  %s3884_s3 = inlined_call_operand.vmem [shape: f32[10,1], index: 3, kind: input, shape index: {}]   ;;  %s3885_s4 = inlined_call_operand.vmem [shape: bf16[2,10,128], index: 4, kind: output, shape index: {}]  }
   0x1 LB: > { %s2197_s16 = sadd.s32 4294967295, %s3239_s15   ;;  %p2201_p0 = scmp.ge.s32.totalorder %s3239_s15, 1  ;;  %s3239_s15 = sphi %s3269_s15, %s14_s15  }
   0x2   : > { %p162_p1 = scmp.lt.s32.totalorder %s3239_s15, 3 }
   0x4   : > { %p163_p2 = pnand %p2201_p0, %p162_p1 }
   0x5   : > { %v3079_v0 = vld [vmem:[%s3882_s1 + $0x40] sm:$0xff] (!%p163_p2)   ;;  %v3241_v1 = vmov (!%p163_p2), 0.0   ;;  %v3081_v3 = vld [vmem:[%s3882_s1 + $0x48] sm:$0xff] (!%p163_p2)   ;;  %vm3242_vm0 = vmmov (!%p163_p2), 0   ;;  %p188_p3 = scmp.lt.s32.totalorder (!%p163_p2), %s2197_s16, 1  ;;  %v3083_v5 = vld [vmem:[%s3882_s1 + $0x50] sm:$0xff] (!%p163_p2)  }
   0x6   : > { %166 = sbr.rel (%p163_p2) target bundleno = 513 (0x201), region = 36  ;;  %2747 = vmatprep.subr.bf16.mxu0 (!%p163_p2), %v3241_v1  ;;  %2767 = vmatprep.subr.bf16.mxu1 (!%p163_p2), %v3241_v1  ;;  %v3080_v2 = vld [vmem:[%s3882_s1] sm:$0xff] (!%p163_p2)   ;;  %v3082_v4 = vld [vmem:[%s3882_s1 + $0x8] sm:$0xff] (!%p163_p2)   ;;  %v3084_v6 = vld [vmem:[%s3882_s1 + $0x10] sm:$0xff] (!%p163_p2)   ;;  %vm931_vm1 = vsmask.f32 (!%p163_p2), 4352 }
   0x7   : > { %2748 = vmatpush3.bf16.msra.mxu0 (!%p163_p2), %v3079_v0  ;;  %2763 = vmatprep.mubr.msk.bf16.mxu0 (!%p163_p2), %vm3242_vm0, %v3241_v1  ;;  %v3085_v7 = vld [vmem:[%s3882_s1 + $0x58] sm:$0xff] (!%p163_p2)   ;;  %v3087_v9 = vld [vmem:[%s3882_s1 + $0x60] sm:$0xff] (!%p163_p2)   ;;  %v3089_v14 = vld [vmem:[%s3882_s1 + $0x68] sm:$0xff] (!%p163_p2)  }
   0x8   : > { %2768 = vmatpush3.bf16.msra.mxu1 (!%p163_p2), %v3080_v2  ;;  %2749 = vmatprep.subr.bf16.mxu0 (!%p163_p2), %v3241_v1  ;;  %v3086_v8 = vld [vmem:[%s3882_s1 + $0x18] sm:$0xff] (!%p163_p2)   ;;  %v3088_v10 = vld [vmem:[%s3882_s1 + $0x20] sm:$0xff] (!%p163_p2)   ;;  %v3090_v15 = vld [vmem:[%s3882_s1 + $0x28] sm:$0xff] (!%p163_p2)  }
   0x9   : > { %2769 = vmatprep.subr.bf16.mxu1 (!%p163_p2), %v3241_v1  ;;  %2783 = vmatprep.mubr.msk.bf16.mxu1 (!%p163_p2), %vm3242_vm0, %v3241_v1  ;;  %v3091_v17 = vld [vmem:[%s3882_s1 + $0x70] sm:$0xff] (!%p163_p2)   ;;  %v3093_v19 = vld [vmem:[%s3882_s1 + $0x78] sm:$0xff] (!%p163_p2)   ;;  %v3097_v26 = vld [vmem:[%s3882_s1 + $0x80] sm:$0xff] (!%p163_p2)  }
   0xa   : > { %v3092_v18 = vld [vmem:[%s3882_s1 + $0x30] sm:$0xff] (!%p163_p2)   ;;  %v3094_v22 = vld [vmem:[%s3882_s1 + $0x38] sm:$0xff] (!%p163_p2)   ;;  %v3098_v27 = vld [vmem:[%s3882_s1 + $0xc0] sm:$0xff] (!%p163_p2)  }
   0xb   : > { %2750 = vmatpush3.bf16.msra.mxu0 (!%p163_p2), %v3081_v3  ;;  %v3099_v28 = vld [vmem:[%s3882_s1 + $0x88] sm:$0xff] (!%p163_p2)   ;;  %v3101_v30 = vld [vmem:[%s3882_s1 + $0x90] sm:$0xff] (!%p163_p2)   ;;  %v3103_v32 = vld [vmem:[%s3882_s1 + $0x98] sm:$0xff] (!%p163_p2)  }
   0xc   : > { %2770 = vmatpush3.bf16.msra.mxu1 (!%p163_p2), %v3082_v4  ;;  %2751 = vmatprep.subr.bf16.mxu0 (!%p163_p2), %v3241_v1  ;;  %v3100_v29 = vld [vmem:[%s3882_s1 + $0xc8] sm:$0xff] (!%p163_p2)   ;;  %v3102_v31 = vld [vmem:[%s3882_s1 + $0xd0] sm:$0xff] (!%p163_p2)   ;;  %v3104_v33 = vld [vmem:[%s3882_s1 + $0xd8] sm:$0xff] (!%p163_p2)  }
   0xd   : > { %s3887_s16 = smov (!%p188_p3, %s2197_s16), 1  ;;  %2771 = vmatprep.subr.bf16.mxu1 %v3241_v1  ;;  %v3105_v34 = vld [vmem:[%s3882_s1 + $0xa0] sm:$0xff]   ;;  %v3107_v38 = vld [vmem:[%s3882_s1 + $0xa8] sm:$0xff]   ;;  %v3109_v41 = vld [vmem:[%s3882_s1 + $0xb0] sm:$0xff]  }
   0xe   : > { %s2599_s5 = sshll.u32 %s3887_s16, 4  ;;  %v3106_v35 = vld [vmem:[%s3882_s1 + $0xe0] sm:$0xff]   ;;  %v3108_v40 = vld [vmem:[%s3882_s1 + $0xe8] sm:$0xff]   ;;  %v3110_v44 = vld [vmem:[%s3882_s1 + $0xf0] sm:$0xff]   ;;  %s2600_s28 = sshll.u32 %s3887_s16, 3 }
   0xf   : > { %2752 = vmatpush3.bf16.msra.mxu0 %v3083_v5  ;;  %s3319_s10 = scalar_lea.vmem %s3881_s0, %s2599_s5  ;;  %v3111_v45 = vld [vmem:[%s3882_s1 + $0xb8] sm:$0xff]   ;;  %v3115_v52 = vld [vmem:[%s3882_s1 + $0x100] sm:$0xff]   ;;  %v3117_v54 = vld [vmem:[%s3882_s1 + $0x108] sm:$0xff]   ;;  %s197_s5 = scalar_lea.vmem %s3885_s4, %s2600_s28 }
  0x10   : > { %2772 = vmatpush3.bf16.msra.mxu1 %v3084_v6  ;;  %2753 = vmatprep.subr.bf16.mxu0 %v3241_v1  ;;  %v199_v11 = vld [vmem:[%s3319_s10] sm:$0xf]  ;;  %v3331_v12 = vld [vmem:[%s3319_s10 + $0x4] sm:$0x3]  ;;  %v3112_v49 = vld [vmem:[%s3882_s1 + $0xf8] sm:$0xff]  }
  0x11   : > { %2773 = vmatprep.subr.bf16.mxu1 %v3241_v1  ;;  %v2222_v13 = vcombine.low %v199_v11, %v3331_v12  ;;  %v200_v23 = vld [vmem:[%s3319_s10 + $0x4] sm:$0x1]  ;;  %v430_v36 = vld [vmem:[%s3319_s10] sm:$0xe]  ;;  %v3118_v55 = vld [vmem:[%s3882_s1 + $0x148] sm:$0xff]  }
  0x12   : > { %v2231_v25 = vcombine.low %v199_v11, %v200_v23  ;;  %v544_v37 = vld [vmem:[%s3319_s10 + $0x4] sm:$0x7]  ;;  %v2256_v46 = vcombine.low %v430_v36, %v3331_v12  ;;  %v3119_v56 = vld [vmem:[%s3882_s1 + $0x110] sm:$0xff]   ;;  %v3121_v58 = vld [vmem:[%s3882_s1 + $0x118] sm:$0xff]  }
  0x13   : > { %2754 = vmatpush3.bf16.msra.mxu0 %v3085_v7  ;;  %v243_v16 = vshll.u32 %v2222_v13, 16  ;;  %v241_v20 = vshrl.u32 %v2222_v13, 16  ;;  %v2281_v39 = vcombine.low %v430_v36, %v544_v37  ;;  %v3116_v53 = vld [vmem:[%s3882_s1 + $0x140] sm:$0xff]   ;;  %v3120_v57 = vld [vmem:[%s3882_s1 + $0x150] sm:$0xff]   ;;  %v3122_v59 = vld [vmem:[%s3882_s1 + $0x158] sm:$0xff]  }
  0x14   : > { %2774 = vmatpush3.bf16.msra.mxu1 %v3086_v8  ;;  %2755 = vmatprep.subr.bf16.mxu0 %v3241_v1  ;;  %v451_v50 = vrot.slane %v2256_v46, 1  ;;  %v3123_v60 = vld [vmem:[%s3882_s1 + $0x120] sm:$0xff]   ;;  %v3125_v2 = vld [vmem:[%s3882_s1 + $0x128] sm:$0xff]   ;;  %v3127_v6 = vld [vmem:[%s3882_s1 + $0x130] sm:$0xff]  }
  0x15   : > { %2775 = vmatprep.subr.bf16.mxu1 %v3241_v1  ;;  %v245_v21 = vrot.slane %v243_v16, 1  ;;  %v566_v42 = vshrl.u32 %v2281_v39, 16  ;;  %v569_v43 = vshll.u32 %v2281_v39, 16  ;;  %v665_v61 = vld [vmem:[%s3319_s10] sm:$0xc]  ;;  %v3126_v3 = vld [vmem:[%s3882_s1 + $0x168] sm:$0xff]  }
  0x16   : > { %v666_v62 = vld [vmem:[%s3319_s10 + $0x4] sm:$0xf]  ;;  %v3128_v7 = vld [vmem:[%s3882_s1 + $0x170] sm:$0xff]   ;;  %v789_v8 = vld [vmem:[%s3319_s10] sm:$0x8] }
  0x17   : > { %2756 = vmatpush3.bf16.msra.mxu0 %v3087_v9  ;;  %v246_v24 = vor.u32 %v245_v21, %v241_v20  ;;  %v568_v47 = vrot.slane %v566_v42, 1  ;;  %v571_v48 = vrot.slane %v569_v43, 2  ;;  %v3124_v63 = vld [vmem:[%s3882_s1 + $0x160] sm:$0xff]   ;;  %v2306_v0 = vcombine.low %v665_v61, %v666_v62  ;;  %v3129_v11 = vld [vmem:[%s3882_s1 + $0x138] sm:$0xff]   ;;  %v3137_v20 = vld [vmem:[%s3882_s1 + $0x190] sm:$0xff]  }
  0x18   : > { %2776 = vmatpush3.bf16.msra.mxu1 %v3088_v10  ;;  %2757 = vmatprep.subr.bf16.mxu0 %v3241_v1  ;;  %v2331_v12 = vcombine.low %v789_v8, %v666_v62  ;;  %v3130_v13 = vld [vmem:[%s3882_s1 + $0x178] sm:$0xff]   ;;  %v3133_v16 = vld [vmem:[%s3882_s1 + $0x180] sm:$0xff]   ;;  %v3138_v21 = vld [vmem:[%s3882_s1 + $0x1d0] sm:$0xff]  }
  0x19   : > { %2777 = vmatprep.subr.bf16.mxu1 %v3241_v1  ;;  %v572_v51 = vor.u32 %v571_v48, %v568_v47  ;;  %v690_v4 = vshrl.u32 %v2306_v0, 16  ;;  %v693_v5 = vshll.u32 %v2306_v0, 16  ;;  %v3140_v23 = vld [vmem:[%s3882_s1 + $0x1d8] sm:$0xff]   ;;  %v3146_v39 = vld [vmem:[%s3882_s1 + $0x1f0] sm:$0xff]   ;;  %v3152_v46 = vld [vmem:[%s3882_s1 + $0x200] sm:$0xff]  }
  0x1a   : > { %v3148_v43 = vld [vmem:[%s3882_s1 + $0x1f8] sm:$0xff]   ;;  %v3153_v47 = vld [vmem:[%s3882_s1 + $0x240] sm:$0xff]   ;;  %v3154_v48 = vld [vmem:[%s3882_s1 + $0x208] sm:$0xff]  }
  0x1b   : > { %2758 = vmatpush3.bf16.msra.mxu0 %v3089_v14  ;;  %v692_v9 = vrot.slane %v690_v4, 2  ;;  %v695_v10 = vrot.slane %v693_v5, 3  ;;  %v3164_v61 = vld [vmem:[%s3882_s1 + $0x230] sm:$0xff]   ;;  %v1148_v62 = vld [vmem:[%s3319_s10 + $0x8] sm:$0x3]  ;;  %v3166_v4 = vld [vmem:[%s3882_s1 + $0x238] sm:$0xff]  }
  0x1c   : > { %2778 = vmatpush3.bf16.msra.mxu1 %v3090_v15  ;;  %2759 = vmatprep.subr.bf16.mxu0 %v3241_v1  ;;  %v810_v15 = vrot.slane %v2331_v12, 3  ;;  %v3172_v12 = vld [vmem:[%s3882_s1 + $0x288] sm:$0xff]  }
  0x1d   : > { %2779 = vmatprep.subr.bf16.mxu1 %v3241_v1  ;;  %v696_v14 = vor.u32 %v695_v10, %v692_v9  ;;  %v3170_v10 = vld [vmem:[%s3882_s1 + $0x280] sm:$0xff]  }
  0x1f   : > { %2760 = vmatpush3.bf16.msra.mxu0 %v3091_v17  ;;  %v3134_v17 = vld [vmem:[%s3882_s1 + $0x1c0] sm:$0xff]  }
  0x20   : > { %2780 = vmatpush3.bf16.msra.mxu1 %v3092_v18  ;;  %2761 = vmatprep.subr.bf16.mxu0 %v3241_v1  ;;  %v3135_v18 = vld [vmem:[%s3882_s1 + $0x188] sm:$0xff]  }
  0x21   : > { %2781 = vmatprep.subr.bf16.mxu1 %v3241_v1 }
  0x23   : > { %2762 = vmatpush3.bf16.msra.mxu0 %v3093_v19  ;;  %v3136_v19 = vld [vmem:[%s3882_s1 + $0x1c8] sm:$0xff]  }
  0x24   : > { %2782 = vmatpush3.bf16.msra.mxu1 %v3094_v22  ;;  %2787 = vmatprep.subr.bf16.mxu0 %v3241_v1  ;;  %v3139_v22 = vld [vmem:[%s3882_s1 + $0x198] sm:$0xff]  }
  0x25   : > { %2807 = vmatprep.subr.bf16.mxu1 %v3241_v1 }
  0x26   : > { %2764 = vmatmul.mubr.bf16.vlgmr.msra.gmra.mrb[0].mxu0 %v246_v24  ;;  %v903_v24 = vld [vmem:[%s3319_s10] sm:$0x8] }
  0x27   : > { %2784 = vmatmul.mubr.bf16.vlgmr.msra.gmra.mrb[0].mxu1 %v2231_v25  ;;  %2788 = vmatpush3.bf16.msra.mxu0 %v3097_v26  ;;  %v904_v25 = vld [vmem:[%s3319_s10 + $0x4] sm:$0xf] }
  0x28   : > { %2808 = vmatpush3.bf16.msra.mxu1 %v3098_v27  ;;  %2789 = vmatprep.subr.bf16.mxu0 %v3241_v1  ;;  %v3141_v26 = vld [vmem:[%s3882_s1 + $0x1a0] sm:$0xff]   ;;  %v905_v27 = vld [vmem:[%s3319_s10 + $0x8] sm:$0x1] }
  0x29   : > { %2809 = vmatprep.subr.bf16.mxu1 %v3241_v1  ;;  %2803 = vmatprep.mubr.msk.bf16.mxu0 %vm3242_vm0, %v3241_v1 }
  0x2a   : > { %2823 = vmatprep.mubr.msk.bf16.mxu1 %vm3242_vm0, %v3241_v1 }
  0x2b   : > { %2790 = vmatpush3.bf16.msra.mxu0 %v3099_v28  ;;  %v2356_v28 = vcombine.low %v903_v24, %v904_v25  ;;  %v3181_v24 = vld [vmem:[%s3882_s1 + $0x2e8] sm:$0xff]  }
  0x2c   : > { %2810 = vmatpush3.bf16.msra.mxu1 %v3100_v29  ;;  %2791 = vmatprep.subr.bf16.mxu0 %v3241_v1  ;;  %v3142_v29 = vld [vmem:[%s3882_s1 + $0x1e0] sm:$0xff]  }
  0x2d   : > { %2811 = vmatprep.subr.bf16.mxu1 %v3241_v1 }
  0x2f   : > { %2792 = vmatpush3.bf16.msra.mxu0 %v3101_v30  ;;  %v3143_v30 = vld [vmem:[%s3882_s1 + $0x1a8] sm:$0xff]  }
  0x30   : > { %2812 = vmatpush3.bf16.msra.mxu1 %v3102_v31  ;;  %2793 = vmatprep.subr.bf16.mxu0 %v3241_v1  ;;  %v2357_v31 = vcombine.low %v905_v27, %v905_v27 }
  0x31   : > { %2813 = vmatprep.subr.bf16.mxu1 %v3241_v1 }
  0x32   : > { %v941_v36 = vshll.u32 %v2357_v31, 16 }
  0x33   : > { %2794 = vmatpush3.bf16.msra.mxu0 %v3103_v32  ;;  %v933_v32 = vshrl.u32 %v2356_v28, 16 }
  0x34   : > { %2814 = vmatpush3.bf16.msra.mxu1 %v3104_v33  ;;  %2795 = vmatprep.subr.bf16.mxu0 %v3241_v1  ;;  %v936_v33 = vshll.u32 %v2356_v28, 16  ;;  %v943_v42 = vrot.slane %v941_v36, 4  ;;  %v3183_v28 = vld [vmem:[%s3882_s1 + $0x2f0] sm:$0xff]  }
  0x35   : > { %2815 = vmatprep.subr.bf16.mxu1 %v3241_v1  ;;  %v935_v37 = vrot.slane %v933_v32, 3 }
  0x37   : > { %2796 = vmatpush3.bf16.msra.mxu0 %v3105_v34  ;;  %v3144_v34 = vld [vmem:[%s3882_s1 + $0x1e8] sm:$0xff]  }
  0x38   : > { %2816 = vmatpush3.bf16.msra.mxu1 %v3106_v35  ;;  %2797 = vmatprep.subr.bf16.mxu0 %v3241_v1  ;;  %v3145_v35 = vld [vmem:[%s3882_s1 + $0x1b0] sm:$0xff]  }
  0x39   : > { %2817 = vmatprep.subr.bf16.mxu1 %v3241_v1 }
  0x3b   : > { %2798 = vmatpush3.bf16.msra.mxu0 %v3107_v38  ;;  %v938_v38 = vrot.slane %v936_v33, 4  ;;  %v3243_v33 = vmov 0  }
  0x3c   : > { %2818 = vmatpush3.bf16.msra.mxu1 %v3108_v40  ;;  %2799 = vmatprep.subr.bf16.mxu0 %v3241_v1  ;;  %v3147_v40 = vld [vmem:[%s3882_s1 + $0x1b8] sm:$0xff]  }
  0x3d   : > { %2819 = vmatprep.subr.bf16.mxu1 %v3241_v1  ;;  %3078 = vset.pattern.permute.xlu0 %v3243_v33 }
  0x3f   : > { %2800 = vmatpush3.bf16.msra.mxu0 %v3109_v41  ;;  %v939_v41 = vor.u32 %v938_v38, %v935_v37  ;;  %v3188_v37 = vld [vmem:[%s3882_s1 + $0x300] sm:$0xff]  }
  0x40   : > { %2820 = vmatpush3.bf16.msra.mxu1 %v3110_v44  ;;  %2801 = vmatprep.subr.bf16.mxu0 %v3241_v1  ;;  %v3189_v38 = vld [vmem:[%s3882_s1 + $0x340] sm:$0xff]  }
  0x41   : > { %2821 = vmatprep.subr.bf16.mxu1 %v3241_v1  ;;  %v944_v44 = vsel %vm931_vm1, %v939_v41, %v943_v42  ;;  %v3192_v41 = vld [vmem:[%s3882_s1 + $0x310] sm:$0xff]  }
  0x42   : > { %v3193_v42 = vld [vmem:[%s3882_s1 + $0x350] sm:$0xff]  }
  0x43   : > { %2802 = vmatpush3.bf16.msra.mxu0 %v3111_v45  ;;  %v2382_v45 = vcombine.low %v904_v25, %v905_v27  ;;  %v3182_v25 = vld [vmem:[%s3882_s1 + $0x2b0] sm:$0xff]  }
  0x44   : > { %2822 = vmatpush3.bf16.msra.mxu1 %v3112_v49  ;;  %2827 = vmatprep.subr.bf16.mxu0 %v3241_v1  ;;  %v3155_v49 = vld [vmem:[%s3882_s1 + $0x248] sm:$0xff]  }
  0x45   : > { %2847 = vmatprep.subr.bf16.mxu1 %v3241_v1 }
  0x46   : > { %2804 = vmatmul.mubr.bf16.vlgmr.msra.gmra.mrb[4].mxu0 %v451_v50  ;;  %v3156_v50 = vld [vmem:[%s3882_s1 + $0x210] sm:$0xff]  }
  0x47   : > { %2824 = vmatmul.mubr.bf16.vlgmr.msra.gmra.mrb[4].mxu1 %v572_v51  ;;  %2828 = vmatpush3.bf16.msra.mxu0 %v3115_v52  ;;  %v3157_v51 = vld [vmem:[%s3882_s1 + $0x250] sm:$0xff]   ;;  %v3158_v52 = vld [vmem:[%s3882_s1 + $0x218] sm:$0xff]  }
  0x48   : > { %2848 = vmatpush3.bf16.msra.mxu1 %v3116_v53  ;;  %2829 = vmatprep.subr.bf16.mxu0 %v3241_v1  ;;  %v3159_v53 = vld [vmem:[%s3882_s1 + $0x258] sm:$0xff]  }
  0x49   : > { %2849 = vmatprep.subr.bf16.mxu1 %v3241_v1  ;;  %2843 = vmatprep.mubr.msk.bf16.mxu0 %vm3242_vm0, %v3241_v1 }
  0x4a   : > { %2863 = vmatprep.mubr.msk.bf16.mxu1 %vm3242_vm0, %v3241_v1 }
  0x4b   : > { %2830 = vmatpush3.bf16.msra.mxu0 %v3117_v54  ;;  %v3160_v54 = vld [vmem:[%s3882_s1 + $0x220] sm:$0xff]  }
  0x4c   : > { %2850 = vmatpush3.bf16.msra.mxu1 %v3118_v55  ;;  %2831 = vmatprep.subr.bf16.mxu0 %v3241_v1  ;;  %v3161_v55 = vld [vmem:[%s3882_s1 + $0x260] sm:$0xff]  }
  0x4d   : > { %2851 = vmatprep.subr.bf16.mxu1 %v3241_v1 }
  0x4f   : > { %2832 = vmatpush3.bf16.msra.mxu0 %v3119_v56  ;;  %v1147_v56 = vld [vmem:[%s3319_s10 + $0x4] sm:$0xe] }
  0x50   : > { %2852 = vmatpush3.bf16.msra.mxu1 %v3120_v57  ;;  %2833 = vmatprep.subr.bf16.mxu0 %v3241_v1  ;;  %v3618_v57 = vld [vmem:[%s3319_s10 + $0x8] sm:$0x7] }
  0x51   : > { %2853 = vmatprep.subr.bf16.mxu1 %v3241_v1 }
  0x53   : > { %2834 = vmatpush3.bf16.msra.mxu0 %v3121_v58  ;;  %v3162_v58 = vld [vmem:[%s3882_s1 + $0x228] sm:$0xff]  }
  0x54   : > { %2854 = vmatpush3.bf16.msra.mxu1 %v3122_v59  ;;  %2835 = vmatprep.subr.bf16.mxu0 %v3241_v1  ;;  %v2432_v59 = vcombine.low %v1147_v56, %v3618_v57 }
  0x55   : > { %2855 = vmatprep.subr.bf16.mxu1 %v3241_v1 }
  0x56   : > { %v1289_v0 = vshll.u32 %v2432_v59, 16 }
  0x57   : > { %2836 = vmatpush3.bf16.msra.mxu0 %v3123_v60  ;;  %v3163_v60 = vld [vmem:[%s3882_s1 + $0x268] sm:$0xff]  }
  0x58   : > { %2856 = vmatpush3.bf16.msra.mxu1 %v3124_v63  ;;  %2837 = vmatprep.subr.bf16.mxu0 %v3241_v1  ;;  %v1286_v63 = vshrl.u32 %v2432_v59, 16 }
  0x59   : > { %2857 = vmatprep.subr.bf16.mxu1 %v3241_v1 }
  0x5a   : > { %v1288_v5 = vrot.slane %v1286_v63, 1  ;;  %v3202_v63 = vld [vmem:[%s3882_s1 + $0x338] sm:$0xff]  }
  0x5b   : > { %2838 = vmatpush3.bf16.msra.mxu0 %v3125_v2  ;;  %v3165_v2 = vld [vmem:[%s3882_s1 + $0x270] sm:$0xff]  }
  0x5c   : > { %2858 = vmatpush3.bf16.msra.mxu1 %v3126_v3  ;;  %2839 = vmatprep.subr.bf16.mxu0 %v3241_v1  ;;  %v2407_v3 = vcombine.low %v1147_v56, %v1148_v62  ;;  %v2097_v56 = vld [vmem:[%s3884_s3] sm:$0xff]  ;;  %v2098_v62 = vld [vmem:[%s3884_s3 + $0x8] sm:$0x3] }
  0x5d   : > { %2859 = vmatprep.subr.bf16.mxu1 %v3241_v1  ;;  %2110 = vperm.xlu0 %3078, %v2097_v56  }
  0x5e   : > { %v1171_v8 = vrot.slane %v2407_v3, 1  ;;  %v3203_v3 = vld [vmem:[%s3882_s1 + $0x378] sm:$0xff]  }
  0x5f   : > { %2840 = vmatpush3.bf16.msra.mxu0 %v3127_v6  ;;  %v1291_v6 = vrot.slane %v1289_v0, 2 }
  0x60   : > { %2860 = vmatpush3.bf16.msra.mxu1 %v3128_v7  ;;  %2841 = vmatprep.subr.bf16.mxu0 %v3241_v1  ;;  %v3167_v7 = vld [vmem:[%s3882_s1 + $0x278] sm:$0xff]  }
  0x61   : > { %2861 = vmatprep.subr.bf16.mxu1 %v3241_v1  ;;  %v1292_v9 = vor.u32 %v1291_v6, %v1288_v5  ;;  %2115 = vperm.xlu0 %3078, %v2098_v62   ;;  %v3207_v6 = vld [vmem:[%s3882_s1 + $0x380] sm:$0xff]  }
  0x63   : > { %2842 = vmatpush3.bf16.msra.mxu0 %v3129_v11  ;;  %v3171_v11 = vld [vmem:[%s3882_s1 + $0x2c0] sm:$0xff]  }
  0x64   : > { %2862 = vmatpush3.bf16.msra.mxu1 %v3130_v13  ;;  %2867 = vmatprep.subr.bf16.mxu0 %v3241_v1  ;;  %v3173_v13 = vld [vmem:[%s3882_s1 + $0x2c8] sm:$0xff]  }
  0x65   : > { %2887 = vmatprep.subr.bf16.mxu1 %v3241_v1 }
  0x66   : > { %2844 = vmatmul.mubr.bf16.vlgmr.msra.gmra.mrb[8].mxu0 %v696_v14  ;;  %v3174_v14 = vld [vmem:[%s3882_s1 + $0x290] sm:$0xff]  }
  0x67   : > { %2864 = vmatmul.mubr.bf16.vlgmr.msra.gmra.mrb[8].mxu1 %v810_v15  ;;  %2868 = vmatpush3.bf16.msra.mxu0 %v3133_v16  ;;  %v3175_v15 = vld [vmem:[%s3882_s1 + $0x2d0] sm:$0xff]   ;;  %v3176_v16 = vld [vmem:[%s3882_s1 + $0x298] sm:$0xff]  }
  0x68   : > { %2888 = vmatpush3.bf16.msra.mxu1 %v3134_v17  ;;  %2869 = vmatprep.subr.bf16.mxu0 %v3241_v1  ;;  %v3177_v17 = vld [vmem:[%s3882_s1 + $0x2d8] sm:$0xff]  }
  0x69   : > { %2889 = vmatprep.subr.bf16.mxu1 %v3241_v1  ;;  %2883 = vmatprep.mubr.msk.bf16.mxu0 %vm3242_vm0, %v3241_v1 }
  0x6a   : > { %2903 = vmatprep.mubr.msk.bf16.mxu1 %vm3242_vm0, %v3241_v1 }
  0x6b   : > { %2870 = vmatpush3.bf16.msra.mxu0 %v3135_v18  ;;  %v3178_v18 = vld [vmem:[%s3882_s1 + $0x2a0] sm:$0xff]  }
  0x6c   : > { %2890 = vmatpush3.bf16.msra.mxu1 %v3136_v19  ;;  %2871 = vmatprep.subr.bf16.mxu0 %v3241_v1  ;;  %v3179_v19 = vld [vmem:[%s3882_s1 + $0x2e0] sm:$0xff]  }
  0x6d   : > { %2891 = vmatprep.subr.bf16.mxu1 %v3241_v1 }
  0x6f   : > { %2872 = vmatpush3.bf16.msra.mxu0 %v3137_v20  ;;  %v1385_v20 = vld [vmem:[%s3319_s10 + $0x4] sm:$0xc] }
  0x70   : > { %2892 = vmatpush3.bf16.msra.mxu1 %v3138_v21  ;;  %2873 = vmatprep.subr.bf16.mxu0 %v3241_v1  ;;  %v1499_v21 = vld [vmem:[%s3319_s10 + $0x8] sm:$0xf] }
  0x71   : > { %2893 = vmatprep.subr.bf16.mxu1 %v3241_v1 }
  0x73   : > { %2874 = vmatpush3.bf16.msra.mxu0 %v3139_v22  ;;  %v3180_v22 = vld [vmem:[%s3882_s1 + $0x2a8] sm:$0xff]  }
  0x74   : > { %2894 = vmatpush3.bf16.msra.mxu1 %v3140_v23  ;;  %2875 = vmatprep.subr.bf16.mxu0 %v3241_v1  ;;  %v2482_v23 = vcombine.low %v1385_v20, %v1499_v21 }
  0x75   : > { %2895 = vmatprep.subr.bf16.mxu1 %v3241_v1 }
  0x76   : > { %v1524_v27 = vshll.u32 %v2482_v23, 16 }
  0x77   : > { %2876 = vmatpush3.bf16.msra.mxu0 %v3141_v26  ;;  %v1521_v26 = vshrl.u32 %v2482_v23, 16 }
  0x78   : > { %2896 = vmatpush3.bf16.msra.mxu1 %v3142_v29  ;;  %2877 = vmatprep.subr.bf16.mxu0 %v3241_v1  ;;  %v2457_v29 = vcombine.low %v1385_v20, %v3618_v57  ;;  %v1526_v32 = vrot.slane %v1524_v27, 3  ;;  %v3200_v57 = vld [vmem:[%s3882_s1 + $0x330] sm:$0xff]  }
  0x79   : > { %2897 = vmatprep.subr.bf16.mxu1 %v3241_v1  ;;  %v1523_v31 = vrot.slane %v1521_v26, 2  ;;  %v3219_v27 = vld [vmem:[%s3882_s1 + $0x3b0] sm:$0xff]  }
  0x7b   : > { %2878 = vmatpush3.bf16.msra.mxu0 %v3143_v30  ;;  %v3184_v30 = vld [vmem:[%s3882_s1 + $0x2b8] sm:$0xff]   ;;  %v1527_v36 = vor.u32 %v1526_v32, %v1523_v31  ;;  %v1983_v31 = vld [vmem:[%s3319_s10 + $0x8] sm:$0xe] }
  0x7c   : > { %2898 = vmatpush3.bf16.msra.mxu1 %v3144_v34  ;;  %2879 = vmatprep.subr.bf16.mxu0 %v3241_v1  ;;  %v3185_v34 = vld [vmem:[%s3882_s1 + $0x2f8] sm:$0xff]  }
  0x7d   : > { %2899 = vmatprep.subr.bf16.mxu1 %v3241_v1 }
  0x7f   : > { %2880 = vmatpush3.bf16.msra.mxu0 %v3145_v35  ;;  %v1406_v35 = vrot.slane %v2457_v29, 2 }
  0x80   : > { %2900 = vmatpush3.bf16.msra.mxu1 %v3146_v39  ;;  %2881 = vmatprep.subr.bf16.mxu0 %v3241_v1  ;;  %v3190_v39 = vld [vmem:[%s3882_s1 + $0x308] sm:$0xff]  }
  0x81   : > { %2901 = vmatprep.subr.bf16.mxu1 %v3241_v1 }
  0x83   : > { %2882 = vmatpush3.bf16.msra.mxu0 %v3147_v40  ;;  %v3191_v40 = vld [vmem:[%s3882_s1 + $0x348] sm:$0xff]  }
  0x84   : > { %2902 = vmatpush3.bf16.msra.mxu1 %v3148_v43  ;;  %2907 = vmatprep.subr.bf16.mxu0 %v3241_v1  ;;  %v3194_v43 = vld [vmem:[%s3882_s1 + $0x318] sm:$0xff]  }
  0x85   : > { %2927 = vmatprep.subr.bf16.mxu1 %v3241_v1 }
  0x86   : > { %2884 = vmatmul.mubr.bf16.vlgmr.msra.gmra.mrb[12].mxu0 %v944_v44  ;;  %v3195_v44 = vld [vmem:[%s3882_s1 + $0x358] sm:$0xff]  }
  0x87   : > { %2904 = vmatmul.mubr.bf16.vlgmr.msra.gmra.mrb[12].mxu1 %v2382_v45  ;;  %2908 = vmatpush3.bf16.msra.mxu0 %v3152_v46  ;;  %v1620_v45 = vld [vmem:[%s3319_s10 + $0x4] sm:$0x8]  ;;  %v3755_v46 = vld [vmem:[%s3319_s10 + $0x8] sm:$0xf] }
  0x88   : > { %2928 = vmatpush3.bf16.msra.mxu1 %v3153_v47  ;;  %2909 = vmatprep.subr.bf16.mxu0 %v3241_v1  ;;  %v3196_v47 = vld [vmem:[%s3882_s1 + $0x320] sm:$0xff]  }
  0x89   : > { %2929 = vmatprep.subr.bf16.mxu1 %v3241_v1  ;;  %2923 = vmatprep.mubr.msk.bf16.mxu0 %vm3242_vm0, %v3241_v1 }
  0x8a   : > { %2943 = vmatprep.mubr.msk.bf16.mxu1 %vm3242_vm0, %v3241_v1 }
  0x8b   : > { %2910 = vmatpush3.bf16.msra.mxu0 %v3154_v48  ;;  %v2507_v48 = vcombine.low %v1620_v45, %v3755_v46 }
  0x8c   : > { %2930 = vmatpush3.bf16.msra.mxu1 %v3155_v49  ;;  %2911 = vmatprep.subr.bf16.mxu0 %v3241_v1  ;;  %v3197_v49 = vld [vmem:[%s3882_s1 + $0x360] sm:$0xff]  }
  0x8d   : > { %2931 = vmatprep.subr.bf16.mxu1 %v3241_v1 }
  0x8f   : > { %2912 = vmatpush3.bf16.msra.mxu0 %v3156_v50  ;;  %v1622_v50 = vld [vmem:[%s3319_s10 + $0xc] sm:$0x1] }
  0x90   : > { %2932 = vmatpush3.bf16.msra.mxu1 %v3157_v51  ;;  %2913 = vmatprep.subr.bf16.mxu0 %v3241_v1  ;;  %v3198_v51 = vld [vmem:[%s3882_s1 + $0x328] sm:$0xff]   ;;  %v2533_v5 = vcombine.low %v3755_v46, %v1622_v50 }
  0x91   : > { %2933 = vmatprep.subr.bf16.mxu1 %v3241_v1 }
  0x93   : > { %2914 = vmatpush3.bf16.msra.mxu0 %v3158_v52  ;;  %v2508_v52 = vcombine.low %v1622_v50, %v1622_v50 }
  0x94   : > { %2934 = vmatpush3.bf16.msra.mxu1 %v3159_v53  ;;  %2915 = vmatprep.subr.bf16.mxu0 %v3241_v1  ;;  %v1649_v53 = vshrl.u32 %v2507_v48, 16 }
  0x95   : > { %2935 = vmatprep.subr.bf16.mxu1 %v3241_v1 }
  0x97   : > { %2916 = vmatpush3.bf16.msra.mxu0 %v3160_v54  ;;  %v1652_v54 = vshll.u32 %v2507_v48, 16 }
  0x98   : > { %2936 = vmatpush3.bf16.msra.mxu1 %v3161_v55  ;;  %2917 = vmatprep.subr.bf16.mxu0 %v3241_v1  ;;  %v3199_v55 = vld [vmem:[%s3882_s1 + $0x368] sm:$0xff]  }
  0x99   : > { %2937 = vmatprep.subr.bf16.mxu1 %v3241_v1  ;;  %v1654_v59 = vrot.slane %v1652_v54, 4 }
  0x9b   : > { %2918 = vmatpush3.bf16.msra.mxu0 %v3162_v58  ;;  %v1651_v58 = vrot.slane %v1649_v53, 3 }
  0x9c   : > { %2938 = vmatpush3.bf16.msra.mxu1 %v3163_v60  ;;  %2919 = vmatprep.subr.bf16.mxu0 %v3241_v1  ;;  %v1657_v60 = vshll.u32 %v2508_v52, 16 }
  0x9d   : > { %2939 = vmatprep.subr.bf16.mxu1 %v3241_v1  ;;  %v1655_v0 = vor.u32 %v1654_v59, %v1651_v58 }
  0x9f   : > { %2920 = vmatpush3.bf16.msra.mxu0 %v3164_v61  ;;  %v3201_v61 = vld [vmem:[%s3882_s1 + $0x370] sm:$0xff]  }
  0xa0   : > { %2940 = vmatpush3.bf16.msra.mxu1 %v3165_v2  ;;  %2921 = vmatprep.subr.bf16.mxu0 %v3241_v1  ;;  %v1659_v2 = vrot.slane %v1657_v60, 4 }
  0xa1   : > { %2941 = vmatprep.subr.bf16.mxu1 %v3241_v1 }
  0xa3   : > { %2922 = vmatpush3.bf16.msra.mxu0 %v3166_v4  ;;  %v1660_v4 = vsel %vm931_vm1, %v1655_v0, %v1659_v2 }
  0xa4   : > { %2942 = vmatpush3.bf16.msra.mxu1 %v3167_v7  ;;  %2947 = vmatprep.subr.bf16.mxu0 %v3241_v1  ;;  %v3208_v7 = vld [vmem:[%s3882_s1 + $0x3c0] sm:$0xff]  }
  0xa5   : > { %2967 = vmatprep.subr.bf16.mxu1 %v3241_v1 }
  0xa6   : > { %2924 = vmatmul.mubr.bf16.vlgmr.msra.gmra.mrb[16].mxu0 %v1171_v8  ;;  %v3209_v8 = vld [vmem:[%s3882_s1 + $0x388] sm:$0xff]  }
  0xa7   : > { %2944 = vmatmul.mubr.bf16.vlgmr.msra.gmra.mrb[16].mxu1 %v1292_v9  ;;  %2948 = vmatpush3.bf16.msra.mxu0 %v3170_v10  ;;  %v3210_v9 = vld [vmem:[%s3882_s1 + $0x3c8] sm:$0xff]   ;;  %v3211_v10 = vld [vmem:[%s3882_s1 + $0x390] sm:$0xff]  }
  0xa8   : > { %2968 = vmatpush3.bf16.msra.mxu1 %v3171_v11  ;;  %2949 = vmatprep.subr.bf16.mxu0 %v3241_v1  ;;  %v3212_v11 = vld [vmem:[%s3882_s1 + $0x3d0] sm:$0xff]  }
  0xa9   : > { %2969 = vmatprep.subr.bf16.mxu1 %v3241_v1  ;;  %2963 = vmatprep.mubr.msk.bf16.mxu0 %vm3242_vm0, %v3241_v1 }
  0xaa   : > { %2983 = vmatprep.mubr.msk.bf16.mxu1 %vm3242_vm0, %v3241_v1 }
  0xab   : > { %2950 = vmatpush3.bf16.msra.mxu0 %v3172_v12  ;;  %v3213_v12 = vld [vmem:[%s3882_s1 + $0x398] sm:$0xff]  }
  0xac   : > { %2970 = vmatpush3.bf16.msra.mxu1 %v3173_v13  ;;  %2951 = vmatprep.subr.bf16.mxu0 %v3241_v1  ;;  %v3214_v13 = vld [vmem:[%s3882_s1 + $0x3d8] sm:$0xff]  }
  0xad   : > { %2971 = vmatprep.subr.bf16.mxu1 %v3241_v1 }
  0xaf   : > { %2952 = vmatpush3.bf16.msra.mxu0 %v3174_v14  ;;  %v3215_v14 = vld [vmem:[%s3882_s1 + $0x3a0] sm:$0xff]  }
  0xb0   : > { %2972 = vmatpush3.bf16.msra.mxu1 %v3175_v15  ;;  %2953 = vmatprep.subr.bf16.mxu0 %v3241_v1  ;;  %v1863_v15 = vld [vmem:[%s3319_s10 + $0xc] sm:$0x3] }
  0xb1   : > { %2973 = vmatprep.subr.bf16.mxu1 %v3241_v1 }
  0xb3   : > { %2954 = vmatpush3.bf16.msra.mxu0 %v3176_v16  ;;  %v3216_v16 = vld [vmem:[%s3882_s1 + $0x3e0] sm:$0xff]  }
  0xb4   : > { %2974 = vmatpush3.bf16.msra.mxu1 %v3177_v17  ;;  %2955 = vmatprep.subr.bf16.mxu0 %v3241_v1  ;;  %v2558_v17 = vcombine.low %v3755_v46, %v1863_v15 }
  0xb5   : > { %2975 = vmatprep.subr.bf16.mxu1 %v3241_v1 }
  0xb6   : > { %v1887_v23 = vshll.u32 %v2558_v17, 16 }
  0xb7   : > { %2956 = vmatpush3.bf16.msra.mxu0 %v3178_v18  ;;  %v3217_v18 = vld [vmem:[%s3882_s1 + $0x3a8] sm:$0xff]  }
  0xb8   : > { %2976 = vmatpush3.bf16.msra.mxu1 %v3179_v19  ;;  %2957 = vmatprep.subr.bf16.mxu0 %v3241_v1  ;;  %v3218_v19 = vld [vmem:[%s3882_s1 + $0x3e8] sm:$0xff]  }
  0xb9   : > { %2977 = vmatprep.subr.bf16.mxu1 %v3241_v1 }
  0xbb   : > { %2958 = vmatpush3.bf16.msra.mxu0 %v3180_v22 }
  0xbc   : > { %2978 = vmatpush3.bf16.msra.mxu1 %v3181_v24  ;;  %2959 = vmatprep.subr.bf16.mxu0 %v3241_v1 }
  0xbd   : > { %2979 = vmatprep.subr.bf16.mxu1 %v3241_v1 }
  0xbf   : > { %2960 = vmatpush3.bf16.msra.mxu0 %v3182_v25 }
  0xc0   : > { %2980 = vmatpush3.bf16.msra.mxu1 %v3183_v28  ;;  %2961 = vmatprep.subr.bf16.mxu0 %v3241_v1 }
  0xc1   : > { %2981 = vmatprep.subr.bf16.mxu1 %v3241_v1 }
  0xc3   : > { %2962 = vmatpush3.bf16.msra.mxu0 %v3184_v30  ;;  %v3220_v30 = vld [vmem:[%s3882_s1 + $0x3f0] sm:$0xff]  }
  0xc4   : > { %2982 = vmatpush3.bf16.msra.mxu1 %v3185_v34  ;;  %2987 = vmatprep.subr.bf16.mxu0 %v3241_v1  ;;  %v1885_v34 = vshrl.u32 %v2558_v17, 16 }
  0xc5   : > { %3007 = vmatprep.subr.bf16.mxu1 %v3241_v1 }
  0xc6   : > { %2964 = vmatmul.mubr.bf16.vlgmr.msra.gmra.mrb[20].mxu0 %v1406_v35  ;;  %v1889_v35 = vrot.slane %v1887_v23, 1 }
  0xc7   : > { %2984 = vmatmul.mubr.bf16.vlgmr.msra.gmra.mrb[20].mxu1 %v1527_v36  ;;  %2988 = vmatpush3.bf16.msra.mxu0 %v3188_v37  ;;  %v3221_v36 = vld [vmem:[%s3882_s1 + $0x3b8] sm:$0xff]   ;;  %v2583_v37 = vcombine.low %v1983_v31, %v1863_v15 }
  0xc8   : > { %3008 = vmatpush3.bf16.msra.mxu1 %v3189_v38  ;;  %2989 = vmatprep.subr.bf16.mxu0 %v3241_v1  ;;  %v3222_v38 = vld [vmem:[%s3882_s1 + $0x3f8] sm:$0xff]  }
  0xc9   : > { %3009 = vmatprep.subr.bf16.mxu1 %v3241_v1  ;;  %3003 = vmatprep.mubr.msk.bf16.mxu0 %vm3242_vm0, %v3241_v1 }
  0xca   : > { %3023 = vmatprep.mubr.msk.bf16.mxu1 %vm3242_vm0, %v3241_v1 }
  0xcb   : > { %2990 = vmatpush3.bf16.msra.mxu0 %v3190_v39  ;;  %v1890_v39 = vor.u32 %v1889_v35, %v1885_v34 }
  0xcc   : > { %3010 = vmatpush3.bf16.msra.mxu1 %v3191_v40  ;;  %2991 = vmatprep.subr.bf16.mxu0 %v3241_v1  ;;  %v2004_v40 = vrot.slane %v2583_v37, 1 }
  0xcd   : > { %3011 = vmatprep.subr.bf16.mxu1 %v3241_v1 }
  0xcf   : > { %2992 = vmatpush3.bf16.msra.mxu0 %v3192_v41 }
  0xd0   : > { %3012 = vmatpush3.bf16.msra.mxu1 %v3193_v42  ;;  %2993 = vmatprep.subr.bf16.mxu0 %v3241_v1 }
  0xd1   : > { %3013 = vmatprep.subr.bf16.mxu1 %v3241_v1 }
  0xd3   : > { %2994 = vmatpush3.bf16.msra.mxu0 %v3194_v43 }
  0xd4   : > { %3014 = vmatpush3.bf16.msra.mxu1 %v3195_v44  ;;  %2995 = vmatprep.subr.bf16.mxu0 %v3241_v1 }
  0xd5   : > { %3015 = vmatprep.subr.bf16.mxu1 %v3241_v1 }
  0xd7   : > { %2996 = vmatpush3.bf16.msra.mxu0 %v3196_v47 }
  0xd8   : > { %3016 = vmatpush3.bf16.msra.mxu1 %v3197_v49  ;;  %2997 = vmatprep.subr.bf16.mxu0 %v3241_v1 }
  0xd9   : > { %3017 = vmatprep.subr.bf16.mxu1 %v3241_v1 }
  0xdb   : > { %2998 = vmatpush3.bf16.msra.mxu0 %v3198_v51 }
  0xdc   : > { %3018 = vmatpush3.bf16.msra.mxu1 %v3199_v55  ;;  %2999 = vmatprep.subr.bf16.mxu0 %v3241_v1 }
  0xdd   : > { %3019 = vmatprep.subr.bf16.mxu1 %v3241_v1 }
  0xdf   : > { %3000 = vmatpush3.bf16.msra.mxu0 %v3200_v57 }
  0xe0   : > { %3020 = vmatpush3.bf16.msra.mxu1 %v3201_v61  ;;  %3001 = vmatprep.subr.bf16.mxu0 %v3241_v1 }
  0xe1   : > { %3021 = vmatprep.subr.bf16.mxu1 %v3241_v1 }
  0xe3   : > { %3002 = vmatpush3.bf16.msra.mxu0 %v3202_v63 }
  0xe4   : > { %3022 = vmatpush3.bf16.msra.mxu1 %v3203_v3  ;;  %3027 = vmatprep.subr.bf16.mxu0 %v3241_v1 }
  0xe5   : > { %3047 = vmatprep.subr.bf16.mxu1 %v3241_v1 }
  0xe6   : > { %3004 = vmatmul.mubr.bf16.vlgmr.msra.gmra.mrb[24].mxu0 %v1660_v4 }
  0xe7   : > { %3024 = vmatmul.mubr.bf16.vlgmr.msra.gmra.mrb[24].mxu1 %v2533_v5  ;;  %3028 = vmatpush3.bf16.msra.mxu0 %v3207_v6 }
  0xe8   : > { %3048 = vmatpush3.bf16.msra.mxu1 %v3208_v7  ;;  %3029 = vmatprep.subr.bf16.mxu0 %v3241_v1 }
  0xe9   : > { %3049 = vmatprep.subr.bf16.mxu1 %v3241_v1  ;;  %3043 = vmatprep.mubr.msk.bf16.mxu0 %vm3242_vm0, %v3241_v1 }
  0xea   : > { %3063 = vmatprep.mubr.msk.bf16.mxu1 %vm3242_vm0, %v3241_v1 }
  0xeb   : > { %3030 = vmatpush3.bf16.msra.mxu0 %v3209_v8 }
  0xec   : > { %3050 = vmatpush3.bf16.msra.mxu1 %v3210_v9  ;;  %3031 = vmatprep.subr.bf16.mxu0 %v3241_v1 }
  0xed   : > { %3051 = vmatprep.subr.bf16.mxu1 %v3241_v1 }
  0xef   : > { %3032 = vmatpush3.bf16.msra.mxu0 %v3211_v10 }
  0xf0   : > { %3052 = vmatpush3.bf16.msra.mxu1 %v3212_v11  ;;  %3033 = vmatprep.subr.bf16.mxu0 %v3241_v1 }
  0xf1   : > { %3053 = vmatprep.subr.bf16.mxu1 %v3241_v1 }
  0xf3   : > { %3034 = vmatpush3.bf16.msra.mxu0 %v3213_v12 }
  0xf4   : > { %3054 = vmatpush3.bf16.msra.mxu1 %v3214_v13  ;;  %3035 = vmatprep.subr.bf16.mxu0 %v3241_v1 }
  0xf5   : > { %3055 = vmatprep.subr.bf16.mxu1 %v3241_v1 }
  0xf7   : > { %3036 = vmatpush3.bf16.msra.mxu0 %v3215_v14 }
  0xf8   : > { %3056 = vmatpush3.bf16.msra.mxu1 %v3216_v16  ;;  %3037 = vmatprep.subr.bf16.mxu0 %v3241_v1 }
  0xf9   : > { %v330_v20 = vpop.f32.mrb[0].mxu0  ;;  %3057 = vmatprep.subr.bf16.mxu1 %v3241_v1 }
  0xfa   : > { %v423_v21 = vpop.f32.mrb[0].mxu1  ;;  %v2765_v22 = vpop.f32.mrb[1].mxu0 }
  0xfb   : > { %v424_v24 = vadd.f32 %v423_v21, %v330_v20  ;;  %v2785_v25 = vpop.f32.mrb[1].mxu1  ;;  %v333_v26 = vpop.f32.mrb[2].mxu0  ;;  %3038 = vmatpush3.bf16.msra.mxu0 %v3217_v18 }
  0xfc   : > { %v426_v28 = vpop.f32.mrb[2].mxu1  ;;  %3058 = vmatpush3.bf16.msra.mxu1 %v3218_v19  ;;  %v2766_v29 = vpop.f32.mrb[3].mxu0  ;;  %3039 = vmatprep.subr.bf16.mxu0 %v3241_v1 }
  0xfd   : > { %v427_v32 = vadd.f32 %v426_v28, %v333_v26  ;;  %v2786_v33 = vpop.f32.mrb[3].mxu1  ;;  %3059 = vmatprep.subr.bf16.mxu1 %v3241_v1 }
  0xff   : > { %3040 = vmatpush3.bf16.msra.mxu0 %v3219_v27 }
 0x100   : > { %3060 = vmatpush3.bf16.msra.mxu1 %v3220_v30  ;;  %3041 = vmatprep.subr.bf16.mxu0 %v3241_v1 }
 0x101   : > { %3061 = vmatprep.subr.bf16.mxu1 %v3241_v1 }
 0x103   : > { %3042 = vmatpush3.bf16.msra.mxu0 %v3221_v36 }
 0x104   : > { %3062 = vmatpush3.bf16.msra.mxu1 %v3222_v38 }
 0x106   : > { %3044 = vmatmul.mubr.bf16.vlgmr.msra.gmra.mrb[28].mxu0 %v1890_v39 }
 0x107   : > { %3064 = vmatmul.mubr.bf16.vlgmr.msra.gmra.mrb[28].mxu1 %v2004_v40 }
 0x119   : > { %v535_v41 = vpop.f32.mrb[4].mxu0 }
 0x11a   : > { %v542_v42 = vadd.f32 %v535_v41, %v424_v24  ;;  %v656_v43 = vpop.f32.mrb[4].mxu1  ;;  %v2805_v44 = vpop.f32.mrb[5].mxu0 }
 0x11b   : > { %v2825_v45 = vpop.f32.mrb[5].mxu1  ;;  %v538_v46 = vpop.f32.mrb[6].mxu0 }
 0x11c   : > { %v663_v47 = vadd.f32 %v656_v43, %v542_v42  ;;  %v543_v48 = vadd.f32 %v538_v46, %v427_v32  ;;  %v659_v49 = vpop.f32.mrb[6].mxu1  ;;  %v2806_v50 = vpop.f32.mrb[7].mxu0 }
 0x11d   : > { %v2826_v51 = vpop.f32.mrb[7].mxu1 }
 0x11e   : > { %v664_v52 = vadd.f32 %v659_v49, %v543_v48  ;;  %v2111_v49 = vpop.permute.xlu0 %2110 }
 0x139   : > { %v780_v53 = vpop.f32.mrb[8].mxu0 }
 0x13a   : > { %v787_v1 = vadd.f32 %v780_v53, %v663_v47  ;;  %v894_v54 = vpop.f32.mrb[8].mxu1  ;;  %v2845_v55 = vpop.f32.mrb[9].mxu0 }
 0x13b   : > { %v2865_v56 = vpop.f32.mrb[9].mxu1  ;;  %v783_v57 = vpop.f32.mrb[10].mxu0 }
 0x13c   : > { %v901_v58 = vadd.f32 %v894_v54, %v787_v1  ;;  %v788_v59 = vadd.f32 %v783_v57, %v664_v52  ;;  %v897_v60 = vpop.f32.mrb[10].mxu1  ;;  %v2846_v61 = vpop.f32.mrb[11].mxu0  ;;  %v2592_v1 = vld [vmem:[%s3883_s2] ss:$0 sm:$0xff] }
 0x13d   : > { %v2866_v62 = vpop.f32.mrb[11].mxu1 }
 0x13e   : > { %v902_v63 = vadd.f32 %v897_v60, %v788_v59 }
 0x159   : > { %v1028_v0 = vpop.f32.mrb[12].mxu0 }
 0x15a   : > { %v1035_v2 = vadd.f32 %v1028_v0, %v901_v58  ;;  %v1138_v3 = vpop.f32.mrb[12].mxu1  ;;  %v2885_v4 = vpop.f32.mrb[13].mxu0 }
 0x15b   : > { %v2905_v5 = vpop.f32.mrb[13].mxu1  ;;  %v1031_v6 = vpop.f32.mrb[14].mxu0 }
 0x15c   : > { %v1145_v7 = vadd.f32 %v1138_v3, %v1035_v2  ;;  %v1036_v8 = vadd.f32 %v1031_v6, %v902_v63  ;;  %v1141_v9 = vpop.f32.mrb[14].mxu1  ;;  %v2886_v10 = vpop.f32.mrb[15].mxu0 }
 0x15d   : > { %v2906_v11 = vpop.f32.mrb[15].mxu1  ;;  %v2116_v2 = vpop.permute.xlu0 %2115 }
 0x15e   : > { %v1146_v12 = vadd.f32 %v1141_v9, %v1036_v8 }
 0x179   : > { %v1255_v13 = vpop.f32.mrb[16].mxu0 }
 0x17a   : > { %v1262_v14 = vadd.f32 %v1255_v13, %v1145_v7  ;;  %v1376_v15 = vpop.f32.mrb[16].mxu1  ;;  %v2925_v16 = vpop.f32.mrb[17].mxu0 }
 0x17b   : > { %v2945_v17 = vpop.f32.mrb[17].mxu1  ;;  %v1258_v18 = vpop.f32.mrb[18].mxu0 }
 0x17c   : > { %v1383_v19 = vadd.f32 %v1376_v15, %v1262_v14  ;;  %v1263_v20 = vadd.f32 %v1258_v18, %v1146_v12  ;;  %v1379_v21 = vpop.f32.mrb[18].mxu1  ;;  %v2926_v22 = vpop.f32.mrb[19].mxu0 }
 0x17d   : > { %v2946_v23 = vpop.f32.mrb[19].mxu1 }
 0x17e   : > { %v1384_v24 = vadd.f32 %v1379_v21, %v1263_v20 }
 0x199   : > { %v1490_v25 = vpop.f32.mrb[20].mxu0 }
 0x19a   : > { %v1497_v26 = vadd.f32 %v1490_v25, %v1383_v19  ;;  %v1611_v27 = vpop.f32.mrb[20].mxu1  ;;  %v2965_v28 = vpop.f32.mrb[21].mxu0 }
 0x19b   : > { %v2985_v29 = vpop.f32.mrb[21].mxu1  ;;  %v1493_v30 = vpop.f32.mrb[22].mxu0 }
 0x19c   : > { %v1618_v31 = vadd.f32 %v1611_v27, %v1497_v26  ;;  %v1498_v32 = vadd.f32 %v1493_v30, %v1384_v24  ;;  %v1614_v33 = vpop.f32.mrb[22].mxu1  ;;  %v2966_v34 = vpop.f32.mrb[23].mxu0 }
 0x19d   : > { %v2986_v35 = vpop.f32.mrb[23].mxu1 }
 0x19e   : > { %v1619_v36 = vadd.f32 %v1614_v33, %v1498_v32 }
 0x1b9   : > { %v1744_v37 = vpop.f32.mrb[24].mxu0 }
 0x1ba   : > { %v1751_v38 = vadd.f32 %v1744_v37, %v1618_v31  ;;  %v1854_v39 = vpop.f32.mrb[24].mxu1  ;;  %v3005_v40 = vpop.f32.mrb[25].mxu0 }
 0x1bb   : > { %v3025_v41 = vpop.f32.mrb[25].mxu1  ;;  %v1747_v42 = vpop.f32.mrb[26].mxu0 }
 0x1bc   : > { %v1861_v43 = vadd.f32 %v1854_v39, %v1751_v38  ;;  %v1752_v44 = vadd.f32 %v1747_v42, %v1619_v36  ;;  %v1857_v45 = vpop.f32.mrb[26].mxu1  ;;  %v3006_v46 = vpop.f32.mrb[27].mxu0 }
 0x1bd   : > { %v3026_v47 = vpop.f32.mrb[27].mxu1 }
 0x1be   : > { %v1862_v48 = vadd.f32 %v1857_v45, %v1752_v44 }
 0x1d9   : > { %v1974_v50 = vpop.f32.mrb[28].mxu0 }
 0x1da   : > { %v1981_v51 = vadd.f32 %v1974_v50, %v1861_v43  ;;  %v2088_v52 = vpop.f32.mrb[28].mxu1  ;;  %v3045_v53 = vpop.f32.mrb[29].mxu0 }
 0x1db   : > { %v3065_v54 = vpop.f32.mrb[29].mxu1  ;;  %v1977_v55 = vpop.f32.mrb[30].mxu0 }
 0x1dc   : > { %v2095_v56 = vadd.f32 %v2088_v52, %v1981_v51  ;;  %v1982_v57 = vadd.f32 %v1977_v55, %v1862_v48  ;;  %v2091_v58 = vpop.f32.mrb[30].mxu1  ;;  %v3046_v59 = vpop.f32.mrb[31].mxu0 }
 0x1dd   : > { %v3066_v60 = vpop.f32.mrb[31].mxu1 }
 0x1de   : > { %v2106_v61 = vadd.f32 %v2592_v1, %v2095_v56  ;;  %v2096_v62 = vadd.f32 %v2091_v58, %v1982_v57 }
 0x1e0   : > { %v2118_v63 = vmul.f32 %v2111_v49, %v2106_v61  ;;  %v2107_v0 = vadd.f32 %v2592_v1, %v2096_v62 }
 0x1e2   : > { %v2593_v3 = vmul.f32 -1.442695, %v2118_v63  ;;  %v2119_v4 = vmul.f32 %v2116_v2, %v2107_v0 }
 0x1e4   : > { %3225 = vpow2.f32 %v2593_v3  ;;  %v2594_v5 = vmul.f32 -1.442695, %v2119_v4 }
 0x1e6   : > { %3227 = vpow2.f32 %v2594_v5 }
 0x1ee   : > { %v3226_v6 = vpop.eup %3225 }
 0x1ef   : > { %v2126_v7 = vadd.f32 1.0, %v3226_v6 }
 0x1f0   : > { %v3228_v8 = vpop.eup %3227 }
 0x1f1   : > { %3229 = vrcp.f32 %v2126_v7  ;;  %v2127_v9 = vadd.f32 1.0, %v3228_v8 }
 0x1f3   : > { %3231 = vrcp.f32 %v2127_v9 }
 0x1fb   : > { %v3230_v10 = vpop.eup %3229 }
 0x1fc   : > { %v2601_v11 = vpack.c.bf16 %v3230_v10, %v3230_v10 }
 0x1fd   : > { %v3232_v12 = vpop.eup %3231 }
 0x1fe   : > { %v2602_v13 = vpack.c.bf16 %v3232_v12, %v3232_v12  ;;  %2140 = vst [vmem:[%s197_s5] sm:$0xf] %v2601_v11 }
 0x200   : > { %2141 = vst [vmem:[%s197_s5 + $0x4] sm:$0x1] %v2602_v13 }
 0x201 PF: > { %s14_s15 = sadd.s32 1, %s3239_s15  }
 0x202   : > { %p11_p4 = scmp.ge.s32.totalorder %s14_s15, 4  }
 0x204   :  { %13 = sbr.rel (!%p11_p4) target bundleno = 1 (0x1), region = 81 }

</bundles_post_ra>
